<compile_context>
chip_gen: v7x
topology: tpu7x:2x2x1
jax: 0.10.0
libtpu: 0.0.40
codegen_flags: <defaults>
</compile_context>

<pallas_src>
import functools

import jax
import jax.numpy as jnp
from jax.experimental import pallas as pl
from jax.experimental.pallas import tpu as pltpu


# ----------------------------- in-kernel helpers ------------------------------

def _conv3x3(pad_ref, hh, ww, cin, cout, w_ref, b_ref, relu):
    """3x3 / stride-1 / pad-1 conv read from the zero-padded scratch `pad_ref`.

    pad_ref : VMEM (hh+2, ww+2, cin) f32, input in interior [1:hh+1, 1:ww+1]
              with a zero 1-px border.
    w_ref   : (9*cin, cout) bf16, rows ordered (dy, dx, cin) (pre-cast im2col).
    b_ref   : (1, cout) f32.
    Returns an (hh*ww, cout) f32 value (bias included, optional ReLU).
    """
    # Init accumulator with the broadcast bias: saves a zeros materialization
    # and the trailing VALU bias add per conv.
    acc = jnp.broadcast_to(b_ref[...], (hh * ww, cout)).astype(jnp.float32)
    for t in range(9):
        dy, dx = t // 3, t % 3
        tap = pad_ref[dy:dy + hh, dx:dx + ww, :]               # (hh, ww, cin) f32
        tap = tap.reshape(hh * ww, cin).astype(jnp.bfloat16)
        wt = w_ref[t * cin:(t + 1) * cin, :]                   # bf16 (pre-cast)
        acc = acc + jnp.dot(tap, wt, preferred_element_type=jnp.float32)
    if relu:
        acc = jnp.maximum(acc, 0.0)
    return acc


def _block(in_pad, out_pad, params, hh, ww, cin, cout, stride):
    """conv_resblock_one: conv3x3(stride)+ReLU, then y + conv3x3(ReLU(conv3x3(y))).

    in_pad  : scratch holding the block input in its interior (zero border).
    out_pad : scratch reused as the pad buffer for the two ResBlock convs.
    Returns the block output value of shape (hh//stride, ww//stride, cout).
    """
    w0, b0, w1, b1, w2, b2 = params
    ho, wo = hh // stride, ww // stride

    # ---- conv A: conv3x3(stride) + ReLU ----
    y = _conv3x3(in_pad, hh, ww, cin, cout, w0, b0, relu=True)   # (hh*ww, cout)
    y3 = y.reshape(hh, ww, cout)
    if stride == 2:
        # k=3/pad=1/stride=2 conv == stride-1 conv sampled at even (h, w).
        # TODO(synk): per perf review, stride-2 taps could be read directly with
        # pl.ds(..., stride=2) to cut conv-A MXU rows 4x; kept the proven
        # post-conv subsample since the workload is launch/DMA-bound here and
        # strided-ref lowering at these shapes is unverified.
        y3 = y3.reshape(ho, 2, ww, cout)[:, 0]                   # rows 0,2,4,...
        y3 = y3.reshape(ho, wo, 2, cout)[:, :, 0]                # cols 0,2,4,...

    # ---- ResBlock: z = y + conv3x3(ReLU(conv3x3(y))) ----
    out_pad[1:ho + 1, 1:wo + 1, :] = y3
    h1 = _conv3x3(out_pad, ho, wo, cout, cout, w1, b1, relu=True)
    out_pad[1:ho + 1, 1:wo + 1, :] = h1.reshape(ho, wo, cout)
    z = _conv3x3(out_pad, ho, wo, cout, cout, w2, b2, relu=False)
    # TODO(synk): assumes ResBlock applies no activation after the residual add;
    # add a final ReLU here if the actual blocks.py ResBlock has one.
    return z.reshape(ho, wo, cout) + y3


# ------------------------------ fused encoder ---------------------------------

def _encoder_kernel(*refs, num_chs, H, W):
    """Whole EncoderRef for one batch element. refs = inputs + outputs + scratch.

    inputs : x (1,H,W,c0), then 4 blocks x (w0,b0,w1,b1,w2,b2)  -> 25 refs
    outputs: f1 (1,H/2,W/2,c2), f2 (1,H/4,W/4,c3), f3 (1,H/8,W/8,c4)
    scratch: s0..s4 zero-padded f32 activation buffers (see wrapper)
    """
    c0, c1, c2, c3, c4 = num_chs
    x_ref = refs[0]
    p = refs[1:25]
    f1_ref, f2_ref, f3_ref = refs[25], refs[26], refs[27]
    s0, s1, s2, s3, s4 = refs[28], refs[29], refs[30], refs[31], refs[32]

    # Zero only the 1-px borders (interiors are fully overwritten below every
    # step). Cheap, and correct even when the 'parallel' batch axis is split
    # across TensorCores (no reliance on program_id == 0).
    for s in (s0, s1, s2, s3, s4):
        hp, wp, cc = s.shape
        zrow = jnp.zeros((1, wp, cc), jnp.float32)
        zcol = jnp.zeros((hp, 1, cc), jnp.float32)
        s[0:1, :, :] = zrow
        s[hp - 1:hp, :, :] = zrow
        s[:, 0:1, :] = zcol
        s[:, wp - 1:wp, :] = zcol

    H2, W2, H4, W4 = H // 2, W // 2, H // 4, W // 4

    # conv1 (stride 1): image -> x    (stays in VMEM)
    s0[1:H + 1, 1:W + 1, :] = x_ref[0]
    x1 = _block(s0, s1, p[0:6], H, W, c0, c1, stride=1)          # (H, W, c1)

    # conv2 (stride 2): x -> f1
    s1[1:H + 1, 1:W + 1, :] = x1
    f1 = _block(s1, s2, p[6:12], H, W, c1, c2, stride=2)         # (H/2, W/2, c2)
    f1_ref[0] = f1.astype(f1_ref.dtype)

    # conv3 (stride 2): f1 -> f2
    s2[1:H2 + 1, 1:W2 + 1, :] = f1
    f2 = _block(s2, s3, p[12:18], H2, W2, c2, c3, stride=2)      # (H/4, W/4, c3)
    f2_ref[0] = f2.astype(f2_ref.dtype)

    # conv4 (stride 2): f2 -> f3
    s3[1:H4 + 1, 1:W4 + 1, :] = f2
    f3 = _block(s3, s4, p[18:24], H4, W4, c3, c4, stride=2)      # (H/8, W/8, c4)
    f3_ref[0] = f3.astype(f3_ref.dtype)


def _flat_block_params(p, cin, cout):
    """(3,3,ci,co) HWIO weights + (co,) biases -> bf16 im2col weights, f32 biases."""
    w0, b0, w1, b1, w2, b2 = p
    return [
        w0.reshape(9 * cin, cout).astype(jnp.bfloat16), b0.reshape(1, cout),
        w1.reshape(9 * cout, cout).astype(jnp.bfloat16), b1.reshape(1, cout),
        w2.reshape(9 * cout, cout).astype(jnp.bfloat16), b2.reshape(1, cout),
    ]


def encoder_ref(image_nchw, params):
    """image_nchw: (N, C0, H, W) -> (f1, f2, f3) each NCHW, matching PyTorch."""
    x = jnp.transpose(image_nchw, (0, 2, 3, 1))            # NCHW -> NHWC
    N, H, W, c0 = x.shape
    assert H % 8 == 0 and W % 8 == 0, "H, W must stay even through 3 stride-2 stages"

    c1 = params[0][0].shape[-1]
    c2 = params[1][0].shape[-1]
    c3 = params[2][0].shape[-1]
    c4 = params[3][0].shape[-1]
    cins, couts = (c0, c1, c2, c3), (c1, c2, c3, c4)

    flat = []
    for p, ci, co in zip(params, cins, couts):
        flat += _flat_block_params(p, ci, co)

    H2, W2, H4, W4, H8, W8 = H // 2, W // 2, H // 4, W // 4, H // 8, W // 8

    in_specs = [pl.BlockSpec((1, H, W, c0), lambda n: (n, 0, 0, 0))]
    for ci, co in zip(cins, couts):
        in_specs += [
            pl.BlockSpec((9 * ci, co), lambda n: (0, 0)),
            pl.BlockSpec((1, co), lambda n: (0, 0)),
            pl.BlockSpec((9 * co, co), lambda n: (0, 0)),
            pl.BlockSpec((1, co), lambda n: (0, 0)),
            pl.BlockSpec((9 * co, co), lambda n: (0, 0)),
            pl.BlockSpec((1, co), lambda n: (0, 0)),
        ]

    out_shape = (
        jax.ShapeDtypeStruct((N, H2, W2, c2), x.dtype),
        jax.ShapeDtypeStruct((N, H4, W4, c3), x.dtype),
        jax.ShapeDtypeStruct((N, H8, W8, c4), x.dtype),
    )
    out_specs = (
        pl.BlockSpec((1, H2, W2, c2), lambda n: (n, 0, 0, 0)),
        pl.BlockSpec((1, H4, W4, c3), lambda n: (n, 0, 0, 0)),
        pl.BlockSpec((1, H8, W8, c4), lambda n: (n, 0, 0, 0)),
    )
    # Zero-padded activation scratches; s1/s2/s3 are reused as both the
    # ResBlock pad of stage k and the conv-A pad of stage k+1.
    scratch_shapes = [
        pltpu.VMEM((H + 2, W + 2, c0), jnp.float32),
        pltpu.VMEM((H + 2, W + 2, c1), jnp.float32),
        pltpu.VMEM((H2 + 2, W2 + 2, c2), jnp.float32),
        pltpu.VMEM((H4 + 2, W4 + 2, c3), jnp.float32),
        pltpu.VMEM((H8 + 2, W8 + 2, c4), jnp.float32),
    ]

    kernel = functools.partial(_encoder_kernel, num_chs=(c0, c1, c2, c3, c4), H=H, W=W)
    f1, f2, f3 = pl.pallas_call(
        kernel,
        out_shape=out_shape,
        grid=(N,),
        in_specs=in_specs,
        out_specs=out_specs,
        scratch_shapes=scratch_shapes,
        compiler_params=pltpu.CompilerParams(
            dimension_semantics=("parallel",),
            vmem_limit_bytes=32 * 1024 * 1024,
        ),
    )(x, *flat)

    to_nchw = lambda t: jnp.transpose(t, (0, 3, 1, 2))
    return to_nchw(f1), to_nchw(f2), to_nchw(f3)


# ----------------------------- param init (demo) ------------------------------

def init_block_params(key, cin, cout):
    ks = jax.random.split(key, 6)

    def conv_init(kw, kb, ci, co):
        fan_in = ci * 9
        bound = (1.0 / fan_in) ** 0.5
        w = jax.random.uniform(kw, (3, 3, ci, co), jnp.float32, -bound, bound)
        b = jax.random.uniform(kb, (co,), jnp.float32, -bound, bound)
        return w, b

    w0, b0 = conv_init(ks[0], ks[1], cin, cout)
    w1, b1 = conv_init(ks[2], ks[3], cout, cout)
    w2, b2 = conv_init(ks[4], ks[5], cout, cout)
    return (w0, b0, w1, b1, w2, b2)


# --------------------------------- main ----------------------------------------

if __name__ == "__main__":
    num_chs = [4, 8, 16, 32, 32]
    N, H, W = 2, 16, 16

    key = jax.random.PRNGKey(0)
    k_img, k_p = jax.random.split(key)
    image = jax.random.normal(k_img, (N, num_chs[0], H, W), jnp.float32)  # NCHW

    pkeys = jax.random.split(k_p, 4)
    params = [
        init_block_params(pkeys[0], num_chs[0], num_chs[1]),
        init_block_params(pkeys[1], num_chs[1], num_chs[2]),
        init_block_params(pkeys[2], num_chs[2], num_chs[3]),
        init_block_params(pkeys[3], num_chs[3], num_chs[4]),
    ]

    f1, f2, f3 = jax.jit(encoder_ref)(image, params)
    jax.block_until_ready((f1, f2, f3))

    assert f1.shape == (N, num_chs[2], H // 2, W // 2), f1.shape
    assert f2.shape == (N, num_chs[3], H // 4, W // 4), f2.shape
    assert f3.shape == (N, num_chs[4], H // 8, W // 8), f3.shape
    print("KERNEL_OK")
</pallas_src>

<mosaic_0001>
module attributes {stable_mosaic.version = 11 : i64} {
  func.func @_encoder_kernel(%arg0: i32, %arg1: memref<1x16x16x4xf32, #tpu.memory_space<vmem>>, %arg2: memref<36x8xbf16, #tpu.memory_space<vmem>>, %arg3: memref<1x8xf32, #tpu.memory_space<vmem>>, %arg4: memref<72x8xbf16, #tpu.memory_space<vmem>>, %arg5: memref<1x8xf32, #tpu.memory_space<vmem>>, %arg6: memref<72x8xbf16, #tpu.memory_space<vmem>>, %arg7: memref<1x8xf32, #tpu.memory_space<vmem>>, %arg8: memref<72x16xbf16, #tpu.memory_space<vmem>>, %arg9: memref<1x16xf32, #tpu.memory_space<vmem>>, %arg10: memref<144x16xbf16, #tpu.memory_space<vmem>>, %arg11: memref<1x16xf32, #tpu.memory_space<vmem>>, %arg12: memref<144x16xbf16, #tpu.memory_space<vmem>>, %arg13: memref<1x16xf32, #tpu.memory_space<vmem>>, %arg14: memref<144x32xbf16, #tpu.memory_space<vmem>>, %arg15: memref<1x32xf32, #tpu.memory_space<vmem>>, %arg16: memref<288x32xbf16, #tpu.memory_space<vmem>>, %arg17: memref<1x32xf32, #tpu.memory_space<vmem>>, %arg18: memref<288x32xbf16, #tpu.memory_space<vmem>>, %arg19: memref<1x32xf32, #tpu.memory_space<vmem>>, %arg20: memref<288x32xbf16, #tpu.memory_space<vmem>>, %arg21: memref<1x32xf32, #tpu.memory_space<vmem>>, %arg22: memref<288x32xbf16, #tpu.memory_space<vmem>>, %arg23: memref<1x32xf32, #tpu.memory_space<vmem>>, %arg24: memref<288x32xbf16, #tpu.memory_space<vmem>>, %arg25: memref<1x32xf32, #tpu.memory_space<vmem>>, %arg26: memref<1x8x8x16xf32, #tpu.memory_space<vmem>>, %arg27: memref<1x4x4x32xf32, #tpu.memory_space<vmem>>, %arg28: memref<1x2x2x32xf32, #tpu.memory_space<vmem>>, %arg29: memref<18x18x4xf32, #tpu.memory_space<vmem>>, %arg30: memref<18x18x8xf32, #tpu.memory_space<vmem>>, %arg31: memref<10x10x16xf32, #tpu.memory_space<vmem>>, %arg32: memref<6x6x32xf32, #tpu.memory_space<vmem>>, %arg33: memref<4x4x32xf32, #tpu.memory_space<vmem>>) attributes {dimension_semantics = [#tpu.dimension_semantics<parallel>], iteration_bounds = array<i64: 2>, scalar_prefetch = 0 : i64, scratch_operands = 5 : i64, tpu.core_type = #tpu.core_type<tc>, window_params = [{transform_indices = @transform_0, window_bounds = array<i64: 1, 16, 16, 4>}, {pipeline_mode = #tpu.pipeline_mode<synchronous>, transform_indices = @transform_1, window_bounds = array<i64: 36, 8>}, {pipeline_mode = #tpu.pipeline_mode<synchronous>, transform_indices = @transform_2, window_bounds = array<i64: 1, 8>}, {pipeline_mode = #tpu.pipeline_mode<synchronous>, transform_indices = @transform_3, window_bounds = array<i64: 72, 8>}, {pipeline_mode = #tpu.pipeline_mode<synchronous>, transform_indices = @transform_4, window_bounds = array<i64: 1, 8>}, {pipeline_mode = #tpu.pipeline_mode<synchronous>, transform_indices = @transform_5, window_bounds = array<i64: 72, 8>}, {pipeline_mode = #tpu.pipeline_mode<synchronous>, transform_indices = @transform_6, window_bounds = array<i64: 1, 8>}, {pipeline_mode = #tpu.pipeline_mode<synchronous>, transform_indices = @transform_7, window_bounds = array<i64: 72, 16>}, {pipeline_mode = #tpu.pipeline_mode<synchronous>, transform_indices = @transform_8, window_bounds = array<i64: 1, 16>}, {pipeline_mode = #tpu.pipeline_mode<synchronous>, transform_indices = @transform_9, window_bounds = array<i64: 144, 16>}, {pipeline_mode = #tpu.pipeline_mode<synchronous>, transform_indices = @transform_10, window_bounds = array<i64: 1, 16>}, {pipeline_mode = #tpu.pipeline_mode<synchronous>, transform_indices = @transform_11, window_bounds = array<i64: 144, 16>}, {pipeline_mode = #tpu.pipeline_mode<synchronous>, transform_indices = @transform_12, window_bounds = array<i64: 1, 16>}, {pipeline_mode = #tpu.pipeline_mode<synchronous>, transform_indices = @transform_13, window_bounds = array<i64: 144, 32>}, {pipeline_mode = #tpu.pipeline_mode<synchronous>, transform_indices = @transform_14, window_bounds = array<i64: 1, 32>}, {pipeline_mode = #tpu.pipeline_mode<synchronous>, transform_indices = @transform_15, window_bounds = array<i64: 288, 32>}, {pipeline_mode = #tpu.pipeline_mode<synchronous>, transform_indices = @transform_16, window_bounds = array<i64: 1, 32>}, {pipeline_mode = #tpu.pipeline_mode<synchronous>, transform_indices = @transform_17, window_bounds = array<i64: 288, 32>}, {pipeline_mode = #tpu.pipeline_mode<synchronous>, transform_indices = @transform_18, window_bounds = array<i64: 1, 32>}, {pipeline_mode = #tpu.pipeline_mode<synchronous>, transform_indices = @transform_19, window_bounds = array<i64: 288, 32>}, {pipeline_mode = #tpu.pipeline_mode<synchronous>, transform_indices = @transform_20, window_bounds = array<i64: 1, 32>}, {pipeline_mode = #tpu.pipeline_mode<synchronous>, transform_indices = @transform_21, window_bounds = array<i64: 288, 32>}, {pipeline_mode = #tpu.pipeline_mode<synchronous>, transform_indices = @transform_22, window_bounds = array<i64: 1, 32>}, {pipeline_mode = #tpu.pipeline_mode<synchronous>, transform_indices = @transform_23, window_bounds = array<i64: 288, 32>}, {pipeline_mode = #tpu.pipeline_mode<synchronous>, transform_indices = @transform_24, window_bounds = array<i64: 1, 32>}, {transform_indices = @transform_25, window_bounds = array<i64: 1, 8, 8, 16>}, {transform_indices = @transform_26, window_bounds = array<i64: 1, 4, 4, 32>}, {transform_indices = @transform_27, window_bounds = array<i64: 1, 2, 2, 32>}]} {
    %cst = arith.constant 0.000000e+00 : f32
    %0 = vector.broadcast %cst : f32 to vector<1x18x4xf32>
    %cst_0 = arith.constant 0.000000e+00 : f32
    %1 = vector.broadcast %cst_0 : f32 to vector<18x1x4xf32>
    %c0 = arith.constant 0 : index
    %c0_1 = arith.constant 0 : index
    %c0_2 = arith.constant 0 : index
    %2 = vector.load %arg29[%c0, %c0_1, %c0_2] : memref<18x18x4xf32, #tpu.memory_space<vmem>>, vector<1x18x4xf32>
    tpu.vector_store %arg29[%c0, %c0_1, %c0_2], %0 {strides = array<i32>} : memref<18x18x4xf32, #tpu.memory_space<vmem>>, vector<1x18x4xf32>,
    %c17 = arith.constant 17 : index
    %c0_3 = arith.constant 0 : index
    %c0_4 = arith.constant 0 : index
    %3 = vector.load %arg29[%c17, %c0_3, %c0_4] : memref<18x18x4xf32, #tpu.memory_space<vmem>>, vector<1x18x4xf32>
    tpu.vector_store %arg29[%c17, %c0_3, %c0_4], %0 {strides = array<i32>} : memref<18x18x4xf32, #tpu.memory_space<vmem>>, vector<1x18x4xf32>,
    %c0_5 = arith.constant 0 : index
    %c0_6 = arith.constant 0 : index
    %c0_7 = arith.constant 0 : index
    %4 = vector.load %arg29[%c0_5, %c0_6, %c0_7] : memref<18x18x4xf32, #tpu.memory_space<vmem>>, vector<18x1x4xf32>
    tpu.vector_store %arg29[%c0_5, %c0_6, %c0_7], %1 {strides = array<i32>} : memref<18x18x4xf32, #tpu.memory_space<vmem>>, vector<18x1x4xf32>,
    %c0_8 = arith.constant 0 : index
    %c17_9 = arith.constant 17 : index
    %c0_10 = arith.constant 0 : index
    %5 = vector.load %arg29[%c0_8, %c17_9, %c0_10] : memref<18x18x4xf32, #tpu.memory_space<vmem>>, vector<18x1x4xf32>
    tpu.vector_store %arg29[%c0_8, %c17_9, %c0_10], %1 {strides = array<i32>} : memref<18x18x4xf32, #tpu.memory_space<vmem>>, vector<18x1x4xf32>,
    %cst_11 = arith.constant 0.000000e+00 : f32
    %6 = vector.broadcast %cst_11 : f32 to vector<1x18x8xf32>
    %cst_12 = arith.constant 0.000000e+00 : f32
    %7 = vector.broadcast %cst_12 : f32 to vector<18x1x8xf32>
    %c0_13 = arith.constant 0 : index
    %c0_14 = arith.constant 0 : index
    %c0_15 = arith.constant 0 : index
    %8 = vector.load %arg30[%c0_13, %c0_14, %c0_15] : memref<18x18x8xf32, #tpu.memory_space<vmem>>, vector<1x18x8xf32>
    tpu.vector_store %arg30[%c0_13, %c0_14, %c0_15], %6 {strides = array<i32>} : memref<18x18x8xf32, #tpu.memory_space<vmem>>, vector<1x18x8xf32>,
    %c17_16 = arith.constant 17 : index
    %c0_17 = arith.constant 0 : index
    %c0_18 = arith.constant 0 : index
    %9 = vector.load %arg30[%c17_16, %c0_17, %c0_18] : memref<18x18x8xf32, #tpu.memory_space<vmem>>, vector<1x18x8xf32>
    tpu.vector_store %arg30[%c17_16, %c0_17, %c0_18], %6 {strides = array<i32>} : memref<18x18x8xf32, #tpu.memory_space<vmem>>, vector<1x18x8xf32>,
    %c0_19 = arith.constant 0 : index
    %c0_20 = arith.constant 0 : index
    %c0_21 = arith.constant 0 : index
    %10 = vector.load %arg30[%c0_19, %c0_20, %c0_21] : memref<18x18x8xf32, #tpu.memory_space<vmem>>, vector<18x1x8xf32>
    tpu.vector_store %arg30[%c0_19, %c0_20, %c0_21], %7 {strides = array<i32>} : memref<18x18x8xf32, #tpu.memory_space<vmem>>, vector<18x1x8xf32>,
    %c0_22 = arith.constant 0 : index
    %c17_23 = arith.constant 17 : index
    %c0_24 = arith.constant 0 : index
    %11 = vector.load %arg30[%c0_22, %c17_23, %c0_24] : memref<18x18x8xf32, #tpu.memory_space<vmem>>, vector<18x1x8xf32>
    tpu.vector_store %arg30[%c0_22, %c17_23, %c0_24], %7 {strides = array<i32>} : memref<18x18x8xf32, #tpu.memory_space<vmem>>, vector<18x1x8xf32>,
    %cst_25 = arith.constant 0.000000e+00 : f32
    %12 = vector.broadcast %cst_25 : f32 to vector<1x10x16xf32>
    %cst_26 = arith.constant 0.000000e+00 : f32
    %13 = vector.broadcast %cst_26 : f32 to vector<10x1x16xf32>
    %c0_27 = arith.constant 0 : index
    %c0_28 = arith.constant 0 : index
    %c0_29 = arith.constant 0 : index
    %14 = vector.load %arg31[%c0_27, %c0_28, %c0_29] : memref<10x10x16xf32, #tpu.memory_space<vmem>>, vector<1x10x16xf32>
    tpu.vector_store %arg31[%c0_27, %c0_28, %c0_29], %12 {strides = array<i32>} : memref<10x10x16xf32, #tpu.memory_space<vmem>>, vector<1x10x16xf32>,
    %c9 = arith.constant 9 : index
    %c0_30 = arith.constant 0 : index
    %c0_31 = arith.constant 0 : index
    %15 = vector.load %arg31[%c9, %c0_30, %c0_31] : memref<10x10x16xf32, #tpu.memory_space<vmem>>, vector<1x10x16xf32>
    tpu.vector_store %arg31[%c9, %c0_30, %c0_31], %12 {strides = array<i32>} : memref<10x10x16xf32, #tpu.memory_space<vmem>>, vector<1x10x16xf32>,
    %c0_32 = arith.constant 0 : index
    %c0_33 = arith.constant 0 : index
    %c0_34 = arith.constant 0 : index
    %16 = vector.load %arg31[%c0_32, %c0_33, %c0_34] : memref<10x10x16xf32, #tpu.memory_space<vmem>>, vector<10x1x16xf32>
    tpu.vector_store %arg31[%c0_32, %c0_33, %c0_34], %13 {strides = array<i32>} : memref<10x10x16xf32, #tpu.memory_space<vmem>>, vector<10x1x16xf32>,
    %c0_35 = arith.constant 0 : index
    %c9_36 = arith.constant 9 : index
    %c0_37 = arith.constant 0 : index
    %17 = vector.load %arg31[%c0_35, %c9_36, %c0_37] : memref<10x10x16xf32, #tpu.memory_space<vmem>>, vector<10x1x16xf32>
    tpu.vector_store %arg31[%c0_35, %c9_36, %c0_37], %13 {strides = array<i32>} : memref<10x10x16xf32, #tpu.memory_space<vmem>>, vector<10x1x16xf32>,
    %cst_38 = arith.constant 0.000000e+00 : f32
    %18 = vector.broadcast %cst_38 : f32 to vector<1x6x32xf32>
    %cst_39 = arith.constant 0.000000e+00 : f32
    %19 = vector.broadcast %cst_39 : f32 to vector<6x1x32xf32>
    %c0_40 = arith.constant 0 : index
    %c0_41 = arith.constant 0 : index
    %c0_42 = arith.constant 0 : index
    %20 = vector.load %arg32[%c0_40, %c0_41, %c0_42] : memref<6x6x32xf32, #tpu.memory_space<vmem>>, vector<1x6x32xf32>
    tpu.vector_store %arg32[%c0_40, %c0_41, %c0_42], %18 {strides = array<i32>} : memref<6x6x32xf32, #tpu.memory_space<vmem>>, vector<1x6x32xf32>,
    %c5 = arith.constant 5 : index
    %c0_43 = arith.constant 0 : index
    %c0_44 = arith.constant 0 : index
    %21 = vector.load %arg32[%c5, %c0_43, %c0_44] : memref<6x6x32xf32, #tpu.memory_space<vmem>>, vector<1x6x32xf32>
    tpu.vector_store %arg32[%c5, %c0_43, %c0_44], %18 {strides = array<i32>} : memref<6x6x32xf32, #tpu.memory_space<vmem>>, vector<1x6x32xf32>,
    %c0_45 = arith.constant 0 : index
    %c0_46 = arith.constant 0 : index
    %c0_47 = arith.constant 0 : index
    %22 = vector.load %arg32[%c0_45, %c0_46, %c0_47] : memref<6x6x32xf32, #tpu.memory_space<vmem>>, vector<6x1x32xf32>
    tpu.vector_store %arg32[%c0_45, %c0_46, %c0_47], %19 {strides = array<i32>} : memref<6x6x32xf32, #tpu.memory_space<vmem>>, vector<6x1x32xf32>,
    %c0_48 = arith.constant 0 : index
    %c5_49 = arith.constant 5 : index
    %c0_50 = arith.constant 0 : index
    %23 = vector.load %arg32[%c0_48, %c5_49, %c0_50] : memref<6x6x32xf32, #tpu.memory_space<vmem>>, vector<6x1x32xf32>
    tpu.vector_store %arg32[%c0_48, %c5_49, %c0_50], %19 {strides = array<i32>} : memref<6x6x32xf32, #tpu.memory_space<vmem>>, vector<6x1x32xf32>,
    %cst_51 = arith.constant 0.000000e+00 : f32
    %24 = vector.broadcast %cst_51 : f32 to vector<1x4x32xf32>
    %cst_52 = arith.constant 0.000000e+00 : f32
    %25 = vector.broadcast %cst_52 : f32 to vector<4x1x32xf32>
    %c0_53 = arith.constant 0 : index
    %c0_54 = arith.constant 0 : index
    %c0_55 = arith.constant 0 : index
    %26 = vector.load %arg33[%c0_53, %c0_54, %c0_55] : memref<4x4x32xf32, #tpu.memory_space<vmem>>, vector<1x4x32xf32>
    tpu.vector_store %arg33[%c0_53, %c0_54, %c0_55], %24 {strides = array<i32>} : memref<4x4x32xf32, #tpu.memory_space<vmem>>, vector<1x4x32xf32>,
    %c3 = arith.constant 3 : index
    %c0_56 = arith.constant 0 : index
    %c0_57 = arith.constant 0 : index
    %27 = vector.load %arg33[%c3, %c0_56, %c0_57] : memref<4x4x32xf32, #tpu.memory_space<vmem>>, vector<1x4x32xf32>
    tpu.vector_store %arg33[%c3, %c0_56, %c0_57], %24 {strides = array<i32>} : memref<4x4x32xf32, #tpu.memory_space<vmem>>, vector<1x4x32xf32>,
    %c0_58 = arith.constant 0 : index
    %c0_59 = arith.constant 0 : index
    %c0_60 = arith.constant 0 : index
    %28 = vector.load %arg33[%c0_58, %c0_59, %c0_60] : memref<4x4x32xf32, #tpu.memory_space<vmem>>, vector<4x1x32xf32>
    tpu.vector_store %arg33[%c0_58, %c0_59, %c0_60], %25 {strides = array<i32>} : memref<4x4x32xf32, #tpu.memory_space<vmem>>, vector<4x1x32xf32>,
    %c0_61 = arith.constant 0 : index
    %c3_62 = arith.constant 3 : index
    %c0_63 = arith.constant 0 : index
    %29 = vector.load %arg33[%c0_61, %c3_62, %c0_63] : memref<4x4x32xf32, #tpu.memory_space<vmem>>, vector<4x1x32xf32>
    tpu.vector_store %arg33[%c0_61, %c3_62, %c0_63], %25 {strides = array<i32>} : memref<4x4x32xf32, #tpu.memory_space<vmem>>, vector<4x1x32xf32>,
    %c0_64 = arith.constant 0 : index
    %c0_65 = arith.constant 0 : index
    %c0_66 = arith.constant 0 : index
    %c0_67 = arith.constant 0 : index
    %30 = vector.load %arg1[%c0_64, %c0_65, %c0_66, %c0_67] : memref<1x16x16x4xf32, #tpu.memory_space<vmem>>, vector<1x16x16x4xf32>
    %31 = vector.shape_cast %30 : vector<1x16x16x4xf32> to vector<16x16x4xf32>
    %c1 = arith.constant 1 : index
    %c1_68 = arith.constant 1 : index
    %c0_69 = arith.constant 0 : index
    %32 = vector.load %arg29[%c1, %c1_68, %c0_69] : memref<18x18x4xf32, #tpu.memory_space<vmem>>, vector<16x16x4xf32>
    tpu.vector_store %arg29[%c1, %c1_68, %c0_69], %31 {strides = array<i32>} : memref<18x18x4xf32, #tpu.memory_space<vmem>>, vector<16x16x4xf32>,
    %c0_70 = arith.constant 0 : index
    %c0_71 = arith.constant 0 : index
    %33 = vector.load %arg3[%c0_70, %c0_71] : memref<1x8xf32, #tpu.memory_space<vmem>>, vector<1x8xf32>
    %34 = vector.shape_cast %33 : vector<1x8xf32> to vector<1x8xf32>
    %35 = vector.broadcast %34 : vector<1x8xf32> to vector<256x8xf32>
    %c0_72 = arith.constant 0 : index
    %c0_73 = arith.constant 0 : index
    %c0_74 = arith.constant 0 : index
    %36 = vector.load %arg29[%c0_72, %c0_73, %c0_74] : memref<18x18x4xf32, #tpu.memory_space<vmem>>, vector<16x16x4xf32>
    %37 = vector.shape_cast %36 : vector<16x16x4xf32> to vector<256x4xf32>
    %38 = arith.truncf %37 : vector<256x4xf32> to vector<256x4xbf16>
    %c0_75 = arith.constant 0 : index
    %c0_76 = arith.constant 0 : index
    %39 = vector.load %arg2[%c0_75, %c0_76] : memref<36x8xbf16, #tpu.memory_space<vmem>>, vector<4x8xbf16>
    %cst_77 = arith.constant dense<0.000000e+00> : vector<256x8xf32>
    %40 = tpu.matmul %38, %39, %cst_77 {dimension_numbers = #tpu.dot_dimension_numbers<[1], [0], [0], [1], [0, 0, 1, 1], [], []>} : vector<256x4xbf16>, vector<4x8xbf16>, vector<256x8xf32> -> vector<256x8xf32>
    %41 = arith.addf %35, %40 : vector<256x8xf32>
    %c0_78 = arith.constant 0 : index
    %c1_79 = arith.constant 1 : index
    %c0_80 = arith.constant 0 : index
    %42 = vector.load %arg29[%c0_78, %c1_79, %c0_80] : memref<18x18x4xf32, #tpu.memory_space<vmem>>, vector<16x16x4xf32>
    %43 = vector.shape_cast %42 : vector<16x16x4xf32> to vector<256x4xf32>
    %44 = arith.truncf %43 : vector<256x4xf32> to vector<256x4xbf16>
    %c4 = arith.constant 4 : index
    %c0_81 = arith.constant 0 : index
    %45 = vector.load %arg2[%c4, %c0_81] : memref<36x8xbf16, #tpu.memory_space<vmem>>, vector<4x8xbf16>
    %cst_82 = arith.constant dense<0.000000e+00> : vector<256x8xf32>
    %46 = tpu.matmul %44, %45, %cst_82 {dimension_numbers = #tpu.dot_dimension_numbers<[1], [0], [0], [1], [0, 0, 1, 1], [], []>} : vector<256x4xbf16>, vector<4x8xbf16>, vector<256x8xf32> -> vector<256x8xf32>
    %47 = arith.addf %41, %46 : vector<256x8xf32>
    %c0_83 = arith.constant 0 : index
    %c2 = arith.constant 2 : index
    %c0_84 = arith.constant 0 : index
    %48 = vector.load %arg29[%c0_83, %c2, %c0_84] : memref<18x18x4xf32, #tpu.memory_space<vmem>>, vector<16x16x4xf32>
    %49 = vector.shape_cast %48 : vector<16x16x4xf32> to vector<256x4xf32>
    %50 = arith.truncf %49 : vector<256x4xf32> to vector<256x4xbf16>
    %c8 = arith.constant 8 : index
    %c0_85 = arith.constant 0 : index
    %51 = vector.load %arg2[%c8, %c0_85] : memref<36x8xbf16, #tpu.memory_space<vmem>>, vector<4x8xbf16>
    %cst_86 = arith.constant dense<0.000000e+00> : vector<256x8xf32>
    %52 = tpu.matmul %50, %51, %cst_86 {dimension_numbers = #tpu.dot_dimension_numbers<[1], [0], [0], [1], [0, 0, 1, 1], [], []>} : vector<256x4xbf16>, vector<4x8xbf16>, vector<256x8xf32> -> vector<256x8xf32>
    %53 = arith.addf %47, %52 : vector<256x8xf32>
    %c1_87 = arith.constant 1 : index
    %c0_88 = arith.constant 0 : index
    %c0_89 = arith.constant 0 : index
    %54 = vector.load %arg29[%c1_87, %c0_88, %c0_89] : memref<18x18x4xf32, #tpu.memory_space<vmem>>, vector<16x16x4xf32>
    %55 = vector.shape_cast %54 : vector<16x16x4xf32> to vector<256x4xf32>
    %56 = arith.truncf %55 : vector<256x4xf32> to vector<256x4xbf16>
    %c12 = arith.constant 12 : index
    %c0_90 = arith.constant 0 : index
    %57 = vector.load %arg2[%c12, %c0_90] : memref<36x8xbf16, #tpu.memory_space<vmem>>, vector<4x8xbf16>
    %cst_91 = arith.constant dense<0.000000e+00> : vector<256x8xf32>
    %58 = tpu.matmul %56, %57, %cst_91 {dimension_numbers = #tpu.dot_dimension_numbers<[1], [0], [0], [1], [0, 0, 1, 1], [], []>} : vector<256x4xbf16>, vector<4x8xbf16>, vector<256x8xf32> -> vector<256x8xf32>
    %59 = arith.addf %53, %58 : vector<256x8xf32>
    %c1_92 = arith.constant 1 : index
    %c1_93 = arith.constant 1 : index
    %c0_94 = arith.constant 0 : index
    %60 = vector.load %arg29[%c1_92, %c1_93, %c0_94] : memref<18x18x4xf32, #tpu.memory_space<vmem>>, vector<16x16x4xf32>
    %61 = vector.shape_cast %60 : vector<16x16x4xf32> to vector<256x4xf32>
    %62 = arith.truncf %61 : vector<256x4xf32> to vector<256x4xbf16>
    %c16 = arith.constant 16 : index
    %c0_95 = arith.constant 0 : index
    %63 = vector.load %arg2[%c16, %c0_95] : memref<36x8xbf16, #tpu.memory_space<vmem>>, vector<4x8xbf16>
    %cst_96 = arith.constant dense<0.000000e+00> : vector<256x8xf32>
    %64 = tpu.matmul %62, %63, %cst_96 {dimension_numbers = #tpu.dot_dimension_numbers<[1], [0], [0], [1], [0, 0, 1, 1], [], []>} : vector<256x4xbf16>, vector<4x8xbf16>, vector<256x8xf32> -> vector<256x8xf32>
    %65 = arith.addf %59, %64 : vector<256x8xf32>
    %c1_97 = arith.constant 1 : index
    %c2_98 = arith.constant 2 : index
    %c0_99 = arith.constant 0 : index
    %66 = vector.load %arg29[%c1_97, %c2_98, %c0_99] : memref<18x18x4xf32, #tpu.memory_space<vmem>>, vector<16x16x4xf32>
    %67 = vector.shape_cast %66 : vector<16x16x4xf32> to vector<256x4xf32>
    %68 = arith.truncf %67 : vector<256x4xf32> to vector<256x4xbf16>
    %c20 = arith.constant 20 : index
    %c0_100 = arith.constant 0 : index
    %69 = vector.load %arg2[%c20, %c0_100] : memref<36x8xbf16, #tpu.memory_space<vmem>>, vector<4x8xbf16>
    %cst_101 = arith.constant dense<0.000000e+00> : vector<256x8xf32>
    %70 = tpu.matmul %68, %69, %cst_101 {dimension_numbers = #tpu.dot_dimension_numbers<[1], [0], [0], [1], [0, 0, 1, 1], [], []>} : vector<256x4xbf16>, vector<4x8xbf16>, vector<256x8xf32> -> vector<256x8xf32>
    %71 = arith.addf %65, %70 : vector<256x8xf32>
    %c2_102 = arith.constant 2 : index
    %c0_103 = arith.constant 0 : index
    %c0_104 = arith.constant 0 : index
    %72 = vector.load %arg29[%c2_102, %c0_103, %c0_104] : memref<18x18x4xf32, #tpu.memory_space<vmem>>, vector<16x16x4xf32>
    %73 = vector.shape_cast %72 : vector<16x16x4xf32> to vector<256x4xf32>
    %74 = arith.truncf %73 : vector<256x4xf32> to vector<256x4xbf16>
    %c24 = arith.constant 24 : index
    %c0_105 = arith.constant 0 : index
    %75 = vector.load %arg2[%c24, %c0_105] : memref<36x8xbf16, #tpu.memory_space<vmem>>, vector<4x8xbf16>
    %cst_106 = arith.constant dense<0.000000e+00> : vector<256x8xf32>
    %76 = tpu.matmul %74, %75, %cst_106 {dimension_numbers = #tpu.dot_dimension_numbers<[1], [0], [0], [1], [0, 0, 1, 1], [], []>} : vector<256x4xbf16>, vector<4x8xbf16>, vector<256x8xf32> -> vector<256x8xf32>
    %77 = arith.addf %71, %76 : vector<256x8xf32>
    %c2_107 = arith.constant 2 : index
    %c1_108 = arith.constant 1 : index
    %c0_109 = arith.constant 0 : index
    %78 = vector.load %arg29[%c2_107, %c1_108, %c0_109] : memref<18x18x4xf32, #tpu.memory_space<vmem>>, vector<16x16x4xf32>
    %79 = vector.shape_cast %78 : vector<16x16x4xf32> to vector<256x4xf32>
    %80 = arith.truncf %79 : vector<256x4xf32> to vector<256x4xbf16>
    %c28 = arith.constant 28 : index
    %c0_110 = arith.constant 0 : index
    %81 = vector.load %arg2[%c28, %c0_110] : memref<36x8xbf16, #tpu.memory_space<vmem>>, vector<4x8xbf16>
    %cst_111 = arith.constant dense<0.000000e+00> : vector<256x8xf32>
    %82 = tpu.matmul %80, %81, %cst_111 {dimension_numbers = #tpu.dot_dimension_numbers<[1], [0], [0], [1], [0, 0, 1, 1], [], []>} : vector<256x4xbf16>, vector<4x8xbf16>, vector<256x8xf32> -> vector<256x8xf32>
    %83 = arith.addf %77, %82 : vector<256x8xf32>
    %c2_112 = arith.constant 2 : index
    %c2_113 = arith.constant 2 : index
    %c0_114 = arith.constant 0 : index
    %84 = vector.load %arg29[%c2_112, %c2_113, %c0_114] : memref<18x18x4xf32, #tpu.memory_space<vmem>>, vector<16x16x4xf32>
    %85 = vector.shape_cast %84 : vector<16x16x4xf32> to vector<256x4xf32>
    %86 = arith.truncf %85 : vector<256x4xf32> to vector<256x4xbf16>
    %c32 = arith.constant 32 : index
    %c0_115 = arith.constant 0 : index
    %87 = vector.load %arg2[%c32, %c0_115] : memref<36x8xbf16, #tpu.memory_space<vmem>>, vector<4x8xbf16>
    %cst_116 = arith.constant dense<0.000000e+00> : vector<256x8xf32>
    %88 = tpu.matmul %86, %87, %cst_116 {dimension_numbers = #tpu.dot_dimension_numbers<[1], [0], [0], [1], [0, 0, 1, 1], [], []>} : vector<256x4xbf16>, vector<4x8xbf16>, vector<256x8xf32> -> vector<256x8xf32>
    %89 = arith.addf %83, %88 : vector<256x8xf32>
    %cst_117 = arith.constant 0.000000e+00 : f32
    %90 = vector.broadcast %cst_117 : f32 to vector<256x8xf32>
    %91 = arith.maximumf %89, %90 : vector<256x8xf32>
    %92 = vector.shape_cast %91 : vector<256x8xf32> to vector<16x16x8xf32>
    %c1_118 = arith.constant 1 : index
    %c1_119 = arith.constant 1 : index
    %c0_120 = arith.constant 0 : index
    %93 = vector.load %arg30[%c1_118, %c1_119, %c0_120] : memref<18x18x8xf32, #tpu.memory_space<vmem>>, vector<16x16x8xf32>
    tpu.vector_store %arg30[%c1_118, %c1_119, %c0_120], %92 {strides = array<i32>} : memref<18x18x8xf32, #tpu.memory_space<vmem>>, vector<16x16x8xf32>,
    %c0_121 = arith.constant 0 : index
    %c0_122 = arith.constant 0 : index
    %94 = vector.load %arg5[%c0_121, %c0_122] : memref<1x8xf32, #tpu.memory_space<vmem>>, vector<1x8xf32>
    %95 = vector.shape_cast %94 : vector<1x8xf32> to vector<1x8xf32>
    %96 = vector.broadcast %95 : vector<1x8xf32> to vector<256x8xf32>
    %c0_123 = arith.constant 0 : index
    %c0_124 = arith.constant 0 : index
    %c0_125 = arith.constant 0 : index
    %97 = vector.load %arg30[%c0_123, %c0_124, %c0_125] : memref<18x18x8xf32, #tpu.memory_space<vmem>>, vector<16x16x8xf32>
    %98 = vector.shape_cast %97 : vector<16x16x8xf32> to vector<256x8xf32>
    %99 = arith.truncf %98 : vector<256x8xf32> to vector<256x8xbf16>
    %c0_126 = arith.constant 0 : index
    %c0_127 = arith.constant 0 : index
    %100 = vector.load %arg4[%c0_126, %c0_127] : memref<72x8xbf16, #tpu.memory_space<vmem>>, vector<8x8xbf16>
    %cst_128 = arith.constant dense<0.000000e+00> : vector<256x8xf32>
    %101 = tpu.matmul %99, %100, %cst_128 {dimension_numbers = #tpu.dot_dimension_numbers<[1], [0], [0], [1], [0, 0, 1, 1], [], []>} : vector<256x8xbf16>, vector<8x8xbf16>, vector<256x8xf32> -> vector<256x8xf32>
    %102 = arith.addf %96, %101 : vector<256x8xf32>
    %c0_129 = arith.constant 0 : index
    %c1_130 = arith.constant 1 : index
    %c0_131 = arith.constant 0 : index
    %103 = vector.load %arg30[%c0_129, %c1_130, %c0_131] : memref<18x18x8xf32, #tpu.memory_space<vmem>>, vector<16x16x8xf32>
    %104 = vector.shape_cast %103 : vector<16x16x8xf32> to vector<256x8xf32>
    %105 = arith.truncf %104 : vector<256x8xf32> to vector<256x8xbf16>
    %c8_132 = arith.constant 8 : index
    %c0_133 = arith.constant 0 : index
    %106 = vector.load %arg4[%c8_132, %c0_133] : memref<72x8xbf16, #tpu.memory_space<vmem>>, vector<8x8xbf16>
    %cst_134 = arith.constant dense<0.000000e+00> : vector<256x8xf32>
    %107 = tpu.matmul %105, %106, %cst_134 {dimension_numbers = #tpu.dot_dimension_numbers<[1], [0], [0], [1], [0, 0, 1, 1], [], []>} : vector<256x8xbf16>, vector<8x8xbf16>, vector<256x8xf32> -> vector<256x8xf32>
    %108 = arith.addf %102, %107 : vector<256x8xf32>
    %c0_135 = arith.constant 0 : index
    %c2_136 = arith.constant 2 : index
    %c0_137 = arith.constant 0 : index
    %109 = vector.load %arg30[%c0_135, %c2_136, %c0_137] : memref<18x18x8xf32, #tpu.memory_space<vmem>>, vector<16x16x8xf32>
    %110 = vector.shape_cast %109 : vector<16x16x8xf32> to vector<256x8xf32>
    %111 = arith.truncf %110 : vector<256x8xf32> to vector<256x8xbf16>
    %c16_138 = arith.constant 16 : index
    %c0_139 = arith.constant 0 : index
    %112 = vector.load %arg4[%c16_138, %c0_139] : memref<72x8xbf16, #tpu.memory_space<vmem>>, vector<8x8xbf16>
    %cst_140 = arith.constant dense<0.000000e+00> : vector<256x8xf32>
    %113 = tpu.matmul %111, %112, %cst_140 {dimension_numbers = #tpu.dot_dimension_numbers<[1], [0], [0], [1], [0, 0, 1, 1], [], []>} : vector<256x8xbf16>, vector<8x8xbf16>, vector<256x8xf32> -> vector<256x8xf32>
    %114 = arith.addf %108, %113 : vector<256x8xf32>
    %c1_141 = arith.constant 1 : index
    %c0_142 = arith.constant 0 : index
    %c0_143 = arith.constant 0 : index
    %115 = vector.load %arg30[%c1_141, %c0_142, %c0_143] : memref<18x18x8xf32, #tpu.memory_space<vmem>>, vector<16x16x8xf32>
    %116 = vector.shape_cast %115 : vector<16x16x8xf32> to vector<256x8xf32>
    %117 = arith.truncf %116 : vector<256x8xf32> to vector<256x8xbf16>
    %c24_144 = arith.constant 24 : index
    %c0_145 = arith.constant 0 : index
    %118 = vector.load %arg4[%c24_144, %c0_145] : memref<72x8xbf16, #tpu.memory_space<vmem>>, vector<8x8xbf16>
    %cst_146 = arith.constant dense<0.000000e+00> : vector<256x8xf32>
    %119 = tpu.matmul %117, %118, %cst_146 {dimension_numbers = #tpu.dot_dimension_numbers<[1], [0], [0], [1], [0, 0, 1, 1], [], []>} : vector<256x8xbf16>, vector<8x8xbf16>, vector<256x8xf32> -> vector<256x8xf32>
    %120 = arith.addf %114, %119 : vector<256x8xf32>
    %c1_147 = arith.constant 1 : index
    %c1_148 = arith.constant 1 : index
    %c0_149 = arith.constant 0 : index
    %121 = vector.load %arg30[%c1_147, %c1_148, %c0_149] : memref<18x18x8xf32, #tpu.memory_space<vmem>>, vector<16x16x8xf32>
    %122 = vector.shape_cast %121 : vector<16x16x8xf32> to vector<256x8xf32>
    %123 = arith.truncf %122 : vector<256x8xf32> to vector<256x8xbf16>
    %c32_150 = arith.constant 32 : index
    %c0_151 = arith.constant 0 : index
    %124 = vector.load %arg4[%c32_150, %c0_151] : memref<72x8xbf16, #tpu.memory_space<vmem>>, vector<8x8xbf16>
    %cst_152 = arith.constant dense<0.000000e+00> : vector<256x8xf32>
    %125 = tpu.matmul %123, %124, %cst_152 {dimension_numbers = #tpu.dot_dimension_numbers<[1], [0], [0], [1], [0, 0, 1, 1], [], []>} : vector<256x8xbf16>, vector<8x8xbf16>, vector<256x8xf32> -> vector<256x8xf32>
    %126 = arith.addf %120, %125 : vector<256x8xf32>
    %c1_153 = arith.constant 1 : index
    %c2_154 = arith.constant 2 : index
    %c0_155 = arith.constant 0 : index
    %127 = vector.load %arg30[%c1_153, %c2_154, %c0_155] : memref<18x18x8xf32, #tpu.memory_space<vmem>>, vector<16x16x8xf32>
    %128 = vector.shape_cast %127 : vector<16x16x8xf32> to vector<256x8xf32>
    %129 = arith.truncf %128 : vector<256x8xf32> to vector<256x8xbf16>
    %c40 = arith.constant 40 : index
    %c0_156 = arith.constant 0 : index
    %130 = vector.load %arg4[%c40, %c0_156] : memref<72x8xbf16, #tpu.memory_space<vmem>>, vector<8x8xbf16>
    %cst_157 = arith.constant dense<0.000000e+00> : vector<256x8xf32>
    %131 = tpu.matmul %129, %130, %cst_157 {dimension_numbers = #tpu.dot_dimension_numbers<[1], [0], [0], [1], [0, 0, 1, 1], [], []>} : vector<256x8xbf16>, vector<8x8xbf16>, vector<256x8xf32> -> vector<256x8xf32>
    %132 = arith.addf %126, %131 : vector<256x8xf32>
    %c2_158 = arith.constant 2 : index
    %c0_159 = arith.constant 0 : index
    %c0_160 = arith.constant 0 : index
    %133 = vector.load %arg30[%c2_158, %c0_159, %c0_160] : memref<18x18x8xf32, #tpu.memory_space<vmem>>, vector<16x16x8xf32>
    %134 = vector.shape_cast %133 : vector<16x16x8xf32> to vector<256x8xf32>
    %135 = arith.truncf %134 : vector<256x8xf32> to vector<256x8xbf16>
    %c48 = arith.constant 48 : index
    %c0_161 = arith.constant 0 : index
    %136 = vector.load %arg4[%c48, %c0_161] : memref<72x8xbf16, #tpu.memory_space<vmem>>, vector<8x8xbf16>
    %cst_162 = arith.constant dense<0.000000e+00> : vector<256x8xf32>
    %137 = tpu.matmul %135, %136, %cst_162 {dimension_numbers = #tpu.dot_dimension_numbers<[1], [0], [0], [1], [0, 0, 1, 1], [], []>} : vector<256x8xbf16>, vector<8x8xbf16>, vector<256x8xf32> -> vector<256x8xf32>
    %138 = arith.addf %132, %137 : vector<256x8xf32>
    %c2_163 = arith.constant 2 : index
    %c1_164 = arith.constant 1 : index
    %c0_165 = arith.constant 0 : index
    %139 = vector.load %arg30[%c2_163, %c1_164, %c0_165] : memref<18x18x8xf32, #tpu.memory_space<vmem>>, vector<16x16x8xf32>
    %140 = vector.shape_cast %139 : vector<16x16x8xf32> to vector<256x8xf32>
    %141 = arith.truncf %140 : vector<256x8xf32> to vector<256x8xbf16>
    %c56 = arith.constant 56 : index
    %c0_166 = arith.constant 0 : index
    %142 = vector.load %arg4[%c56, %c0_166] : memref<72x8xbf16, #tpu.memory_space<vmem>>, vector<8x8xbf16>
    %cst_167 = arith.constant dense<0.000000e+00> : vector<256x8xf32>
    %143 = tpu.matmul %141, %142, %cst_167 {dimension_numbers = #tpu.dot_dimension_numbers<[1], [0], [0], [1], [0, 0, 1, 1], [], []>} : vector<256x8xbf16>, vector<8x8xbf16>, vector<256x8xf32> -> vector<256x8xf32>
    %144 = arith.addf %138, %143 : vector<256x8xf32>
    %c2_168 = arith.constant 2 : index
    %c2_169 = arith.constant 2 : index
    %c0_170 = arith.constant 0 : index
    %145 = vector.load %arg30[%c2_168, %c2_169, %c0_170] : memref<18x18x8xf32, #tpu.memory_space<vmem>>, vector<16x16x8xf32>
    %146 = vector.shape_cast %145 : vector<16x16x8xf32> to vector<256x8xf32>
    %147 = arith.truncf %146 : vector<256x8xf32> to vector<256x8xbf16>
    %c64 = arith.constant 64 : index
    %c0_171 = arith.constant 0 : index
    %148 = vector.load %arg4[%c64, %c0_171] : memref<72x8xbf16, #tpu.memory_space<vmem>>, vector<8x8xbf16>
    %cst_172 = arith.constant dense<0.000000e+00> : vector<256x8xf32>
    %149 = tpu.matmul %147, %148, %cst_172 {dimension_numbers = #tpu.dot_dimension_numbers<[1], [0], [0], [1], [0, 0, 1, 1], [], []>} : vector<256x8xbf16>, vector<8x8xbf16>, vector<256x8xf32> -> vector<256x8xf32>
    %150 = arith.addf %144, %149 : vector<256x8xf32>
    %cst_173 = arith.constant 0.000000e+00 : f32
    %151 = vector.broadcast %cst_173 : f32 to vector<256x8xf32>
    %152 = arith.maximumf %150, %151 : vector<256x8xf32>
    %153 = vector.shape_cast %152 : vector<256x8xf32> to vector<16x16x8xf32>
    %c1_174 = arith.constant 1 : index
    %c1_175 = arith.constant 1 : index
    %c0_176 = arith.constant 0 : index
    %154 = vector.load %arg30[%c1_174, %c1_175, %c0_176] : memref<18x18x8xf32, #tpu.memory_space<vmem>>, vector<16x16x8xf32>
    tpu.vector_store %arg30[%c1_174, %c1_175, %c0_176], %153 {strides = array<i32>} : memref<18x18x8xf32, #tpu.memory_space<vmem>>, vector<16x16x8xf32>,
    %c0_177 = arith.constant 0 : index
    %c0_178 = arith.constant 0 : index
    %155 = vector.load %arg7[%c0_177, %c0_178] : memref<1x8xf32, #tpu.memory_space<vmem>>, vector<1x8xf32>
    %156 = vector.shape_cast %155 : vector<1x8xf32> to vector<1x8xf32>
    %157 = vector.broadcast %156 : vector<1x8xf32> to vector<256x8xf32>
    %c0_179 = arith.constant 0 : index
    %c0_180 = arith.constant 0 : index
    %c0_181 = arith.constant 0 : index
    %158 = vector.load %arg30[%c0_179, %c0_180, %c0_181] : memref<18x18x8xf32, #tpu.memory_space<vmem>>, vector<16x16x8xf32>
    %159 = vector.shape_cast %158 : vector<16x16x8xf32> to vector<256x8xf32>
    %160 = arith.truncf %159 : vector<256x8xf32> to vector<256x8xbf16>
    %c0_182 = arith.constant 0 : index
    %c0_183 = arith.constant 0 : index
    %161 = vector.load %arg6[%c0_182, %c0_183] : memref<72x8xbf16, #tpu.memory_space<vmem>>, vector<8x8xbf16>
    %cst_184 = arith.constant dense<0.000000e+00> : vector<256x8xf32>
    %162 = tpu.matmul %160, %161, %cst_184 {dimension_numbers = #tpu.dot_dimension_numbers<[1], [0], [0], [1], [0, 0, 1, 1], [], []>} : vector<256x8xbf16>, vector<8x8xbf16>, vector<256x8xf32> -> vector<256x8xf32>
    %163 = arith.addf %157, %162 : vector<256x8xf32>
    %c0_185 = arith.constant 0 : index
    %c1_186 = arith.constant 1 : index
    %c0_187 = arith.constant 0 : index
    %164 = vector.load %arg30[%c0_185, %c1_186, %c0_187] : memref<18x18x8xf32, #tpu.memory_space<vmem>>, vector<16x16x8xf32>
    %165 = vector.shape_cast %164 : vector<16x16x8xf32> to vector<256x8xf32>
    %166 = arith.truncf %165 : vector<256x8xf32> to vector<256x8xbf16>
    %c8_188 = arith.constant 8 : index
    %c0_189 = arith.constant 0 : index
    %167 = vector.load %arg6[%c8_188, %c0_189] : memref<72x8xbf16, #tpu.memory_space<vmem>>, vector<8x8xbf16>
    %cst_190 = arith.constant dense<0.000000e+00> : vector<256x8xf32>
    %168 = tpu.matmul %166, %167, %cst_190 {dimension_numbers = #tpu.dot_dimension_numbers<[1], [0], [0], [1], [0, 0, 1, 1], [], []>} : vector<256x8xbf16>, vector<8x8xbf16>, vector<256x8xf32> -> vector<256x8xf32>
    %169 = arith.addf %163, %168 : vector<256x8xf32>
    %c0_191 = arith.constant 0 : index
    %c2_192 = arith.constant 2 : index
    %c0_193 = arith.constant 0 : index
    %170 = vector.load %arg30[%c0_191, %c2_192, %c0_193] : memref<18x18x8xf32, #tpu.memory_space<vmem>>, vector<16x16x8xf32>
    %171 = vector.shape_cast %170 : vector<16x16x8xf32> to vector<256x8xf32>
    %172 = arith.truncf %171 : vector<256x8xf32> to vector<256x8xbf16>
    %c16_194 = arith.constant 16 : index
    %c0_195 = arith.constant 0 : index
    %173 = vector.load %arg6[%c16_194, %c0_195] : memref<72x8xbf16, #tpu.memory_space<vmem>>, vector<8x8xbf16>
    %cst_196 = arith.constant dense<0.000000e+00> : vector<256x8xf32>
    %174 = tpu.matmul %172, %173, %cst_196 {dimension_numbers = #tpu.dot_dimension_numbers<[1], [0], [0], [1], [0, 0, 1, 1], [], []>} : vector<256x8xbf16>, vector<8x8xbf16>, vector<256x8xf32> -> vector<256x8xf32>
    %175 = arith.addf %169, %174 : vector<256x8xf32>
    %c1_197 = arith.constant 1 : index
    %c0_198 = arith.constant 0 : index
    %c0_199 = arith.constant 0 : index
    %176 = vector.load %arg30[%c1_197, %c0_198, %c0_199] : memref<18x18x8xf32, #tpu.memory_space<vmem>>, vector<16x16x8xf32>
    %177 = vector.shape_cast %176 : vector<16x16x8xf32> to vector<256x8xf32>
    %178 = arith.truncf %177 : vector<256x8xf32> to vector<256x8xbf16>
    %c24_200 = arith.constant 24 : index
    %c0_201 = arith.constant 0 : index
    %179 = vector.load %arg6[%c24_200, %c0_201] : memref<72x8xbf16, #tpu.memory_space<vmem>>, vector<8x8xbf16>
    %cst_202 = arith.constant dense<0.000000e+00> : vector<256x8xf32>
    %180 = tpu.matmul %178, %179, %cst_202 {dimension_numbers = #tpu.dot_dimension_numbers<[1], [0], [0], [1], [0, 0, 1, 1], [], []>} : vector<256x8xbf16>, vector<8x8xbf16>, vector<256x8xf32> -> vector<256x8xf32>
    %181 = arith.addf %175, %180 : vector<256x8xf32>
    %c1_203 = arith.constant 1 : index
    %c1_204 = arith.constant 1 : index
    %c0_205 = arith.constant 0 : index
    %182 = vector.load %arg30[%c1_203, %c1_204, %c0_205] : memref<18x18x8xf32, #tpu.memory_space<vmem>>, vector<16x16x8xf32>
    %183 = vector.shape_cast %182 : vector<16x16x8xf32> to vector<256x8xf32>
    %184 = arith.truncf %183 : vector<256x8xf32> to vector<256x8xbf16>
    %c32_206 = arith.constant 32 : index
    %c0_207 = arith.constant 0 : index
    %185 = vector.load %arg6[%c32_206, %c0_207] : memref<72x8xbf16, #tpu.memory_space<vmem>>, vector<8x8xbf16>
    %cst_208 = arith.constant dense<0.000000e+00> : vector<256x8xf32>
    %186 = tpu.matmul %184, %185, %cst_208 {dimension_numbers = #tpu.dot_dimension_numbers<[1], [0], [0], [1], [0, 0, 1, 1], [], []>} : vector<256x8xbf16>, vector<8x8xbf16>, vector<256x8xf32> -> vector<256x8xf32>
    %187 = arith.addf %181, %186 : vector<256x8xf32>
    %c1_209 = arith.constant 1 : index
    %c2_210 = arith.constant 2 : index
    %c0_211 = arith.constant 0 : index
    %188 = vector.load %arg30[%c1_209, %c2_210, %c0_211] : memref<18x18x8xf32, #tpu.memory_space<vmem>>, vector<16x16x8xf32>
    %189 = vector.shape_cast %188 : vector<16x16x8xf32> to vector<256x8xf32>
    %190 = arith.truncf %189 : vector<256x8xf32> to vector<256x8xbf16>
    %c40_212 = arith.constant 40 : index
    %c0_213 = arith.constant 0 : index
    %191 = vector.load %arg6[%c40_212, %c0_213] : memref<72x8xbf16, #tpu.memory_space<vmem>>, vector<8x8xbf16>
    %cst_214 = arith.constant dense<0.000000e+00> : vector<256x8xf32>
    %192 = tpu.matmul %190, %191, %cst_214 {dimension_numbers = #tpu.dot_dimension_numbers<[1], [0], [0], [1], [0, 0, 1, 1], [], []>} : vector<256x8xbf16>, vector<8x8xbf16>, vector<256x8xf32> -> vector<256x8xf32>
    %193 = arith.addf %187, %192 : vector<256x8xf32>
    %c2_215 = arith.constant 2 : index
    %c0_216 = arith.constant 0 : index
    %c0_217 = arith.constant 0 : index
    %194 = vector.load %arg30[%c2_215, %c0_216, %c0_217] : memref<18x18x8xf32, #tpu.memory_space<vmem>>, vector<16x16x8xf32>
    %195 = vector.shape_cast %194 : vector<16x16x8xf32> to vector<256x8xf32>
    %196 = arith.truncf %195 : vector<256x8xf32> to vector<256x8xbf16>
    %c48_218 = arith.constant 48 : index
    %c0_219 = arith.constant 0 : index
    %197 = vector.load %arg6[%c48_218, %c0_219] : memref<72x8xbf16, #tpu.memory_space<vmem>>, vector<8x8xbf16>
    %cst_220 = arith.constant dense<0.000000e+00> : vector<256x8xf32>
    %198 = tpu.matmul %196, %197, %cst_220 {dimension_numbers = #tpu.dot_dimension_numbers<[1], [0], [0], [1], [0, 0, 1, 1], [], []>} : vector<256x8xbf16>, vector<8x8xbf16>, vector<256x8xf32> -> vector<256x8xf32>
    %199 = arith.addf %193, %198 : vector<256x8xf32>
    %c2_221 = arith.constant 2 : index
    %c1_222 = arith.constant 1 : index
    %c0_223 = arith.constant 0 : index
    %200 = vector.load %arg30[%c2_221, %c1_222, %c0_223] : memref<18x18x8xf32, #tpu.memory_space<vmem>>, vector<16x16x8xf32>
    %201 = vector.shape_cast %200 : vector<16x16x8xf32> to vector<256x8xf32>
    %202 = arith.truncf %201 : vector<256x8xf32> to vector<256x8xbf16>
    %c56_224 = arith.constant 56 : index
    %c0_225 = arith.constant 0 : index
    %203 = vector.load %arg6[%c56_224, %c0_225] : memref<72x8xbf16, #tpu.memory_space<vmem>>, vector<8x8xbf16>
    %cst_226 = arith.constant dense<0.000000e+00> : vector<256x8xf32>
    %204 = tpu.matmul %202, %203, %cst_226 {dimension_numbers = #tpu.dot_dimension_numbers<[1], [0], [0], [1], [0, 0, 1, 1], [], []>} : vector<256x8xbf16>, vector<8x8xbf16>, vector<256x8xf32> -> vector<256x8xf32>
    %205 = arith.addf %199, %204 : vector<256x8xf32>
    %c2_227 = arith.constant 2 : index
    %c2_228 = arith.constant 2 : index
    %c0_229 = arith.constant 0 : index
    %206 = vector.load %arg30[%c2_227, %c2_228, %c0_229] : memref<18x18x8xf32, #tpu.memory_space<vmem>>, vector<16x16x8xf32>
    %207 = vector.shape_cast %206 : vector<16x16x8xf32> to vector<256x8xf32>
    %208 = arith.truncf %207 : vector<256x8xf32> to vector<256x8xbf16>
    %c64_230 = arith.constant 64 : index
    %c0_231 = arith.constant 0 : index
    %209 = vector.load %arg6[%c64_230, %c0_231] : memref<72x8xbf16, #tpu.memory_space<vmem>>, vector<8x8xbf16>
    %cst_232 = arith.constant dense<0.000000e+00> : vector<256x8xf32>
    %210 = tpu.matmul %208, %209, %cst_232 {dimension_numbers = #tpu.dot_dimension_numbers<[1], [0], [0], [1], [0, 0, 1, 1], [], []>} : vector<256x8xbf16>, vector<8x8xbf16>, vector<256x8xf32> -> vector<256x8xf32>
    %211 = arith.addf %205, %210 : vector<256x8xf32>
    %212 = vector.shape_cast %211 : vector<256x8xf32> to vector<16x16x8xf32>
    %213 = arith.addf %212, %92 : vector<16x16x8xf32>
    %c1_233 = arith.constant 1 : index
    %c1_234 = arith.constant 1 : index
    %c0_235 = arith.constant 0 : index
    %214 = vector.load %arg30[%c1_233, %c1_234, %c0_235] : memref<18x18x8xf32, #tpu.memory_space<vmem>>, vector<16x16x8xf32>
    tpu.vector_store %arg30[%c1_233, %c1_234, %c0_235], %213 {strides = array<i32>} : memref<18x18x8xf32, #tpu.memory_space<vmem>>, vector<16x16x8xf32>,
    %c0_236 = arith.constant 0 : index
    %c0_237 = arith.constant 0 : index
    %215 = vector.load %arg9[%c0_236, %c0_237] : memref<1x16xf32, #tpu.memory_space<vmem>>, vector<1x16xf32>
    %216 = vector.shape_cast %215 : vector<1x16xf32> to vector<1x16xf32>
    %217 = vector.broadcast %216 : vector<1x16xf32> to vector<256x16xf32>
    %c0_238 = arith.constant 0 : index
    %c0_239 = arith.constant 0 : index
    %c0_240 = arith.constant 0 : index
    %218 = vector.load %arg30[%c0_238, %c0_239, %c0_240] : memref<18x18x8xf32, #tpu.memory_space<vmem>>, vector<16x16x8xf32>
    %219 = vector.shape_cast %218 : vector<16x16x8xf32> to vector<256x8xf32>
    %220 = arith.truncf %219 : vector<256x8xf32> to vector<256x8xbf16>
    %c0_241 = arith.constant 0 : index
    %c0_242 = arith.constant 0 : index
    %221 = vector.load %arg8[%c0_241, %c0_242] : memref<72x16xbf16, #tpu.memory_space<vmem>>, vector<8x16xbf16>
    %cst_243 = arith.constant dense<0.000000e+00> : vector<256x16xf32>
    %222 = tpu.matmul %220, %221, %cst_243 {dimension_numbers = #tpu.dot_dimension_numbers<[1], [0], [0], [1], [0, 0, 1, 1], [], []>} : vector<256x8xbf16>, vector<8x16xbf16>, vector<256x16xf32> -> vector<256x16xf32>
    %223 = arith.addf %217, %222 : vector<256x16xf32>
    %c0_244 = arith.constant 0 : index
    %c1_245 = arith.constant 1 : index
    %c0_246 = arith.constant 0 : index
    %224 = vector.load %arg30[%c0_244, %c1_245, %c0_246] : memref<18x18x8xf32, #tpu.memory_space<vmem>>, vector<16x16x8xf32>
    %225 = vector.shape_cast %224 : vector<16x16x8xf32> to vector<256x8xf32>
    %226 = arith.truncf %225 : vector<256x8xf32> to vector<256x8xbf16>
    %c8_247 = arith.constant 8 : index
    %c0_248 = arith.constant 0 : index
    %227 = vector.load %arg8[%c8_247, %c0_248] : memref<72x16xbf16, #tpu.memory_space<vmem>>, vector<8x16xbf16>
    %cst_249 = arith.constant dense<0.000000e+00> : vector<256x16xf32>
    %228 = tpu.matmul %226, %227, %cst_249 {dimension_numbers = #tpu.dot_dimension_numbers<[1], [0], [0], [1], [0, 0, 1, 1], [], []>} : vector<256x8xbf16>, vector<8x16xbf16>, vector<256x16xf32> -> vector<256x16xf32>
    %229 = arith.addf %223, %228 : vector<256x16xf32>
    %c0_250 = arith.constant 0 : index
    %c2_251 = arith.constant 2 : index
    %c0_252 = arith.constant 0 : index
    %230 = vector.load %arg30[%c0_250, %c2_251, %c0_252] : memref<18x18x8xf32, #tpu.memory_space<vmem>>, vector<16x16x8xf32>
    %231 = vector.shape_cast %230 : vector<16x16x8xf32> to vector<256x8xf32>
    %232 = arith.truncf %231 : vector<256x8xf32> to vector<256x8xbf16>
    %c16_253 = arith.constant 16 : index
    %c0_254 = arith.constant 0 : index
    %233 = vector.load %arg8[%c16_253, %c0_254] : memref<72x16xbf16, #tpu.memory_space<vmem>>, vector<8x16xbf16>
    %cst_255 = arith.constant dense<0.000000e+00> : vector<256x16xf32>
    %234 = tpu.matmul %232, %233, %cst_255 {dimension_numbers = #tpu.dot_dimension_numbers<[1], [0], [0], [1], [0, 0, 1, 1], [], []>} : vector<256x8xbf16>, vector<8x16xbf16>, vector<256x16xf32> -> vector<256x16xf32>
    %235 = arith.addf %229, %234 : vector<256x16xf32>
    %c1_256 = arith.constant 1 : index
    %c0_257 = arith.constant 0 : index
    %c0_258 = arith.constant 0 : index
    %236 = vector.load %arg30[%c1_256, %c0_257, %c0_258] : memref<18x18x8xf32, #tpu.memory_space<vmem>>, vector<16x16x8xf32>
    %237 = vector.shape_cast %236 : vector<16x16x8xf32> to vector<256x8xf32>
    %238 = arith.truncf %237 : vector<256x8xf32> to vector<256x8xbf16>
    %c24_259 = arith.constant 24 : index
    %c0_260 = arith.constant 0 : index
    %239 = vector.load %arg8[%c24_259, %c0_260] : memref<72x16xbf16, #tpu.memory_space<vmem>>, vector<8x16xbf16>
    %cst_261 = arith.constant dense<0.000000e+00> : vector<256x16xf32>
    %240 = tpu.matmul %238, %239, %cst_261 {dimension_numbers = #tpu.dot_dimension_numbers<[1], [0], [0], [1], [0, 0, 1, 1], [], []>} : vector<256x8xbf16>, vector<8x16xbf16>, vector<256x16xf32> -> vector<256x16xf32>
    %241 = arith.addf %235, %240 : vector<256x16xf32>
    %c1_262 = arith.constant 1 : index
    %c1_263 = arith.constant 1 : index
    %c0_264 = arith.constant 0 : index
    %242 = vector.load %arg30[%c1_262, %c1_263, %c0_264] : memref<18x18x8xf32, #tpu.memory_space<vmem>>, vector<16x16x8xf32>
    %243 = vector.shape_cast %242 : vector<16x16x8xf32> to vector<256x8xf32>
    %244 = arith.truncf %243 : vector<256x8xf32> to vector<256x8xbf16>
    %c32_265 = arith.constant 32 : index
    %c0_266 = arith.constant 0 : index
    %245 = vector.load %arg8[%c32_265, %c0_266] : memref<72x16xbf16, #tpu.memory_space<vmem>>, vector<8x16xbf16>
    %cst_267 = arith.constant dense<0.000000e+00> : vector<256x16xf32>
    %246 = tpu.matmul %244, %245, %cst_267 {dimension_numbers = #tpu.dot_dimension_numbers<[1], [0], [0], [1], [0, 0, 1, 1], [], []>} : vector<256x8xbf16>, vector<8x16xbf16>, vector<256x16xf32> -> vector<256x16xf32>
    %247 = arith.addf %241, %246 : vector<256x16xf32>
    %c1_268 = arith.constant 1 : index
    %c2_269 = arith.constant 2 : index
    %c0_270 = arith.constant 0 : index
    %248 = vector.load %arg30[%c1_268, %c2_269, %c0_270] : memref<18x18x8xf32, #tpu.memory_space<vmem>>, vector<16x16x8xf32>
    %249 = vector.shape_cast %248 : vector<16x16x8xf32> to vector<256x8xf32>
    %250 = arith.truncf %249 : vector<256x8xf32> to vector<256x8xbf16>
    %c40_271 = arith.constant 40 : index
    %c0_272 = arith.constant 0 : index
    %251 = vector.load %arg8[%c40_271, %c0_272] : memref<72x16xbf16, #tpu.memory_space<vmem>>, vector<8x16xbf16>
    %cst_273 = arith.constant dense<0.000000e+00> : vector<256x16xf32>
    %252 = tpu.matmul %250, %251, %cst_273 {dimension_numbers = #tpu.dot_dimension_numbers<[1], [0], [0], [1], [0, 0, 1, 1], [], []>} : vector<256x8xbf16>, vector<8x16xbf16>, vector<256x16xf32> -> vector<256x16xf32>
    %253 = arith.addf %247, %252 : vector<256x16xf32>
    %c2_274 = arith.constant 2 : index
    %c0_275 = arith.constant 0 : index
    %c0_276 = arith.constant 0 : index
    %254 = vector.load %arg30[%c2_274, %c0_275, %c0_276] : memref<18x18x8xf32, #tpu.memory_space<vmem>>, vector<16x16x8xf32>
    %255 = vector.shape_cast %254 : vector<16x16x8xf32> to vector<256x8xf32>
    %256 = arith.truncf %255 : vector<256x8xf32> to vector<256x8xbf16>
    %c48_277 = arith.constant 48 : index
    %c0_278 = arith.constant 0 : index
    %257 = vector.load %arg8[%c48_277, %c0_278] : memref<72x16xbf16, #tpu.memory_space<vmem>>, vector<8x16xbf16>
    %cst_279 = arith.constant dense<0.000000e+00> : vector<256x16xf32>
    %258 = tpu.matmul %256, %257, %cst_279 {dimension_numbers = #tpu.dot_dimension_numbers<[1], [0], [0], [1], [0, 0, 1, 1], [], []>} : vector<256x8xbf16>, vector<8x16xbf16>, vector<256x16xf32> -> vector<256x16xf32>
    %259 = arith.addf %253, %258 : vector<256x16xf32>
    %c2_280 = arith.constant 2 : index
    %c1_281 = arith.constant 1 : index
    %c0_282 = arith.constant 0 : index
    %260 = vector.load %arg30[%c2_280, %c1_281, %c0_282] : memref<18x18x8xf32, #tpu.memory_space<vmem>>, vector<16x16x8xf32>
    %261 = vector.shape_cast %260 : vector<16x16x8xf32> to vector<256x8xf32>
    %262 = arith.truncf %261 : vector<256x8xf32> to vector<256x8xbf16>
    %c56_283 = arith.constant 56 : index
    %c0_284 = arith.constant 0 : index
    %263 = vector.load %arg8[%c56_283, %c0_284] : memref<72x16xbf16, #tpu.memory_space<vmem>>, vector<8x16xbf16>
    %cst_285 = arith.constant dense<0.000000e+00> : vector<256x16xf32>
    %264 = tpu.matmul %262, %263, %cst_285 {dimension_numbers = #tpu.dot_dimension_numbers<[1], [0], [0], [1], [0, 0, 1, 1], [], []>} : vector<256x8xbf16>, vector<8x16xbf16>, vector<256x16xf32> -> vector<256x16xf32>
    %265 = arith.addf %259, %264 : vector<256x16xf32>
    %c2_286 = arith.constant 2 : index
    %c2_287 = arith.constant 2 : index
    %c0_288 = arith.constant 0 : index
    %266 = vector.load %arg30[%c2_286, %c2_287, %c0_288] : memref<18x18x8xf32, #tpu.memory_space<vmem>>, vector<16x16x8xf32>
    %267 = vector.shape_cast %266 : vector<16x16x8xf32> to vector<256x8xf32>
    %268 = arith.truncf %267 : vector<256x8xf32> to vector<256x8xbf16>
    %c64_289 = arith.constant 64 : index
    %c0_290 = arith.constant 0 : index
    %269 = vector.load %arg8[%c64_289, %c0_290] : memref<72x16xbf16, #tpu.memory_space<vmem>>, vector<8x16xbf16>
    %cst_291 = arith.constant dense<0.000000e+00> : vector<256x16xf32>
    %270 = tpu.matmul %268, %269, %cst_291 {dimension_numbers = #tpu.dot_dimension_numbers<[1], [0], [0], [1], [0, 0, 1, 1], [], []>} : vector<256x8xbf16>, vector<8x16xbf16>, vector<256x16xf32> -> vector<256x16xf32>
    %271 = arith.addf %265, %270 : vector<256x16xf32>
    %cst_292 = arith.constant 0.000000e+00 : f32
    %272 = vector.broadcast %cst_292 : f32 to vector<256x16xf32>
    %273 = arith.maximumf %271, %272 : vector<256x16xf32>
    %274 = vector.shape_cast %273 : vector<256x16xf32> to vector<16x16x16xf32>
    %275 = vector.shape_cast %274 : vector<16x16x16xf32> to vector<8x2x16x16xf32>
    %276 = vector.extract_strided_slice %275 {offsets = [0, 0, 0, 0], sizes = [8, 1, 16, 16], strides = [1, 1, 1, 1]} : vector<8x2x16x16xf32> to vector<8x1x16x16xf32>
    %277 = vector.shape_cast %276 : vector<8x1x16x16xf32> to vector<8x16x16xf32>
    %278 = vector.shape_cast %277 : vector<8x16x16xf32> to vector<8x8x2x16xf32>
    %279 = vector.extract_strided_slice %278 {offsets = [0, 0, 0, 0], sizes = [8, 8, 1, 16], strides = [1, 1, 1, 1]} : vector<8x8x2x16xf32> to vector<8x8x1x16xf32>
    %280 = vector.shape_cast %279 : vector<8x8x1x16xf32> to vector<8x8x16xf32>
    %c1_293 = arith.constant 1 : index
    %c1_294 = arith.constant 1 : index
    %c0_295 = arith.constant 0 : index
    %281 = vector.load %arg31[%c1_293, %c1_294, %c0_295] : memref<10x10x16xf32, #tpu.memory_space<vmem>>, vector<8x8x16xf32>
    tpu.vector_store %arg31[%c1_293, %c1_294, %c0_295], %280 {strides = array<i32>} : memref<10x10x16xf32, #tpu.memory_space<vmem>>, vector<8x8x16xf32>,
    %c0_296 = arith.constant 0 : index
    %c0_297 = arith.constant 0 : index
    %282 = vector.load %arg11[%c0_296, %c0_297] : memref<1x16xf32, #tpu.memory_space<vmem>>, vector<1x16xf32>
    %283 = vector.shape_cast %282 : vector<1x16xf32> to vector<1x16xf32>
    %284 = vector.broadcast %283 : vector<1x16xf32> to vector<64x16xf32>
    %c0_298 = arith.constant 0 : index
    %c0_299 = arith.constant 0 : index
    %c0_300 = arith.constant 0 : index
    %285 = vector.load %arg31[%c0_298, %c0_299, %c0_300] : memref<10x10x16xf32, #tpu.memory_space<vmem>>, vector<8x8x16xf32>
    %286 = vector.shape_cast %285 : vector<8x8x16xf32> to vector<64x16xf32>
    %287 = arith.truncf %286 : vector<64x16xf32> to vector<64x16xbf16>
    %c0_301 = arith.constant 0 : index
    %c0_302 = arith.constant 0 : index
    %288 = vector.load %arg10[%c0_301, %c0_302] : memref<144x16xbf16, #tpu.memory_space<vmem>>, vector<16x16xbf16>
    %cst_303 = arith.constant dense<0.000000e+00> : vector<64x16xf32>
    %289 = tpu.matmul %287, %288, %cst_303 {dimension_numbers = #tpu.dot_dimension_numbers<[1], [0], [0], [1], [0, 0, 1, 1], [], []>} : vector<64x16xbf16>, vector<16x16xbf16>, vector<64x16xf32> -> vector<64x16xf32>
    %290 = arith.addf %284, %289 : vector<64x16xf32>
    %c0_304 = arith.constant 0 : index
    %c1_305 = arith.constant 1 : index
    %c0_306 = arith.constant 0 : index
    %291 = vector.load %arg31[%c0_304, %c1_305, %c0_306] : memref<10x10x16xf32, #tpu.memory_space<vmem>>, vector<8x8x16xf32>
    %292 = vector.shape_cast %291 : vector<8x8x16xf32> to vector<64x16xf32>
    %293 = arith.truncf %292 : vector<64x16xf32> to vector<64x16xbf16>
    %c16_307 = arith.constant 16 : index
    %c0_308 = arith.constant 0 : index
    %294 = vector.load %arg10[%c16_307, %c0_308] : memref<144x16xbf16, #tpu.memory_space<vmem>>, vector<16x16xbf16>
    %cst_309 = arith.constant dense<0.000000e+00> : vector<64x16xf32>
    %295 = tpu.matmul %293, %294, %cst_309 {dimension_numbers = #tpu.dot_dimension_numbers<[1], [0], [0], [1], [0, 0, 1, 1], [], []>} : vector<64x16xbf16>, vector<16x16xbf16>, vector<64x16xf32> -> vector<64x16xf32>
    %296 = arith.addf %290, %295 : vector<64x16xf32>
    %c0_310 = arith.constant 0 : index
    %c2_311 = arith.constant 2 : index
    %c0_312 = arith.constant 0 : index
    %297 = vector.load %arg31[%c0_310, %c2_311, %c0_312] : memref<10x10x16xf32, #tpu.memory_space<vmem>>, vector<8x8x16xf32>
    %298 = vector.shape_cast %297 : vector<8x8x16xf32> to vector<64x16xf32>
    %299 = arith.truncf %298 : vector<64x16xf32> to vector<64x16xbf16>
    %c32_313 = arith.constant 32 : index
    %c0_314 = arith.constant 0 : index
    %300 = vector.load %arg10[%c32_313, %c0_314] : memref<144x16xbf16, #tpu.memory_space<vmem>>, vector<16x16xbf16>
    %cst_315 = arith.constant dense<0.000000e+00> : vector<64x16xf32>
    %301 = tpu.matmul %299, %300, %cst_315 {dimension_numbers = #tpu.dot_dimension_numbers<[1], [0], [0], [1], [0, 0, 1, 1], [], []>} : vector<64x16xbf16>, vector<16x16xbf16>, vector<64x16xf32> -> vector<64x16xf32>
    %302 = arith.addf %296, %301 : vector<64x16xf32>
    %c1_316 = arith.constant 1 : index
    %c0_317 = arith.constant 0 : index
    %c0_318 = arith.constant 0 : index
    %303 = vector.load %arg31[%c1_316, %c0_317, %c0_318] : memref<10x10x16xf32, #tpu.memory_space<vmem>>, vector<8x8x16xf32>
    %304 = vector.shape_cast %303 : vector<8x8x16xf32> to vector<64x16xf32>
    %305 = arith.truncf %304 : vector<64x16xf32> to vector<64x16xbf16>
    %c48_319 = arith.constant 48 : index
    %c0_320 = arith.constant 0 : index
    %306 = vector.load %arg10[%c48_319, %c0_320] : memref<144x16xbf16, #tpu.memory_space<vmem>>, vector<16x16xbf16>
    %cst_321 = arith.constant dense<0.000000e+00> : vector<64x16xf32>
    %307 = tpu.matmul %305, %306, %cst_321 {dimension_numbers = #tpu.dot_dimension_numbers<[1], [0], [0], [1], [0, 0, 1, 1], [], []>} : vector<64x16xbf16>, vector<16x16xbf16>, vector<64x16xf32> -> vector<64x16xf32>
    %308 = arith.addf %302, %307 : vector<64x16xf32>
    %c1_322 = arith.constant 1 : index
    %c1_323 = arith.constant 1 : index
    %c0_324 = arith.constant 0 : index
    %309 = vector.load %arg31[%c1_322, %c1_323, %c0_324] : memref<10x10x16xf32, #tpu.memory_space<vmem>>, vector<8x8x16xf32>
    %310 = vector.shape_cast %309 : vector<8x8x16xf32> to vector<64x16xf32>
    %311 = arith.truncf %310 : vector<64x16xf32> to vector<64x16xbf16>
    %c64_325 = arith.constant 64 : index
    %c0_326 = arith.constant 0 : index
    %312 = vector.load %arg10[%c64_325, %c0_326] : memref<144x16xbf16, #tpu.memory_space<vmem>>, vector<16x16xbf16>
    %cst_327 = arith.constant dense<0.000000e+00> : vector<64x16xf32>
    %313 = tpu.matmul %311, %312, %cst_327 {dimension_numbers = #tpu.dot_dimension_numbers<[1], [0], [0], [1], [0, 0, 1, 1], [], []>} : vector<64x16xbf16>, vector<16x16xbf16>, vector<64x16xf32> -> vector<64x16xf32>
    %314 = arith.addf %308, %313 : vector<64x16xf32>
    %c1_328 = arith.constant 1 : index
    %c2_329 = arith.constant 2 : index
    %c0_330 = arith.constant 0 : index
    %315 = vector.load %arg31[%c1_328, %c2_329, %c0_330] : memref<10x10x16xf32, #tpu.memory_space<vmem>>, vector<8x8x16xf32>
    %316 = vector.shape_cast %315 : vector<8x8x16xf32> to vector<64x16xf32>
    %317 = arith.truncf %316 : vector<64x16xf32> to vector<64x16xbf16>
    %c80 = arith.constant 80 : index
    %c0_331 = arith.constant 0 : index
    %318 = vector.load %arg10[%c80, %c0_331] : memref<144x16xbf16, #tpu.memory_space<vmem>>, vector<16x16xbf16>
    %cst_332 = arith.constant dense<0.000000e+00> : vector<64x16xf32>
    %319 = tpu.matmul %317, %318, %cst_332 {dimension_numbers = #tpu.dot_dimension_numbers<[1], [0], [0], [1], [0, 0, 1, 1], [], []>} : vector<64x16xbf16>, vector<16x16xbf16>, vector<64x16xf32> -> vector<64x16xf32>
    %320 = arith.addf %314, %319 : vector<64x16xf32>
    %c2_333 = arith.constant 2 : index
    %c0_334 = arith.constant 0 : index
    %c0_335 = arith.constant 0 : index
    %321 = vector.load %arg31[%c2_333, %c0_334, %c0_335] : memref<10x10x16xf32, #tpu.memory_space<vmem>>, vector<8x8x16xf32>
    %322 = vector.shape_cast %321 : vector<8x8x16xf32> to vector<64x16xf32>
    %323 = arith.truncf %322 : vector<64x16xf32> to vector<64x16xbf16>
    %c96 = arith.constant 96 : index
    %c0_336 = arith.constant 0 : index
    %324 = vector.load %arg10[%c96, %c0_336] : memref<144x16xbf16, #tpu.memory_space<vmem>>, vector<16x16xbf16>
    %cst_337 = arith.constant dense<0.000000e+00> : vector<64x16xf32>
    %325 = tpu.matmul %323, %324, %cst_337 {dimension_numbers = #tpu.dot_dimension_numbers<[1], [0], [0], [1], [0, 0, 1, 1], [], []>} : vector<64x16xbf16>, vector<16x16xbf16>, vector<64x16xf32> -> vector<64x16xf32>
    %326 = arith.addf %320, %325 : vector<64x16xf32>
    %c2_338 = arith.constant 2 : index
    %c1_339 = arith.constant 1 : index
    %c0_340 = arith.constant 0 : index
    %327 = vector.load %arg31[%c2_338, %c1_339, %c0_340] : memref<10x10x16xf32, #tpu.memory_space<vmem>>, vector<8x8x16xf32>
    %328 = vector.shape_cast %327 : vector<8x8x16xf32> to vector<64x16xf32>
    %329 = arith.truncf %328 : vector<64x16xf32> to vector<64x16xbf16>
    %c112 = arith.constant 112 : index
    %c0_341 = arith.constant 0 : index
    %330 = vector.load %arg10[%c112, %c0_341] : memref<144x16xbf16, #tpu.memory_space<vmem>>, vector<16x16xbf16>
    %cst_342 = arith.constant dense<0.000000e+00> : vector<64x16xf32>
    %331 = tpu.matmul %329, %330, %cst_342 {dimension_numbers = #tpu.dot_dimension_numbers<[1], [0], [0], [1], [0, 0, 1, 1], [], []>} : vector<64x16xbf16>, vector<16x16xbf16>, vector<64x16xf32> -> vector<64x16xf32>
    %332 = arith.addf %326, %331 : vector<64x16xf32>
    %c2_343 = arith.constant 2 : index
    %c2_344 = arith.constant 2 : index
    %c0_345 = arith.constant 0 : index
    %333 = vector.load %arg31[%c2_343, %c2_344, %c0_345] : memref<10x10x16xf32, #tpu.memory_space<vmem>>, vector<8x8x16xf32>
    %334 = vector.shape_cast %333 : vector<8x8x16xf32> to vector<64x16xf32>
    %335 = arith.truncf %334 : vector<64x16xf32> to vector<64x16xbf16>
    %c128 = arith.constant 128 : index
    %c0_346 = arith.constant 0 : index
    %336 = vector.load %arg10[%c128, %c0_346] : memref<144x16xbf16, #tpu.memory_space<vmem>>, vector<16x16xbf16>
    %cst_347 = arith.constant dense<0.000000e+00> : vector<64x16xf32>
    %337 = tpu.matmul %335, %336, %cst_347 {dimension_numbers = #tpu.dot_dimension_numbers<[1], [0], [0], [1], [0, 0, 1, 1], [], []>} : vector<64x16xbf16>, vector<16x16xbf16>, vector<64x16xf32> -> vector<64x16xf32>
    %338 = arith.addf %332, %337 : vector<64x16xf32>
    %cst_348 = arith.constant 0.000000e+00 : f32
    %339 = vector.broadcast %cst_348 : f32 to vector<64x16xf32>
    %340 = arith.maximumf %338, %339 : vector<64x16xf32>
    %341 = vector.shape_cast %340 : vector<64x16xf32> to vector<8x8x16xf32>
    %c1_349 = arith.constant 1 : index
    %c1_350 = arith.constant 1 : index
    %c0_351 = arith.constant 0 : index
    %342 = vector.load %arg31[%c1_349, %c1_350, %c0_351] : memref<10x10x16xf32, #tpu.memory_space<vmem>>, vector<8x8x16xf32>
    tpu.vector_store %arg31[%c1_349, %c1_350, %c0_351], %341 {strides = array<i32>} : memref<10x10x16xf32, #tpu.memory_space<vmem>>, vector<8x8x16xf32>,
    %c0_352 = arith.constant 0 : index
    %c0_353 = arith.constant 0 : index
    %343 = vector.load %arg13[%c0_352, %c0_353] : memref<1x16xf32, #tpu.memory_space<vmem>>, vector<1x16xf32>
    %344 = vector.shape_cast %343 : vector<1x16xf32> to vector<1x16xf32>
    %345 = vector.broadcast %344 : vector<1x16xf32> to vector<64x16xf32>
    %c0_354 = arith.constant 0 : index
    %c0_355 = arith.constant 0 : index
    %c0_356 = arith.constant 0 : index
    %346 = vector.load %arg31[%c0_354, %c0_355, %c0_356] : memref<10x10x16xf32, #tpu.memory_space<vmem>>, vector<8x8x16xf32>
    %347 = vector.shape_cast %346 : vector<8x8x16xf32> to vector<64x16xf32>
    %348 = arith.truncf %347 : vector<64x16xf32> to vector<64x16xbf16>
    %c0_357 = arith.constant 0 : index
    %c0_358 = arith.constant 0 : index
    %349 = vector.load %arg12[%c0_357, %c0_358] : memref<144x16xbf16, #tpu.memory_space<vmem>>, vector<16x16xbf16>
    %cst_359 = arith.constant dense<0.000000e+00> : vector<64x16xf32>
    %350 = tpu.matmul %348, %349, %cst_359 {dimension_numbers = #tpu.dot_dimension_numbers<[1], [0], [0], [1], [0, 0, 1, 1], [], []>} : vector<64x16xbf16>, vector<16x16xbf16>, vector<64x16xf32> -> vector<64x16xf32>
    %351 = arith.addf %345, %350 : vector<64x16xf32>
    %c0_360 = arith.constant 0 : index
    %c1_361 = arith.constant 1 : index
    %c0_362 = arith.constant 0 : index
    %352 = vector.load %arg31[%c0_360, %c1_361, %c0_362] : memref<10x10x16xf32, #tpu.memory_space<vmem>>, vector<8x8x16xf32>
    %353 = vector.shape_cast %352 : vector<8x8x16xf32> to vector<64x16xf32>
    %354 = arith.truncf %353 : vector<64x16xf32> to vector<64x16xbf16>
    %c16_363 = arith.constant 16 : index
    %c0_364 = arith.constant 0 : index
    %355 = vector.load %arg12[%c16_363, %c0_364] : memref<144x16xbf16, #tpu.memory_space<vmem>>, vector<16x16xbf16>
    %cst_365 = arith.constant dense<0.000000e+00> : vector<64x16xf32>
    %356 = tpu.matmul %354, %355, %cst_365 {dimension_numbers = #tpu.dot_dimension_numbers<[1], [0], [0], [1], [0, 0, 1, 1], [], []>} : vector<64x16xbf16>, vector<16x16xbf16>, vector<64x16xf32> -> vector<64x16xf32>
    %357 = arith.addf %351, %356 : vector<64x16xf32>
    %c0_366 = arith.constant 0 : index
    %c2_367 = arith.constant 2 : index
    %c0_368 = arith.constant 0 : index
    %358 = vector.load %arg31[%c0_366, %c2_367, %c0_368] : memref<10x10x16xf32, #tpu.memory_space<vmem>>, vector<8x8x16xf32>
    %359 = vector.shape_cast %358 : vector<8x8x16xf32> to vector<64x16xf32>
    %360 = arith.truncf %359 : vector<64x16xf32> to vector<64x16xbf16>
    %c32_369 = arith.constant 32 : index
    %c0_370 = arith.constant 0 : index
    %361 = vector.load %arg12[%c32_369, %c0_370] : memref<144x16xbf16, #tpu.memory_space<vmem>>, vector<16x16xbf16>
    %cst_371 = arith.constant dense<0.000000e+00> : vector<64x16xf32>
    %362 = tpu.matmul %360, %361, %cst_371 {dimension_numbers = #tpu.dot_dimension_numbers<[1], [0], [0], [1], [0, 0, 1, 1], [], []>} : vector<64x16xbf16>, vector<16x16xbf16>, vector<64x16xf32> -> vector<64x16xf32>
    %363 = arith.addf %357, %362 : vector<64x16xf32>
    %c1_372 = arith.constant 1 : index
    %c0_373 = arith.constant 0 : index
    %c0_374 = arith.constant 0 : index
    %364 = vector.load %arg31[%c1_372, %c0_373, %c0_374] : memref<10x10x16xf32, #tpu.memory_space<vmem>>, vector<8x8x16xf32>
    %365 = vector.shape_cast %364 : vector<8x8x16xf32> to vector<64x16xf32>
    %366 = arith.truncf %365 : vector<64x16xf32> to vector<64x16xbf16>
    %c48_375 = arith.constant 48 : index
    %c0_376 = arith.constant 0 : index
    %367 = vector.load %arg12[%c48_375, %c0_376] : memref<144x16xbf16, #tpu.memory_space<vmem>>, vector<16x16xbf16>
    %cst_377 = arith.constant dense<0.000000e+00> : vector<64x16xf32>
    %368 = tpu.matmul %366, %367, %cst_377 {dimension_numbers = #tpu.dot_dimension_numbers<[1], [0], [0], [1], [0, 0, 1, 1], [], []>} : vector<64x16xbf16>, vector<16x16xbf16>, vector<64x16xf32> -> vector<64x16xf32>
    %369 = arith.addf %363, %368 : vector<64x16xf32>
    %c1_378 = arith.constant 1 : index
    %c1_379 = arith.constant 1 : index
    %c0_380 = arith.constant 0 : index
    %370 = vector.load %arg31[%c1_378, %c1_379, %c0_380] : memref<10x10x16xf32, #tpu.memory_space<vmem>>, vector<8x8x16xf32>
    %371 = vector.shape_cast %370 : vector<8x8x16xf32> to vector<64x16xf32>
    %372 = arith.truncf %371 : vector<64x16xf32> to vector<64x16xbf16>
    %c64_381 = arith.constant 64 : index
    %c0_382 = arith.constant 0 : index
    %373 = vector.load %arg12[%c64_381, %c0_382] : memref<144x16xbf16, #tpu.memory_space<vmem>>, vector<16x16xbf16>
    %cst_383 = arith.constant dense<0.000000e+00> : vector<64x16xf32>
    %374 = tpu.matmul %372, %373, %cst_383 {dimension_numbers = #tpu.dot_dimension_numbers<[1], [0], [0], [1], [0, 0, 1, 1], [], []>} : vector<64x16xbf16>, vector<16x16xbf16>, vector<64x16xf32> -> vector<64x16xf32>
    %375 = arith.addf %369, %374 : vector<64x16xf32>
    %c1_384 = arith.constant 1 : index
    %c2_385 = arith.constant 2 : index
    %c0_386 = arith.constant 0 : index
    %376 = vector.load %arg31[%c1_384, %c2_385, %c0_386] : memref<10x10x16xf32, #tpu.memory_space<vmem>>, vector<8x8x16xf32>
    %377 = vector.shape_cast %376 : vector<8x8x16xf32> to vector<64x16xf32>
    %378 = arith.truncf %377 : vector<64x16xf32> to vector<64x16xbf16>
    %c80_387 = arith.constant 80 : index
    %c0_388 = arith.constant 0 : index
    %379 = vector.load %arg12[%c80_387, %c0_388] : memref<144x16xbf16, #tpu.memory_space<vmem>>, vector<16x16xbf16>
    %cst_389 = arith.constant dense<0.000000e+00> : vector<64x16xf32>
    %380 = tpu.matmul %378, %379, %cst_389 {dimension_numbers = #tpu.dot_dimension_numbers<[1], [0], [0], [1], [0, 0, 1, 1], [], []>} : vector<64x16xbf16>, vector<16x16xbf16>, vector<64x16xf32> -> vector<64x16xf32>
    %381 = arith.addf %375, %380 : vector<64x16xf32>
    %c2_390 = arith.constant 2 : index
    %c0_391 = arith.constant 0 : index
    %c0_392 = arith.constant 0 : index
    %382 = vector.load %arg31[%c2_390, %c0_391, %c0_392] : memref<10x10x16xf32, #tpu.memory_space<vmem>>, vector<8x8x16xf32>
    %383 = vector.shape_cast %382 : vector<8x8x16xf32> to vector<64x16xf32>
    %384 = arith.truncf %383 : vector<64x16xf32> to vector<64x16xbf16>
    %c96_393 = arith.constant 96 : index
    %c0_394 = arith.constant 0 : index
    %385 = vector.load %arg12[%c96_393, %c0_394] : memref<144x16xbf16, #tpu.memory_space<vmem>>, vector<16x16xbf16>
    %cst_395 = arith.constant dense<0.000000e+00> : vector<64x16xf32>
    %386 = tpu.matmul %384, %385, %cst_395 {dimension_numbers = #tpu.dot_dimension_numbers<[1], [0], [0], [1], [0, 0, 1, 1], [], []>} : vector<64x16xbf16>, vector<16x16xbf16>, vector<64x16xf32> -> vector<64x16xf32>
    %387 = arith.addf %381, %386 : vector<64x16xf32>
    %c2_396 = arith.constant 2 : index
    %c1_397 = arith.constant 1 : index
    %c0_398 = arith.constant 0 : index
    %388 = vector.load %arg31[%c2_396, %c1_397, %c0_398] : memref<10x10x16xf32, #tpu.memory_space<vmem>>, vector<8x8x16xf32>
    %389 = vector.shape_cast %388 : vector<8x8x16xf32> to vector<64x16xf32>
    %390 = arith.truncf %389 : vector<64x16xf32> to vector<64x16xbf16>
    %c112_399 = arith.constant 112 : index
    %c0_400 = arith.constant 0 : index
    %391 = vector.load %arg12[%c112_399, %c0_400] : memref<144x16xbf16, #tpu.memory_space<vmem>>, vector<16x16xbf16>
    %cst_401 = arith.constant dense<0.000000e+00> : vector<64x16xf32>
    %392 = tpu.matmul %390, %391, %cst_401 {dimension_numbers = #tpu.dot_dimension_numbers<[1], [0], [0], [1], [0, 0, 1, 1], [], []>} : vector<64x16xbf16>, vector<16x16xbf16>, vector<64x16xf32> -> vector<64x16xf32>
    %393 = arith.addf %387, %392 : vector<64x16xf32>
    %c2_402 = arith.constant 2 : index
    %c2_403 = arith.constant 2 : index
    %c0_404 = arith.constant 0 : index
    %394 = vector.load %arg31[%c2_402, %c2_403, %c0_404] : memref<10x10x16xf32, #tpu.memory_space<vmem>>, vector<8x8x16xf32>
    %395 = vector.shape_cast %394 : vector<8x8x16xf32> to vector<64x16xf32>
    %396 = arith.truncf %395 : vector<64x16xf32> to vector<64x16xbf16>
    %c128_405 = arith.constant 128 : index
    %c0_406 = arith.constant 0 : index
    %397 = vector.load %arg12[%c128_405, %c0_406] : memref<144x16xbf16, #tpu.memory_space<vmem>>, vector<16x16xbf16>
    %cst_407 = arith.constant dense<0.000000e+00> : vector<64x16xf32>
    %398 = tpu.matmul %396, %397, %cst_407 {dimension_numbers = #tpu.dot_dimension_numbers<[1], [0], [0], [1], [0, 0, 1, 1], [], []>} : vector<64x16xbf16>, vector<16x16xbf16>, vector<64x16xf32> -> vector<64x16xf32>
    %399 = arith.addf %393, %398 : vector<64x16xf32>
    %400 = vector.shape_cast %399 : vector<64x16xf32> to vector<8x8x16xf32>
    %401 = arith.addf %400, %280 : vector<8x8x16xf32>
    %c0_408 = arith.constant 0 : index
    %c0_409 = arith.constant 0 : index
    %c0_410 = arith.constant 0 : index
    %c0_411 = arith.constant 0 : index
    %402 = vector.load %arg26[%c0_408, %c0_409, %c0_410, %c0_411] : memref<1x8x8x16xf32, #tpu.memory_space<vmem>>, vector<1x8x8x16xf32>
    %403 = vector.shape_cast %402 : vector<1x8x8x16xf32> to vector<8x8x16xf32>
    %404 = vector.shape_cast %401 : vector<8x8x16xf32> to vector<1x8x8x16xf32>
    tpu.vector_store %arg26[%c0_408, %c0_409, %c0_410, %c0_411], %404 {strides = array<i32>} : memref<1x8x8x16xf32, #tpu.memory_space<vmem>>, vector<1x8x8x16xf32>,
    %c1_412 = arith.constant 1 : index
    %c1_413 = arith.constant 1 : index
    %c0_414 = arith.constant 0 : index
    %405 = vector.load %arg31[%c1_412, %c1_413, %c0_414] : memref<10x10x16xf32, #tpu.memory_space<vmem>>, vector<8x8x16xf32>
    tpu.vector_store %arg31[%c1_412, %c1_413, %c0_414], %401 {strides = array<i32>} : memref<10x10x16xf32, #tpu.memory_space<vmem>>, vector<8x8x16xf32>,
    %c0_415 = arith.constant 0 : index
    %c0_416 = arith.constant 0 : index
    %406 = vector.load %arg15[%c0_415, %c0_416] : memref<1x32xf32, #tpu.memory_space<vmem>>, vector<1x32xf32>
    %407 = vector.shape_cast %406 : vector<1x32xf32> to vector<1x32xf32>
    %408 = vector.broadcast %407 : vector<1x32xf32> to vector<64x32xf32>
    %c0_417 = arith.constant 0 : index
    %c0_418 = arith.constant 0 : index
    %c0_419 = arith.constant 0 : index
    %409 = vector.load %arg31[%c0_417, %c0_418, %c0_419] : memref<10x10x16xf32, #tpu.memory_space<vmem>>, vector<8x8x16xf32>
    %410 = vector.shape_cast %409 : vector<8x8x16xf32> to vector<64x16xf32>
    %411 = arith.truncf %410 : vector<64x16xf32> to vector<64x16xbf16>
    %c0_420 = arith.constant 0 : index
    %c0_421 = arith.constant 0 : index
    %412 = vector.load %arg14[%c0_420, %c0_421] : memref<144x32xbf16, #tpu.memory_space<vmem>>, vector<16x32xbf16>
    %cst_422 = arith.constant dense<0.000000e+00> : vector<64x32xf32>
    %413 = tpu.matmul %411, %412, %cst_422 {dimension_numbers = #tpu.dot_dimension_numbers<[1], [0], [0], [1], [0, 0, 1, 1], [], []>} : vector<64x16xbf16>, vector<16x32xbf16>, vector<64x32xf32> -> vector<64x32xf32>
    %414 = arith.addf %408, %413 : vector<64x32xf32>
    %c0_423 = arith.constant 0 : index
    %c1_424 = arith.constant 1 : index
    %c0_425 = arith.constant 0 : index
    %415 = vector.load %arg31[%c0_423, %c1_424, %c0_425] : memref<10x10x16xf32, #tpu.memory_space<vmem>>, vector<8x8x16xf32>
    %416 = vector.shape_cast %415 : vector<8x8x16xf32> to vector<64x16xf32>
    %417 = arith.truncf %416 : vector<64x16xf32> to vector<64x16xbf16>
    %c16_426 = arith.constant 16 : index
    %c0_427 = arith.constant 0 : index
    %418 = vector.load %arg14[%c16_426, %c0_427] : memref<144x32xbf16, #tpu.memory_space<vmem>>, vector<16x32xbf16>
    %cst_428 = arith.constant dense<0.000000e+00> : vector<64x32xf32>
    %419 = tpu.matmul %417, %418, %cst_428 {dimension_numbers = #tpu.dot_dimension_numbers<[1], [0], [0], [1], [0, 0, 1, 1], [], []>} : vector<64x16xbf16>, vector<16x32xbf16>, vector<64x32xf32> -> vector<64x32xf32>
    %420 = arith.addf %414, %419 : vector<64x32xf32>
    %c0_429 = arith.constant 0 : index
    %c2_430 = arith.constant 2 : index
    %c0_431 = arith.constant 0 : index
    %421 = vector.load %arg31[%c0_429, %c2_430, %c0_431] : memref<10x10x16xf32, #tpu.memory_space<vmem>>, vector<8x8x16xf32>
    %422 = vector.shape_cast %421 : vector<8x8x16xf32> to vector<64x16xf32>
    %423 = arith.truncf %422 : vector<64x16xf32> to vector<64x16xbf16>
    %c32_432 = arith.constant 32 : index
    %c0_433 = arith.constant 0 : index
    %424 = vector.load %arg14[%c32_432, %c0_433] : memref<144x32xbf16, #tpu.memory_space<vmem>>, vector<16x32xbf16>
    %cst_434 = arith.constant dense<0.000000e+00> : vector<64x32xf32>
    %425 = tpu.matmul %423, %424, %cst_434 {dimension_numbers = #tpu.dot_dimension_numbers<[1], [0], [0], [1], [0, 0, 1, 1], [], []>} : vector<64x16xbf16>, vector<16x32xbf16>, vector<64x32xf32> -> vector<64x32xf32>
    %426 = arith.addf %420, %425 : vector<64x32xf32>
    %c1_435 = arith.constant 1 : index
    %c0_436 = arith.constant 0 : index
    %c0_437 = arith.constant 0 : index
    %427 = vector.load %arg31[%c1_435, %c0_436, %c0_437] : memref<10x10x16xf32, #tpu.memory_space<vmem>>, vector<8x8x16xf32>
    %428 = vector.shape_cast %427 : vector<8x8x16xf32> to vector<64x16xf32>
    %429 = arith.truncf %428 : vector<64x16xf32> to vector<64x16xbf16>
    %c48_438 = arith.constant 48 : index
    %c0_439 = arith.constant 0 : index
    %430 = vector.load %arg14[%c48_438, %c0_439] : memref<144x32xbf16, #tpu.memory_space<vmem>>, vector<16x32xbf16>
    %cst_440 = arith.constant dense<0.000000e+00> : vector<64x32xf32>
    %431 = tpu.matmul %429, %430, %cst_440 {dimension_numbers = #tpu.dot_dimension_numbers<[1], [0], [0], [1], [0, 0, 1, 1], [], []>} : vector<64x16xbf16>, vector<16x32xbf16>, vector<64x32xf32> -> vector<64x32xf32>
    %432 = arith.addf %426, %431 : vector<64x32xf32>
    %c1_441 = arith.constant 1 : index
    %c1_442 = arith.constant 1 : index
    %c0_443 = arith.constant 0 : index
    %433 = vector.load %arg31[%c1_441, %c1_442, %c0_443] : memref<10x10x16xf32, #tpu.memory_space<vmem>>, vector<8x8x16xf32>
    %434 = vector.shape_cast %433 : vector<8x8x16xf32> to vector<64x16xf32>
    %435 = arith.truncf %434 : vector<64x16xf32> to vector<64x16xbf16>
    %c64_444 = arith.constant 64 : index
    %c0_445 = arith.constant 0 : index
    %436 = vector.load %arg14[%c64_444, %c0_445] : memref<144x32xbf16, #tpu.memory_space<vmem>>, vector<16x32xbf16>
    %cst_446 = arith.constant dense<0.000000e+00> : vector<64x32xf32>
    %437 = tpu.matmul %435, %436, %cst_446 {dimension_numbers = #tpu.dot_dimension_numbers<[1], [0], [0], [1], [0, 0, 1, 1], [], []>} : vector<64x16xbf16>, vector<16x32xbf16>, vector<64x32xf32> -> vector<64x32xf32>
    %438 = arith.addf %432, %437 : vector<64x32xf32>
    %c1_447 = arith.constant 1 : index
    %c2_448 = arith.constant 2 : index
    %c0_449 = arith.constant 0 : index
    %439 = vector.load %arg31[%c1_447, %c2_448, %c0_449] : memref<10x10x16xf32, #tpu.memory_space<vmem>>, vector<8x8x16xf32>
    %440 = vector.shape_cast %439 : vector<8x8x16xf32> to vector<64x16xf32>
    %441 = arith.truncf %440 : vector<64x16xf32> to vector<64x16xbf16>
    %c80_450 = arith.constant 80 : index
    %c0_451 = arith.constant 0 : index
    %442 = vector.load %arg14[%c80_450, %c0_451] : memref<144x32xbf16, #tpu.memory_space<vmem>>, vector<16x32xbf16>
    %cst_452 = arith.constant dense<0.000000e+00> : vector<64x32xf32>
    %443 = tpu.matmul %441, %442, %cst_452 {dimension_numbers = #tpu.dot_dimension_numbers<[1], [0], [0], [1], [0, 0, 1, 1], [], []>} : vector<64x16xbf16>, vector<16x32xbf16>, vector<64x32xf32> -> vector<64x32xf32>
    %444 = arith.addf %438, %443 : vector<64x32xf32>
    %c2_453 = arith.constant 2 : index
    %c0_454 = arith.constant 0 : index
    %c0_455 = arith.constant 0 : index
    %445 = vector.load %arg31[%c2_453, %c0_454, %c0_455] : memref<10x10x16xf32, #tpu.memory_space<vmem>>, vector<8x8x16xf32>
    %446 = vector.shape_cast %445 : vector<8x8x16xf32> to vector<64x16xf32>
    %447 = arith.truncf %446 : vector<64x16xf32> to vector<64x16xbf16>
    %c96_456 = arith.constant 96 : index
    %c0_457 = arith.constant 0 : index
    %448 = vector.load %arg14[%c96_456, %c0_457] : memref<144x32xbf16, #tpu.memory_space<vmem>>, vector<16x32xbf16>
    %cst_458 = arith.constant dense<0.000000e+00> : vector<64x32xf32>
    %449 = tpu.matmul %447, %448, %cst_458 {dimension_numbers = #tpu.dot_dimension_numbers<[1], [0], [0], [1], [0, 0, 1, 1], [], []>} : vector<64x16xbf16>, vector<16x32xbf16>, vector<64x32xf32> -> vector<64x32xf32>
    %450 = arith.addf %444, %449 : vector<64x32xf32>
    %c2_459 = arith.constant 2 : index
    %c1_460 = arith.constant 1 : index
    %c0_461 = arith.constant 0 : index
    %451 = vector.load %arg31[%c2_459, %c1_460, %c0_461] : memref<10x10x16xf32, #tpu.memory_space<vmem>>, vector<8x8x16xf32>
    %452 = vector.shape_cast %451 : vector<8x8x16xf32> to vector<64x16xf32>
    %453 = arith.truncf %452 : vector<64x16xf32> to vector<64x16xbf16>
    %c112_462 = arith.constant 112 : index
    %c0_463 = arith.constant 0 : index
    %454 = vector.load %arg14[%c112_462, %c0_463] : memref<144x32xbf16, #tpu.memory_space<vmem>>, vector<16x32xbf16>
    %cst_464 = arith.constant dense<0.000000e+00> : vector<64x32xf32>
    %455 = tpu.matmul %453, %454, %cst_464 {dimension_numbers = #tpu.dot_dimension_numbers<[1], [0], [0], [1], [0, 0, 1, 1], [], []>} : vector<64x16xbf16>, vector<16x32xbf16>, vector<64x32xf32> -> vector<64x32xf32>
    %456 = arith.addf %450, %455 : vector<64x32xf32>
    %c2_465 = arith.constant 2 : index
    %c2_466 = arith.constant 2 : index
    %c0_467 = arith.constant 0 : index
    %457 = vector.load %arg31[%c2_465, %c2_466, %c0_467] : memref<10x10x16xf32, #tpu.memory_space<vmem>>, vector<8x8x16xf32>
    %458 = vector.shape_cast %457 : vector<8x8x16xf32> to vector<64x16xf32>
    %459 = arith.truncf %458 : vector<64x16xf32> to vector<64x16xbf16>
    %c128_468 = arith.constant 128 : index
    %c0_469 = arith.constant 0 : index
    %460 = vector.load %arg14[%c128_468, %c0_469] : memref<144x32xbf16, #tpu.memory_space<vmem>>, vector<16x32xbf16>
    %cst_470 = arith.constant dense<0.000000e+00> : vector<64x32xf32>
    %461 = tpu.matmul %459, %460, %cst_470 {dimension_numbers = #tpu.dot_dimension_numbers<[1], [0], [0], [1], [0, 0, 1, 1], [], []>} : vector<64x16xbf16>, vector<16x32xbf16>, vector<64x32xf32> -> vector<64x32xf32>
    %462 = arith.addf %456, %461 : vector<64x32xf32>
    %cst_471 = arith.constant 0.000000e+00 : f32
    %463 = vector.broadcast %cst_471 : f32 to vector<64x32xf32>
    %464 = arith.maximumf %462, %463 : vector<64x32xf32>
    %465 = vector.shape_cast %464 : vector<64x32xf32> to vector<8x8x32xf32>
    %466 = vector.shape_cast %465 : vector<8x8x32xf32> to vector<4x2x8x32xf32>
    %467 = vector.extract_strided_slice %466 {offsets = [0, 0, 0, 0], sizes = [4, 1, 8, 32], strides = [1, 1, 1, 1]} : vector<4x2x8x32xf32> to vector<4x1x8x32xf32>
    %468 = vector.shape_cast %467 : vector<4x1x8x32xf32> to vector<4x8x32xf32>
    %469 = vector.shape_cast %468 : vector<4x8x32xf32> to vector<4x4x2x32xf32>
    %470 = vector.extract_strided_slice %469 {offsets = [0, 0, 0, 0], sizes = [4, 4, 1, 32], strides = [1, 1, 1, 1]} : vector<4x4x2x32xf32> to vector<4x4x1x32xf32>
    %471 = vector.shape_cast %470 : vector<4x4x1x32xf32> to vector<4x4x32xf32>
    %c1_472 = arith.constant 1 : index
    %c1_473 = arith.constant 1 : index
    %c0_474 = arith.constant 0 : index
    %472 = vector.load %arg32[%c1_472, %c1_473, %c0_474] : memref<6x6x32xf32, #tpu.memory_space<vmem>>, vector<4x4x32xf32>
    tpu.vector_store %arg32[%c1_472, %c1_473, %c0_474], %471 {strides = array<i32>} : memref<6x6x32xf32, #tpu.memory_space<vmem>>, vector<4x4x32xf32>,
    %c0_475 = arith.constant 0 : index
    %c0_476 = arith.constant 0 : index
    %473 = vector.load %arg17[%c0_475, %c0_476] : memref<1x32xf32, #tpu.memory_space<vmem>>, vector<1x32xf32>
    %474 = vector.shape_cast %473 : vector<1x32xf32> to vector<1x32xf32>
    %475 = vector.broadcast %474 : vector<1x32xf32> to vector<16x32xf32>
    %c0_477 = arith.constant 0 : index
    %c0_478 = arith.constant 0 : index
    %c0_479 = arith.constant 0 : index
    %476 = vector.load %arg32[%c0_477, %c0_478, %c0_479] : memref<6x6x32xf32, #tpu.memory_space<vmem>>, vector<4x4x32xf32>
    %477 = vector.shape_cast %476 : vector<4x4x32xf32> to vector<16x32xf32>
    %478 = arith.truncf %477 : vector<16x32xf32> to vector<16x32xbf16>
    %c0_480 = arith.constant 0 : index
    %c0_481 = arith.constant 0 : index
    %479 = vector.load %arg16[%c0_480, %c0_481] : memref<288x32xbf16, #tpu.memory_space<vmem>>, vector<32x32xbf16>
    %cst_482 = arith.constant dense<0.000000e+00> : vector<16x32xf32>
    %480 = tpu.matmul %478, %479, %cst_482 {dimension_numbers = #tpu.dot_dimension_numbers<[1], [0], [0], [1], [0, 0, 1, 1], [], []>} : vector<16x32xbf16>, vector<32x32xbf16>, vector<16x32xf32> -> vector<16x32xf32>
    %481 = arith.addf %475, %480 : vector<16x32xf32>
    %c0_483 = arith.constant 0 : index
    %c1_484 = arith.constant 1 : index
    %c0_485 = arith.constant 0 : index
    %482 = vector.load %arg32[%c0_483, %c1_484, %c0_485] : memref<6x6x32xf32, #tpu.memory_space<vmem>>, vector<4x4x32xf32>
    %483 = vector.shape_cast %482 : vector<4x4x32xf32> to vector<16x32xf32>
    %484 = arith.truncf %483 : vector<16x32xf32> to vector<16x32xbf16>
    %c32_486 = arith.constant 32 : index
    %c0_487 = arith.constant 0 : index
    %485 = vector.load %arg16[%c32_486, %c0_487] : memref<288x32xbf16, #tpu.memory_space<vmem>>, vector<32x32xbf16>
    %cst_488 = arith.constant dense<0.000000e+00> : vector<16x32xf32>
    %486 = tpu.matmul %484, %485, %cst_488 {dimension_numbers = #tpu.dot_dimension_numbers<[1], [0], [0], [1], [0, 0, 1, 1], [], []>} : vector<16x32xbf16>, vector<32x32xbf16>, vector<16x32xf32> -> vector<16x32xf32>
    %487 = arith.addf %481, %486 : vector<16x32xf32>
    %c0_489 = arith.constant 0 : index
    %c2_490 = arith.constant 2 : index
    %c0_491 = arith.constant 0 : index
    %488 = vector.load %arg32[%c0_489, %c2_490, %c0_491] : memref<6x6x32xf32, #tpu.memory_space<vmem>>, vector<4x4x32xf32>
    %489 = vector.shape_cast %488 : vector<4x4x32xf32> to vector<16x32xf32>
    %490 = arith.truncf %489 : vector<16x32xf32> to vector<16x32xbf16>
    %c64_492 = arith.constant 64 : index
    %c0_493 = arith.constant 0 : index
    %491 = vector.load %arg16[%c64_492, %c0_493] : memref<288x32xbf16, #tpu.memory_space<vmem>>, vector<32x32xbf16>
    %cst_494 = arith.constant dense<0.000000e+00> : vector<16x32xf32>
    %492 = tpu.matmul %490, %491, %cst_494 {dimension_numbers = #tpu.dot_dimension_numbers<[1], [0], [0], [1], [0, 0, 1, 1], [], []>} : vector<16x32xbf16>, vector<32x32xbf16>, vector<16x32xf32> -> vector<16x32xf32>
    %493 = arith.addf %487, %492 : vector<16x32xf32>
    %c1_495 = arith.constant 1 : index
    %c0_496 = arith.constant 0 : index
    %c0_497 = arith.constant 0 : index
    %494 = vector.load %arg32[%c1_495, %c0_496, %c0_497] : memref<6x6x32xf32, #tpu.memory_space<vmem>>, vector<4x4x32xf32>
    %495 = vector.shape_cast %494 : vector<4x4x32xf32> to vector<16x32xf32>
    %496 = arith.truncf %495 : vector<16x32xf32> to vector<16x32xbf16>
    %c96_498 = arith.constant 96 : index
    %c0_499 = arith.constant 0 : index
    %497 = vector.load %arg16[%c96_498, %c0_499] : memref<288x32xbf16, #tpu.memory_space<vmem>>, vector<32x32xbf16>
    %cst_500 = arith.constant dense<0.000000e+00> : vector<16x32xf32>
    %498 = tpu.matmul %496, %497, %cst_500 {dimension_numbers = #tpu.dot_dimension_numbers<[1], [0], [0], [1], [0, 0, 1, 1], [], []>} : vector<16x32xbf16>, vector<32x32xbf16>, vector<16x32xf32> -> vector<16x32xf32>
    %499 = arith.addf %493, %498 : vector<16x32xf32>
    %c1_501 = arith.constant 1 : index
    %c1_502 = arith.constant 1 : index
    %c0_503 = arith.constant 0 : index
    %500 = vector.load %arg32[%c1_501, %c1_502, %c0_503] : memref<6x6x32xf32, #tpu.memory_space<vmem>>, vector<4x4x32xf32>
    %501 = vector.shape_cast %500 : vector<4x4x32xf32> to vector<16x32xf32>
    %502 = arith.truncf %501 : vector<16x32xf32> to vector<16x32xbf16>
    %c128_504 = arith.constant 128 : index
    %c0_505 = arith.constant 0 : index
    %503 = vector.load %arg16[%c128_504, %c0_505] : memref<288x32xbf16, #tpu.memory_space<vmem>>, vector<32x32xbf16>
    %cst_506 = arith.constant dense<0.000000e+00> : vector<16x32xf32>
    %504 = tpu.matmul %502, %503, %cst_506 {dimension_numbers = #tpu.dot_dimension_numbers<[1], [0], [0], [1], [0, 0, 1, 1], [], []>} : vector<16x32xbf16>, vector<32x32xbf16>, vector<16x32xf32> -> vector<16x32xf32>
    %505 = arith.addf %499, %504 : vector<16x32xf32>
    %c1_507 = arith.constant 1 : index
    %c2_508 = arith.constant 2 : index
    %c0_509 = arith.constant 0 : index
    %506 = vector.load %arg32[%c1_507, %c2_508, %c0_509] : memref<6x6x32xf32, #tpu.memory_space<vmem>>, vector<4x4x32xf32>
    %507 = vector.shape_cast %506 : vector<4x4x32xf32> to vector<16x32xf32>
    %508 = arith.truncf %507 : vector<16x32xf32> to vector<16x32xbf16>
    %c160 = arith.constant 160 : index
    %c0_510 = arith.constant 0 : index
    %509 = vector.load %arg16[%c160, %c0_510] : memref<288x32xbf16, #tpu.memory_space<vmem>>, vector<32x32xbf16>
    %cst_511 = arith.constant dense<0.000000e+00> : vector<16x32xf32>
    %510 = tpu.matmul %508, %509, %cst_511 {dimension_numbers = #tpu.dot_dimension_numbers<[1], [0], [0], [1], [0, 0, 1, 1], [], []>} : vector<16x32xbf16>, vector<32x32xbf16>, vector<16x32xf32> -> vector<16x32xf32>
    %511 = arith.addf %505, %510 : vector<16x32xf32>
    %c2_512 = arith.constant 2 : index
    %c0_513 = arith.constant 0 : index
    %c0_514 = arith.constant 0 : index
    %512 = vector.load %arg32[%c2_512, %c0_513, %c0_514] : memref<6x6x32xf32, #tpu.memory_space<vmem>>, vector<4x4x32xf32>
    %513 = vector.shape_cast %512 : vector<4x4x32xf32> to vector<16x32xf32>
    %514 = arith.truncf %513 : vector<16x32xf32> to vector<16x32xbf16>
    %c192 = arith.constant 192 : index
    %c0_515 = arith.constant 0 : index
    %515 = vector.load %arg16[%c192, %c0_515] : memref<288x32xbf16, #tpu.memory_space<vmem>>, vector<32x32xbf16>
    %cst_516 = arith.constant dense<0.000000e+00> : vector<16x32xf32>
    %516 = tpu.matmul %514, %515, %cst_516 {dimension_numbers = #tpu.dot_dimension_numbers<[1], [0], [0], [1], [0, 0, 1, 1], [], []>} : vector<16x32xbf16>, vector<32x32xbf16>, vector<16x32xf32> -> vector<16x32xf32>
    %517 = arith.addf %511, %516 : vector<16x32xf32>
    %c2_517 = arith.constant 2 : index
    %c1_518 = arith.constant 1 : index
    %c0_519 = arith.constant 0 : index
    %518 = vector.load %arg32[%c2_517, %c1_518, %c0_519] : memref<6x6x32xf32, #tpu.memory_space<vmem>>, vector<4x4x32xf32>
    %519 = vector.shape_cast %518 : vector<4x4x32xf32> to vector<16x32xf32>
    %520 = arith.truncf %519 : vector<16x32xf32> to vector<16x32xbf16>
    %c224 = arith.constant 224 : index
    %c0_520 = arith.constant 0 : index
    %521 = vector.load %arg16[%c224, %c0_520] : memref<288x32xbf16, #tpu.memory_space<vmem>>, vector<32x32xbf16>
    %cst_521 = arith.constant dense<0.000000e+00> : vector<16x32xf32>
    %522 = tpu.matmul %520, %521, %cst_521 {dimension_numbers = #tpu.dot_dimension_numbers<[1], [0], [0], [1], [0, 0, 1, 1], [], []>} : vector<16x32xbf16>, vector<32x32xbf16>, vector<16x32xf32> -> vector<16x32xf32>
    %523 = arith.addf %517, %522 : vector<16x32xf32>
    %c2_522 = arith.constant 2 : index
    %c2_523 = arith.constant 2 : index
    %c0_524 = arith.constant 0 : index
    %524 = vector.load %arg32[%c2_522, %c2_523, %c0_524] : memref<6x6x32xf32, #tpu.memory_space<vmem>>, vector<4x4x32xf32>
    %525 = vector.shape_cast %524 : vector<4x4x32xf32> to vector<16x32xf32>
    %526 = arith.truncf %525 : vector<16x32xf32> to vector<16x32xbf16>
    %c256 = arith.constant 256 : index
    %c0_525 = arith.constant 0 : index
    %527 = vector.load %arg16[%c256, %c0_525] : memref<288x32xbf16, #tpu.memory_space<vmem>>, vector<32x32xbf16>
    %cst_526 = arith.constant dense<0.000000e+00> : vector<16x32xf32>
    %528 = tpu.matmul %526, %527, %cst_526 {dimension_numbers = #tpu.dot_dimension_numbers<[1], [0], [0], [1], [0, 0, 1, 1], [], []>} : vector<16x32xbf16>, vector<32x32xbf16>, vector<16x32xf32> -> vector<16x32xf32>
    %529 = arith.addf %523, %528 : vector<16x32xf32>
    %cst_527 = arith.constant 0.000000e+00 : f32
    %530 = vector.broadcast %cst_527 : f32 to vector<16x32xf32>
    %531 = arith.maximumf %529, %530 : vector<16x32xf32>
    %532 = vector.shape_cast %531 : vector<16x32xf32> to vector<4x4x32xf32>
    %c1_528 = arith.constant 1 : index
    %c1_529 = arith.constant 1 : index
    %c0_530 = arith.constant 0 : index
    %533 = vector.load %arg32[%c1_528, %c1_529, %c0_530] : memref<6x6x32xf32, #tpu.memory_space<vmem>>, vector<4x4x32xf32>
    tpu.vector_store %arg32[%c1_528, %c1_529, %c0_530], %532 {strides = array<i32>} : memref<6x6x32xf32, #tpu.memory_space<vmem>>, vector<4x4x32xf32>,
    %c0_531 = arith.constant 0 : index
    %c0_532 = arith.constant 0 : index
    %534 = vector.load %arg19[%c0_531, %c0_532] : memref<1x32xf32, #tpu.memory_space<vmem>>, vector<1x32xf32>
    %535 = vector.shape_cast %534 : vector<1x32xf32> to vector<1x32xf32>
    %536 = vector.broadcast %535 : vector<1x32xf32> to vector<16x32xf32>
    %c0_533 = arith.constant 0 : index
    %c0_534 = arith.constant 0 : index
    %c0_535 = arith.constant 0 : index
    %537 = vector.load %arg32[%c0_533, %c0_534, %c0_535] : memref<6x6x32xf32, #tpu.memory_space<vmem>>, vector<4x4x32xf32>
    %538 = vector.shape_cast %537 : vector<4x4x32xf32> to vector<16x32xf32>
    %539 = arith.truncf %538 : vector<16x32xf32> to vector<16x32xbf16>
    %c0_536 = arith.constant 0 : index
    %c0_537 = arith.constant 0 : index
    %540 = vector.load %arg18[%c0_536, %c0_537] : memref<288x32xbf16, #tpu.memory_space<vmem>>, vector<32x32xbf16>
    %cst_538 = arith.constant dense<0.000000e+00> : vector<16x32xf32>
    %541 = tpu.matmul %539, %540, %cst_538 {dimension_numbers = #tpu.dot_dimension_numbers<[1], [0], [0], [1], [0, 0, 1, 1], [], []>} : vector<16x32xbf16>, vector<32x32xbf16>, vector<16x32xf32> -> vector<16x32xf32>
    %542 = arith.addf %536, %541 : vector<16x32xf32>
    %c0_539 = arith.constant 0 : index
    %c1_540 = arith.constant 1 : index
    %c0_541 = arith.constant 0 : index
    %543 = vector.load %arg32[%c0_539, %c1_540, %c0_541] : memref<6x6x32xf32, #tpu.memory_space<vmem>>, vector<4x4x32xf32>
    %544 = vector.shape_cast %543 : vector<4x4x32xf32> to vector<16x32xf32>
    %545 = arith.truncf %544 : vector<16x32xf32> to vector<16x32xbf16>
    %c32_542 = arith.constant 32 : index
    %c0_543 = arith.constant 0 : index
    %546 = vector.load %arg18[%c32_542, %c0_543] : memref<288x32xbf16, #tpu.memory_space<vmem>>, vector<32x32xbf16>
    %cst_544 = arith.constant dense<0.000000e+00> : vector<16x32xf32>
    %547 = tpu.matmul %545, %546, %cst_544 {dimension_numbers = #tpu.dot_dimension_numbers<[1], [0], [0], [1], [0, 0, 1, 1], [], []>} : vector<16x32xbf16>, vector<32x32xbf16>, vector<16x32xf32> -> vector<16x32xf32>
    %548 = arith.addf %542, %547 : vector<16x32xf32>
    %c0_545 = arith.constant 0 : index
    %c2_546 = arith.constant 2 : index
    %c0_547 = arith.constant 0 : index
    %549 = vector.load %arg32[%c0_545, %c2_546, %c0_547] : memref<6x6x32xf32, #tpu.memory_space<vmem>>, vector<4x4x32xf32>
    %550 = vector.shape_cast %549 : vector<4x4x32xf32> to vector<16x32xf32>
    %551 = arith.truncf %550 : vector<16x32xf32> to vector<16x32xbf16>
    %c64_548 = arith.constant 64 : index
    %c0_549 = arith.constant 0 : index
    %552 = vector.load %arg18[%c64_548, %c0_549] : memref<288x32xbf16, #tpu.memory_space<vmem>>, vector<32x32xbf16>
    %cst_550 = arith.constant dense<0.000000e+00> : vector<16x32xf32>
    %553 = tpu.matmul %551, %552, %cst_550 {dimension_numbers = #tpu.dot_dimension_numbers<[1], [0], [0], [1], [0, 0, 1, 1], [], []>} : vector<16x32xbf16>, vector<32x32xbf16>, vector<16x32xf32> -> vector<16x32xf32>
    %554 = arith.addf %548, %553 : vector<16x32xf32>
    %c1_551 = arith.constant 1 : index
    %c0_552 = arith.constant 0 : index
    %c0_553 = arith.constant 0 : index
    %555 = vector.load %arg32[%c1_551, %c0_552, %c0_553] : memref<6x6x32xf32, #tpu.memory_space<vmem>>, vector<4x4x32xf32>
    %556 = vector.shape_cast %555 : vector<4x4x32xf32> to vector<16x32xf32>
    %557 = arith.truncf %556 : vector<16x32xf32> to vector<16x32xbf16>
    %c96_554 = arith.constant 96 : index
    %c0_555 = arith.constant 0 : index
    %558 = vector.load %arg18[%c96_554, %c0_555] : memref<288x32xbf16, #tpu.memory_space<vmem>>, vector<32x32xbf16>
    %cst_556 = arith.constant dense<0.000000e+00> : vector<16x32xf32>
    %559 = tpu.matmul %557, %558, %cst_556 {dimension_numbers = #tpu.dot_dimension_numbers<[1], [0], [0], [1], [0, 0, 1, 1], [], []>} : vector<16x32xbf16>, vector<32x32xbf16>, vector<16x32xf32> -> vector<16x32xf32>
    %560 = arith.addf %554, %559 : vector<16x32xf32>
    %c1_557 = arith.constant 1 : index
    %c1_558 = arith.constant 1 : index
    %c0_559 = arith.constant 0 : index
    %561 = vector.load %arg32[%c1_557, %c1_558, %c0_559] : memref<6x6x32xf32, #tpu.memory_space<vmem>>, vector<4x4x32xf32>
    %562 = vector.shape_cast %561 : vector<4x4x32xf32> to vector<16x32xf32>
    %563 = arith.truncf %562 : vector<16x32xf32> to vector<16x32xbf16>
    %c128_560 = arith.constant 128 : index
    %c0_561 = arith.constant 0 : index
    %564 = vector.load %arg18[%c128_560, %c0_561] : memref<288x32xbf16, #tpu.memory_space<vmem>>, vector<32x32xbf16>
    %cst_562 = arith.constant dense<0.000000e+00> : vector<16x32xf32>
    %565 = tpu.matmul %563, %564, %cst_562 {dimension_numbers = #tpu.dot_dimension_numbers<[1], [0], [0], [1], [0, 0, 1, 1], [], []>} : vector<16x32xbf16>, vector<32x32xbf16>, vector<16x32xf32> -> vector<16x32xf32>
    %566 = arith.addf %560, %565 : vector<16x32xf32>
    %c1_563 = arith.constant 1 : index
    %c2_564 = arith.constant 2 : index
    %c0_565 = arith.constant 0 : index
    %567 = vector.load %arg32[%c1_563, %c2_564, %c0_565] : memref<6x6x32xf32, #tpu.memory_space<vmem>>, vector<4x4x32xf32>
    %568 = vector.shape_cast %567 : vector<4x4x32xf32> to vector<16x32xf32>
    %569 = arith.truncf %568 : vector<16x32xf32> to vector<16x32xbf16>
    %c160_566 = arith.constant 160 : index
    %c0_567 = arith.constant 0 : index
    %570 = vector.load %arg18[%c160_566, %c0_567] : memref<288x32xbf16, #tpu.memory_space<vmem>>, vector<32x32xbf16>
    %cst_568 = arith.constant dense<0.000000e+00> : vector<16x32xf32>
    %571 = tpu.matmul %569, %570, %cst_568 {dimension_numbers = #tpu.dot_dimension_numbers<[1], [0], [0], [1], [0, 0, 1, 1], [], []>} : vector<16x32xbf16>, vector<32x32xbf16>, vector<16x32xf32> -> vector<16x32xf32>
    %572 = arith.addf %566, %571 : vector<16x32xf32>
    %c2_569 = arith.constant 2 : index
    %c0_570 = arith.constant 0 : index
    %c0_571 = arith.constant 0 : index
    %573 = vector.load %arg32[%c2_569, %c0_570, %c0_571] : memref<6x6x32xf32, #tpu.memory_space<vmem>>, vector<4x4x32xf32>
    %574 = vector.shape_cast %573 : vector<4x4x32xf32> to vector<16x32xf32>
    %575 = arith.truncf %574 : vector<16x32xf32> to vector<16x32xbf16>
    %c192_572 = arith.constant 192 : index
    %c0_573 = arith.constant 0 : index
    %576 = vector.load %arg18[%c192_572, %c0_573] : memref<288x32xbf16, #tpu.memory_space<vmem>>, vector<32x32xbf16>
    %cst_574 = arith.constant dense<0.000000e+00> : vector<16x32xf32>
    %577 = tpu.matmul %575, %576, %cst_574 {dimension_numbers = #tpu.dot_dimension_numbers<[1], [0], [0], [1], [0, 0, 1, 1], [], []>} : vector<16x32xbf16>, vector<32x32xbf16>, vector<16x32xf32> -> vector<16x32xf32>
    %578 = arith.addf %572, %577 : vector<16x32xf32>
    %c2_575 = arith.constant 2 : index
    %c1_576 = arith.constant 1 : index
    %c0_577 = arith.constant 0 : index
    %579 = vector.load %arg32[%c2_575, %c1_576, %c0_577] : memref<6x6x32xf32, #tpu.memory_space<vmem>>, vector<4x4x32xf32>
    %580 = vector.shape_cast %579 : vector<4x4x32xf32> to vector<16x32xf32>
    %581 = arith.truncf %580 : vector<16x32xf32> to vector<16x32xbf16>
    %c224_578 = arith.constant 224 : index
    %c0_579 = arith.constant 0 : index
    %582 = vector.load %arg18[%c224_578, %c0_579] : memref<288x32xbf16, #tpu.memory_space<vmem>>, vector<32x32xbf16>
    %cst_580 = arith.constant dense<0.000000e+00> : vector<16x32xf32>
    %583 = tpu.matmul %581, %582, %cst_580 {dimension_numbers = #tpu.dot_dimension_numbers<[1], [0], [0], [1], [0, 0, 1, 1], [], []>} : vector<16x32xbf16>, vector<32x32xbf16>, vector<16x32xf32> -> vector<16x32xf32>
    %584 = arith.addf %578, %583 : vector<16x32xf32>
    %c2_581 = arith.constant 2 : index
    %c2_582 = arith.constant 2 : index
    %c0_583 = arith.constant 0 : index
    %585 = vector.load %arg32[%c2_581, %c2_582, %c0_583] : memref<6x6x32xf32, #tpu.memory_space<vmem>>, vector<4x4x32xf32>
    %586 = vector.shape_cast %585 : vector<4x4x32xf32> to vector<16x32xf32>
    %587 = arith.truncf %586 : vector<16x32xf32> to vector<16x32xbf16>
    %c256_584 = arith.constant 256 : index
    %c0_585 = arith.constant 0 : index
    %588 = vector.load %arg18[%c256_584, %c0_585] : memref<288x32xbf16, #tpu.memory_space<vmem>>, vector<32x32xbf16>
    %cst_586 = arith.constant dense<0.000000e+00> : vector<16x32xf32>
    %589 = tpu.matmul %587, %588, %cst_586 {dimension_numbers = #tpu.dot_dimension_numbers<[1], [0], [0], [1], [0, 0, 1, 1], [], []>} : vector<16x32xbf16>, vector<32x32xbf16>, vector<16x32xf32> -> vector<16x32xf32>
    %590 = arith.addf %584, %589 : vector<16x32xf32>
    %591 = vector.shape_cast %590 : vector<16x32xf32> to vector<4x4x32xf32>
    %592 = arith.addf %591, %471 : vector<4x4x32xf32>
    %c0_587 = arith.constant 0 : index
    %c0_588 = arith.constant 0 : index
    %c0_589 = arith.constant 0 : index
    %c0_590 = arith.constant 0 : index
    %593 = vector.load %arg27[%c0_587, %c0_588, %c0_589, %c0_590] : memref<1x4x4x32xf32, #tpu.memory_space<vmem>>, vector<1x4x4x32xf32>
    %594 = vector.shape_cast %593 : vector<1x4x4x32xf32> to vector<4x4x32xf32>
    %595 = vector.shape_cast %592 : vector<4x4x32xf32> to vector<1x4x4x32xf32>
    tpu.vector_store %arg27[%c0_587, %c0_588, %c0_589, %c0_590], %595 {strides = array<i32>} : memref<1x4x4x32xf32, #tpu.memory_space<vmem>>, vector<1x4x4x32xf32>,
    %c1_591 = arith.constant 1 : index
    %c1_592 = arith.constant 1 : index
    %c0_593 = arith.constant 0 : index
    %596 = vector.load %arg32[%c1_591, %c1_592, %c0_593] : memref<6x6x32xf32, #tpu.memory_space<vmem>>, vector<4x4x32xf32>
    tpu.vector_store %arg32[%c1_591, %c1_592, %c0_593], %592 {strides = array<i32>} : memref<6x6x32xf32, #tpu.memory_space<vmem>>, vector<4x4x32xf32>,
    %c0_594 = arith.constant 0 : index
    %c0_595 = arith.constant 0 : index
    %597 = vector.load %arg21[%c0_594, %c0_595] : memref<1x32xf32, #tpu.memory_space<vmem>>, vector<1x32xf32>
    %598 = vector.shape_cast %597 : vector<1x32xf32> to vector<1x32xf32>
    %599 = vector.broadcast %598 : vector<1x32xf32> to vector<16x32xf32>
    %c0_596 = arith.constant 0 : index
    %c0_597 = arith.constant 0 : index
    %c0_598 = arith.constant 0 : index
    %600 = vector.load %arg32[%c0_596, %c0_597, %c0_598] : memref<6x6x32xf32, #tpu.memory_space<vmem>>, vector<4x4x32xf32>
    %601 = vector.shape_cast %600 : vector<4x4x32xf32> to vector<16x32xf32>
    %602 = arith.truncf %601 : vector<16x32xf32> to vector<16x32xbf16>
    %c0_599 = arith.constant 0 : index
    %c0_600 = arith.constant 0 : index
    %603 = vector.load %arg20[%c0_599, %c0_600] : memref<288x32xbf16, #tpu.memory_space<vmem>>, vector<32x32xbf16>
    %cst_601 = arith.constant dense<0.000000e+00> : vector<16x32xf32>
    %604 = tpu.matmul %602, %603, %cst_601 {dimension_numbers = #tpu.dot_dimension_numbers<[1], [0], [0], [1], [0, 0, 1, 1], [], []>} : vector<16x32xbf16>, vector<32x32xbf16>, vector<16x32xf32> -> vector<16x32xf32>
    %605 = arith.addf %599, %604 : vector<16x32xf32>
    %c0_602 = arith.constant 0 : index
    %c1_603 = arith.constant 1 : index
    %c0_604 = arith.constant 0 : index
    %606 = vector.load %arg32[%c0_602, %c1_603, %c0_604] : memref<6x6x32xf32, #tpu.memory_space<vmem>>, vector<4x4x32xf32>
    %607 = vector.shape_cast %606 : vector<4x4x32xf32> to vector<16x32xf32>
    %608 = arith.truncf %607 : vector<16x32xf32> to vector<16x32xbf16>
    %c32_605 = arith.constant 32 : index
    %c0_606 = arith.constant 0 : index
    %609 = vector.load %arg20[%c32_605, %c0_606] : memref<288x32xbf16, #tpu.memory_space<vmem>>, vector<32x32xbf16>
    %cst_607 = arith.constant dense<0.000000e+00> : vector<16x32xf32>
    %610 = tpu.matmul %608, %609, %cst_607 {dimension_numbers = #tpu.dot_dimension_numbers<[1], [0], [0], [1], [0, 0, 1, 1], [], []>} : vector<16x32xbf16>, vector<32x32xbf16>, vector<16x32xf32> -> vector<16x32xf32>
    %611 = arith.addf %605, %610 : vector<16x32xf32>
    %c0_608 = arith.constant 0 : index
    %c2_609 = arith.constant 2 : index
    %c0_610 = arith.constant 0 : index
    %612 = vector.load %arg32[%c0_608, %c2_609, %c0_610] : memref<6x6x32xf32, #tpu.memory_space<vmem>>, vector<4x4x32xf32>
    %613 = vector.shape_cast %612 : vector<4x4x32xf32> to vector<16x32xf32>
    %614 = arith.truncf %613 : vector<16x32xf32> to vector<16x32xbf16>
    %c64_611 = arith.constant 64 : index
    %c0_612 = arith.constant 0 : index
    %615 = vector.load %arg20[%c64_611, %c0_612] : memref<288x32xbf16, #tpu.memory_space<vmem>>, vector<32x32xbf16>
    %cst_613 = arith.constant dense<0.000000e+00> : vector<16x32xf32>
    %616 = tpu.matmul %614, %615, %cst_613 {dimension_numbers = #tpu.dot_dimension_numbers<[1], [0], [0], [1], [0, 0, 1, 1], [], []>} : vector<16x32xbf16>, vector<32x32xbf16>, vector<16x32xf32> -> vector<16x32xf32>
    %617 = arith.addf %611, %616 : vector<16x32xf32>
    %c1_614 = arith.constant 1 : index
    %c0_615 = arith.constant 0 : index
    %c0_616 = arith.constant 0 : index
    %618 = vector.load %arg32[%c1_614, %c0_615, %c0_616] : memref<6x6x32xf32, #tpu.memory_space<vmem>>, vector<4x4x32xf32>
    %619 = vector.shape_cast %618 : vector<4x4x32xf32> to vector<16x32xf32>
    %620 = arith.truncf %619 : vector<16x32xf32> to vector<16x32xbf16>
    %c96_617 = arith.constant 96 : index
    %c0_618 = arith.constant 0 : index
    %621 = vector.load %arg20[%c96_617, %c0_618] : memref<288x32xbf16, #tpu.memory_space<vmem>>, vector<32x32xbf16>
    %cst_619 = arith.constant dense<0.000000e+00> : vector<16x32xf32>
    %622 = tpu.matmul %620, %621, %cst_619 {dimension_numbers = #tpu.dot_dimension_numbers<[1], [0], [0], [1], [0, 0, 1, 1], [], []>} : vector<16x32xbf16>, vector<32x32xbf16>, vector<16x32xf32> -> vector<16x32xf32>
    %623 = arith.addf %617, %622 : vector<16x32xf32>
    %c1_620 = arith.constant 1 : index
    %c1_621 = arith.constant 1 : index
    %c0_622 = arith.constant 0 : index
    %624 = vector.load %arg32[%c1_620, %c1_621, %c0_622] : memref<6x6x32xf32, #tpu.memory_space<vmem>>, vector<4x4x32xf32>
    %625 = vector.shape_cast %624 : vector<4x4x32xf32> to vector<16x32xf32>
    %626 = arith.truncf %625 : vector<16x32xf32> to vector<16x32xbf16>
    %c128_623 = arith.constant 128 : index
    %c0_624 = arith.constant 0 : index
    %627 = vector.load %arg20[%c128_623, %c0_624] : memref<288x32xbf16, #tpu.memory_space<vmem>>, vector<32x32xbf16>
    %cst_625 = arith.constant dense<0.000000e+00> : vector<16x32xf32>
    %628 = tpu.matmul %626, %627, %cst_625 {dimension_numbers = #tpu.dot_dimension_numbers<[1], [0], [0], [1], [0, 0, 1, 1], [], []>} : vector<16x32xbf16>, vector<32x32xbf16>, vector<16x32xf32> -> vector<16x32xf32>
    %629 = arith.addf %623, %628 : vector<16x32xf32>
    %c1_626 = arith.constant 1 : index
    %c2_627 = arith.constant 2 : index
    %c0_628 = arith.constant 0 : index
    %630 = vector.load %arg32[%c1_626, %c2_627, %c0_628] : memref<6x6x32xf32, #tpu.memory_space<vmem>>, vector<4x4x32xf32>
    %631 = vector.shape_cast %630 : vector<4x4x32xf32> to vector<16x32xf32>
    %632 = arith.truncf %631 : vector<16x32xf32> to vector<16x32xbf16>
    %c160_629 = arith.constant 160 : index
    %c0_630 = arith.constant 0 : index
    %633 = vector.load %arg20[%c160_629, %c0_630] : memref<288x32xbf16, #tpu.memory_space<vmem>>, vector<32x32xbf16>
    %cst_631 = arith.constant dense<0.000000e+00> : vector<16x32xf32>
    %634 = tpu.matmul %632, %633, %cst_631 {dimension_numbers = #tpu.dot_dimension_numbers<[1], [0], [0], [1], [0, 0, 1, 1], [], []>} : vector<16x32xbf16>, vector<32x32xbf16>, vector<16x32xf32> -> vector<16x32xf32>
    %635 = arith.addf %629, %634 : vector<16x32xf32>
    %c2_632 = arith.constant 2 : index
    %c0_633 = arith.constant 0 : index
    %c0_634 = arith.constant 0 : index
    %636 = vector.load %arg32[%c2_632, %c0_633, %c0_634] : memref<6x6x32xf32, #tpu.memory_space<vmem>>, vector<4x4x32xf32>
    %637 = vector.shape_cast %636 : vector<4x4x32xf32> to vector<16x32xf32>
    %638 = arith.truncf %637 : vector<16x32xf32> to vector<16x32xbf16>
    %c192_635 = arith.constant 192 : index
    %c0_636 = arith.constant 0 : index
    %639 = vector.load %arg20[%c192_635, %c0_636] : memref<288x32xbf16, #tpu.memory_space<vmem>>, vector<32x32xbf16>
    %cst_637 = arith.constant dense<0.000000e+00> : vector<16x32xf32>
    %640 = tpu.matmul %638, %639, %cst_637 {dimension_numbers = #tpu.dot_dimension_numbers<[1], [0], [0], [1], [0, 0, 1, 1], [], []>} : vector<16x32xbf16>, vector<32x32xbf16>, vector<16x32xf32> -> vector<16x32xf32>
    %641 = arith.addf %635, %640 : vector<16x32xf32>
    %c2_638 = arith.constant 2 : index
    %c1_639 = arith.constant 1 : index
    %c0_640 = arith.constant 0 : index
    %642 = vector.load %arg32[%c2_638, %c1_639, %c0_640] : memref<6x6x32xf32, #tpu.memory_space<vmem>>, vector<4x4x32xf32>
    %643 = vector.shape_cast %642 : vector<4x4x32xf32> to vector<16x32xf32>
    %644 = arith.truncf %643 : vector<16x32xf32> to vector<16x32xbf16>
    %c224_641 = arith.constant 224 : index
    %c0_642 = arith.constant 0 : index
    %645 = vector.load %arg20[%c224_641, %c0_642] : memref<288x32xbf16, #tpu.memory_space<vmem>>, vector<32x32xbf16>
    %cst_643 = arith.constant dense<0.000000e+00> : vector<16x32xf32>
    %646 = tpu.matmul %644, %645, %cst_643 {dimension_numbers = #tpu.dot_dimension_numbers<[1], [0], [0], [1], [0, 0, 1, 1], [], []>} : vector<16x32xbf16>, vector<32x32xbf16>, vector<16x32xf32> -> vector<16x32xf32>
    %647 = arith.addf %641, %646 : vector<16x32xf32>
    %c2_644 = arith.constant 2 : index
    %c2_645 = arith.constant 2 : index
    %c0_646 = arith.constant 0 : index
    %648 = vector.load %arg32[%c2_644, %c2_645, %c0_646] : memref<6x6x32xf32, #tpu.memory_space<vmem>>, vector<4x4x32xf32>
    %649 = vector.shape_cast %648 : vector<4x4x32xf32> to vector<16x32xf32>
    %650 = arith.truncf %649 : vector<16x32xf32> to vector<16x32xbf16>
    %c256_647 = arith.constant 256 : index
    %c0_648 = arith.constant 0 : index
    %651 = vector.load %arg20[%c256_647, %c0_648] : memref<288x32xbf16, #tpu.memory_space<vmem>>, vector<32x32xbf16>
    %cst_649 = arith.constant dense<0.000000e+00> : vector<16x32xf32>
    %652 = tpu.matmul %650, %651, %cst_649 {dimension_numbers = #tpu.dot_dimension_numbers<[1], [0], [0], [1], [0, 0, 1, 1], [], []>} : vector<16x32xbf16>, vector<32x32xbf16>, vector<16x32xf32> -> vector<16x32xf32>
    %653 = arith.addf %647, %652 : vector<16x32xf32>
    %cst_650 = arith.constant 0.000000e+00 : f32
    %654 = vector.broadcast %cst_650 : f32 to vector<16x32xf32>
    %655 = arith.maximumf %653, %654 : vector<16x32xf32>
    %656 = vector.shape_cast %655 : vector<16x32xf32> to vector<4x4x32xf32>
    %657 = vector.shape_cast %656 : vector<4x4x32xf32> to vector<2x2x4x32xf32>
    %658 = vector.extract_strided_slice %657 {offsets = [0, 0, 0, 0], sizes = [2, 1, 4, 32], strides = [1, 1, 1, 1]} : vector<2x2x4x32xf32> to vector<2x1x4x32xf32>
    %659 = vector.shape_cast %658 : vector<2x1x4x32xf32> to vector<2x4x32xf32>
    %660 = vector.shape_cast %659 : vector<2x4x32xf32> to vector<2x2x2x32xf32>
    %661 = vector.extract_strided_slice %660 {offsets = [0, 0, 0, 0], sizes = [2, 2, 1, 32], strides = [1, 1, 1, 1]} : vector<2x2x2x32xf32> to vector<2x2x1x32xf32>
    %662 = vector.shape_cast %661 : vector<2x2x1x32xf32> to vector<2x2x32xf32>
    %c1_651 = arith.constant 1 : index
    %c1_652 = arith.constant 1 : index
    %c0_653 = arith.constant 0 : index
    %663 = vector.load %arg33[%c1_651, %c1_652, %c0_653] : memref<4x4x32xf32, #tpu.memory_space<vmem>>, vector<2x2x32xf32>
    tpu.vector_store %arg33[%c1_651, %c1_652, %c0_653], %662 {strides = array<i32>} : memref<4x4x32xf32, #tpu.memory_space<vmem>>, vector<2x2x32xf32>,
    %c0_654 = arith.constant 0 : index
    %c0_655 = arith.constant 0 : index
    %664 = vector.load %arg23[%c0_654, %c0_655] : memref<1x32xf32, #tpu.memory_space<vmem>>, vector<1x32xf32>
    %665 = vector.shape_cast %664 : vector<1x32xf32> to vector<1x32xf32>
    %666 = vector.broadcast %665 : vector<1x32xf32> to vector<4x32xf32>
    %c0_656 = arith.constant 0 : index
    %c0_657 = arith.constant 0 : index
    %c0_658 = arith.constant 0 : index
    %667 = vector.load %arg33[%c0_656, %c0_657, %c0_658] : memref<4x4x32xf32, #tpu.memory_space<vmem>>, vector<2x2x32xf32>
    %668 = vector.shape_cast %667 : vector<2x2x32xf32> to vector<4x32xf32>
    %669 = arith.truncf %668 : vector<4x32xf32> to vector<4x32xbf16>
    %c0_659 = arith.constant 0 : index
    %c0_660 = arith.constant 0 : index
    %670 = vector.load %arg22[%c0_659, %c0_660] : memref<288x32xbf16, #tpu.memory_space<vmem>>, vector<32x32xbf16>
    %cst_661 = arith.constant dense<0.000000e+00> : vector<4x32xf32>
    %671 = tpu.matmul %669, %670, %cst_661 {dimension_numbers = #tpu.dot_dimension_numbers<[1], [0], [0], [1], [0, 0, 1, 1], [], []>} : vector<4x32xbf16>, vector<32x32xbf16>, vector<4x32xf32> -> vector<4x32xf32>
    %672 = arith.addf %666, %671 : vector<4x32xf32>
    %c0_662 = arith.constant 0 : index
    %c1_663 = arith.constant 1 : index
    %c0_664 = arith.constant 0 : index
    %673 = vector.load %arg33[%c0_662, %c1_663, %c0_664] : memref<4x4x32xf32, #tpu.memory_space<vmem>>, vector<2x2x32xf32>
    %674 = vector.shape_cast %673 : vector<2x2x32xf32> to vector<4x32xf32>
    %675 = arith.truncf %674 : vector<4x32xf32> to vector<4x32xbf16>
    %c32_665 = arith.constant 32 : index
    %c0_666 = arith.constant 0 : index
    %676 = vector.load %arg22[%c32_665, %c0_666] : memref<288x32xbf16, #tpu.memory_space<vmem>>, vector<32x32xbf16>
    %cst_667 = arith.constant dense<0.000000e+00> : vector<4x32xf32>
    %677 = tpu.matmul %675, %676, %cst_667 {dimension_numbers = #tpu.dot_dimension_numbers<[1], [0], [0], [1], [0, 0, 1, 1], [], []>} : vector<4x32xbf16>, vector<32x32xbf16>, vector<4x32xf32> -> vector<4x32xf32>
    %678 = arith.addf %672, %677 : vector<4x32xf32>
    %c0_668 = arith.constant 0 : index
    %c2_669 = arith.constant 2 : index
    %c0_670 = arith.constant 0 : index
    %679 = vector.load %arg33[%c0_668, %c2_669, %c0_670] : memref<4x4x32xf32, #tpu.memory_space<vmem>>, vector<2x2x32xf32>
    %680 = vector.shape_cast %679 : vector<2x2x32xf32> to vector<4x32xf32>
    %681 = arith.truncf %680 : vector<4x32xf32> to vector<4x32xbf16>
    %c64_671 = arith.constant 64 : index
    %c0_672 = arith.constant 0 : index
    %682 = vector.load %arg22[%c64_671, %c0_672] : memref<288x32xbf16, #tpu.memory_space<vmem>>, vector<32x32xbf16>
    %cst_673 = arith.constant dense<0.000000e+00> : vector<4x32xf32>
    %683 = tpu.matmul %681, %682, %cst_673 {dimension_numbers = #tpu.dot_dimension_numbers<[1], [0], [0], [1], [0, 0, 1, 1], [], []>} : vector<4x32xbf16>, vector<32x32xbf16>, vector<4x32xf32> -> vector<4x32xf32>
    %684 = arith.addf %678, %683 : vector<4x32xf32>
    %c1_674 = arith.constant 1 : index
    %c0_675 = arith.constant 0 : index
    %c0_676 = arith.constant 0 : index
    %685 = vector.load %arg33[%c1_674, %c0_675, %c0_676] : memref<4x4x32xf32, #tpu.memory_space<vmem>>, vector<2x2x32xf32>
    %686 = vector.shape_cast %685 : vector<2x2x32xf32> to vector<4x32xf32>
    %687 = arith.truncf %686 : vector<4x32xf32> to vector<4x32xbf16>
    %c96_677 = arith.constant 96 : index
    %c0_678 = arith.constant 0 : index
    %688 = vector.load %arg22[%c96_677, %c0_678] : memref<288x32xbf16, #tpu.memory_space<vmem>>, vector<32x32xbf16>
    %cst_679 = arith.constant dense<0.000000e+00> : vector<4x32xf32>
    %689 = tpu.matmul %687, %688, %cst_679 {dimension_numbers = #tpu.dot_dimension_numbers<[1], [0], [0], [1], [0, 0, 1, 1], [], []>} : vector<4x32xbf16>, vector<32x32xbf16>, vector<4x32xf32> -> vector<4x32xf32>
    %690 = arith.addf %684, %689 : vector<4x32xf32>
    %c1_680 = arith.constant 1 : index
    %c1_681 = arith.constant 1 : index
    %c0_682 = arith.constant 0 : index
    %691 = vector.load %arg33[%c1_680, %c1_681, %c0_682] : memref<4x4x32xf32, #tpu.memory_space<vmem>>, vector<2x2x32xf32>
    %692 = vector.shape_cast %691 : vector<2x2x32xf32> to vector<4x32xf32>
    %693 = arith.truncf %692 : vector<4x32xf32> to vector<4x32xbf16>
    %c128_683 = arith.constant 128 : index
    %c0_684 = arith.constant 0 : index
    %694 = vector.load %arg22[%c128_683, %c0_684] : memref<288x32xbf16, #tpu.memory_space<vmem>>, vector<32x32xbf16>
    %cst_685 = arith.constant dense<0.000000e+00> : vector<4x32xf32>
    %695 = tpu.matmul %693, %694, %cst_685 {dimension_numbers = #tpu.dot_dimension_numbers<[1], [0], [0], [1], [0, 0, 1, 1], [], []>} : vector<4x32xbf16>, vector<32x32xbf16>, vector<4x32xf32> -> vector<4x32xf32>
    %696 = arith.addf %690, %695 : vector<4x32xf32>
    %c1_686 = arith.constant 1 : index
    %c2_687 = arith.constant 2 : index
    %c0_688 = arith.constant 0 : index
    %697 = vector.load %arg33[%c1_686, %c2_687, %c0_688] : memref<4x4x32xf32, #tpu.memory_space<vmem>>, vector<2x2x32xf32>
    %698 = vector.shape_cast %697 : vector<2x2x32xf32> to vector<4x32xf32>
    %699 = arith.truncf %698 : vector<4x32xf32> to vector<4x32xbf16>
    %c160_689 = arith.constant 160 : index
    %c0_690 = arith.constant 0 : index
    %700 = vector.load %arg22[%c160_689, %c0_690] : memref<288x32xbf16, #tpu.memory_space<vmem>>, vector<32x32xbf16>
    %cst_691 = arith.constant dense<0.000000e+00> : vector<4x32xf32>
    %701 = tpu.matmul %699, %700, %cst_691 {dimension_numbers = #tpu.dot_dimension_numbers<[1], [0], [0], [1], [0, 0, 1, 1], [], []>} : vector<4x32xbf16>, vector<32x32xbf16>, vector<4x32xf32> -> vector<4x32xf32>
    %702 = arith.addf %696, %701 : vector<4x32xf32>
    %c2_692 = arith.constant 2 : index
    %c0_693 = arith.constant 0 : index
    %c0_694 = arith.constant 0 : index
    %703 = vector.load %arg33[%c2_692, %c0_693, %c0_694] : memref<4x4x32xf32, #tpu.memory_space<vmem>>, vector<2x2x32xf32>
    %704 = vector.shape_cast %703 : vector<2x2x32xf32> to vector<4x32xf32>
    %705 = arith.truncf %704 : vector<4x32xf32> to vector<4x32xbf16>
    %c192_695 = arith.constant 192 : index
    %c0_696 = arith.constant 0 : index
    %706 = vector.load %arg22[%c192_695, %c0_696] : memref<288x32xbf16, #tpu.memory_space<vmem>>, vector<32x32xbf16>
    %cst_697 = arith.constant dense<0.000000e+00> : vector<4x32xf32>
    %707 = tpu.matmul %705, %706, %cst_697 {dimension_numbers = #tpu.dot_dimension_numbers<[1], [0], [0], [1], [0, 0, 1, 1], [], []>} : vector<4x32xbf16>, vector<32x32xbf16>, vector<4x32xf32> -> vector<4x32xf32>
    %708 = arith.addf %702, %707 : vector<4x32xf32>
    %c2_698 = arith.constant 2 : index
    %c1_699 = arith.constant 1 : index
    %c0_700 = arith.constant 0 : index
    %709 = vector.load %arg33[%c2_698, %c1_699, %c0_700] : memref<4x4x32xf32, #tpu.memory_space<vmem>>, vector<2x2x32xf32>
    %710 = vector.shape_cast %709 : vector<2x2x32xf32> to vector<4x32xf32>
    %711 = arith.truncf %710 : vector<4x32xf32> to vector<4x32xbf16>
    %c224_701 = arith.constant 224 : index
    %c0_702 = arith.constant 0 : index
    %712 = vector.load %arg22[%c224_701, %c0_702] : memref<288x32xbf16, #tpu.memory_space<vmem>>, vector<32x32xbf16>
    %cst_703 = arith.constant dense<0.000000e+00> : vector<4x32xf32>
    %713 = tpu.matmul %711, %712, %cst_703 {dimension_numbers = #tpu.dot_dimension_numbers<[1], [0], [0], [1], [0, 0, 1, 1], [], []>} : vector<4x32xbf16>, vector<32x32xbf16>, vector<4x32xf32> -> vector<4x32xf32>
    %714 = arith.addf %708, %713 : vector<4x32xf32>
    %c2_704 = arith.constant 2 : index
    %c2_705 = arith.constant 2 : index
    %c0_706 = arith.constant 0 : index
    %715 = vector.load %arg33[%c2_704, %c2_705, %c0_706] : memref<4x4x32xf32, #tpu.memory_space<vmem>>, vector<2x2x32xf32>
    %716 = vector.shape_cast %715 : vector<2x2x32xf32> to vector<4x32xf32>
    %717 = arith.truncf %716 : vector<4x32xf32> to vector<4x32xbf16>
    %c256_707 = arith.constant 256 : index
    %c0_708 = arith.constant 0 : index
    %718 = vector.load %arg22[%c256_707, %c0_708] : memref<288x32xbf16, #tpu.memory_space<vmem>>, vector<32x32xbf16>
    %cst_709 = arith.constant dense<0.000000e+00> : vector<4x32xf32>
    %719 = tpu.matmul %717, %718, %cst_709 {dimension_numbers = #tpu.dot_dimension_numbers<[1], [0], [0], [1], [0, 0, 1, 1], [], []>} : vector<4x32xbf16>, vector<32x32xbf16>, vector<4x32xf32> -> vector<4x32xf32>
    %720 = arith.addf %714, %719 : vector<4x32xf32>
    %cst_710 = arith.constant 0.000000e+00 : f32
    %721 = vector.broadcast %cst_710 : f32 to vector<4x32xf32>
    %722 = arith.maximumf %720, %721 : vector<4x32xf32>
    %723 = vector.shape_cast %722 : vector<4x32xf32> to vector<2x2x32xf32>
    %c1_711 = arith.constant 1 : index
    %c1_712 = arith.constant 1 : index
    %c0_713 = arith.constant 0 : index
    %724 = vector.load %arg33[%c1_711, %c1_712, %c0_713] : memref<4x4x32xf32, #tpu.memory_space<vmem>>, vector<2x2x32xf32>
    tpu.vector_store %arg33[%c1_711, %c1_712, %c0_713], %723 {strides = array<i32>} : memref<4x4x32xf32, #tpu.memory_space<vmem>>, vector<2x2x32xf32>,
    %c0_714 = arith.constant 0 : index
    %c0_715 = arith.constant 0 : index
    %725 = vector.load %arg25[%c0_714, %c0_715] : memref<1x32xf32, #tpu.memory_space<vmem>>, vector<1x32xf32>
    %726 = vector.shape_cast %725 : vector<1x32xf32> to vector<1x32xf32>
    %727 = vector.broadcast %726 : vector<1x32xf32> to vector<4x32xf32>
    %c0_716 = arith.constant 0 : index
    %c0_717 = arith.constant 0 : index
    %c0_718 = arith.constant 0 : index
    %728 = vector.load %arg33[%c0_716, %c0_717, %c0_718] : memref<4x4x32xf32, #tpu.memory_space<vmem>>, vector<2x2x32xf32>
    %729 = vector.shape_cast %728 : vector<2x2x32xf32> to vector<4x32xf32>
    %730 = arith.truncf %729 : vector<4x32xf32> to vector<4x32xbf16>
    %c0_719 = arith.constant 0 : index
    %c0_720 = arith.constant 0 : index
    %731 = vector.load %arg24[%c0_719, %c0_720] : memref<288x32xbf16, #tpu.memory_space<vmem>>, vector<32x32xbf16>
    %cst_721 = arith.constant dense<0.000000e+00> : vector<4x32xf32>
    %732 = tpu.matmul %730, %731, %cst_721 {dimension_numbers = #tpu.dot_dimension_numbers<[1], [0], [0], [1], [0, 0, 1, 1], [], []>} : vector<4x32xbf16>, vector<32x32xbf16>, vector<4x32xf32> -> vector<4x32xf32>
    %733 = arith.addf %727, %732 : vector<4x32xf32>
    %c0_722 = arith.constant 0 : index
    %c1_723 = arith.constant 1 : index
    %c0_724 = arith.constant 0 : index
    %734 = vector.load %arg33[%c0_722, %c1_723, %c0_724] : memref<4x4x32xf32, #tpu.memory_space<vmem>>, vector<2x2x32xf32>
    %735 = vector.shape_cast %734 : vector<2x2x32xf32> to vector<4x32xf32>
    %736 = arith.truncf %735 : vector<4x32xf32> to vector<4x32xbf16>
    %c32_725 = arith.constant 32 : index
    %c0_726 = arith.constant 0 : index
    %737 = vector.load %arg24[%c32_725, %c0_726] : memref<288x32xbf16, #tpu.memory_space<vmem>>, vector<32x32xbf16>
    %cst_727 = arith.constant dense<0.000000e+00> : vector<4x32xf32>
    %738 = tpu.matmul %736, %737, %cst_727 {dimension_numbers = #tpu.dot_dimension_numbers<[1], [0], [0], [1], [0, 0, 1, 1], [], []>} : vector<4x32xbf16>, vector<32x32xbf16>, vector<4x32xf32> -> vector<4x32xf32>
    %739 = arith.addf %733, %738 : vector<4x32xf32>
    %c0_728 = arith.constant 0 : index
    %c2_729 = arith.constant 2 : index
    %c0_730 = arith.constant 0 : index
    %740 = vector.load %arg33[%c0_728, %c2_729, %c0_730] : memref<4x4x32xf32, #tpu.memory_space<vmem>>, vector<2x2x32xf32>
    %741 = vector.shape_cast %740 : vector<2x2x32xf32> to vector<4x32xf32>
    %742 = arith.truncf %741 : vector<4x32xf32> to vector<4x32xbf16>
    %c64_731 = arith.constant 64 : index
    %c0_732 = arith.constant 0 : index
    %743 = vector.load %arg24[%c64_731, %c0_732] : memref<288x32xbf16, #tpu.memory_space<vmem>>, vector<32x32xbf16>
    %cst_733 = arith.constant dense<0.000000e+00> : vector<4x32xf32>
    %744 = tpu.matmul %742, %743, %cst_733 {dimension_numbers = #tpu.dot_dimension_numbers<[1], [0], [0], [1], [0, 0, 1, 1], [], []>} : vector<4x32xbf16>, vector<32x32xbf16>, vector<4x32xf32> -> vector<4x32xf32>
    %745 = arith.addf %739, %744 : vector<4x32xf32>
    %c1_734 = arith.constant 1 : index
    %c0_735 = arith.constant 0 : index
    %c0_736 = arith.constant 0 : index
    %746 = vector.load %arg33[%c1_734, %c0_735, %c0_736] : memref<4x4x32xf32, #tpu.memory_space<vmem>>, vector<2x2x32xf32>
    %747 = vector.shape_cast %746 : vector<2x2x32xf32> to vector<4x32xf32>
    %748 = arith.truncf %747 : vector<4x32xf32> to vector<4x32xbf16>
    %c96_737 = arith.constant 96 : index
    %c0_738 = arith.constant 0 : index
    %749 = vector.load %arg24[%c96_737, %c0_738] : memref<288x32xbf16, #tpu.memory_space<vmem>>, vector<32x32xbf16>
    %cst_739 = arith.constant dense<0.000000e+00> : vector<4x32xf32>
    %750 = tpu.matmul %748, %749, %cst_739 {dimension_numbers = #tpu.dot_dimension_numbers<[1], [0], [0], [1], [0, 0, 1, 1], [], []>} : vector<4x32xbf16>, vector<32x32xbf16>, vector<4x32xf32> -> vector<4x32xf32>
    %751 = arith.addf %745, %750 : vector<4x32xf32>
    %c1_740 = arith.constant 1 : index
    %c1_741 = arith.constant 1 : index
    %c0_742 = arith.constant 0 : index
    %752 = vector.load %arg33[%c1_740, %c1_741, %c0_742] : memref<4x4x32xf32, #tpu.memory_space<vmem>>, vector<2x2x32xf32>
    %753 = vector.shape_cast %752 : vector<2x2x32xf32> to vector<4x32xf32>
    %754 = arith.truncf %753 : vector<4x32xf32> to vector<4x32xbf16>
    %c128_743 = arith.constant 128 : index
    %c0_744 = arith.constant 0 : index
    %755 = vector.load %arg24[%c128_743, %c0_744] : memref<288x32xbf16, #tpu.memory_space<vmem>>, vector<32x32xbf16>
    %cst_745 = arith.constant dense<0.000000e+00> : vector<4x32xf32>
    %756 = tpu.matmul %754, %755, %cst_745 {dimension_numbers = #tpu.dot_dimension_numbers<[1], [0], [0], [1], [0, 0, 1, 1], [], []>} : vector<4x32xbf16>, vector<32x32xbf16>, vector<4x32xf32> -> vector<4x32xf32>
    %757 = arith.addf %751, %756 : vector<4x32xf32>
    %c1_746 = arith.constant 1 : index
    %c2_747 = arith.constant 2 : index
    %c0_748 = arith.constant 0 : index
    %758 = vector.load %arg33[%c1_746, %c2_747, %c0_748] : memref<4x4x32xf32, #tpu.memory_space<vmem>>, vector<2x2x32xf32>
    %759 = vector.shape_cast %758 : vector<2x2x32xf32> to vector<4x32xf32>
    %760 = arith.truncf %759 : vector<4x32xf32> to vector<4x32xbf16>
    %c160_749 = arith.constant 160 : index
    %c0_750 = arith.constant 0 : index
    %761 = vector.load %arg24[%c160_749, %c0_750] : memref<288x32xbf16, #tpu.memory_space<vmem>>, vector<32x32xbf16>
    %cst_751 = arith.constant dense<0.000000e+00> : vector<4x32xf32>
    %762 = tpu.matmul %760, %761, %cst_751 {dimension_numbers = #tpu.dot_dimension_numbers<[1], [0], [0], [1], [0, 0, 1, 1], [], []>} : vector<4x32xbf16>, vector<32x32xbf16>, vector<4x32xf32> -> vector<4x32xf32>
    %763 = arith.addf %757, %762 : vector<4x32xf32>
    %c2_752 = arith.constant 2 : index
    %c0_753 = arith.constant 0 : index
    %c0_754 = arith.constant 0 : index
    %764 = vector.load %arg33[%c2_752, %c0_753, %c0_754] : memref<4x4x32xf32, #tpu.memory_space<vmem>>, vector<2x2x32xf32>
    %765 = vector.shape_cast %764 : vector<2x2x32xf32> to vector<4x32xf32>
    %766 = arith.truncf %765 : vector<4x32xf32> to vector<4x32xbf16>
    %c192_755 = arith.constant 192 : index
    %c0_756 = arith.constant 0 : index
    %767 = vector.load %arg24[%c192_755, %c0_756] : memref<288x32xbf16, #tpu.memory_space<vmem>>, vector<32x32xbf16>
    %cst_757 = arith.constant dense<0.000000e+00> : vector<4x32xf32>
    %768 = tpu.matmul %766, %767, %cst_757 {dimension_numbers = #tpu.dot_dimension_numbers<[1], [0], [0], [1], [0, 0, 1, 1], [], []>} : vector<4x32xbf16>, vector<32x32xbf16>, vector<4x32xf32> -> vector<4x32xf32>
    %769 = arith.addf %763, %768 : vector<4x32xf32>
    %c2_758 = arith.constant 2 : index
    %c1_759 = arith.constant 1 : index
    %c0_760 = arith.constant 0 : index
    %770 = vector.load %arg33[%c2_758, %c1_759, %c0_760] : memref<4x4x32xf32, #tpu.memory_space<vmem>>, vector<2x2x32xf32>
    %771 = vector.shape_cast %770 : vector<2x2x32xf32> to vector<4x32xf32>
    %772 = arith.truncf %771 : vector<4x32xf32> to vector<4x32xbf16>
    %c224_761 = arith.constant 224 : index
    %c0_762 = arith.constant 0 : index
    %773 = vector.load %arg24[%c224_761, %c0_762] : memref<288x32xbf16, #tpu.memory_space<vmem>>, vector<32x32xbf16>
    %cst_763 = arith.constant dense<0.000000e+00> : vector<4x32xf32>
    %774 = tpu.matmul %772, %773, %cst_763 {dimension_numbers = #tpu.dot_dimension_numbers<[1], [0], [0], [1], [0, 0, 1, 1], [], []>} : vector<4x32xbf16>, vector<32x32xbf16>, vector<4x32xf32> -> vector<4x32xf32>
    %775 = arith.addf %769, %774 : vector<4x32xf32>
    %c2_764 = arith.constant 2 : index
    %c2_765 = arith.constant 2 : index
    %c0_766 = arith.constant 0 : index
    %776 = vector.load %arg33[%c2_764, %c2_765, %c0_766] : memref<4x4x32xf32, #tpu.memory_space<vmem>>, vector<2x2x32xf32>
    %777 = vector.shape_cast %776 : vector<2x2x32xf32> to vector<4x32xf32>
    %778 = arith.truncf %777 : vector<4x32xf32> to vector<4x32xbf16>
    %c256_767 = arith.constant 256 : index
    %c0_768 = arith.constant 0 : index
    %779 = vector.load %arg24[%c256_767, %c0_768] : memref<288x32xbf16, #tpu.memory_space<vmem>>, vector<32x32xbf16>
    %cst_769 = arith.constant dense<0.000000e+00> : vector<4x32xf32>
    %780 = tpu.matmul %778, %779, %cst_769 {dimension_numbers = #tpu.dot_dimension_numbers<[1], [0], [0], [1], [0, 0, 1, 1], [], []>} : vector<4x32xbf16>, vector<32x32xbf16>, vector<4x32xf32> -> vector<4x32xf32>
    %781 = arith.addf %775, %780 : vector<4x32xf32>
    %782 = vector.shape_cast %781 : vector<4x32xf32> to vector<2x2x32xf32>
    %783 = arith.addf %782, %662 : vector<2x2x32xf32>
    %c0_770 = arith.constant 0 : index
    %c0_771 = arith.constant 0 : index
    %c0_772 = arith.constant 0 : index
    %c0_773 = arith.constant 0 : index
    %784 = vector.load %arg28[%c0_770, %c0_771, %c0_772, %c0_773] : memref<1x2x2x32xf32, #tpu.memory_space<vmem>>, vector<1x2x2x32xf32>
    %785 = vector.shape_cast %784 : vector<1x2x2x32xf32> to vector<2x2x32xf32>
    %786 = vector.shape_cast %783 : vector<2x2x32xf32> to vector<1x2x2x32xf32>
    tpu.vector_store %arg28[%c0_770, %c0_771, %c0_772, %c0_773], %786 {strides = array<i32>} : memref<1x2x2x32xf32, #tpu.memory_space<vmem>>, vector<1x2x2x32xf32>,
    return
  }
  func.func @transform_0(%arg0: i32) -> (i32, i32, i32, i32) {
    %c0_i32 = arith.constant 0 : i32
    %c0_i32_0 = arith.constant 0 : i32
    %c0_i32_1 = arith.constant 0 : i32
    %c0_i32_2 = arith.constant 0 : i32
    return %arg0, %c0_i32, %c0_i32_0, %c0_i32_1 : i32, i32, i32, i32
  }
  func.func @transform_1(%arg0: i32) -> (i32, i32) {
    %c0_i32 = arith.constant 0 : i32
    %c0_i32_0 = arith.constant 0 : i32
    %c0_i32_1 = arith.constant 0 : i32
    return %c0_i32, %c0_i32_0 : i32, i32
  }
  func.func @transform_2(%arg0: i32) -> (i32, i32) {
    %c0_i32 = arith.constant 0 : i32
    %c0_i32_0 = arith.constant 0 : i32
    %c0_i32_1 = arith.constant 0 : i32
    return %c0_i32, %c0_i32_0 : i32, i32
  }
  func.func @transform_3(%arg0: i32) -> (i32, i32) {
    %c0_i32 = arith.constant 0 : i32
    %c0_i32_0 = arith.constant 0 : i32
    %c0_i32_1 = arith.constant 0 : i32
    return %c0_i32, %c0_i32_0 : i32, i32
  }
  func.func @transform_4(%arg0: i32) -> (i32, i32) {
    %c0_i32 = arith.constant 0 : i32
    %c0_i32_0 = arith.constant 0 : i32
    %c0_i32_1 = arith.constant 0 : i32
    return %c0_i32, %c0_i32_0 : i32, i32
  }
  func.func @transform_5(%arg0: i32) -> (i32, i32) {
    %c0_i32 = arith.constant 0 : i32
    %c0_i32_0 = arith.constant 0 : i32
    %c0_i32_1 = arith.constant 0 : i32
    return %c0_i32, %c0_i32_0 : i32, i32
  }
  func.func @transform_6(%arg0: i32) -> (i32, i32) {
    %c0_i32 = arith.constant 0 : i32
    %c0_i32_0 = arith.constant 0 : i32
    %c0_i32_1 = arith.constant 0 : i32
    return %c0_i32, %c0_i32_0 : i32, i32
  }
  func.func @transform_7(%arg0: i32) -> (i32, i32) {
    %c0_i32 = arith.constant 0 : i32
    %c0_i32_0 = arith.constant 0 : i32
    %c0_i32_1 = arith.constant 0 : i32
    return %c0_i32, %c0_i32_0 : i32, i32
  }
  func.func @transform_8(%arg0: i32) -> (i32, i32) {
    %c0_i32 = arith.constant 0 : i32
    %c0_i32_0 = arith.constant 0 : i32
    %c0_i32_1 = arith.constant 0 : i32
    return %c0_i32, %c0_i32_0 : i32, i32
  }
  func.func @transform_9(%arg0: i32) -> (i32, i32) {
    %c0_i32 = arith.constant 0 : i32
    %c0_i32_0 = arith.constant 0 : i32
    %c0_i32_1 = arith.constant 0 : i32
    return %c0_i32, %c0_i32_0 : i32, i32
  }
  func.func @transform_10(%arg0: i32) -> (i32, i32) {
    %c0_i32 = arith.constant 0 : i32
    %c0_i32_0 = arith.constant 0 : i32
    %c0_i32_1 = arith.constant 0 : i32
    return %c0_i32, %c0_i32_0 : i32, i32
  }
  func.func @transform_11(%arg0: i32) -> (i32, i32) {
    %c0_i32 = arith.constant 0 : i32
    %c0_i32_0 = arith.constant 0 : i32
    %c0_i32_1 = arith.constant 0 : i32
    return %c0_i32, %c0_i32_0 : i32, i32
  }
  func.func @transform_12(%arg0: i32) -> (i32, i32) {
    %c0_i32 = arith.constant 0 : i32
    %c0_i32_0 = arith.constant 0 : i32
    %c0_i32_1 = arith.constant 0 : i32
    return %c0_i32, %c0_i32_0 : i32, i32
  }
  func.func @transform_13(%arg0: i32) -> (i32, i32) {
    %c0_i32 = arith.constant 0 : i32
    %c0_i32_0 = arith.constant 0 : i32
    %c0_i32_1 = arith.constant 0 : i32
    return %c0_i32, %c0_i32_0 : i32, i32
  }
  func.func @transform_14(%arg0: i32) -> (i32, i32) {
    %c0_i32 = arith.constant 0 : i32
    %c0_i32_0 = arith.constant 0 : i32
    %c0_i32_1 = arith.constant 0 : i32
    return %c0_i32, %c0_i32_0 : i32, i32
  }
  func.func @transform_15(%arg0: i32) -> (i32, i32) {
    %c0_i32 = arith.constant 0 : i32
    %c0_i32_0 = arith.constant 0 : i32
    %c0_i32_1 = arith.constant 0 : i32
    return %c0_i32, %c0_i32_0 : i32, i32
  }
  func.func @transform_16(%arg0: i32) -> (i32, i32) {
    %c0_i32 = arith.constant 0 : i32
    %c0_i32_0 = arith.constant 0 : i32
    %c0_i32_1 = arith.constant 0 : i32
    return %c0_i32, %c0_i32_0 : i32, i32
  }
  func.func @transform_17(%arg0: i32) -> (i32, i32) {
    %c0_i32 = arith.constant 0 : i32
    %c0_i32_0 = arith.constant 0 : i32
    %c0_i32_1 = arith.constant 0 : i32
    return %c0_i32, %c0_i32_0 : i32, i32
  }
  func.func @transform_18(%arg0: i32) -> (i32, i32) {
    %c0_i32 = arith.constant 0 : i32
    %c0_i32_0 = arith.constant 0 : i32
    %c0_i32_1 = arith.constant 0 : i32
    return %c0_i32, %c0_i32_0 : i32, i32
  }
  func.func @transform_19(%arg0: i32) -> (i32, i32) {
    %c0_i32 = arith.constant 0 : i32
    %c0_i32_0 = arith.constant 0 : i32
    %c0_i32_1 = arith.constant 0 : i32
    return %c0_i32, %c0_i32_0 : i32, i32
  }
  func.func @transform_20(%arg0: i32) -> (i32, i32) {
    %c0_i32 = arith.constant 0 : i32
    %c0_i32_0 = arith.constant 0 : i32
    %c0_i32_1 = arith.constant 0 : i32
    return %c0_i32, %c0_i32_0 : i32, i32
  }
  func.func @transform_21(%arg0: i32) -> (i32, i32) {
    %c0_i32 = arith.constant 0 : i32
    %c0_i32_0 = arith.constant 0 : i32
    %c0_i32_1 = arith.constant 0 : i32
    return %c0_i32, %c0_i32_0 : i32, i32
  }
  func.func @transform_22(%arg0: i32) -> (i32, i32) {
    %c0_i32 = arith.constant 0 : i32
    %c0_i32_0 = arith.constant 0 : i32
    %c0_i32_1 = arith.constant 0 : i32
    return %c0_i32, %c0_i32_0 : i32, i32
  }
  func.func @transform_23(%arg0: i32) -> (i32, i32) {
    %c0_i32 = arith.constant 0 : i32
    %c0_i32_0 = arith.constant 0 : i32
    %c0_i32_1 = arith.constant 0 : i32
    return %c0_i32, %c0_i32_0 : i32, i32
  }
  func.func @transform_24(%arg0: i32) -> (i32, i32) {
    %c0_i32 = arith.constant 0 : i32
    %c0_i32_0 = arith.constant 0 : i32
    %c0_i32_1 = arith.constant 0 : i32
    return %c0_i32, %c0_i32_0 : i32, i32
  }
  func.func @transform_25(%arg0: i32) -> (i32, i32, i32, i32) {
    %c0_i32 = arith.constant 0 : i32
    %c0_i32_0 = arith.constant 0 : i32
    %c0_i32_1 = arith.constant 0 : i32
    %c0_i32_2 = arith.constant 0 : i32
    return %arg0, %c0_i32, %c0_i32_0, %c0_i32_1 : i32, i32, i32, i32
  }
  func.func @transform_26(%arg0: i32) -> (i32, i32, i32, i32) {
    %c0_i32 = arith.constant 0 : i32
    %c0_i32_0 = arith.constant 0 : i32
    %c0_i32_1 = arith.constant 0 : i32
    %c0_i32_2 = arith.constant 0 : i32
    return %arg0, %c0_i32, %c0_i32_0, %c0_i32_1 : i32, i32, i32, i32
  }
  func.func @transform_27(%arg0: i32) -> (i32, i32, i32, i32) {
    %c0_i32 = arith.constant 0 : i32
    %c0_i32_0 = arith.constant 0 : i32
    %c0_i32_1 = arith.constant 0 : i32
    %c0_i32_2 = arith.constant 0 : i32
    return %arg0, %c0_i32, %c0_i32_0, %c0_i32_1 : i32, i32, i32, i32
  }
}

</mosaic_0001>

<bundles_post_ra>
// kernel: encoder_ref.1
= control target key start
LH: loop header
LB: loop body
LE: loop exit
PB: predicated region body
PF: predicated region fallthrough
CT: control target
= control target key end

     0   :  { %s28687_s0 = inlined_call_operand.vmem [shape: f32[2,16,16,4], index: 0, kind: input, shape index: {}]   ;;  %s28688_s1 = inlined_call_operand.vmem [shape: bf16[36,8], index: 1, kind: input, shape index: {}]   ;;  %s28689_s2 = inlined_call_operand.vmem [shape: f32[1,8], index: 2, kind: input, shape index: {}]   ;;  %s28690_s3 = inlined_call_operand.vmem [shape: bf16[72,8], index: 3, kind: input, shape index: {}]   ;;  %s28691_s4 = inlined_call_operand.vmem [shape: f32[1,8], index: 4, kind: input, shape index: {}]   ;;  %s28692_s5 = inlined_call_operand.vmem [shape: bf16[72,8], index: 5, kind: input, shape index: {}]   ;;  %s28693_s6 = inlined_call_operand.vmem [shape: f32[1,8], index: 6, kind: input, shape index: {}]   ;;  %s28694_s7 = inlined_call_operand.vmem [shape: bf16[72,16], index: 7, kind: input, shape index: {}]   ;;  %s28695_s8 = inlined_call_operand.vmem [shape: f32[1,16], index: 8, kind: input, shape index: {}]   ;;  %s28696_s9 = inlined_call_operand.vmem [shape: bf16[144,16], index: 9, kind: input, shape index: {}]   ;;  %s28697_s10 = inlined_call_operand.vmem [shape: f32[1,16], index: 10, kind: input, shape index: {}]   ;;  %s28698_s11 = inlined_call_operand.vmem [shape: bf16[144,16], index: 11, kind: input, shape index: {}]   ;;  %s28699_s12 = inlined_call_operand.vmem [shape: f32[1,16], index: 12, kind: input, shape index: {}]   ;;  %s28700_s13 = inlined_call_operand.vmem [shape: bf16[144,32], index: 13, kind: input, shape index: {}]   ;;  %s28701_s14 = inlined_call_operand.vmem [shape: f32[1,32], index: 14, kind: input, shape index: {}]   ;;  %s28702_s15 = inlined_call_operand.vmem [shape: bf16[288,32], index: 15, kind: input, shape index: {}]   ;;  %s28703_s16 = inlined_call_operand.vmem [shape: f32[1,32], index: 16, kind: input, shape index: {}]   ;;  %s28704_s17 = inlined_call_operand.vmem [shape: bf16[288,32], index: 17, kind: input, shape index: {}]   ;;  %s28705_s18 = inlined_call_operand.vmem [shape: f32[1,32], index: 18, kind: input, shape index: {}]   ;;  %s28706_s19 = inlined_call_operand.vmem [shape: bf16[288,32], index: 19, kind: input, shape index: {}]   ;;  %s28707_s20 = inlined_call_operand.vmem [shape: f32[1,32], index: 20, kind: input, shape index: {}]   ;;  %s28708_s21 = inlined_call_operand.vmem [shape: bf16[288,32], index: 21, kind: input, shape index: {}]   ;;  %s28709_s22 = inlined_call_operand.vmem [shape: f32[1,32], index: 22, kind: input, shape index: {}]   ;;  %s28710_s23 = inlined_call_operand.vmem [shape: bf16[288,32], index: 23, kind: input, shape index: {}]   ;;  %s28711_s24 = inlined_call_operand.vmem [shape: f32[1,32], index: 24, kind: input, shape index: {}]   ;;  %s28712_s25 = inlined_call_operand.hbm [shape: f32[2,8,8,16], index: 25, kind: output, shape index: {0}]   ;;  %s28713_s26 = inlined_call_operand.hbm [shape: f32[2,4,4,32], index: 26, kind: output, shape index: {1}]   ;;  %s28714_s27 = inlined_call_operand.hbm [shape: f32[2,2,2,32], index: 27, kind: output, shape index: {2}]  }
   0x1   :  { %28784 = sst [smem:[#allocation37_spill]] %s28687_s0 }
   0x2   :  { %28785 = sst [smem:[#allocation38_spill]] %s28688_s1 }
   0x3   :  { %28786 = sst [smem:[#allocation39_spill]] %s28689_s2 }
   0x4   :  { %28787 = sst [smem:[#allocation40_spill]] %s28690_s3 }
   0x5   :  { %28788 = sst [smem:[#allocation41_spill]] %s28691_s4 }
   0x6   :  { %28789 = sst [smem:[#allocation42_spill]] %s28692_s5 }
   0x7   :  { %28790 = sst [smem:[#allocation43_spill]] %s28693_s6 }
   0x8   :  { %28791 = sst [smem:[#allocation44_spill]] %s28694_s7 }
   0x9   :  { %28792 = sst [smem:[#allocation45_spill]] %s28695_s8 }
   0xa   :  { %28793 = sst [smem:[#allocation46_spill]] %s28696_s9 }
   0xb   :  { %28794 = sst [smem:[#allocation47_spill]] %s28697_s10 }
   0xc   :  { %28795 = sst [smem:[#allocation48_spill]] %s28698_s11 }
   0xd   :  { %28796 = sst [smem:[#allocation49_spill]] %s28699_s12 }
   0xe   :  { %28797 = sst [smem:[#allocation50_spill]] %s28700_s13 }
   0xf   :  { %28798 = sst [smem:[#allocation51_spill]] %s28701_s14 }
  0x10   :  { %28799 = sst [smem:[#allocation52_spill]] %s28702_s15 }
  0x11   :  { %28800 = sst [smem:[#allocation53_spill]] %s28703_s16 }
  0x12   :  { %28801 = sst [smem:[#allocation54_spill]] %s28704_s17 }
  0x13   :  { %28802 = sst [smem:[#allocation55_spill]] %s28705_s18 }
  0x14   :  { %33 = vsyncpa [#allocation8], 0 }
  0x15   :  { %35 = vsyncpa [#allocation8 + $0x1], 0 }
  0x16   :  { %36 = vsyncpa [#allocation10], 0 }
  0x17   :  { %38 = vsyncpa [#allocation10 + $0x1], 0  ;;  %s24734_s7 = smov 0   ;;  %s24736_s4 = smov 0  }
  0x18   :  { %s24738_s8 = smov 0   ;;  %s24740_s30 = smov 0  }
  0x19 LB: > { %28803 = sst [smem:[#allocation14_spill]] %s24575_s8  ;;  %s24755_s9 = sadd.s32 4294967295, %s24579_s30   ;;  %s24579_s30 = sphi %s24740_s30, %s28906_s30   ;;  %s24575_s8 = sphi %s24738_s8, %s28903_s8   ;;  %s24571_s4 = sphi %s24736_s4, %s28905_s4   ;;  %s24567_s7 = sphi %s24734_s7, %s28904_s7  }
  0x1a   : > { %s28721_s5 = sadd.s32 4294967294, %s24579_s30   ;;  %s24759_s28 = sadd.s32 1, %s24579_s30  }
  0x1b   : > { %s581_s0 = sadd.s32 1, %s24575_s8  ;;  %s578_s10 = ssub.s32 %s24579_s30, %s24759_s28 }
  0x1c   : > { %p591_p0 = scmp.ne.s32.totalorder %s24575_s8, %s24571_s4  ;;  %p579_p1 = scmp.eq.s32.totalorder %s578_s10, 0 }
  0x1d   : > { %p592_p2 = scmp.eq.s32.totalorder %s24755_s9, 1  ;;  %p597_p3 = scmp.ne.s32.totalorder %s24571_s4, %s24567_s7 }
  0x1e   : > { %p598_p4 = scmp.eq.s32.totalorder %s28721_s5, 1  ;;  %p19013_p7 = scmp.ge.s32.totalorder %s24579_s30, 1 }
  0x1f   : > { %s24772_s29 = scalar_select %p579_p1, %s24575_s8, %s581_s0  }
  0x20   : > { %p24774_p5 = por %p592_p2, %p591_p0  ;;  %p24778_p6 = por %p598_p4, %p597_p3 }
  0x21   : > { %28804 = sst [smem:[#allocation15_spill]] %s24772_s29  ;;  %p748_p8 = scmp.lt.s32.totalorder %s24579_s30, 3 }
  0x23   : > { %p749_p9 = pnand %p19013_p7, %p748_p8 }
  0x25   : > { %752 = sbr.rel (%p749_p9) target bundleno = 5784 (0x1698), region = 120 }
  0x2c   : > { %s28807_s3 = sld [smem:[#allocation38_spill]]  ;;  %vm1154_vm0 = vcmask 1041408   ;;  %vm836_vm1 = vcmask 31744   ;;  %vm845_vm2 = vcmask 24576   ;;  %v28722_v2 = vmov 0.0   ;;  %p830_p10 = scmp.lt.s32.totalorder %s24755_s9, 1 }
  0x2d   : > { %837 = vst.msk [vmem:[#allocation2] sm:$0xff] %vm836_vm1, %v28722_v2  ;;  %838 = vst.msk [vmem:[#allocation2 + $0x8] sm:$0xff] %vm836_vm1, %v28722_v2  ;;  %vm839_vm3 = vcmask 25600   ;;  %s28808_s5 = sld [smem:[#allocation37_spill]]  ;;  %vm3881_vm4 = vcmask 1043456   ;;  %vm882_vm5 = vcmask 64512  }
  0x2e   : > { %842 = vst.msk [vmem:[#allocation2 + $0x198] sm:$0xff] %vm836_vm1, %v28722_v2  ;;  %843 = vst.msk [vmem:[#allocation2 + $0x1a0] sm:$0xff] %vm836_vm1, %v28722_v2  ;;  %s831_s11 = scalar_select %p830_p10, %s24755_s9, 1  ;;  %vm891_vm6 = vcmask 57344   ;;  %vm885_vm7 = vcmask 58368   ;;  %vm928_vm8 = vcmask 130048  }
  0x2f   : > { %847 = vst.msk [vmem:[#allocation2 + $0x18] sm:$0x1] %vm845_vm2, %v28722_v2  ;;  %848 = vst.msk [vmem:[#allocation2 + $0x30] sm:$0x1] %vm845_vm2, %v28722_v2  ;;  %s28810_s0 = sld [smem:[#allocation39_spill]]  ;;  %vm930_vm9 = vcmask 123904  }
  0x30   : > { %849 = vst.msk [vmem:[#allocation2 + $0x48] sm:$0x1] %vm845_vm2, %v28722_v2  ;;  %850 = vst.msk [vmem:[#allocation2 + $0x60] sm:$0x1] %vm845_vm2, %v28722_v2  ;;  %s19892_s2 = sshll.u32 %s831_s11, 8  ;;  %s28834_s11 = sld [smem:[#allocation44_spill]] }
  0x31   : > { %851 = vst.msk [vmem:[#allocation2 + $0x78] sm:$0x1] %vm845_vm2, %v28722_v2  ;;  %852 = vst.msk [vmem:[#allocation2 + $0x90] sm:$0x1] %vm845_vm2, %v28722_v2  ;;  %vm935_vm10 = vcmask 122880   ;;  %vm12111_vm11 = vcmask 1041409  }
  0x32   : > { %v1105_v0 = vld [vmem:[%s28807_s3] sm:$0x3]  ;;  %853 = vst.msk [vmem:[#allocation2 + $0xa8] sm:$0x1] %vm845_vm2, %v28722_v2  ;;  %854 = vst.msk [vmem:[#allocation2 + $0xc0] sm:$0x1] %vm845_vm2, %v28722_v2 }
  0x33   : > { %24150 = vmatprep.subr.msk.bf16.mxu0 %vm1154_vm0, %v1105_v0  ;;  %v1156_v1 = vsel %vm1154_vm0, %v1105_v0, 0  ;;  %855 = vst.msk [vmem:[#allocation2 + $0xd8] sm:$0x1] %vm845_vm2, %v28722_v2  ;;  %856 = vst.msk [vmem:[#allocation2 + $0xf0] sm:$0x1] %vm845_vm2, %v28722_v2  ;;  %24151 = vmatprep.subr.msk.bf16.mxu1 %vm1154_vm0, %v1105_v0  ;;  %s24884_s29 = scalar_lea.vmem %s28808_s5, %s19892_s2  ;;  %s28832_s5 = sld [smem:[#allocation42_spill]] }
  0x34   : > { %857 = vst.msk [vmem:[#allocation2 + $0x108] sm:$0x1] %vm845_vm2, %v28722_v2  ;;  %858 = vst.msk [vmem:[#allocation2 + $0x120] sm:$0x1] %vm845_vm2, %v28722_v2  ;;  %20779 = vmatpush3.bf16.msra.mxu0 %v1156_v1  ;;  %22633 = vmatpush3.bf16.msra.mxu1 %v1156_v1  ;;  %v1058_v5 = vld [vmem:[#allocation2 + $0x8] sm:$0xff]  ;;  %v985_v6 = vld [vmem:[%s24884_s29] sm:$0xff] }
  0x35   : > { %859 = vst.msk [vmem:[#allocation2 + $0x138] sm:$0x1] %vm845_vm2, %v28722_v2  ;;  %860 = vst.msk [vmem:[#allocation2 + $0x150] sm:$0x1] %vm845_vm2, %v28722_v2  ;;  %v986_v7 = vld [vmem:[%s24884_s29 + $0x8] sm:$0xff]  ;;  %v987_v9 = vld [vmem:[%s24884_s29 + $0x10] sm:$0xff] }
  0x36   : > { %861 = vst.msk [vmem:[#allocation2 + $0x168] sm:$0x1] %vm845_vm2, %v28722_v2  ;;  %862 = vst.msk [vmem:[#allocation2 + $0x180] sm:$0x1] %vm845_vm2, %v28722_v2  ;;  %v988_v10 = vld [vmem:[%s24884_s29 + $0x18] sm:$0xff]  ;;  %v989_v12 = vld [vmem:[%s24884_s29 + $0x20] sm:$0xff] }
  0x37   : > { %865 = vst.msk [vmem:[#allocation2 + $0x29] sm:$0x1] %vm845_vm2, %v28722_v2  ;;  %866 = vst.msk [vmem:[#allocation2 + $0x41] sm:$0x1] %vm845_vm2, %v28722_v2  ;;  %v990_v13 = vld [vmem:[%s24884_s29 + $0x28] sm:$0xff]  ;;  %v991_v14 = vld [vmem:[%s24884_s29 + $0x30] sm:$0xff] }
  0x38   : > { %867 = vst.msk [vmem:[#allocation2 + $0x59] sm:$0x1] %vm845_vm2, %v28722_v2  ;;  %868 = vst.msk [vmem:[#allocation2 + $0x71] sm:$0x1] %vm845_vm2, %v28722_v2  ;;  %v992_v15 = vld [vmem:[%s24884_s29 + $0x38] sm:$0xff]  ;;  %v993_v16 = vld [vmem:[%s24884_s29 + $0x40] sm:$0xff] }
  0x39   : > { %869 = vst.msk [vmem:[#allocation2 + $0x89] sm:$0x1] %vm845_vm2, %v28722_v2  ;;  %870 = vst.msk [vmem:[#allocation2 + $0xa1] sm:$0x1] %vm845_vm2, %v28722_v2  ;;  %v994_v17 = vld [vmem:[%s24884_s29 + $0x48] sm:$0xff]  ;;  %v995_v18 = vld [vmem:[%s24884_s29 + $0x50] sm:$0xff] }
  0x3a   : > { %871 = vst.msk [vmem:[#allocation2 + $0xb9] sm:$0x1] %vm845_vm2, %v28722_v2  ;;  %872 = vst.msk [vmem:[#allocation2 + $0xd1] sm:$0x1] %vm845_vm2, %v28722_v2  ;;  %v996_v19 = vld [vmem:[%s24884_s29 + $0x58] sm:$0xff]  ;;  %v997_v20 = vld [vmem:[%s24884_s29 + $0x60] sm:$0xff] }
  0x3b   : > { %873 = vst.msk [vmem:[#allocation2 + $0xe9] sm:$0x1] %vm845_vm2, %v28722_v2  ;;  %874 = vst.msk [vmem:[#allocation2 + $0x101] sm:$0x1] %vm845_vm2, %v28722_v2  ;;  %v998_v21 = vld [vmem:[%s24884_s29 + $0x68] sm:$0xff]  ;;  %v999_v22 = vld [vmem:[%s24884_s29 + $0x70] sm:$0xff] }
  0x3c   : > { %875 = vst.msk [vmem:[#allocation2 + $0x119] sm:$0x1] %vm845_vm2, %v28722_v2  ;;  %876 = vst.msk [vmem:[#allocation2 + $0x131] sm:$0x1] %vm845_vm2, %v28722_v2  ;;  %v1000_v23 = vld [vmem:[%s24884_s29 + $0x78] sm:$0xff]  ;;  %v1001_v24 = vld [vmem:[%s24884_s29 + $0x80] sm:$0xff] }
  0x3d   : > { %877 = vst.msk [vmem:[#allocation2 + $0x149] sm:$0x1] %vm845_vm2, %v28722_v2  ;;  %878 = vst.msk [vmem:[#allocation2 + $0x161] sm:$0x1] %vm845_vm2, %v28722_v2  ;;  %v1002_v25 = vld [vmem:[%s24884_s29 + $0x88] sm:$0xff]  ;;  %v1003_v26 = vld [vmem:[%s24884_s29 + $0x90] sm:$0xff] }
  0x3e   : > { %879 = vst.msk [vmem:[#allocation2 + $0x179] sm:$0x1] %vm845_vm2, %v28722_v2  ;;  %880 = vst.msk [vmem:[#allocation2 + $0x191] sm:$0x1] %vm845_vm2, %v28722_v2  ;;  %v1004_v27 = vld [vmem:[%s24884_s29 + $0x98] sm:$0xff]  ;;  %v1005_v46 = vld [vmem:[%s24884_s29 + $0xa0] sm:$0xff] }
  0x3f   : > { %v24864_v3 = vld [vmem:[%s28807_s3] ss:$0 sps:$4 sm:$0xcc]   ;;  %846 = vst.msk [vmem:[#allocation2] sm:$0x1] %vm845_vm2, %v28722_v2  ;;  %v1006_v47 = vld [vmem:[%s24884_s29 + $0xa8] sm:$0xff] }
  0x40   : > { %863 = vst.msk [vmem:[#allocation2 + $0x198] sm:$0x1] %vm845_vm2, %v28722_v2  ;;  %v1403_v4 = vrot.slane %v24864_v3, 2  ;;  %v1696_v35 = vld [vmem:[%s28807_s3 + $0x4] sm:$0x3]  ;;  %v1007_v48 = vld [vmem:[%s24884_s29 + $0xb0] sm:$0xff] }
  0x41   : > { %840 = vst.msk [vmem:[#allocation2 + $0x10] sm:$0x3] %vm839_vm3, %v28722_v2  ;;  %844 = vst.msk [vmem:[#allocation2 + $0x1a8] sm:$0x3] %vm839_vm3, %v28722_v2  ;;  %v1008_v49 = vld [vmem:[%s24884_s29 + $0xb8] sm:$0xff]  ;;  %v1009_v50 = vld [vmem:[%s24884_s29 + $0xc0] sm:$0xff] }
  0x42   : > { %864 = vst.msk [vmem:[#allocation2 + $0x11] sm:$0x1] %vm845_vm2, %v28722_v2  ;;  %881 = vst.msk [vmem:[#allocation2 + $0x1a9] sm:$0x1] %vm845_vm2, %v28722_v2  ;;  %24152 = vmatprep.subr.msk.bf16.mxu0 %vm1154_vm0, %v1403_v4  ;;  %v1453_v31 = vsel %vm1154_vm0, %v1403_v4, 0  ;;  %v1010_v51 = vld [vmem:[%s24884_s29 + $0xc8] sm:$0xff] }
  0x43   : > { %1018 = vst.msk [vmem:[#allocation2 + $0x19] sm:$0xff] %vm836_vm1, %v985_v6  ;;  %1019 = vst.msk [vmem:[#allocation2 + $0x21] sm:$0xff] %vm836_vm1, %v986_v7  ;;  %v1011_v52 = vld [vmem:[%s24884_s29 + $0xd0] sm:$0xff]  ;;  %v1012_v53 = vld [vmem:[%s24884_s29 + $0xd8] sm:$0xff]  ;;  %v1746_v4 = vsel %vm1154_vm0, %v1696_v35, 0  ;;  %s28890_s2 = sld [smem:[#allocation46_spill]] }
  0x44   : > { %1020 = vst.msk [vmem:[#allocation2 + $0x31] sm:$0xff] %vm836_vm1, %v987_v9  ;;  %1021 = vst.msk [vmem:[#allocation2 + $0x39] sm:$0xff] %vm836_vm1, %v988_v10  ;;  %v1013_v54 = vld [vmem:[%s24884_s29 + $0xe0] sm:$0xff]  ;;  %v1014_v55 = vld [vmem:[%s24884_s29 + $0xe8] sm:$0xff]  ;;  %vm12113_vm12 = vcmask 1042434   ;;  %vm12115_vm13 = vcmask 1043459  }
  0x45   : > { %1022 = vst.msk [vmem:[#allocation2 + $0x49] sm:$0xff] %vm836_vm1, %v989_v12  ;;  %1023 = vst.msk [vmem:[#allocation2 + $0x51] sm:$0xff] %vm836_vm1, %v990_v13  ;;  %v1351_v60 = vld [vmem:[#allocation2 + $0x1] sm:$0xff]  ;;  %vm12117_vm14 = vcmask 1044484   ;;  %vm12119_vm15 = vcmask 1045509   ;;  %s28894_s13 = sld [smem:[#allocation50_spill]] }
  0x46   : > { %v1057_v8 = vld [vmem:[#allocation2] sm:$0xff]  ;;  %1024 = vst.msk [vmem:[#allocation2 + $0x61] sm:$0xff] %vm836_vm1, %v991_v14  ;;  %1025 = vst.msk [vmem:[#allocation2 + $0x69] sm:$0xff] %vm836_vm1, %v992_v15  ;;  %s27732_s10 = sand.u32 1, %s24571_s4   ;;  %s28895_s12 = sld [smem:[#allocation49_spill]]  ;;  %vm973_vm2 = vcmask 257024  }
  0x47   : > { %v1089_v11 = vpack.c.bf16 %v1058_v5, %v1057_v8  ;;  %1026 = vst.msk [vmem:[#allocation2 + $0x79] sm:$0xff] %vm836_vm1, %v993_v16  ;;  %1027 = vst.msk [vmem:[#allocation2 + $0x81] sm:$0xff] %vm836_vm1, %v994_v17  ;;  %v24981_v0 = vld [vmem:[%s28807_s3 + $0x4] ss:$0 sps:$4 sm:$0xcc]   ;;  %s19014_s8 = sshll.u32 %s27732_s10, 6 }
  0x48   : > { %1028 = vst.msk [vmem:[#allocation2 + $0x91] sm:$0xff] %vm836_vm1, %v995_v18  ;;  %1029 = vst.msk [vmem:[#allocation2 + $0x99] sm:$0xff] %vm836_vm1, %v996_v19  ;;  %v1352_v61 = vld [vmem:[#allocation2 + $0x9] sm:$0xff]  ;;  %v1993_v7 = vrot.slane %v24981_v0, 2  ;;  %vm956_vm3 = vcmask 259072   ;;  %s28896_s15 = sld [smem:[#allocation52_spill]] }
  0x49   : > { %20780 = vmatprep.mubr.msk.bf16.mxu0 %vm836_vm1, %v1089_v11  ;;  %1030 = vst.msk [vmem:[#allocation2 + $0xa9] sm:$0xff] %vm836_vm1, %v997_v20  ;;  %1031 = vst.msk [vmem:[#allocation2 + $0xb1] sm:$0xff] %vm836_vm1, %v998_v21  ;;  %v1383_v63 = vpack.c.bf16 %v1352_v61, %v1351_v60  ;;  %s28897_s14 = sld [smem:[#allocation51_spill]]  ;;  %s28898_s17 = sld [smem:[#allocation54_spill]] }
  0x4a   : > { %1032 = vst.msk [vmem:[#allocation2 + $0xc1] sm:$0xff] %vm836_vm1, %v999_v22  ;;  %1033 = vst.msk [vmem:[#allocation2 + $0xc9] sm:$0xff] %vm836_vm1, %v1000_v23  ;;  %v1059_v28 = vld [vmem:[#allocation2 + $0x18] sm:$0xff]  ;;  %v1060_v29 = vld [vmem:[#allocation2 + $0x20] sm:$0xff]  ;;  %s28899_s16 = sld [smem:[#allocation53_spill]]  ;;  %s28900_s18 = sld [smem:[#allocation55_spill]] }
  0x4b   : > { %1034 = vst.msk [vmem:[#allocation2 + $0xd9] sm:$0xff] %vm836_vm1, %v1001_v24  ;;  %1035 = vst.msk [vmem:[#allocation2 + $0xe1] sm:$0xff] %vm836_vm1, %v1002_v25  ;;  %v24927_v30 = vpack.c.bf16 %v1060_v29, %v1059_v28  ;;  %v1061_v32 = vld [vmem:[#allocation2 + $0x30] sm:$0xff]  ;;  %v1062_v33 = vld [vmem:[#allocation2 + $0x38] sm:$0xff] }
  0x4c   : > { %1036 = vst.msk [vmem:[#allocation2 + $0xf1] sm:$0xff] %vm836_vm1, %v1003_v26  ;;  %1037 = vst.msk [vmem:[#allocation2 + $0xf9] sm:$0xff] %vm836_vm1, %v1004_v27  ;;  %v24930_v34 = vpack.c.bf16 %v1062_v33, %v1061_v32  ;;  %v1063_v36 = vld [vmem:[#allocation2 + $0x48] sm:$0xff]  ;;  %v1064_v37 = vld [vmem:[#allocation2 + $0x50] sm:$0xff] }
  0x4d   : > { %20781 = vmatmul.mubr.msk.bf16.vlgmr.msra.gmra.mrb[0].mxu0 %vm836_vm1, %v24927_v30  ;;  %v1065_v38 = vld [vmem:[#allocation2 + $0x60] sm:$0xff]  ;;  %v1066_v39 = vld [vmem:[#allocation2 + $0x68] sm:$0xff]  ;;  %v24940_v40 = vpack.c.bf16 %v1064_v37, %v1063_v36  ;;  %1038 = vst.msk [vmem:[#allocation2 + $0x109] sm:$0xff] %vm836_vm1, %v1005_v46  ;;  %1039 = vst.msk [vmem:[#allocation2 + $0x111] sm:$0xff] %vm836_vm1, %v1006_v47 }
  0x4e   : > { %20813 = vmatpush3.bf16.msra.mxu0 %v1453_v31  ;;  %20784 = vmatprep.mubr.msk.bf16.mxu0 %vm836_vm1, %v24930_v34  ;;  %v24942_v41 = vpack.c.bf16 %v1066_v39, %v1065_v38  ;;  %v1067_v42 = vld [vmem:[#allocation2 + $0x78] sm:$0xff]  ;;  %v1068_v43 = vld [vmem:[#allocation2 + $0x80] sm:$0xff]  ;;  %1040 = vst.msk [vmem:[#allocation2 + $0x121] sm:$0xff] %vm836_vm1, %v1007_v48  ;;  %1041 = vst.msk [vmem:[#allocation2 + $0x129] sm:$0xff] %vm836_vm1, %v1008_v49 }
  0x4f   : > { %24153 = vmatprep.subr.msk.bf16.mxu0 %vm1154_vm0, %v1696_v35  ;;  %v1069_v44 = vld [vmem:[#allocation2 + $0x90] sm:$0xff]  ;;  %v1070_v45 = vld [vmem:[#allocation2 + $0x98] sm:$0xff]  ;;  %1042 = vst.msk [vmem:[#allocation2 + $0x139] sm:$0xff] %vm836_vm1, %v1009_v50  ;;  %1043 = vst.msk [vmem:[#allocation2 + $0x141] sm:$0xff] %vm836_vm1, %v1010_v51  ;;  %v24966_v56 = vpack.c.bf16 %v1068_v43, %v1067_v42 }
  0x50   : > { %1044 = vst.msk [vmem:[#allocation2 + $0x151] sm:$0xff] %vm836_vm1, %v1011_v52  ;;  %1045 = vst.msk [vmem:[#allocation2 + $0x159] sm:$0xff] %vm836_vm1, %v1012_v53  ;;  %v24970_v57 = vpack.c.bf16 %v1070_v45, %v1069_v44  ;;  %v1071_v58 = vld [vmem:[#allocation2 + $0xa8] sm:$0xff]  ;;  %v1072_v59 = vld [vmem:[#allocation2 + $0xb0] sm:$0xff] }
  0x51   : > { %1046 = vst.msk [vmem:[#allocation2 + $0x169] sm:$0xff] %vm836_vm1, %v1013_v54  ;;  %1047 = vst.msk [vmem:[#allocation2 + $0x171] sm:$0xff] %vm836_vm1, %v1014_v55  ;;  %v24976_v62 = vpack.c.bf16 %v1072_v59, %v1071_v58  ;;  %v1353_v1 = vld [vmem:[#allocation2 + $0x19] sm:$0xff]  ;;  %v1354_v3 = vld [vmem:[#allocation2 + $0x21] sm:$0xff] }
  0x52   : > { %v1355_v5 = vld [vmem:[#allocation2 + $0x31] sm:$0xff]  ;;  %v1356_v6 = vld [vmem:[#allocation2 + $0x39] sm:$0xff]  ;;  %v24988_v8 = vpack.c.bf16 %v1354_v3, %v1353_v1  ;;  %v1357_v10 = vld [vmem:[#allocation2 + $0x49] sm:$0xff]  ;;  %883 = vst.msk [vmem:[#allocation3] sm:$0xff] %vm882_vm5, %v28722_v2 }
  0x53   : > { %v24990_v9 = vpack.c.bf16 %v1356_v6, %v1355_v5  ;;  %v1358_v11 = vld [vmem:[#allocation2 + $0x51] sm:$0xff]  ;;  %v1359_v12 = vld [vmem:[#allocation2 + $0x61] sm:$0xff]  ;;  %v1360_v13 = vld [vmem:[#allocation2 + $0x69] sm:$0xff]  ;;  %884 = vst.msk [vmem:[#allocation3 + $0x8] sm:$0xff] %vm882_vm5, %v28722_v2 }
  0x54   : > { %v24999_v14 = vpack.c.bf16 %v1358_v11, %v1357_v10  ;;  %v25001_v15 = vpack.c.bf16 %v1360_v13, %v1359_v12  ;;  %v1361_v16 = vld [vmem:[#allocation2 + $0x79] sm:$0xff]  ;;  %v1362_v17 = vld [vmem:[#allocation2 + $0x81] sm:$0xff]  ;;  %v1363_v18 = vld [vmem:[#allocation2 + $0x91] sm:$0xff]  ;;  %888 = vst.msk [vmem:[#allocation3 + $0x198] sm:$0xff] %vm882_vm5, %v28722_v2 }
  0x55   : > { %20785 = vmatmul.mubr.msk.bf16.gmra.mrb[4].mxu0 %vm836_vm1, %v24940_v40  ;;  %v1364_v19 = vld [vmem:[#allocation2 + $0x99] sm:$0xff]  ;;  %v25007_v20 = vpack.c.bf16 %v1362_v17, %v1361_v16  ;;  %v1365_v22 = vld [vmem:[#allocation2 + $0xa9] sm:$0xff]  ;;  %v1366_v23 = vld [vmem:[#allocation2 + $0xb1] sm:$0xff]  ;;  %889 = vst.msk [vmem:[#allocation3 + $0x1a0] sm:$0xff] %vm882_vm5, %v28722_v2 }
  0x56   : > { %20788 = vmatprep.mubr.msk.bf16.mxu0 %vm836_vm1, %v24942_v41  ;;  %v25009_v21 = vpack.c.bf16 %v1364_v19, %v1363_v18  ;;  %v1367_v24 = vld [vmem:[#allocation2 + $0xc1] sm:$0xff]  ;;  %v1368_v25 = vld [vmem:[#allocation2 + $0xc9] sm:$0xff]  ;;  %v25017_v29 = vpack.c.bf16 %v1366_v23, %v1365_v22  ;;  %v1369_v32 = vld [vmem:[#allocation2 + $0xd9] sm:$0xff]  ;;  %892 = vst.msk [vmem:[#allocation3] sm:$0x1] %vm891_vm6, %v28722_v2 }
  0x57   : > { %v1955_v26 = vld [vmem:[#allocation2 + $0xc0] sm:$0xff]  ;;  %v1956_v27 = vld [vmem:[#allocation2 + $0xc8] sm:$0xff]  ;;  %v25021_v31 = vpack.c.bf16 %v1368_v25, %v1367_v24  ;;  %v1371_v35 = vld [vmem:[#allocation2 + $0xf1] sm:$0xff]  ;;  %893 = vst.msk [vmem:[#allocation3 + $0x18] sm:$0x1] %vm891_vm6, %v28722_v2 }
  0x58   : > { %v25015_v28 = vpack.c.bf16 %v1956_v27, %v1955_v26  ;;  %v1370_v33 = vld [vmem:[#allocation2 + $0xe1] sm:$0xff]  ;;  %v1372_v36 = vld [vmem:[#allocation2 + $0xf9] sm:$0xff]  ;;  %v1959_v42 = vld [vmem:[#allocation2 + $0xf0] sm:$0xff]  ;;  %894 = vst.msk [vmem:[#allocation3 + $0x30] sm:$0x1] %vm891_vm6, %v28722_v2 }
  0x59   : > { %v1957_v37 = vld [vmem:[#allocation2 + $0xd8] sm:$0xff]  ;;  %v1958_v38 = vld [vmem:[#allocation2 + $0xe0] sm:$0xff]  ;;  %v25033_v45 = vpack.c.bf16 %v1370_v33, %v1369_v32  ;;  %v25037_v46 = vpack.c.bf16 %v1372_v36, %v1371_v35  ;;  %v1373_v47 = vld [vmem:[#allocation2 + $0x109] sm:$0xff]  ;;  %895 = vst.msk [vmem:[#allocation3 + $0x48] sm:$0x1] %vm891_vm6, %v28722_v2 }
  0x5a   : > { %20796 = vmatprep.mubr.msk.bf16.mxu1 %vm836_vm1, %v25015_v28  ;;  %v25027_v39 = vpack.c.bf16 %v1958_v38, %v1957_v37  ;;  %v1960_v43 = vld [vmem:[#allocation2 + $0xf8] sm:$0xff]  ;;  %v1375_v49 = vld [vmem:[#allocation2 + $0x121] sm:$0xff]  ;;  %v1376_v50 = vld [vmem:[#allocation2 + $0x129] sm:$0xff]  ;;  %896 = vst.msk [vmem:[#allocation3 + $0x60] sm:$0x1] %vm891_vm6, %v28722_v2 }
  0x5b   : > { %v25029_v44 = vpack.c.bf16 %v1960_v43, %v1959_v42  ;;  %v1374_v48 = vld [vmem:[#allocation2 + $0x111] sm:$0xff]  ;;  %v1961_v51 = vld [vmem:[#allocation2 + $0x108] sm:$0xff]  ;;  %v1963_v54 = vld [vmem:[#allocation2 + $0x120] sm:$0xff]  ;;  %v25053_v60 = vpack.c.bf16 %v1376_v50, %v1375_v49  ;;  %v2043_v42 = vsel %vm1154_vm0, %v1993_v7, 0  ;;  %897 = vst.msk [vmem:[#allocation3 + $0x78] sm:$0x1] %vm891_vm6, %v28722_v2 }
  0x5c   : > { %20797 = vmatmul.mubr.msk.bf16.vlgmr.msra.gmra.mrb[0].mxu1 %vm836_vm1, %v25027_v39  ;;  %v1962_v52 = vld [vmem:[#allocation2 + $0x110] sm:$0xff]  ;;  %v1964_v55 = vld [vmem:[#allocation2 + $0x128] sm:$0xff]  ;;  %v25049_v59 = vpack.c.bf16 %v1374_v48, %v1373_v47  ;;  %v1377_v61 = vld [vmem:[#allocation2 + $0x139] sm:$0xff]  ;;  %898 = vst.msk [vmem:[#allocation3 + $0x90] sm:$0x1] %vm891_vm6, %v28722_v2 }
  0x5d   : > { %20789 = vmatmul.mubr.msk.bf16.gmra.mrb[8].mxu0 %vm836_vm1, %v24966_v56  ;;  %20800 = vmatprep.mubr.msk.bf16.mxu1 %vm836_vm1, %v25029_v44  ;;  %v25043_v53 = vpack.c.bf16 %v1962_v52, %v1961_v51  ;;  %v25045_v58 = vpack.c.bf16 %v1964_v55, %v1963_v54  ;;  %v1379_v1 = vld [vmem:[#allocation2 + $0x151] sm:$0xff]  ;;  %v1380_v3 = vld [vmem:[#allocation2 + $0x159] sm:$0xff]  ;;  %v1381_v19 = vld [vmem:[#allocation2 + $0x169] sm:$0xff]  ;;  %899 = vst.msk [vmem:[#allocation3 + $0xa8] sm:$0x1] %vm891_vm6, %v28722_v2 }
  0x5e   : > { %20792 = vmatprep.mubr.msk.bf16.mxu0 %vm836_vm1, %v24970_v57  ;;  %v1966_v5 = vld [vmem:[#allocation2 + $0x140] sm:$0xff]  ;;  %v1967_v10 = vld [vmem:[#allocation2 + $0x150] sm:$0xff]  ;;  %v1968_v11 = vld [vmem:[#allocation2 + $0x158] sm:$0xff]  ;;  %v25069_v16 = vpack.c.bf16 %v1380_v3, %v1379_v1  ;;  %900 = vst.msk [vmem:[#allocation3 + $0xc0] sm:$0x1] %vm891_vm6, %v28722_v2 }
  0x5f   : > { %v25061_v12 = vpack.c.bf16 %v1968_v11, %v1967_v10  ;;  %v1015_v17 = vld [vmem:[%s24884_s29 + $0xf0] sm:$0xff]  ;;  %v1016_v18 = vld [vmem:[%s24884_s29 + $0xf8] sm:$0xff]  ;;  %v1648_v23 = vld [vmem:[#allocation2 + $0x2] sm:$0xff]  ;;  %s28809_s29 = sld [smem:[#allocation40_spill]]  ;;  %901 = vst.msk [vmem:[#allocation3 + $0xd8] sm:$0x1] %vm891_vm6, %v28722_v2 }
  0x60   : > { %1048 = vst.msk [vmem:[#allocation2 + $0x181] sm:$0xff] %vm836_vm1, %v1015_v17  ;;  %1049 = vst.msk [vmem:[#allocation2 + $0x189] sm:$0xff] %vm836_vm1, %v1016_v18  ;;  %v1382_v22 = vld [vmem:[#allocation2 + $0x171] sm:$0xff]  ;;  %v1969_v25 = vld [vmem:[#allocation2 + $0x168] sm:$0xff] }
  0x61   : > { %v1649_v24 = vld [vmem:[#allocation2 + $0xa] sm:$0xff]  ;;  %v25083_v32 = vpack.c.bf16 %v1382_v22, %v1381_v19  ;;  %v1650_v35 = vld [vmem:[#allocation2 + $0x1a] sm:$0xff]  ;;  %v1651_v36 = vld [vmem:[#allocation2 + $0x22] sm:$0xff]  ;;  %902 = vst.msk [vmem:[#allocation3 + $0xf0] sm:$0x1] %vm891_vm6, %v28722_v2 }
  0x62   : > { %v1970_v26 = vld [vmem:[#allocation2 + $0x170] sm:$0xff]  ;;  %v1680_v33 = vpack.c.bf16 %v1649_v24, %v1648_v23  ;;  %v1653_v38 = vld [vmem:[#allocation2 + $0x3a] sm:$0xff]  ;;  %v25091_v43 = vpack.c.bf16 %v1651_v36, %v1650_v35  ;;  %v2286_v48 = vld [vmem:[%s28807_s3 + $0x8] sm:$0x3]  ;;  %903 = vst.msk [vmem:[#allocation3 + $0x108] sm:$0x1] %vm891_vm6, %v28722_v2 }
  0x63   : > { %v25079_v27 = vpack.c.bf16 %v1970_v26, %v1969_v25  ;;  %v1652_v37 = vld [vmem:[#allocation2 + $0x32] sm:$0xff]  ;;  %v1654_v49 = vld [vmem:[#allocation2 + $0x4a] sm:$0xff]  ;;  %v1656_v51 = vld [vmem:[#allocation2 + $0x62] sm:$0xff]  ;;  %904 = vst.msk [vmem:[#allocation3 + $0x120] sm:$0x1] %vm891_vm6, %v28722_v2 }
  0x64   : > { %20801 = vmatmul.mubr.msk.bf16.gmra.mrb[4].mxu1 %vm836_vm1, %v25043_v53  ;;  %v25093_v47 = vpack.c.bf16 %v1653_v38, %v1652_v37  ;;  %v1655_v50 = vld [vmem:[#allocation2 + $0x52] sm:$0xff]  ;;  %v1657_v52 = vld [vmem:[#allocation2 + $0x6a] sm:$0xff]  ;;  %v1658_v54 = vld [vmem:[#allocation2 + $0x7a] sm:$0xff]  ;;  %905 = vst.msk [vmem:[#allocation3 + $0x138] sm:$0x1] %vm891_vm6, %v28722_v2 }
  0x65   : > { %20793 = vmatmul.mubr.msk.bf16.gmra.mrb[12].mxu0 %vm836_vm1, %v24976_v62  ;;  %20804 = vmatprep.mubr.msk.bf16.mxu1 %vm836_vm1, %v25045_v58  ;;  %v25103_v0 = vpack.c.bf16 %v1655_v50, %v1654_v49  ;;  %v1659_v55 = vld [vmem:[#allocation2 + $0x82] sm:$0xff]  ;;  %v1665_v11 = vld [vmem:[#allocation2 + $0xca] sm:$0xff]  ;;  %v1666_v19 = vld [vmem:[#allocation2 + $0xda] sm:$0xff]  ;;  %906 = vst.msk [vmem:[#allocation3 + $0x150] sm:$0x1] %vm891_vm6, %v28722_v2 }
  0x66   : > { %20814 = vmatprep.mubr.msk.bf16.mxu0 %vm836_vm1, %v1383_v63  ;;  %v1378_v63 = vld [vmem:[#allocation2 + $0x141] sm:$0xff]  ;;  %v25111_v1 = vpack.c.bf16 %v1659_v55, %v1658_v54  ;;  %v1668_v23 = vld [vmem:[#allocation2 + $0xf2] sm:$0xff]  ;;  %v1673_v37 = vld [vmem:[#allocation2 + $0x12a] sm:$0xff]  ;;  %907 = vst.msk [vmem:[#allocation3 + $0x168] sm:$0x1] %vm891_vm6, %v28722_v2 }
  0x67   : > { %v25065_v13 = vpack.c.bf16 %v1378_v63, %v1377_v61  ;;  %v1660_v61 = vld [vmem:[#allocation2 + $0x92] sm:$0xff]  ;;  %v1661_v63 = vld [vmem:[#allocation2 + $0x9a] sm:$0xff]  ;;  %v1664_v10 = vld [vmem:[#allocation2 + $0xc2] sm:$0xff]  ;;  %908 = vst.msk [vmem:[#allocation3 + $0x180] sm:$0x1] %vm891_vm6, %v28722_v2 }
  0x68   : > { %v25113_v3 = vpack.c.bf16 %v1661_v63, %v1660_v61  ;;  %v25121_v18 = vpack.c.bf16 %v1665_v11, %v1664_v10  ;;  %v1667_v22 = vld [vmem:[#allocation2 + $0xe2] sm:$0xff]  ;;  %v1669_v24 = vld [vmem:[#allocation2 + $0xfa] sm:$0xff]  ;;  %v1671_v35 = vld [vmem:[#allocation2 + $0x112] sm:$0xff]  ;;  %v2336_v10 = vsel %vm1154_vm0, %v2286_v48, 0  ;;  %909 = vst.msk [vmem:[#allocation3 + $0x198] sm:$0x1] %vm891_vm6, %v28722_v2 }
  0x69   : > { %v25127_v25 = vpack.c.bf16 %v1667_v22, %v1666_v19  ;;  %v25129_v26 = vpack.c.bf16 %v1669_v24, %v1668_v23  ;;  %v1672_v36 = vld [vmem:[#allocation2 + $0x122] sm:$0xff]  ;;  %v1674_v49 = vld [vmem:[#allocation2 + $0x13a] sm:$0xff]  ;;  %v1678_v61 = vld [vmem:[#allocation2 + $0x16a] sm:$0xff]  ;;  %911 = vst.msk [vmem:[#allocation3 + $0x29] sm:$0x1] %vm891_vm6, %v28722_v2 }
  0x6a   : > { %v1675_v50 = vld [vmem:[#allocation2 + $0x142] sm:$0xff]  ;;  %v1679_v63 = vld [vmem:[#allocation2 + $0x172] sm:$0xff]  ;;  %v2877_v23 = vld [vmem:[%s28807_s3 + $0xc] sm:$0x3]  ;;  %912 = vst.msk [vmem:[#allocation3 + $0x41] sm:$0x1] %vm891_vm6, %v28722_v2 }
  0x6b   : > { %v25143_v54 = vpack.c.bf16 %v1675_v50, %v1674_v49  ;;  %v2269_v24 = vld [vmem:[#allocation2 + $0x189] sm:$0xff]  ;;  %913 = vst.msk [vmem:[#allocation3 + $0x59] sm:$0x1] %vm891_vm6, %v28722_v2  ;;  %914 = vst.msk [vmem:[#allocation3 + $0x71] sm:$0x1] %vm891_vm6, %v28722_v2 }
  0x6c   : > { %v2562_v49 = vld [vmem:[#allocation2 + $0x18a] sm:$0xff]  ;;  %915 = vst.msk [vmem:[#allocation3 + $0x89] sm:$0x1] %vm891_vm6, %v28722_v2  ;;  %916 = vst.msk [vmem:[#allocation3 + $0xa1] sm:$0x1] %vm891_vm6, %v28722_v2 }
  0x6d   : > { %20815 = vmatmul.mubr.msk.bf16.vlgmr.msra.gmra.mrb[0].mxu0 %vm836_vm1, %v24988_v8  ;;  %917 = vst.msk [vmem:[#allocation3 + $0xb9] sm:$0x1] %vm891_vm6, %v28722_v2  ;;  %918 = vst.msk [vmem:[#allocation3 + $0xd1] sm:$0x1] %vm891_vm6, %v28722_v2 }
  0x6e   : > { %20847 = vmatpush3.bf16.msra.mxu0 %v1746_v4  ;;  %20818 = vmatprep.mubr.msk.bf16.mxu0 %vm836_vm1, %v24990_v9  ;;  %v1965_v4 = vld [vmem:[#allocation2 + $0x138] sm:$0xff]  ;;  %919 = vst.msk [vmem:[#allocation3 + $0xe9] sm:$0x1] %vm891_vm6, %v28722_v2  ;;  %920 = vst.msk [vmem:[#allocation3 + $0x101] sm:$0x1] %vm891_vm6, %v28722_v2 }
  0x6f   : > { %24154 = vmatprep.subr.msk.bf16.mxu0 %vm1154_vm0, %v1993_v7  ;;  %v25059_v6 = vpack.c.bf16 %v1966_v5, %v1965_v4  ;;  %v25105_v7 = vpack.c.bf16 %v1657_v52, %v1656_v51  ;;  %v1662_v4 = vld [vmem:[#allocation2 + $0xaa] sm:$0xff]  ;;  %v1663_v5 = vld [vmem:[#allocation2 + $0xb2] sm:$0xff]  ;;  %v1677_v52 = vld [vmem:[#allocation2 + $0x15a] sm:$0xff]  ;;  %921 = vst.msk [vmem:[#allocation3 + $0x119] sm:$0x1] %vm891_vm6, %v28722_v2 }
  0x70   : > { %v25119_v17 = vpack.c.bf16 %v1663_v5, %v1662_v4  ;;  %v1676_v51 = vld [vmem:[#allocation2 + $0x152] sm:$0xff]  ;;  %v25151_v4 = vpack.c.bf16 %v1679_v63, %v1678_v61  ;;  %v24248_v5 = vld [vmem:[%s28807_s3 + $0x8] ss:$0 sps:$4 sm:$0xcc]   ;;  %922 = vst.msk [vmem:[#allocation3 + $0x131] sm:$0x1] %vm891_vm6, %v28722_v2 }
  0x71   : > { %20805 = vmatmul.mubr.msk.bf16.gmra.mrb[8].mxu1 %vm836_vm1, %v25059_v6  ;;  %v25145_v55 = vpack.c.bf16 %v1677_v52, %v1676_v51  ;;  %v2583_v11 = vrot.slane %v24248_v5, 2  ;;  %v3467_v52 = vld [vmem:[%s28807_s3 + $0x10] sm:$0x3]  ;;  %923 = vst.msk [vmem:[#allocation3 + $0x149] sm:$0x1] %vm891_vm6, %v28722_v2 }
  0x72   : > { %20808 = vmatprep.mubr.msk.bf16.mxu1 %vm836_vm1, %v25061_v12  ;;  %924 = vst.msk [vmem:[#allocation3 + $0x161] sm:$0x1] %vm891_vm6, %v28722_v2  ;;  %925 = vst.msk [vmem:[#allocation3 + $0x179] sm:$0x1] %vm891_vm6, %v28722_v2 }
  0x73   : > { %v2633_v22 = vsel %vm1154_vm0, %v2583_v11, 0  ;;  %926 = vst.msk [vmem:[#allocation3 + $0x191] sm:$0x1] %vm891_vm6, %v28722_v2 }
  0x74   : > { %886 = vst.msk [vmem:[#allocation3 + $0x10] sm:$0x3] %vm885_vm7, %v28722_v2  ;;  %890 = vst.msk [vmem:[#allocation3 + $0x1a8] sm:$0x3] %vm885_vm7, %v28722_v2  ;;  %vm17436_vm7 = vcmask 254976  }
  0x75   : > { %20819 = vmatmul.mubr.msk.bf16.gmra.mrb[4].mxu0 %vm836_vm1, %v24999_v14  ;;  %910 = vst.msk [vmem:[#allocation3 + $0x11] sm:$0x1] %vm891_vm6, %v28722_v2  ;;  %927 = vst.msk [vmem:[#allocation3 + $0x1a9] sm:$0x1] %vm891_vm6, %v28722_v2  ;;  %vm15213_vm6 = vcmask 261120  }
  0x76   : > { %20822 = vmatprep.mubr.msk.bf16.mxu0 %vm836_vm1, %v25001_v15 }
  0x79   : > { %20809 = vmatmul.mubr.msk.bf16.gmra.mrb[12].mxu1 %vm836_vm1, %v25079_v27 }
  0x7d   : > { %20823 = vmatmul.mubr.msk.bf16.gmra.mrb[8].mxu0 %vm836_vm1, %v25007_v20 }
  0x7e   : > { %20826 = vmatprep.mubr.msk.bf16.mxu0 %vm836_vm1, %v25009_v21 }
  0x85   : > { %20827 = vmatmul.mubr.msk.bf16.gmra.mrb[12].mxu0 %vm836_vm1, %v25017_v29 }
  0x86   : > { %20830 = vmatprep.mubr.msk.bf16.mxu0 %vm836_vm1, %v25021_v31 }
  0x8d   : > { %20831 = vmatmul.mubr.msk.bf16.gmra.mrb[16].mxu0 %vm836_vm1, %v25033_v45 }
  0x8e   : > { %20834 = vmatprep.mubr.msk.bf16.mxu0 %vm836_vm1, %v25037_v46 }
  0x95   : > { %20835 = vmatmul.mubr.msk.bf16.gmra.mrb[20].mxu0 %vm836_vm1, %v25049_v59 }
  0x96   : > { %20838 = vmatprep.mubr.msk.bf16.mxu0 %vm836_vm1, %v25053_v60 }
  0x9d   : > { %20839 = vmatmul.mubr.msk.bf16.gmra.mrb[24].mxu0 %vm836_vm1, %v25065_v13 }
  0x9e   : > { %20842 = vmatprep.mubr.msk.bf16.mxu0 %vm836_vm1, %v25069_v16 }
  0xa5   : > { %20843 = vmatmul.mubr.msk.bf16.gmra.mrb[28].mxu0 %vm836_vm1, %v25083_v32 }
  0xa6   : > { %20848 = vmatprep.mubr.msk.bf16.mxu0 %vm836_vm1, %v1680_v33  ;;  %v1670_v33 = vld [vmem:[#allocation2 + $0x10a] sm:$0xff] }
  0xa7   : > { %v25135_v38 = vpack.c.bf16 %v1671_v35, %v1670_v33  ;;  %v24249_v35 = vld [vmem:[%s28807_s3 + $0xc] ss:$0 sps:$4 sm:$0xcc]   ;;  %s28833_s3 = sld [smem:[#allocation41_spill]] }
  0xad   : > { %20849 = vmatmul.mubr.msk.bf16.vlgmr.msra.gmra.mrb[0].mxu0 %vm836_vm1, %v25091_v43 }
  0xae   : > { %20881 = vmatpush3.bf16.msra.mxu0 %v2043_v42  ;;  %20852 = vmatprep.mubr.msk.bf16.mxu0 %vm836_vm1, %v25093_v47  ;;  %v25137_v42 = vpack.c.bf16 %v1673_v37, %v1672_v36  ;;  %v2927_v36 = vsel %vm1154_vm0, %v2877_v23, 0  ;;  %v3174_v37 = vrot.slane %v24249_v35, 2 }
  0xaf   : > { %24155 = vmatprep.subr.msk.bf16.mxu0 %vm1154_vm0, %v2286_v48  ;;  %v1972_v48 = vld [vmem:[#allocation2 + $0x188] sm:$0xff] }
  0xb0   : > { %v3224_v51 = vsel %vm1154_vm0, %v3174_v37, 0 }
  0xb5   : > { %20853 = vmatmul.mubr.msk.bf16.gmra.mrb[4].mxu0 %vm836_vm1, %v25103_v0 }
  0xb6   : > { %20856 = vmatprep.mubr.msk.bf16.mxu0 %vm836_vm1, %v25105_v7 }
  0xbd   : > { %20857 = vmatmul.mubr.msk.bf16.gmra.mrb[8].mxu0 %vm836_vm1, %v25111_v1 }
  0xbe   : > { %20860 = vmatprep.mubr.msk.bf16.mxu0 %vm836_vm1, %v25113_v3 }
  0xc5   : > { %20861 = vmatmul.mubr.msk.bf16.gmra.mrb[12].mxu0 %vm836_vm1, %v25119_v17 }
  0xc6   : > { %20864 = vmatprep.mubr.msk.bf16.mxu0 %vm836_vm1, %v25121_v18 }
  0xcd   : > { %20865 = vmatmul.mubr.msk.bf16.gmra.mrb[16].mxu0 %vm836_vm1, %v25127_v25 }
  0xce   : > { %20868 = vmatprep.mubr.msk.bf16.mxu0 %vm836_vm1, %v25129_v26 }
  0xd5   : > { %20869 = vmatmul.mubr.msk.bf16.gmra.mrb[20].mxu0 %vm836_vm1, %v25135_v38 }
  0xd6   : > { %20872 = vmatprep.mubr.msk.bf16.mxu0 %vm836_vm1, %v25137_v42 }
  0xdd   : > { %20873 = vmatmul.mubr.msk.bf16.gmra.mrb[24].mxu0 %vm836_vm1, %v25143_v54 }
  0xde   : > { %20876 = vmatprep.mubr.msk.bf16.mxu0 %vm836_vm1, %v25145_v55 }
  0xe5   : > { %20877 = vmatmul.mubr.msk.bf16.gmra.mrb[28].mxu0 %vm836_vm1, %v25151_v4 }
  0xe6   : > { %20882 = vmatprep.mubr.msk.bf16.mxu0 %vm836_vm1, %v24927_v30  ;;  %v1971_v30 = vld [vmem:[#allocation2 + $0x180] sm:$0xff] }
  0xe7   : > { %v25190_v19 = vpack.c.bf16 %v1972_v48, %v1971_v30 }
  0xed   : > { %20883 = vmatmul.mubr.msk.bf16.vlgmr.msra.gmra.mrb[0].mxu0 %vm836_vm1, %v24930_v34 }
  0xee   : > { %20915 = vmatpush3.bf16.msra.mxu0 %v2336_v10  ;;  %20886 = vmatprep.mubr.msk.bf16.mxu0 %vm836_vm1, %v24940_v40 }
  0xef   : > { %24156 = vmatprep.subr.msk.bf16.mxu0 %vm1154_vm0, %v2583_v11 }
  0xf5   : > { %20887 = vmatmul.mubr.msk.bf16.gmra.mrb[4].mxu0 %vm836_vm1, %v24942_v41 }
  0xf6   : > { %20890 = vmatprep.mubr.msk.bf16.mxu0 %vm836_vm1, %v24966_v56 }
  0xfd   : > { %20891 = vmatmul.mubr.msk.bf16.gmra.mrb[8].mxu0 %vm836_vm1, %v24970_v57 }
  0xfe   : > { %20894 = vmatprep.mubr.msk.bf16.mxu0 %vm836_vm1, %v24976_v62 }
 0x105   : > { %20895 = vmatmul.mubr.msk.bf16.gmra.mrb[12].mxu0 %vm836_vm1, %v25015_v28 }
 0x106   : > { %20898 = vmatprep.mubr.msk.bf16.mxu0 %vm836_vm1, %v25027_v39 }
 0x10d   : > { %20899 = vmatmul.mubr.msk.bf16.gmra.mrb[16].mxu0 %vm836_vm1, %v25029_v44 }
 0x10e   : > { %20902 = vmatprep.mubr.msk.bf16.mxu0 %vm836_vm1, %v25043_v53 }
 0x115   : > { %20903 = vmatmul.mubr.msk.bf16.gmra.mrb[20].mxu0 %vm836_vm1, %v25045_v58 }
 0x116   : > { %20906 = vmatprep.mubr.msk.bf16.mxu0 %vm836_vm1, %v25059_v6 }
 0x11d   : > { %20907 = vmatmul.mubr.msk.bf16.gmra.mrb[24].mxu0 %vm836_vm1, %v25061_v12 }
 0x11e   : > { %20910 = vmatprep.mubr.msk.bf16.mxu0 %vm836_vm1, %v25079_v27 }
 0x125   : > { %20911 = vmatmul.mubr.msk.bf16.gmra.mrb[28].mxu0 %vm836_vm1, %v25190_v19 }
 0x126   : > { %20916 = vmatprep.mubr.msk.bf16.mxu0 %vm836_vm1, %v24988_v8  ;;  %v2268_v8 = vld [vmem:[#allocation2 + $0x181] sm:$0xff] }
 0x127   : > { %v25229_v33 = vpack.c.bf16 %v2269_v24, %v2268_v8 }
 0x12d   : > { %20917 = vmatmul.mubr.msk.bf16.vlgmr.msra.gmra.mrb[0].mxu0 %vm836_vm1, %v24990_v9 }
 0x12e   : > { %20949 = vmatpush3.bf16.msra.mxu0 %v2633_v22  ;;  %20920 = vmatprep.mubr.msk.bf16.mxu0 %vm836_vm1, %v24999_v14 }
 0x12f   : > { %24157 = vmatprep.subr.msk.bf16.mxu0 %vm1154_vm0, %v2877_v23 }
 0x135   : > { %20921 = vmatmul.mubr.msk.bf16.gmra.mrb[4].mxu0 %vm836_vm1, %v25001_v15 }
 0x136   : > { %20924 = vmatprep.mubr.msk.bf16.mxu0 %vm836_vm1, %v25007_v20 }
 0x13d   : > { %20925 = vmatmul.mubr.msk.bf16.gmra.mrb[8].mxu0 %vm836_vm1, %v25009_v21 }
 0x13e   : > { %20928 = vmatprep.mubr.msk.bf16.mxu0 %vm836_vm1, %v25017_v29 }
 0x145   : > { %20929 = vmatmul.mubr.msk.bf16.gmra.mrb[12].mxu0 %vm836_vm1, %v25021_v31 }
 0x146   : > { %20932 = vmatprep.mubr.msk.bf16.mxu0 %vm836_vm1, %v25033_v45 }
 0x14d   : > { %20933 = vmatmul.mubr.msk.bf16.gmra.mrb[16].mxu0 %vm836_vm1, %v25037_v46 }
 0x14e   : > { %20936 = vmatprep.mubr.msk.bf16.mxu0 %vm836_vm1, %v25049_v59 }
 0x155   : > { %20937 = vmatmul.mubr.msk.bf16.gmra.mrb[20].mxu0 %vm836_vm1, %v25053_v60 }
 0x156   : > { %20940 = vmatprep.mubr.msk.bf16.mxu0 %vm836_vm1, %v25065_v13 }
 0x15d   : > { %20941 = vmatmul.mubr.msk.bf16.gmra.mrb[24].mxu0 %vm836_vm1, %v25069_v16 }
 0x15e   : > { %20944 = vmatprep.mubr.msk.bf16.mxu0 %vm836_vm1, %v25083_v32 }
 0x165   : > { %20945 = vmatmul.mubr.msk.bf16.gmra.mrb[28].mxu0 %vm836_vm1, %v25229_v33 }
 0x166   : > { %20950 = vmatprep.mubr.msk.bf16.mxu0 %vm836_vm1, %v25091_v43  ;;  %v2561_v43 = vld [vmem:[#allocation2 + $0x182] sm:$0xff] }
 0x167   : > { %v25268_v50 = vpack.c.bf16 %v2562_v49, %v2561_v43 }
 0x16d   : > { %20951 = vmatmul.mubr.msk.bf16.vlgmr.msra.gmra.mrb[0].mxu0 %vm836_vm1, %v25093_v47 }
 0x16e   : > { %20983 = vmatpush3.bf16.msra.mxu0 %v2927_v36  ;;  %20954 = vmatprep.mubr.msk.bf16.mxu0 %vm836_vm1, %v25103_v0 }
 0x16f   : > { %24158 = vmatprep.subr.msk.bf16.mxu0 %vm1154_vm0, %v3174_v37 }
 0x175   : > { %20955 = vmatmul.mubr.msk.bf16.gmra.mrb[4].mxu0 %vm836_vm1, %v25105_v7 }
 0x176   : > { %20958 = vmatprep.mubr.msk.bf16.mxu0 %vm836_vm1, %v25111_v1 }
 0x17d   : > { %20959 = vmatmul.mubr.msk.bf16.gmra.mrb[8].mxu0 %vm836_vm1, %v25113_v3 }
 0x17e   : > { %20962 = vmatprep.mubr.msk.bf16.mxu0 %vm836_vm1, %v25119_v17 }
 0x185   : > { %20963 = vmatmul.mubr.msk.bf16.gmra.mrb[12].mxu0 %vm836_vm1, %v25121_v18 }
 0x186   : > { %20966 = vmatprep.mubr.msk.bf16.mxu0 %vm836_vm1, %v25127_v25 }
 0x18d   : > { %20967 = vmatmul.mubr.msk.bf16.gmra.mrb[16].mxu0 %vm836_vm1, %v25129_v26 }
 0x18e   : > { %20970 = vmatprep.mubr.msk.bf16.mxu0 %vm836_vm1, %v25135_v38 }
 0x195   : > { %20971 = vmatmul.mubr.msk.bf16.gmra.mrb[20].mxu0 %vm836_vm1, %v25137_v42 }
 0x196   : > { %20974 = vmatprep.mubr.msk.bf16.mxu0 %vm836_vm1, %v25143_v54 }
 0x19d   : > { %20975 = vmatmul.mubr.msk.bf16.gmra.mrb[24].mxu0 %vm836_vm1, %v25145_v55 }
 0x19e   : > { %20978 = vmatprep.mubr.msk.bf16.mxu0 %vm836_vm1, %v25151_v4 }
 0x1a5   : > { %20979 = vmatmul.mubr.msk.bf16.gmra.mrb[28].mxu0 %vm836_vm1, %v25268_v50 }
 0x1a6   : > { %20984 = vmatprep.mubr.msk.bf16.mxu0 %vm836_vm1, %v24930_v34  ;;  %v2859_v34 = vld [vmem:[#allocation2 + $0x198] sm:$0xff] }
 0x1ad   : > { %20985 = vmatmul.mubr.msk.bf16.vlgmr.msra.gmra.mrb[0].mxu0 %vm836_vm1, %v24940_v40  ;;  %v2860_v40 = vld [vmem:[#allocation2 + $0x1a0] sm:$0xff] }
 0x1ae   : > { %21017 = vmatpush3.bf16.msra.mxu0 %v3224_v51  ;;  %20988 = vmatprep.mubr.msk.bf16.mxu0 %vm836_vm1, %v24942_v41  ;;  %v2876_v41 = vpack.c.bf16 %v2860_v40, %v2859_v34 }
 0x1af   : > { %24159 = vmatprep.subr.msk.bf16.mxu0 %vm1154_vm0, %v3467_v52 }
 0x1b5   : > { %20989 = vmatmul.mubr.msk.bf16.gmra.mrb[4].mxu0 %vm836_vm1, %v24966_v56  ;;  %v3832_v56 = vld [vmem:[%s28809_s29] sm:$0xf] }
 0x1b6   : > { %20992 = vmatprep.mubr.msk.bf16.mxu0 %vm836_vm1, %v24970_v57  ;;  %24160 = vmatprep.subr.msk.bf16.mxu1 %vm3881_vm4, %v3832_v56  ;;  %v3883_v57 = vsel %vm3881_vm4, %v3832_v56, 0 }
 0x1b7   : > { %21085 = vmatpush3.bf16.msra.mxu1 %v3883_v57  ;;  %v25567_v57 = vld [vmem:[%s28809_s29 + $0x8] sm:$0xf] }
 0x1bd   : > { %20993 = vmatmul.mubr.msk.bf16.gmra.mrb[8].mxu0 %vm836_vm1, %v24976_v62  ;;  %v3517_v62 = vsel %vm1154_vm0, %v3467_v52, 0  ;;  %vm12121_vm0 = vcmask 1046534  }
 0x1be   : > { %20996 = vmatprep.mubr.msk.bf16.mxu0 %vm836_vm1, %v25015_v28 }
 0x1c5   : > { %20997 = vmatmul.mubr.msk.bf16.gmra.mrb[12].mxu0 %vm836_vm1, %v25027_v39 }
 0x1c6   : > { %21000 = vmatprep.mubr.msk.bf16.mxu0 %vm836_vm1, %v25029_v44  ;;  %v4126_v44 = vld [vmem:[%s28809_s29 + $0x4] sm:$0xf] }
 0x1c7   : > { %24161 = vmatprep.subr.msk.bf16.mxu1 %vm3881_vm4, %v4126_v44  ;;  %v4176_v52 = vsel %vm3881_vm4, %v4126_v44, 0 }
 0x1cd   : > { %21001 = vmatmul.mubr.msk.bf16.gmra.mrb[16].mxu0 %vm836_vm1, %v25043_v53 }
 0x1ce   : > { %21004 = vmatprep.mubr.msk.bf16.mxu0 %vm836_vm1, %v25045_v58 }
 0x1d5   : > { %21005 = vmatmul.mubr.msk.bf16.gmra.mrb[20].mxu0 %vm836_vm1, %v25059_v6 }
 0x1d6   : > { %21008 = vmatprep.mubr.msk.bf16.mxu0 %vm836_vm1, %v25061_v12 }
 0x1dd   : > { %21009 = vmatmul.mubr.msk.bf16.gmra.mrb[24].mxu0 %vm836_vm1, %v25079_v27 }
 0x1de   : > { %21012 = vmatprep.mubr.msk.bf16.mxu0 %vm836_vm1, %v25190_v19 }
 0x1e5   : > { %21013 = vmatmul.mubr.msk.bf16.gmra.mrb[28].mxu0 %vm836_vm1, %v2876_v41 }
 0x1e6   : > { %21018 = vmatprep.mubr.msk.bf16.mxu0 %vm836_vm1, %v24990_v9  ;;  %v3152_v9 = vld [vmem:[#allocation2 + $0x199] sm:$0xff] }
 0x1ed   : > { %21019 = vmatmul.mubr.msk.bf16.vlgmr.msra.gmra.mrb[0].mxu0 %vm836_vm1, %v24999_v14  ;;  %v3153_v14 = vld [vmem:[#allocation2 + $0x1a1] sm:$0xff] }
 0x1ee   : > { %21051 = vmatpush3.bf16.msra.mxu0 %v3517_v62  ;;  %21022 = vmatprep.mubr.msk.bf16.mxu0 %vm836_vm1, %v25001_v15  ;;  %v3169_v15 = vpack.c.bf16 %v3153_v14, %v3152_v9 }
 0x1f5   : > { %21023 = vmatmul.mubr.msk.bf16.gmra.mrb[4].mxu0 %vm836_vm1, %v25007_v20  ;;  %v3449_v20 = vld [vmem:[#allocation2 + $0x19a] sm:$0xff] }
 0x1f6   : > { %21026 = vmatprep.mubr.msk.bf16.mxu0 %vm836_vm1, %v25009_v21  ;;  %v3450_v21 = vld [vmem:[#allocation2 + $0x1a2] sm:$0xff] }
 0x1f7   : > { %v3466_v28 = vpack.c.bf16 %v3450_v21, %v3449_v20 }
 0x1fd   : > { %21027 = vmatmul.mubr.msk.bf16.gmra.mrb[8].mxu0 %vm836_vm1, %v25017_v29  ;;  %v3784_v29 = vld [vmem:[#allocation3] sm:$0xff] }
 0x1fe   : > { %21030 = vmatprep.mubr.msk.bf16.mxu0 %vm836_vm1, %v25021_v31  ;;  %v3785_v31 = vld [vmem:[#allocation3 + $0x8] sm:$0xff] }
 0x1ff   : > { %v3816_v39 = vpack.c.bf16 %v3785_v31, %v3784_v29 }
 0x201   : > { %21086 = vmatprep.mubr.msk.bf16.mxu1 %vm882_vm5, %v3816_v39 }
 0x205   : > { %21031 = vmatmul.mubr.msk.bf16.gmra.mrb[12].mxu0 %vm836_vm1, %v25033_v45  ;;  %v25457_v45 = vpop.f32.mrb[0].mxu1 }
 0x206   : > { %21034 = vmatprep.mubr.msk.bf16.mxu0 %vm836_vm1, %v25037_v46  ;;  %v25459_v46 = vpop.f32.mrb[1].mxu1 }
 0x207   : > { %v25461_v53 = vpop.f32.mrb[2].mxu1 }
 0x208   : > { %v25463_v58 = vpop.f32.mrb[3].mxu1 }
 0x20d   : > { %21035 = vmatmul.mubr.msk.bf16.gmra.mrb[16].mxu0 %vm836_vm1, %v25049_v59  ;;  %v25465_v59 = vpop.f32.mrb[4].mxu1 }
 0x20e   : > { %21038 = vmatprep.mubr.msk.bf16.mxu0 %vm836_vm1, %v25053_v60  ;;  %v25467_v60 = vpop.f32.mrb[5].mxu1 }
 0x20f   : > { %v25469_v6 = vpop.f32.mrb[6].mxu1 }
 0x210   : > { %v25471_v12 = vpop.f32.mrb[7].mxu1 }
 0x215   : > { %21039 = vmatmul.mubr.msk.bf16.gmra.mrb[20].mxu0 %vm836_vm1, %v25065_v13  ;;  %v25473_v13 = vpop.f32.mrb[8].mxu1 }
 0x216   : > { %21042 = vmatprep.mubr.msk.bf16.mxu0 %vm836_vm1, %v25069_v16  ;;  %v25475_v16 = vpop.f32.mrb[9].mxu1 }
 0x217   : > { %v25477_v27 = vpop.f32.mrb[10].mxu1 }
 0x21d   : > { %21043 = vmatmul.mubr.msk.bf16.gmra.mrb[24].mxu0 %vm836_vm1, %v25083_v32  ;;  %v25479_v32 = vpop.f32.mrb[11].mxu1 }
 0x21e   : > { %21046 = vmatprep.mubr.msk.bf16.mxu0 %vm836_vm1, %v25229_v33 }
 0x225   : > { %21047 = vmatmul.mubr.msk.bf16.gmra.mrb[28].mxu0 %vm836_vm1, %v3169_v15 }
 0x226   : > { %21052 = vmatprep.mubr.msk.bf16.mxu0 %vm836_vm1, %v25093_v47  ;;  %v25481_v47 = vpop.f32.mrb[12].mxu1 }
 0x22d   : > { %21053 = vmatmul.mubr.msk.bf16.vlgmr.msra.gmra.mrb[0].mxu0 %vm836_vm1, %v25103_v0  ;;  %v25483_v0 = vpop.f32.mrb[13].mxu1 }
 0x22e   : > { %21056 = vmatprep.mubr.msk.bf16.mxu0 %vm836_vm1, %v25105_v7  ;;  %v25485_v7 = vpop.f32.mrb[14].mxu1 }
 0x235   : > { %21057 = vmatmul.mubr.msk.bf16.gmra.mrb[4].mxu0 %vm836_vm1, %v25111_v1  ;;  %v25487_v1 = vpop.f32.mrb[15].mxu1 }
 0x236   : > { %21060 = vmatprep.mubr.msk.bf16.mxu0 %vm836_vm1, %v25113_v3  ;;  %v25498_v3 = vld [vmem:[%s28810_s0] ss:$0 sm:$0xff]  ;;  %s19893_s0 = sshll.u32 %s24755_s9, 10 }
 0x23d   : > { %21061 = vmatmul.mubr.msk.bf16.gmra.mrb[8].mxu0 %vm836_vm1, %v25119_v17 }
 0x23e   : > { %21064 = vmatprep.mubr.msk.bf16.mxu0 %vm836_vm1, %v25121_v18 }
 0x245   : > { %21065 = vmatmul.mubr.msk.bf16.gmra.mrb[12].mxu0 %vm836_vm1, %v25127_v25 }
 0x246   : > { %21068 = vmatprep.mubr.msk.bf16.mxu0 %vm836_vm1, %v25129_v26 }
 0x24d   : > { %21069 = vmatmul.mubr.msk.bf16.gmra.mrb[16].mxu0 %vm836_vm1, %v25135_v38 }
 0x24e   : > { %21072 = vmatprep.mubr.msk.bf16.mxu0 %vm836_vm1, %v25137_v42 }
 0x255   : > { %21073 = vmatmul.mubr.msk.bf16.gmra.mrb[20].mxu0 %vm836_vm1, %v25143_v54 }
 0x256   : > { %21076 = vmatprep.mubr.msk.bf16.mxu0 %vm836_vm1, %v25145_v55 }
 0x25d   : > { %21077 = vmatmul.mubr.msk.bf16.gmra.mrb[24].mxu0 %vm836_vm1, %v25151_v4 }
 0x25e   : > { %21080 = vmatprep.mubr.msk.bf16.mxu0 %vm836_vm1, %v25268_v50 }
 0x265   : > { %21081 = vmatmul.mubr.msk.bf16.gmra.mrb[28].mxu0 %vm836_vm1, %v3466_v28  ;;  %vm12123_vm1 = vcmask 1047559  }
 0x300   : > { %v21054_v17 = vpop.f32.mrb[0].mxu0 }
 0x301   : > { %v25501_v18 = vadd.f32 %v21054_v17, %v25498_v3  ;;  %v3553_v25 = vpop.f32.mrb[1].mxu0 }
 0x302   : > { %v25504_v26 = vadd.f32 %v25498_v3, %v3553_v25  ;;  %v21055_v38 = vpop.f32.mrb[2].mxu0 }
 0x303   : > { %v28755_v42 = vmax.f32 %v25501_v18, 0.0  ;;  %v25508_v54 = vadd.f32 %v21055_v38, %v25498_v3  ;;  %v3556_v55 = vpop.f32.mrb[3].mxu0 }
 0x304   : > { %v28754_v61 = vmax.f32 %v25504_v26, 0.0  ;;  %v25512_v63 = vadd.f32 %v25498_v3, %v3556_v55 }
 0x305   : > { %3747 = vst.msk [vmem:[#allocation3 + $0x31] sm:$0xff] %vm882_vm5, %v28755_v42  ;;  %v28753_v4 = vmax.f32 %v25508_v54, 0.0 }
 0x306   : > { %3745 = vst.msk [vmem:[#allocation3 + $0x19] sm:$0xff] %vm882_vm5, %v28754_v61  ;;  %v28752_v5 = vmax.f32 %v25512_v63, 0.0 }
 0x307   : > { %3748 = vst.msk [vmem:[#allocation3 + $0x39] sm:$0xff] %vm882_vm5, %v28753_v4 }
 0x308   : > { %3746 = vst.msk [vmem:[#allocation3 + $0x21] sm:$0xff] %vm882_vm5, %v28752_v5  ;;  %v21058_v10 = vpop.f32.mrb[4].mxu0 }
 0x309   : > { %v25529_v11 = vadd.f32 %v21058_v10, %v25498_v3  ;;  %v3569_v30 = vpop.f32.mrb[5].mxu0 }
 0x30a   : > { %v25532_v48 = vadd.f32 %v25498_v3, %v3569_v30  ;;  %v21059_v19 = vpop.f32.mrb[6].mxu0 }
 0x30b   : > { %v28751_v22 = vmax.f32 %v25529_v11, 0.0  ;;  %v25536_v23 = vadd.f32 %v21059_v19, %v25498_v3  ;;  %v3572_v8 = vpop.f32.mrb[7].mxu0 }
 0x30c   : > { %v28750_v24 = vmax.f32 %v25532_v48, 0.0  ;;  %v25540_v33 = vadd.f32 %v25498_v3, %v3572_v8  ;;  %v3788_v34 = vld [vmem:[#allocation3 + $0x30] sm:$0xff] }
 0x30d   : > { %3751 = vst.msk [vmem:[#allocation3 + $0x61] sm:$0xff] %vm882_vm5, %v28751_v22  ;;  %v28744_v35 = vmax.f32 %v25536_v23, 0.0  ;;  %v3786_v43 = vld [vmem:[#allocation3 + $0x18] sm:$0xff] }
 0x30e   : > { %3749 = vst.msk [vmem:[#allocation3 + $0x49] sm:$0xff] %vm882_vm5, %v28750_v24  ;;  %v28743_v36 = vmax.f32 %v25540_v33, 0.0  ;;  %v3789_v37 = vld [vmem:[#allocation3 + $0x38] sm:$0xff] }
 0x30f   : > { %3752 = vst.msk [vmem:[#allocation3 + $0x69] sm:$0xff] %vm882_vm5, %v28744_v35  ;;  %v3787_v49 = vld [vmem:[#allocation3 + $0x20] sm:$0xff]  ;;  %v25562_v56 = vpack.c.bf16 %v3789_v37, %v3788_v34  ;;  %v4082_v24 = vld [vmem:[#allocation3 + $0x31] sm:$0xff] }
 0x310   : > { %3750 = vst.msk [vmem:[#allocation3 + $0x51] sm:$0xff] %vm882_vm5, %v28743_v36  ;;  %v21062_v50 = vpop.f32.mrb[8].mxu0  ;;  %v25556_v51 = vpack.c.bf16 %v3787_v49, %v3786_v43 }
 0x311   : > { %v25560_v40 = vadd.f32 %v21062_v50, %v25498_v3  ;;  %v3585_v41 = vpop.f32.mrb[9].mxu0 }
 0x312   : > { %v25570_v62 = vadd.f32 %v25498_v3, %v3585_v41  ;;  %v21063_v9 = vpop.f32.mrb[10].mxu0  ;;  %21087 = vmatmul.mubr.msk.bf16.vlgmr.msra.gmra.mrb[16].mxu1 %vm882_vm5, %v25556_v51 }
 0x313   : > { %v28738_v14 = vmax.f32 %v25560_v40, 0.0  ;;  %v25576_v15 = vadd.f32 %v21063_v9, %v25498_v3  ;;  %21119 = vmatpush3.bf16.msra.mxu1 %v4176_v52  ;;  %v3588_v20 = vpop.f32.mrb[11].mxu0  ;;  %21090 = vmatprep.mubr.msk.bf16.mxu1 %vm882_vm5, %v25562_v56  ;;  %v1337_v9 = vadd.f32 %v25457_v45, %v25498_v3 }
 0x314   : > { %v28737_v21 = vmax.f32 %v25570_v62, 0.0  ;;  %v25582_v28 = vadd.f32 %v25498_v3, %v3588_v20  ;;  %24162 = vmatprep.subr.msk.bf16.mxu1 %vm3881_vm4, %v25567_v57  ;;  %v3792_v55 = vld [vmem:[#allocation3 + $0x60] sm:$0xff] }
 0x315   : > { %3755 = vst.msk [vmem:[#allocation3 + $0x91] sm:$0xff] %vm882_vm5, %v28738_v14  ;;  %v28732_v29 = vmax.f32 %v25576_v15, 0.0  ;;  %v3790_v44 = vld [vmem:[#allocation3 + $0x48] sm:$0xff] }
 0x316   : > { %28811 = vst [vmem:[#allocation16_spill] sm:$0xff] %v25582_v28  ;;  %3753 = vst.msk [vmem:[#allocation3 + $0x79] sm:$0xff] %vm882_vm5, %v28737_v21  ;;  %v28731_v31 = vmax.f32 %v25582_v28, 0.0  ;;  %v3793_v39 = vld [vmem:[#allocation3 + $0x68] sm:$0xff] }
 0x317   : > { %3756 = vst.msk [vmem:[#allocation3 + $0x99] sm:$0xff] %vm882_vm5, %v28732_v29  ;;  %v3791_v17 = vld [vmem:[#allocation3 + $0x50] sm:$0xff]  ;;  %v25605_v19 = vpack.c.bf16 %v3793_v39, %v3792_v55  ;;  %v1335_v39 = vadd.f32 %v25498_v3, %v25459_v46 }
 0x318   : > { %3754 = vst.msk [vmem:[#allocation3 + $0x81] sm:$0xff] %vm882_vm5, %v28731_v31  ;;  %v21066_v25 = vpop.f32.mrb[12].mxu0  ;;  %v25600_v38 = vpack.c.bf16 %v3791_v17, %v3790_v44 }
 0x319   : > { %v25603_v10 = vadd.f32 %v21066_v25, %v25498_v3  ;;  %v3601_v30 = vpop.f32.mrb[13].mxu0 }
 0x31a   : > { %v25608_v8 = vadd.f32 %v25498_v3, %v3601_v30  ;;  %v21067_v37 = vpop.f32.mrb[14].mxu0  ;;  %21091 = vmatmul.mubr.msk.bf16.gmra.mrb[20].mxu1 %vm882_vm5, %v25600_v38 }
 0x31b   : > { %28812 = vst [vmem:[#allocation17_spill] sm:$0xff] %v25603_v10  ;;  %v28726_v43 = vmax.f32 %v25603_v10, 0.0  ;;  %v25614_v49 = vadd.f32 %v21067_v37, %v25498_v3  ;;  %v3604_v50 = vpop.f32.mrb[15].mxu0  ;;  %21094 = vmatprep.mubr.msk.bf16.mxu1 %vm882_vm5, %v25605_v19  ;;  %v1338_v37 = vadd.f32 %v25461_v53, %v25498_v3 }
 0x31c   : > { %28813 = vst [vmem:[#allocation18_spill] sm:$0xff] %v25608_v8  ;;  %v28725_v52 = vmax.f32 %v25608_v8, 0.0  ;;  %v25620_v34 = vadd.f32 %v25498_v3, %v3604_v50  ;;  %v3796_v30 = vld [vmem:[#allocation3 + $0x90] sm:$0xff] }
 0x31d   : > { %28814 = vst [vmem:[#allocation19_spill] sm:$0xff] %v25614_v49  ;;  %3759 = vst.msk [vmem:[#allocation3 + $0xc1] sm:$0xff] %vm882_vm5, %v28726_v43  ;;  %v28724_v41 = vmax.f32 %v25614_v49, 0.0  ;;  %v3794_v17 = vld [vmem:[#allocation3 + $0x78] sm:$0xff] }
 0x31e   : > { %28815 = vst [vmem:[#allocation20_spill] sm:$0xff] %v25620_v34  ;;  %3757 = vst.msk [vmem:[#allocation3 + $0xa9] sm:$0xff] %vm882_vm5, %v28725_v52  ;;  %v28727_v20 = vmax.f32 %v25620_v34, 0.0  ;;  %v3797_v44 = vld [vmem:[#allocation3 + $0x98] sm:$0xff] }
 0x31f   : > { %3760 = vst.msk [vmem:[#allocation3 + $0xc9] sm:$0xff] %vm882_vm5, %v28724_v41  ;;  %v3795_v25 = vld [vmem:[#allocation3 + $0x80] sm:$0xff]  ;;  %v25646_v2 = vpack.c.bf16 %v3797_v44, %v3796_v30  ;;  %v1336_v41 = vadd.f32 %v25498_v3, %v25463_v58  ;;  %v1339_v44 = vadd.f32 %v25498_v3, %v25467_v60  ;;  %v4090_v5 = vld [vmem:[#allocation3 + $0x91] sm:$0xff] }
 0x320   : > { %3758 = vst.msk [vmem:[#allocation3 + $0xb1] sm:$0xff] %vm882_vm5, %v28727_v20  ;;  %v21070_v45 = vpop.f32.mrb[16].mxu0  ;;  %v25640_v55 = vpack.c.bf16 %v3795_v25, %v3794_v17 }
 0x321   : > { %v25644_v50 = vadd.f32 %v21070_v45, %v1337_v9  ;;  %v3617_v46 = vpop.f32.mrb[17].mxu0 }
 0x322   : > { %v25650_v52 = vadd.f32 %v3617_v46, %v1335_v39  ;;  %v21071_v43 = vpop.f32.mrb[18].mxu0  ;;  %21095 = vmatmul.mubr.msk.bf16.gmra.mrb[24].mxu1 %vm882_vm5, %v25640_v55  ;;  %v1341_v39 = vadd.f32 %v25465_v59, %v25498_v3  ;;  %v1342_v46 = vadd.f32 %v25469_v6, %v25498_v3 }
 0x323   : > { %28816 = vst [vmem:[#allocation21_spill] sm:$0xff] %v25644_v50  ;;  %v28729_v17 = vmax.f32 %v25644_v50, 0.0  ;;  %v25655_v25 = vadd.f32 %v21071_v43, %v1338_v37  ;;  %v3620_v20 = vpop.f32.mrb[19].mxu0  ;;  %21098 = vmatprep.mubr.msk.bf16.mxu1 %vm882_vm5, %v25646_v2 }
 0x324   : > { %28817 = vst [vmem:[#allocation22_spill] sm:$0xff] %v25650_v52  ;;  %v28728_v53 = vmax.f32 %v25650_v52, 0.0  ;;  %v25660_v9 = vadd.f32 %v3620_v20, %v1336_v41  ;;  %v3800_v37 = vld [vmem:[#allocation3 + $0xc0] sm:$0xff] }
 0x325   : > { %28818 = vst [vmem:[#allocation23_spill] sm:$0xff] %v25655_v25  ;;  %3763 = vst.msk [vmem:[#allocation3 + $0xf1] sm:$0xff] %vm882_vm5, %v28729_v17  ;;  %v28730_v58 = vmax.f32 %v25655_v25, 0.0  ;;  %v3798_v20 = vld [vmem:[#allocation3 + $0xa8] sm:$0xff] }
 0x326   : > { %28819 = vst [vmem:[#allocation24_spill] sm:$0xff] %v25660_v9  ;;  %3761 = vst.msk [vmem:[#allocation3 + $0xd9] sm:$0xff] %vm882_vm5, %v28728_v53  ;;  %v28733_v43 = vmax.f32 %v25660_v9, 0.0  ;;  %v3801_v41 = vld [vmem:[#allocation3 + $0xc8] sm:$0xff] }
 0x327   : > { %3764 = vst.msk [vmem:[#allocation3 + $0xf9] sm:$0xff] %vm882_vm5, %v28730_v58  ;;  %v3799_v45 = vld [vmem:[#allocation3 + $0xb0] sm:$0xff]  ;;  %v25686_v17 = vpack.c.bf16 %v3801_v41, %v3800_v37  ;;  %v1340_v58 = vadd.f32 %v25498_v3, %v25471_v12  ;;  %v1343_v41 = vadd.f32 %v25498_v3, %v25475_v16  ;;  %v4094_v61 = vld [vmem:[#allocation3 + $0xc1] sm:$0xff] }
 0x328   : > { %3762 = vst.msk [vmem:[#allocation3 + $0xe1] sm:$0xff] %vm882_vm5, %v28733_v43  ;;  %v21074_v59 = vpop.f32.mrb[20].mxu0  ;;  %v25680_v30 = vpack.c.bf16 %v3799_v45, %v3798_v20 }
 0x329   : > { %v25684_v53 = vadd.f32 %v21074_v59, %v1341_v39  ;;  %v3633_v60 = vpop.f32.mrb[21].mxu0 }
 0x32a   : > { %v25690_v31 = vadd.f32 %v3633_v60, %v1339_v44  ;;  %v21075_v29 = vpop.f32.mrb[22].mxu0  ;;  %21099 = vmatmul.mubr.msk.bf16.gmra.mrb[28].mxu1 %vm882_vm5, %v25680_v30  ;;  %v1345_v44 = vadd.f32 %v25473_v13, %v25498_v3  ;;  %v1346_v60 = vadd.f32 %v25477_v27, %v25498_v3 }
 0x32b   : > { %28820 = vst [vmem:[#allocation25_spill] sm:$0xff] %v25684_v53  ;;  %v28735_v20 = vmax.f32 %v25684_v53, 0.0  ;;  %v25695_v45 = vadd.f32 %v21075_v29, %v1342_v46  ;;  %v3636_v43 = vpop.f32.mrb[23].mxu0  ;;  %21102 = vmatprep.mubr.msk.bf16.mxu1 %vm882_vm5, %v25686_v17 }
 0x32c   : > { %28821 = vst [vmem:[#allocation26_spill] sm:$0xff] %v25690_v31  ;;  %v28734_v6 = vmax.f32 %v25690_v31, 0.0  ;;  %v25700_v39 = vadd.f32 %v3636_v43, %v1340_v58  ;;  %v3804_v46 = vld [vmem:[#allocation3 + $0xf0] sm:$0xff] }
 0x32d   : > { %28822 = vst [vmem:[#allocation27_spill] sm:$0xff] %v25695_v45  ;;  %3767 = vst.msk [vmem:[#allocation3 + $0x121] sm:$0xff] %vm882_vm5, %v28735_v20  ;;  %v28736_v12 = vmax.f32 %v25695_v45, 0.0  ;;  %v3802_v43 = vld [vmem:[#allocation3 + $0xd8] sm:$0xff] }
 0x32e   : > { %28823 = vst [vmem:[#allocation28_spill] sm:$0xff] %v25700_v39  ;;  %3765 = vst.msk [vmem:[#allocation3 + $0x109] sm:$0xff] %vm882_vm5, %v28734_v6  ;;  %v28739_v29 = vmax.f32 %v25700_v39, 0.0  ;;  %v3805_v58 = vld [vmem:[#allocation3 + $0xf8] sm:$0xff] }
 0x32f   : > { %3768 = vst.msk [vmem:[#allocation3 + $0x129] sm:$0xff] %vm882_vm5, %v28736_v12  ;;  %v3803_v59 = vld [vmem:[#allocation3 + $0xe0] sm:$0xff]  ;;  %v25726_v20 = vpack.c.bf16 %v3805_v58, %v3804_v46  ;;  %v1344_v12 = vadd.f32 %v25498_v3, %v25479_v32  ;;  %v1347_v58 = vadd.f32 %v25498_v3, %v25483_v0 }
 0x330   : > { %3766 = vst.msk [vmem:[#allocation3 + $0x111] sm:$0xff] %vm882_vm5, %v28739_v29  ;;  %v21078_v13 = vpop.f32.mrb[24].mxu0  ;;  %v25720_v37 = vpack.c.bf16 %v3803_v59, %v3802_v43 }
 0x331   : > { %v25724_v6 = vadd.f32 %v21078_v13, %v1345_v44  ;;  %v3649_v16 = vpop.f32.mrb[25].mxu0 }
 0x332   : > { %v25730_v21 = vadd.f32 %v3649_v16, %v1343_v41  ;;  %v21079_v14 = vpop.f32.mrb[26].mxu0  ;;  %21103 = vmatmul.mubr.msk.bf16.gmra.mrb[32].mxu1 %vm882_vm5, %v25720_v37  ;;  %v1349_v41 = vadd.f32 %v25481_v47, %v25498_v3  ;;  %v1350_v16 = vadd.f32 %v25485_v7, %v25498_v3 }
 0x333   : > { %28824 = vst [vmem:[#allocation29_spill] sm:$0xff] %v25724_v6  ;;  %v28741_v43 = vmax.f32 %v25724_v6, 0.0  ;;  %v25735_v59 = vadd.f32 %v21079_v14, %v1346_v60  ;;  %v3652_v29 = vpop.f32.mrb[27].mxu0  ;;  %21106 = vmatprep.mubr.msk.bf16.mxu1 %vm882_vm5, %v25726_v20 }
 0x334   : > { %28825 = vst [vmem:[#allocation30_spill] sm:$0xff] %v25730_v21  ;;  %v28740_v27 = vmax.f32 %v25730_v21, 0.0  ;;  %v25740_v44 = vadd.f32 %v3652_v29, %v1344_v12  ;;  %v3808_v60 = vld [vmem:[#allocation3 + $0x120] sm:$0xff] }
 0x335   : > { %28826 = vst [vmem:[#allocation31_spill] sm:$0xff] %v25735_v59  ;;  %3771 = vst.msk [vmem:[#allocation3 + $0x151] sm:$0xff] %vm882_vm5, %v28741_v43  ;;  %v28742_v32 = vmax.f32 %v25735_v59, 0.0  ;;  %v3806_v29 = vld [vmem:[#allocation3 + $0x108] sm:$0xff] }
 0x336   : > { %28827 = vst [vmem:[#allocation32_spill] sm:$0xff] %v25740_v44  ;;  %3769 = vst.msk [vmem:[#allocation3 + $0x139] sm:$0xff] %vm882_vm5, %v28740_v27  ;;  %v28745_v14 = vmax.f32 %v25740_v44, 0.0  ;;  %v3809_v12 = vld [vmem:[#allocation3 + $0x128] sm:$0xff] }
 0x337   : > { %3772 = vst.msk [vmem:[#allocation3 + $0x159] sm:$0xff] %vm882_vm5, %v28742_v32  ;;  %v3807_v13 = vld [vmem:[#allocation3 + $0x110] sm:$0xff]  ;;  %v25766_v43 = vpack.c.bf16 %v3809_v12, %v3808_v60  ;;  %v1348_v32 = vadd.f32 %v25498_v3, %v25487_v1  ;;  %v4078_v60 = vld [vmem:[#allocation3 + $0x1] sm:$0xff] }
 0x338   : > { %3770 = vst.msk [vmem:[#allocation3 + $0x141] sm:$0xff] %vm882_vm5, %v28745_v14  ;;  %v21082_v47 = vpop.f32.mrb[28].mxu0  ;;  %v25760_v46 = vpack.c.bf16 %v3807_v13, %v3806_v29 }
 0x339   : > { %v25764_v27 = vadd.f32 %v21082_v47, %v1349_v41  ;;  %v3665_v0 = vpop.f32.mrb[29].mxu0 }
 0x33a   : > { %v25770_v36 = vadd.f32 %v3665_v0, %v1347_v58  ;;  %v21083_v35 = vpop.f32.mrb[30].mxu0  ;;  %21107 = vmatmul.mubr.msk.bf16.gmra.mrb[36].mxu1 %vm882_vm5, %v25760_v46 }
 0x33b   : > { %28828 = vst [vmem:[#allocation33_spill] sm:$0xff] %v25764_v27  ;;  %v28748_v29 = vmax.f32 %v25764_v27, 0.0  ;;  %v25775_v13 = vadd.f32 %v21083_v35, %v1350_v16  ;;  %v3668_v14 = vpop.f32.mrb[31].mxu0  ;;  %21110 = vmatprep.mubr.msk.bf16.mxu1 %vm882_vm5, %v25766_v43  ;;  %v4079_v16 = vld [vmem:[#allocation3 + $0x9] sm:$0xff] }
 0x33c   : > { %28829 = vst [vmem:[#allocation34_spill] sm:$0xff] %v25770_v36  ;;  %v28747_v7 = vmax.f32 %v25770_v36, 0.0  ;;  %v25780_v41 = vadd.f32 %v3668_v14, %v1348_v32  ;;  %v3812_v12 = vld [vmem:[#allocation3 + $0x150] sm:$0xff]  ;;  %v4102_v36 = vld [vmem:[#allocation3 + $0x121] sm:$0xff] }
 0x33d   : > { %28830 = vst [vmem:[#allocation35_spill] sm:$0xff] %v25775_v13  ;;  %3775 = vst.msk [vmem:[#allocation3 + $0x181] sm:$0xff] %vm882_vm5, %v28748_v29  ;;  %v28746_v1 = vmax.f32 %v25775_v13, 0.0  ;;  %v3810_v58 = vld [vmem:[#allocation3 + $0x138] sm:$0xff] }
 0x33e   : > { %28831 = vst [vmem:[#allocation36_spill] sm:$0xff] %v25780_v41  ;;  %3773 = vst.msk [vmem:[#allocation3 + $0x169] sm:$0xff] %vm882_vm5, %v28747_v7  ;;  %v28749_v3 = vmax.f32 %v25780_v41, 0.0  ;;  %v3813_v35 = vld [vmem:[#allocation3 + $0x158] sm:$0xff]  ;;  %v4110_v7 = vpack.c.bf16 %v4079_v16, %v4078_v60  ;;  %v4084_v60 = vld [vmem:[#allocation3 + $0x49] sm:$0xff] }
 0x33f   : > { %3776 = vst.msk [vmem:[#allocation3 + $0x189] sm:$0xff] %vm882_vm5, %v28746_v1  ;;  %v3811_v32 = vld [vmem:[#allocation3 + $0x140] sm:$0xff]  ;;  %v25798_v47 = vpack.c.bf16 %v3813_v35, %v3812_v12  ;;  %v4098_v41 = vld [vmem:[#allocation3 + $0xf1] sm:$0xff] }
 0x340   : > { %3774 = vst.msk [vmem:[#allocation3 + $0x171] sm:$0xff] %vm882_vm5, %v28749_v3  ;;  %v25796_v14 = vpack.c.bf16 %v3811_v32, %v3810_v58  ;;  %v4081_v35 = vld [vmem:[#allocation3 + $0x21] sm:$0xff]  ;;  %v4083_v58 = vld [vmem:[#allocation3 + $0x39] sm:$0xff]  ;;  %v4469_v3 = vsel %vm3881_vm4, %v25567_v57, 0  ;;  %v4087_v57 = vld [vmem:[#allocation3 + $0x69] sm:$0xff] }
 0x341   : > { %v4080_v32 = vld [vmem:[#allocation3 + $0x19] sm:$0xff]  ;;  %v25813_v22 = vpack.c.bf16 %v4083_v58, %v4082_v24  ;;  %v4086_v16 = vld [vmem:[#allocation3 + $0x61] sm:$0xff]  ;;  %v4106_v44 = vld [vmem:[#allocation3 + $0x151] sm:$0xff] }
 0x342   : > { %21111 = vmatmul.mubr.msk.bf16.gmra.mrb[40].mxu1 %vm882_vm5, %v25796_v14  ;;  %v25809_v12 = vpack.c.bf16 %v4081_v35, %v4080_v32  ;;  %v4091_v35 = vld [vmem:[#allocation3 + $0x99] sm:$0xff] }
 0x343   : > { %21114 = vmatprep.mubr.msk.bf16.mxu1 %vm882_vm5, %v25798_v47  ;;  %v4088_v58 = vld [vmem:[#allocation3 + $0x79] sm:$0xff]  ;;  %v25836_v4 = vpack.c.bf16 %v4091_v35, %v4090_v5  ;;  %v4097_v5 = vld [vmem:[#allocation3 + $0xe1] sm:$0xff] }
 0x344   : > { %v4096_v35 = vld [vmem:[#allocation3 + $0xd9] sm:$0xff] }
 0x345   : > { %v3814_v0 = vld [vmem:[#allocation3 + $0x168] sm:$0xff] }
 0x347   : > { %v3815_v1 = vld [vmem:[#allocation3 + $0x170] sm:$0xff] }
 0x348   : > { %v25804_v29 = vpack.c.bf16 %v3815_v1, %v3814_v0  ;;  %v25818_v1 = vld [vmem:[%s28809_s29 + $0xc] sm:$0xf]  ;;  %v25828_v0 = vpack.c.bf16 %v4087_v57, %v4086_v16  ;;  %v4095_v57 = vld [vmem:[#allocation3 + $0xc9] sm:$0xff] }
 0x349   : > { %v25844_v42 = vpack.c.bf16 %v4095_v57, %v4094_v61  ;;  %v4101_v61 = vld [vmem:[#allocation3 + $0x111] sm:$0xff]  ;;  %v4100_v57 = vld [vmem:[#allocation3 + $0x109] sm:$0xff]  ;;  %v4762_v45 = vsel %vm3881_vm4, %v25818_v1, 0 }
 0x34a   : > { %21115 = vmatmul.mubr.msk.bf16.gmra.mrb[44].mxu1 %vm882_vm5, %v25804_v29 }
 0x34b   : > { %21120 = vmatprep.mubr.msk.bf16.mxu1 %vm882_vm5, %v4110_v7  ;;  %v4085_v7 = vld [vmem:[#allocation3 + $0x51] sm:$0xff] }
 0x34c   : > { %v25826_v24 = vpack.c.bf16 %v4085_v7, %v4084_v60  ;;  %v4093_v7 = vld [vmem:[#allocation3 + $0xb1] sm:$0xff]  ;;  %v4092_v60 = vld [vmem:[#allocation3 + $0xa9] sm:$0xff] }
 0x34d   : > { %v25842_v16 = vpack.c.bf16 %v4093_v7, %v4092_v60  ;;  %v4103_v7 = vld [vmem:[#allocation3 + $0x129] sm:$0xff]  ;;  %v25858_v60 = vpack.c.bf16 %v4101_v61, %v4100_v57 }
 0x34e   : > { %v25860_v27 = vpack.c.bf16 %v4103_v7, %v4102_v36  ;;  %v4371_v36 = vld [vmem:[#allocation3 + $0x2] sm:$0xff]  ;;  %v4372_v61 = vld [vmem:[#allocation3 + $0xa] sm:$0xff] }
 0x34f   : > { %v4109_v7 = vld [vmem:[#allocation3 + $0x171] sm:$0xff]  ;;  %v4108_v57 = vld [vmem:[#allocation3 + $0x169] sm:$0xff]  ;;  %v4403_v21 = vpack.c.bf16 %v4372_v61, %v4371_v36  ;;  %v5005_v36 = vld [vmem:[%s28809_s29 + $0x10] sm:$0xf] }
 0x350   : > { %v25874_v6 = vpack.c.bf16 %v4109_v7, %v4108_v57  ;;  %v4378_v61 = vld [vmem:[#allocation3 + $0x52] sm:$0xff]  ;;  %v4379_v7 = vld [vmem:[#allocation3 + $0x62] sm:$0xff]  ;;  %v4380_v57 = vld [vmem:[#allocation3 + $0x6a] sm:$0xff] }
 0x352   : > { %21121 = vmatmul.mubr.msk.bf16.vlgmr.msra.gmra.mrb[16].mxu1 %vm882_vm5, %v25809_v12 }
 0x353   : > { %21153 = vmatpush3.bf16.msra.mxu1 %v4469_v3  ;;  %21124 = vmatprep.mubr.msk.bf16.mxu1 %vm882_vm5, %v25813_v22  ;;  %v4089_v3 = vld [vmem:[#allocation3 + $0x81] sm:$0xff] }
 0x354   : > { %24163 = vmatprep.subr.msk.bf16.mxu1 %vm3881_vm4, %v25818_v1  ;;  %v25834_v32 = vpack.c.bf16 %v4089_v3, %v4088_v58  ;;  %v4099_v3 = vld [vmem:[#allocation3 + $0xf9] sm:$0xff]  ;;  %v25850_v58 = vpack.c.bf16 %v4097_v5, %v4096_v35 }
 0x355   : > { %v25852_v13 = vpack.c.bf16 %v4099_v3, %v4098_v41  ;;  %v4105_v41 = vld [vmem:[#allocation3 + $0x141] sm:$0xff]  ;;  %v4107_v5 = vld [vmem:[#allocation3 + $0x159] sm:$0xff] }
 0x356   : > { %v4104_v3 = vld [vmem:[#allocation3 + $0x139] sm:$0xff]  ;;  %v25868_v59 = vpack.c.bf16 %v4107_v5, %v4106_v44 }
 0x357   : > { %v25866_v35 = vpack.c.bf16 %v4105_v41, %v4104_v3  ;;  %v4373_v44 = vld [vmem:[#allocation3 + $0x1a] sm:$0xff]  ;;  %v4374_v41 = vld [vmem:[#allocation3 + $0x22] sm:$0xff]  ;;  %v4375_v5 = vld [vmem:[#allocation3 + $0x32] sm:$0xff] }
 0x358   : > { %v4376_v3 = vld [vmem:[#allocation3 + $0x3a] sm:$0xff]  ;;  %v25879_v39 = vpack.c.bf16 %v4374_v41, %v4373_v44  ;;  %v25895_v44 = vpack.c.bf16 %v4380_v57, %v4379_v7  ;;  %v4382_v41 = vld [vmem:[#allocation3 + $0x82] sm:$0xff]  ;;  %v4388_v57 = vld [vmem:[#allocation3 + $0xca] sm:$0xff] }
 0x359   : > { %v25883_v31 = vpack.c.bf16 %v4376_v3, %v4375_v5  ;;  %v4383_v5 = vld [vmem:[#allocation3 + $0x92] sm:$0xff]  ;;  %v4384_v3 = vld [vmem:[#allocation3 + $0x9a] sm:$0xff]  ;;  %v4387_v7 = vld [vmem:[#allocation3 + $0xc2] sm:$0xff] }
 0x35a   : > { %21125 = vmatmul.mubr.msk.bf16.gmra.mrb[20].mxu1 %vm882_vm5, %v25826_v24  ;;  %v25903_v9 = vpack.c.bf16 %v4384_v3, %v4383_v5  ;;  %v25911_v52 = vpack.c.bf16 %v4388_v57, %v4387_v7  ;;  %v4391_v5 = vld [vmem:[#allocation3 + $0xf2] sm:$0xff]  ;;  %v4392_v3 = vld [vmem:[#allocation3 + $0xfa] sm:$0xff]  ;;  %v4395_v7 = vld [vmem:[#allocation3 + $0x122] sm:$0xff] }
 0x35b   : > { %21128 = vmatprep.mubr.msk.bf16.mxu1 %vm882_vm5, %v25828_v0  ;;  %v25919_v34 = vpack.c.bf16 %v4392_v3, %v4391_v5  ;;  %v4396_v57 = vld [vmem:[#allocation3 + $0x12a] sm:$0xff]  ;;  %v4399_v5 = vld [vmem:[#allocation3 + $0x152] sm:$0xff]  ;;  %v4400_v3 = vld [vmem:[#allocation3 + $0x15a] sm:$0xff] }
 0x35c   : > { %v25927_v8 = vpack.c.bf16 %v4396_v57, %v4395_v7  ;;  %v25935_v28 = vpack.c.bf16 %v4400_v3, %v4399_v5  ;;  %v5055_v57 = vsel %vm3881_vm4, %v5005_v36, 0  ;;  %v5592_v5 = vld [vmem:[%s28809_s29 + $0x18] sm:$0xf] }
 0x35d   : > { %v4987_v3 = vld [vmem:[#allocation3 + $0x181] sm:$0xff] }
 0x362   : > { %21129 = vmatmul.mubr.msk.bf16.gmra.mrb[24].mxu1 %vm882_vm5, %v25834_v32 }
 0x363   : > { %21132 = vmatprep.mubr.msk.bf16.mxu1 %vm882_vm5, %v25836_v4 }
 0x36a   : > { %21133 = vmatmul.mubr.msk.bf16.gmra.mrb[28].mxu1 %vm882_vm5, %v25842_v16 }
 0x36b   : > { %21136 = vmatprep.mubr.msk.bf16.mxu1 %vm882_vm5, %v25844_v42 }
 0x372   : > { %21137 = vmatmul.mubr.msk.bf16.gmra.mrb[32].mxu1 %vm882_vm5, %v25850_v58 }
 0x373   : > { %21140 = vmatprep.mubr.msk.bf16.mxu1 %vm882_vm5, %v25852_v13 }
 0x37a   : > { %21141 = vmatmul.mubr.msk.bf16.gmra.mrb[36].mxu1 %vm882_vm5, %v25858_v60 }
 0x37b   : > { %21144 = vmatprep.mubr.msk.bf16.mxu1 %vm882_vm5, %v25860_v27 }
 0x382   : > { %21145 = vmatmul.mubr.msk.bf16.gmra.mrb[40].mxu1 %vm882_vm5, %v25866_v35 }
 0x383   : > { %21148 = vmatprep.mubr.msk.bf16.mxu1 %vm882_vm5, %v25868_v59 }
 0x38a   : > { %21149 = vmatmul.mubr.msk.bf16.gmra.mrb[44].mxu1 %vm882_vm5, %v25874_v6 }
 0x38b   : > { %21154 = vmatprep.mubr.msk.bf16.mxu1 %vm882_vm5, %v4403_v21  ;;  %v4377_v21 = vld [vmem:[#allocation3 + $0x4a] sm:$0xff] }
 0x38c   : > { %v25893_v1 = vpack.c.bf16 %v4378_v61, %v4377_v21  ;;  %v4385_v21 = vld [vmem:[#allocation3 + $0xaa] sm:$0xff]  ;;  %v4386_v61 = vld [vmem:[#allocation3 + $0xb2] sm:$0xff] }
 0x38d   : > { %v25909_v25 = vpack.c.bf16 %v4386_v61, %v4385_v21  ;;  %v4393_v21 = vld [vmem:[#allocation3 + $0x10a] sm:$0xff]  ;;  %v4394_v61 = vld [vmem:[#allocation3 + $0x112] sm:$0xff] }
 0x38e   : > { %v25925_v49 = vpack.c.bf16 %v4394_v61, %v4393_v21  ;;  %v4401_v21 = vld [vmem:[#allocation3 + $0x16a] sm:$0xff]  ;;  %v4402_v61 = vld [vmem:[#allocation3 + $0x172] sm:$0xff] }
 0x38f   : > { %v25941_v7 = vpack.c.bf16 %v4402_v61, %v4401_v21  ;;  %v5642_v61 = vsel %vm3881_vm4, %v5592_v5, 0 }
 0x392   : > { %21155 = vmatmul.mubr.msk.bf16.vlgmr.msra.gmra.mrb[16].mxu1 %vm882_vm5, %v25879_v39 }
 0x393   : > { %21187 = vmatpush3.bf16.msra.mxu1 %v4762_v45  ;;  %21158 = vmatprep.mubr.msk.bf16.mxu1 %vm882_vm5, %v25883_v31  ;;  %v4381_v45 = vld [vmem:[#allocation3 + $0x7a] sm:$0xff] }
 0x394   : > { %24164 = vmatprep.subr.msk.bf16.mxu1 %vm3881_vm4, %v5005_v36  ;;  %v25901_v53 = vpack.c.bf16 %v4382_v41, %v4381_v45  ;;  %v4389_v45 = vld [vmem:[#allocation3 + $0xda] sm:$0xff]  ;;  %v4390_v41 = vld [vmem:[#allocation3 + $0xe2] sm:$0xff] }
 0x395   : > { %v25917_v50 = vpack.c.bf16 %v4390_v41, %v4389_v45  ;;  %v4397_v45 = vld [vmem:[#allocation3 + $0x13a] sm:$0xff]  ;;  %v4398_v41 = vld [vmem:[#allocation3 + $0x142] sm:$0xff] }
 0x396   : > { %v25933_v10 = vpack.c.bf16 %v4398_v41, %v4397_v45  ;;  %v5298_v45 = vld [vmem:[%s28809_s29 + $0x14] sm:$0xf] }
 0x397   : > { %v5348_v41 = vsel %vm3881_vm4, %v5298_v45, 0 }
 0x39a   : > { %21159 = vmatmul.mubr.msk.bf16.gmra.mrb[20].mxu1 %vm882_vm5, %v25893_v1 }
 0x39b   : > { %21162 = vmatprep.mubr.msk.bf16.mxu1 %vm882_vm5, %v25895_v44 }
 0x3a2   : > { %21163 = vmatmul.mubr.msk.bf16.gmra.mrb[24].mxu1 %vm882_vm5, %v25901_v53 }
 0x3a3   : > { %21166 = vmatprep.mubr.msk.bf16.mxu1 %vm882_vm5, %v25903_v9 }
 0x3aa   : > { %21167 = vmatmul.mubr.msk.bf16.gmra.mrb[28].mxu1 %vm882_vm5, %v25909_v25 }
 0x3ab   : > { %21170 = vmatprep.mubr.msk.bf16.mxu1 %vm882_vm5, %v25911_v52 }
 0x3b2   : > { %21171 = vmatmul.mubr.msk.bf16.gmra.mrb[32].mxu1 %vm882_vm5, %v25917_v50 }
 0x3b3   : > { %21174 = vmatprep.mubr.msk.bf16.mxu1 %vm882_vm5, %v25919_v34 }
 0x3ba   : > { %21175 = vmatmul.mubr.msk.bf16.gmra.mrb[36].mxu1 %vm882_vm5, %v25925_v49 }
 0x3bb   : > { %21178 = vmatprep.mubr.msk.bf16.mxu1 %vm882_vm5, %v25927_v8 }
 0x3c2   : > { %21179 = vmatmul.mubr.msk.bf16.gmra.mrb[40].mxu1 %vm882_vm5, %v25933_v10 }
 0x3c3   : > { %21182 = vmatprep.mubr.msk.bf16.mxu1 %vm882_vm5, %v25935_v28 }
 0x3ca   : > { %21183 = vmatmul.mubr.msk.bf16.gmra.mrb[44].mxu1 %vm882_vm5, %v25941_v7 }
 0x3cb   : > { %21188 = vmatprep.mubr.msk.bf16.mxu1 %vm882_vm5, %v25556_v51  ;;  %v4695_v51 = vld [vmem:[#allocation3 + $0x188] sm:$0xff] }
 0x3d2   : > { %21189 = vmatmul.mubr.msk.bf16.vlgmr.msra.gmra.mrb[16].mxu1 %vm882_vm5, %v25562_v56  ;;  %v4694_v56 = vld [vmem:[#allocation3 + $0x180] sm:$0xff] }
 0x3d3   : > { %21221 = vmatpush3.bf16.msra.mxu1 %v5055_v57  ;;  %21192 = vmatprep.mubr.msk.bf16.mxu1 %vm882_vm5, %v25600_v38  ;;  %v25980_v36 = vpack.c.bf16 %v4695_v51, %v4694_v56  ;;  %v5885_v57 = vld [vmem:[%s28809_s29 + $0x1c] sm:$0xf]  ;;  %v5545_v51 = vld [vmem:[#allocation3 + $0x38] sm:$0xff] }
 0x3d4   : > { %24165 = vmatprep.subr.msk.bf16.mxu1 %vm3881_vm4, %v5298_v45  ;;  %v5281_v45 = vld [vmem:[#allocation3 + $0x18a] sm:$0xff] }
 0x3da   : > { %21193 = vmatmul.mubr.msk.bf16.gmra.mrb[20].mxu1 %vm882_vm5, %v25605_v19 }
 0x3db   : > { %21196 = vmatprep.mubr.msk.bf16.mxu1 %vm882_vm5, %v25640_v55 }
 0x3e2   : > { %21197 = vmatmul.mubr.msk.bf16.gmra.mrb[24].mxu1 %vm882_vm5, %v25646_v2 }
 0x3e3   : > { %21200 = vmatprep.mubr.msk.bf16.mxu1 %vm882_vm5, %v25680_v30 }
 0x3ea   : > { %21201 = vmatmul.mubr.msk.bf16.gmra.mrb[28].mxu1 %vm882_vm5, %v25686_v17 }
 0x3eb   : > { %21204 = vmatprep.mubr.msk.bf16.mxu1 %vm882_vm5, %v25720_v37 }
 0x3f2   : > { %21205 = vmatmul.mubr.msk.bf16.gmra.mrb[32].mxu1 %vm882_vm5, %v25726_v20 }
 0x3f3   : > { %21208 = vmatprep.mubr.msk.bf16.mxu1 %vm882_vm5, %v25760_v46 }
 0x3fa   : > { %21209 = vmatmul.mubr.msk.bf16.gmra.mrb[36].mxu1 %vm882_vm5, %v25766_v43 }
 0x3fb   : > { %21212 = vmatprep.mubr.msk.bf16.mxu1 %vm882_vm5, %v25796_v14 }
 0x402   : > { %21213 = vmatmul.mubr.msk.bf16.gmra.mrb[40].mxu1 %vm882_vm5, %v25798_v47 }
 0x403   : > { %21216 = vmatprep.mubr.msk.bf16.mxu1 %vm882_vm5, %v25804_v29 }
 0x40a   : > { %21217 = vmatmul.mubr.msk.bf16.gmra.mrb[44].mxu1 %vm882_vm5, %v25980_v36 }
 0x40b   : > { %21222 = vmatprep.mubr.msk.bf16.mxu1 %vm882_vm5, %v25809_v12  ;;  %v4988_v12 = vld [vmem:[#allocation3 + $0x189] sm:$0xff] }
 0x40c   : > { %v26019_v21 = vpack.c.bf16 %v4988_v12, %v4987_v3  ;;  %v5935_v12 = vsel %vm3881_vm4, %v5885_v57, 0  ;;  %v6178_v3 = vld [vmem:[%s28809_s29 + $0x20] sm:$0xf]  ;;  %s18836_s29 = sand.u32 1, %s24755_s9  }
 0x412   : > { %21223 = vmatmul.mubr.msk.bf16.vlgmr.msra.gmra.mrb[16].mxu1 %vm882_vm5, %v25813_v22 }
 0x413   : > { %21255 = vmatpush3.bf16.msra.mxu1 %v5348_v41  ;;  %21226 = vmatprep.mubr.msk.bf16.mxu1 %vm882_vm5, %v25826_v24  ;;  %v5544_v41 = vld [vmem:[#allocation3 + $0x30] sm:$0xff] }
 0x414   : > { %24166 = vmatprep.subr.msk.bf16.mxu1 %vm3881_vm4, %v5592_v5  ;;  %v5576_v5 = vpack.c.bf16 %v5545_v51, %v5544_v41 }
 0x41a   : > { %21227 = vmatmul.mubr.msk.bf16.gmra.mrb[20].mxu1 %vm882_vm5, %v25828_v0 }
 0x41b   : > { %21230 = vmatprep.mubr.msk.bf16.mxu1 %vm882_vm5, %v25834_v32 }
 0x422   : > { %21231 = vmatmul.mubr.msk.bf16.gmra.mrb[24].mxu1 %vm882_vm5, %v25836_v4 }
 0x423   : > { %21234 = vmatprep.mubr.msk.bf16.mxu1 %vm882_vm5, %v25842_v16 }
 0x42a   : > { %21235 = vmatmul.mubr.msk.bf16.gmra.mrb[28].mxu1 %vm882_vm5, %v25844_v42 }
 0x42b   : > { %21238 = vmatprep.mubr.msk.bf16.mxu1 %vm882_vm5, %v25850_v58 }
 0x432   : > { %21239 = vmatmul.mubr.msk.bf16.gmra.mrb[32].mxu1 %vm882_vm5, %v25852_v13 }
 0x433   : > { %21242 = vmatprep.mubr.msk.bf16.mxu1 %vm882_vm5, %v25858_v60 }
 0x43a   : > { %21243 = vmatmul.mubr.msk.bf16.gmra.mrb[36].mxu1 %vm882_vm5, %v25860_v27 }
 0x43b   : > { %21246 = vmatprep.mubr.msk.bf16.mxu1 %vm882_vm5, %v25866_v35 }
 0x442   : > { %21247 = vmatmul.mubr.msk.bf16.gmra.mrb[40].mxu1 %vm882_vm5, %v25868_v59 }
 0x443   : > { %21250 = vmatprep.mubr.msk.bf16.mxu1 %vm882_vm5, %v25874_v6 }
 0x44a   : > { %21251 = vmatmul.mubr.msk.bf16.gmra.mrb[44].mxu1 %vm882_vm5, %v26019_v21 }
 0x44b   : > { %21256 = vmatprep.mubr.msk.bf16.mxu1 %vm882_vm5, %v25879_v39  ;;  %v5280_v39 = vld [vmem:[#allocation3 + $0x182] sm:$0xff] }
 0x44c   : > { %v26058_v56 = vpack.c.bf16 %v5281_v45, %v5280_v39 }
 0x452   : > { %21257 = vmatmul.mubr.msk.bf16.vlgmr.msra.gmra.mrb[16].mxu1 %vm882_vm5, %v25883_v31 }
 0x453   : > { %21289 = vmatpush3.bf16.msra.mxu1 %v5642_v61  ;;  %21260 = vmatprep.mubr.msk.bf16.mxu1 %vm882_vm5, %v25893_v1 }
 0x454   : > { %24167 = vmatprep.subr.msk.bf16.mxu1 %vm3881_vm4, %v5885_v57 }
 0x45a   : > { %21261 = vmatmul.mubr.msk.bf16.gmra.mrb[20].mxu1 %vm882_vm5, %v25895_v44 }
 0x45b   : > { %21264 = vmatprep.mubr.msk.bf16.mxu1 %vm882_vm5, %v25901_v53 }
 0x462   : > { %21265 = vmatmul.mubr.msk.bf16.gmra.mrb[24].mxu1 %vm882_vm5, %v25903_v9 }
 0x463   : > { %21268 = vmatprep.mubr.msk.bf16.mxu1 %vm882_vm5, %v25909_v25 }
 0x46a   : > { %21269 = vmatmul.mubr.msk.bf16.gmra.mrb[28].mxu1 %vm882_vm5, %v25911_v52 }
 0x46b   : > { %21272 = vmatprep.mubr.msk.bf16.mxu1 %vm882_vm5, %v25917_v50 }
 0x472   : > { %21273 = vmatmul.mubr.msk.bf16.gmra.mrb[32].mxu1 %vm882_vm5, %v25919_v34 }
 0x473   : > { %21276 = vmatprep.mubr.msk.bf16.mxu1 %vm882_vm5, %v25925_v49 }
 0x47a   : > { %21277 = vmatmul.mubr.msk.bf16.gmra.mrb[36].mxu1 %vm882_vm5, %v25927_v8 }
 0x47b   : > { %21280 = vmatprep.mubr.msk.bf16.mxu1 %vm882_vm5, %v25933_v10 }
 0x482   : > { %21281 = vmatmul.mubr.msk.bf16.gmra.mrb[40].mxu1 %vm882_vm5, %v25935_v28 }
 0x483   : > { %21284 = vmatprep.mubr.msk.bf16.mxu1 %vm882_vm5, %v25941_v7 }
 0x48a   : > { %21285 = vmatmul.mubr.msk.bf16.gmra.mrb[44].mxu1 %vm882_vm5, %v26058_v56 }
 0x48b   : > { %21290 = vmatprep.mubr.msk.bf16.mxu1 %vm882_vm5, %v5576_v5 }
 0x492   : > { %21291 = vmatmul.mubr.msk.bf16.vlgmr.msra.gmra.mrb[16].mxu1 %vm882_vm5, %v25600_v38  ;;  %v5575_v38 = vld [vmem:[#allocation3 + $0x1a0] sm:$0xff] }
 0x493   : > { %21323 = vmatpush3.bf16.msra.mxu1 %v5935_v12  ;;  %21294 = vmatprep.mubr.msk.bf16.mxu1 %vm882_vm5, %v25605_v19  ;;  %v26200_v12 = vld [vmem:[%s28832_s5 + $0x8] sm:$0xf] }
 0x494   : > { %24168 = vmatprep.subr.msk.bf16.mxu1 %vm3881_vm4, %v6178_v3 }
 0x49a   : > { %21295 = vmatmul.mubr.msk.bf16.gmra.mrb[20].mxu1 %vm882_vm5, %v25640_v55  ;;  %v6542_v55 = vld [vmem:[%s28832_s5] sm:$0xf] }
 0x49b   : > { %21298 = vmatprep.mubr.msk.bf16.mxu1 %vm882_vm5, %v25646_v2  ;;  %v5574_v2 = vld [vmem:[#allocation3 + $0x198] sm:$0xff]  ;;  %24169 = vmatprep.subr.msk.bf16.mxu0 %vm3881_vm4, %v6542_v55 }
 0x49c   : > { %v5591_v19 = vpack.c.bf16 %v5575_v38, %v5574_v2 }
 0x4a2   : > { %21299 = vmatmul.mubr.msk.bf16.gmra.mrb[24].mxu1 %vm882_vm5, %v25680_v30  ;;  %v6228_v30 = vsel %vm3881_vm4, %v6178_v3, 0 }
 0x4a3   : > { %21302 = vmatprep.mubr.msk.bf16.mxu1 %vm882_vm5, %v25686_v17  ;;  %v6592_v17 = vsel %vm3881_vm4, %v6542_v55, 0 }
 0x4a4   : > { %21391 = vmatpush3.bf16.msra.mxu0 %v6592_v17 }
 0x4aa   : > { %21303 = vmatmul.mubr.msk.bf16.gmra.mrb[28].mxu1 %vm882_vm5, %v25720_v37 }
 0x4ab   : > { %21306 = vmatprep.mubr.msk.bf16.mxu1 %vm882_vm5, %v25726_v20 }
 0x4b2   : > { %21307 = vmatmul.mubr.msk.bf16.gmra.mrb[32].mxu1 %vm882_vm5, %v25760_v46 }
 0x4b3   : > { %21310 = vmatprep.mubr.msk.bf16.mxu1 %vm882_vm5, %v25766_v43 }
 0x4ba   : > { %21311 = vmatmul.mubr.msk.bf16.gmra.mrb[36].mxu1 %vm882_vm5, %v25796_v14 }
 0x4bb   : > { %21314 = vmatprep.mubr.msk.bf16.mxu1 %vm882_vm5, %v25798_v47 }
 0x4c2   : > { %21315 = vmatmul.mubr.msk.bf16.gmra.mrb[40].mxu1 %vm882_vm5, %v25804_v29 }
 0x4c3   : > { %21318 = vmatprep.mubr.msk.bf16.mxu1 %vm882_vm5, %v25980_v36 }
 0x4ca   : > { %21319 = vmatmul.mubr.msk.bf16.gmra.mrb[44].mxu1 %vm882_vm5, %v5591_v19 }
 0x4cb   : > { %21324 = vmatprep.mubr.msk.bf16.mxu1 %vm882_vm5, %v25813_v22 }
 0x4d2   : > { %21325 = vmatmul.mubr.msk.bf16.vlgmr.msra.gmra.mrb[16].mxu1 %vm882_vm5, %v25826_v24 }
 0x4d3   : > { %21357 = vmatpush3.bf16.msra.mxu1 %v6228_v30  ;;  %21328 = vmatprep.mubr.msk.bf16.mxu1 %vm882_vm5, %v25828_v0 }
 0x4da   : > { %21329 = vmatmul.mubr.msk.bf16.gmra.mrb[20].mxu1 %vm882_vm5, %v25834_v32 }
 0x4db   : > { %21332 = vmatprep.mubr.msk.bf16.mxu1 %vm882_vm5, %v25836_v4  ;;  %v5868_v4 = vld [vmem:[#allocation3 + $0x1a1] sm:$0xff] }
 0x4e2   : > { %21333 = vmatmul.mubr.msk.bf16.gmra.mrb[24].mxu1 %vm882_vm5, %v25842_v16 }
 0x4e3   : > { %21336 = vmatprep.mubr.msk.bf16.mxu1 %vm882_vm5, %v25844_v42  ;;  %v5867_v42 = vld [vmem:[#allocation3 + $0x199] sm:$0xff] }
 0x4e4   : > { %v5884_v22 = vpack.c.bf16 %v5868_v4, %v5867_v42 }
 0x4ea   : > { %21337 = vmatmul.mubr.msk.bf16.gmra.mrb[28].mxu1 %vm882_vm5, %v25850_v58 }
 0x4eb   : > { %21340 = vmatprep.mubr.msk.bf16.mxu1 %vm882_vm5, %v25852_v13 }
 0x4f2   : > { %21341 = vmatmul.mubr.msk.bf16.gmra.mrb[32].mxu1 %vm882_vm5, %v25858_v60 }
 0x4f3   : > { %21344 = vmatprep.mubr.msk.bf16.mxu1 %vm882_vm5, %v25860_v27 }
 0x4fa   : > { %21345 = vmatmul.mubr.msk.bf16.gmra.mrb[36].mxu1 %vm882_vm5, %v25866_v35 }
 0x4fb   : > { %21348 = vmatprep.mubr.msk.bf16.mxu1 %vm882_vm5, %v25868_v59 }
 0x502   : > { %21349 = vmatmul.mubr.msk.bf16.gmra.mrb[40].mxu1 %vm882_vm5, %v25874_v6 }
 0x503   : > { %21352 = vmatprep.mubr.msk.bf16.mxu1 %vm882_vm5, %v26019_v21 }
 0x50a   : > { %21353 = vmatmul.mubr.msk.bf16.gmra.mrb[44].mxu1 %vm882_vm5, %v5884_v22 }
 0x50b   : > { %21358 = vmatprep.mubr.msk.bf16.mxu1 %vm882_vm5, %v25883_v31  ;;  %v6160_v31 = vld [vmem:[#allocation3 + $0x19a] sm:$0xff] }
 0x512   : > { %21359 = vmatmul.mubr.msk.bf16.vlgmr.msra.gmra.mrb[16].mxu1 %vm882_vm5, %v25893_v1 }
 0x513   : > { %21362 = vmatprep.mubr.msk.bf16.mxu1 %vm882_vm5, %v25895_v44 }
 0x51a   : > { %21363 = vmatmul.mubr.msk.bf16.gmra.mrb[20].mxu1 %vm882_vm5, %v25901_v53 }
 0x51b   : > { %21366 = vmatprep.mubr.msk.bf16.mxu1 %vm882_vm5, %v25903_v9 }
 0x522   : > { %21367 = vmatmul.mubr.msk.bf16.gmra.mrb[24].mxu1 %vm882_vm5, %v25909_v25 }
 0x523   : > { %21370 = vmatprep.mubr.msk.bf16.mxu1 %vm882_vm5, %v25911_v52  ;;  %v6161_v52 = vld [vmem:[#allocation3 + $0x1a2] sm:$0xff] }
 0x52a   : > { %21371 = vmatmul.mubr.msk.bf16.gmra.mrb[28].mxu1 %vm882_vm5, %v25917_v50  ;;  %v6495_v50 = vld [vmem:[#allocation3 + $0x8] sm:$0xff] }
 0x52b   : > { %21374 = vmatprep.mubr.msk.bf16.mxu1 %vm882_vm5, %v25919_v34  ;;  %v6177_v34 = vpack.c.bf16 %v6161_v52, %v6160_v31 }
 0x532   : > { %21375 = vmatmul.mubr.msk.bf16.gmra.mrb[32].mxu1 %vm882_vm5, %v25925_v49  ;;  %v6494_v49 = vld [vmem:[#allocation3] sm:$0xff] }
 0x533   : > { %21378 = vmatprep.mubr.msk.bf16.mxu1 %vm882_vm5, %v25927_v8  ;;  %v6526_v8 = vpack.c.bf16 %v6495_v50, %v6494_v49 }
 0x535   : > { %21392 = vmatprep.mubr.msk.bf16.mxu0 %vm882_vm5, %v6526_v8 }
 0x53a   : > { %21379 = vmatmul.mubr.msk.bf16.gmra.mrb[36].mxu1 %vm882_vm5, %v25933_v10  ;;  %v26173_v10 = vld [vmem:[%s28833_s3] ss:$0 sm:$0xff]  ;;  %s27740_s3 = scalar_lea.vmem [#allocation7], %s19014_s8 }
 0x53b   : > { %21382 = vmatprep.mubr.msk.bf16.mxu1 %vm882_vm5, %v25935_v28  ;;  %v6835_v28 = vld [vmem:[%s28832_s5 + $0x4] sm:$0xf] }
 0x53c   : > { %24170 = vmatprep.subr.msk.bf16.mxu0 %vm3881_vm4, %v6835_v28  ;;  %v6885_v45 = vsel %vm3881_vm4, %v6835_v28, 0 }
 0x542   : > { %21383 = vmatmul.mubr.msk.bf16.gmra.mrb[40].mxu1 %vm882_vm5, %v25941_v7 }
 0x543   : > { %21386 = vmatprep.mubr.msk.bf16.mxu1 %vm882_vm5, %v26058_v56 }
 0x54a   : > { %21387 = vmatmul.mubr.msk.bf16.gmra.mrb[44].mxu1 %vm882_vm5, %v6177_v34 }
 0x5e5   : > { %v21360_v25 = vpop.f32.mrb[16].mxu1 }
 0x5e6   : > { %v22682_v53 = vadd.f32 %v21360_v25, %v26173_v10  ;;  %v6264_v9 = vpop.f32.mrb[17].mxu1 }
 0x5e7   : > { %v22683_v20 = vadd.f32 %v26173_v10, %v6264_v9  ;;  %v21361_v6 = vpop.f32.mrb[18].mxu1 }
 0x5e8   : > { %v6425_v37 = vmax.f32 %v22682_v53, 0.0  ;;  %v22684_v43 = vadd.f32 %v21361_v6, %v26173_v10  ;;  %v6267_v59 = vpop.f32.mrb[19].mxu1 }
 0x5e9   : > { %v6423_v27 = vmax.f32 %v22683_v20, 0.0  ;;  %v22685_v46 = vadd.f32 %v26173_v10, %v6267_v59 }
 0x5ea   : > { %6457 = vst.msk [vmem:[#allocation3 + $0x31] sm:$0xff] %vm882_vm5, %v6425_v37  ;;  %v6426_v29 = vmax.f32 %v22684_v43, 0.0 }
 0x5eb   : > { %6455 = vst.msk [vmem:[#allocation3 + $0x19] sm:$0xff] %vm882_vm5, %v6423_v27  ;;  %v6424_v13 = vmax.f32 %v22685_v46, 0.0 }
 0x5ec   : > { %6458 = vst.msk [vmem:[#allocation3 + $0x39] sm:$0xff] %vm882_vm5, %v6426_v29 }
 0x5ed   : > { %6456 = vst.msk [vmem:[#allocation3 + $0x21] sm:$0xff] %vm882_vm5, %v6424_v13  ;;  %v21364_v14 = vpop.f32.mrb[20].mxu1 }
 0x5ee   : > { %v22686_v47 = vadd.f32 %v21364_v14, %v26173_v10  ;;  %v6280_v24 = vpop.f32.mrb[21].mxu1 }
 0x5ef   : > { %v22687_v0 = vadd.f32 %v26173_v10, %v6280_v24  ;;  %v21365_v32 = vpop.f32.mrb[22].mxu1 }
 0x5f0   : > { %v6429_v16 = vmax.f32 %v22686_v47, 0.0  ;;  %v22688_v58 = vadd.f32 %v21365_v32, %v26173_v10  ;;  %v6283_v60 = vpop.f32.mrb[23].mxu1 }
 0x5f1   : > { %v6427_v35 = vmax.f32 %v22687_v0, 0.0  ;;  %v22689_v1 = vadd.f32 %v26173_v10, %v6283_v60  ;;  %v6498_v51 = vld [vmem:[#allocation3 + $0x30] sm:$0xff] }
 0x5f2   : > { %6461 = vst.msk [vmem:[#allocation3 + $0x61] sm:$0xff] %vm882_vm5, %v6429_v16  ;;  %v6430_v44 = vmax.f32 %v22688_v58, 0.0  ;;  %v6496_v21 = vld [vmem:[#allocation3 + $0x18] sm:$0xff] }
 0x5f3   : > { %6459 = vst.msk [vmem:[#allocation3 + $0x49] sm:$0xff] %vm882_vm5, %v6427_v35  ;;  %v6428_v7 = vmax.f32 %v22689_v1, 0.0  ;;  %v6499_v36 = vld [vmem:[#allocation3 + $0x38] sm:$0xff] }
 0x5f4   : > { %6462 = vst.msk [vmem:[#allocation3 + $0x69] sm:$0xff] %vm882_vm5, %v6430_v44  ;;  %v6497_v61 = vld [vmem:[#allocation3 + $0x20] sm:$0xff]  ;;  %v26195_v5 = vpack.c.bf16 %v6499_v36, %v6498_v51 }
 0x5f5   : > { %6460 = vst.msk [vmem:[#allocation3 + $0x51] sm:$0xff] %vm882_vm5, %v6428_v7  ;;  %v21368_v57 = vpop.f32.mrb[24].mxu1  ;;  %v26191_v39 = vpack.c.bf16 %v6497_v61, %v6496_v21 }
 0x5f6   : > { %v22690_v56 = vadd.f32 %v21368_v57, %v26173_v10  ;;  %v6296_v41 = vpop.f32.mrb[25].mxu1 }
 0x5f7   : > { %v22691_v3 = vadd.f32 %v26173_v10, %v6296_v41  ;;  %v21369_v2 = vpop.f32.mrb[26].mxu1  ;;  %21393 = vmatmul.mubr.msk.bf16.vlgmr.msra.gmra.mrb[32].mxu0 %vm882_vm5, %v26191_v39 }
 0x5f8   : > { %v6433_v38 = vmax.f32 %v22690_v56, 0.0  ;;  %v22692_v19 = vadd.f32 %v21369_v2, %v26173_v10  ;;  %21425 = vmatpush3.bf16.msra.mxu0 %v6885_v45  ;;  %v6299_v55 = vpop.f32.mrb[27].mxu1  ;;  %21396 = vmatprep.mubr.msk.bf16.mxu0 %vm882_vm5, %v26195_v5 }
 0x5f9   : > { %v6431_v17 = vmax.f32 %v22691_v3, 0.0  ;;  %v22693_v30 = vadd.f32 %v26173_v10, %v6299_v55  ;;  %24171 = vmatprep.subr.msk.bf16.mxu0 %vm3881_vm4, %v26200_v12  ;;  %v6502_v50 = vld [vmem:[#allocation3 + $0x60] sm:$0xff] }
 0x5fa   : > { %6465 = vst.msk [vmem:[#allocation3 + $0x91] sm:$0xff] %vm882_vm5, %v6433_v38  ;;  %v6434_v42 = vmax.f32 %v22692_v19, 0.0  ;;  %v6500_v31 = vld [vmem:[#allocation3 + $0x48] sm:$0xff] }
 0x5fb   : > { %6463 = vst.msk [vmem:[#allocation3 + $0x79] sm:$0xff] %vm882_vm5, %v6431_v17  ;;  %v6432_v4 = vmax.f32 %v22693_v30, 0.0  ;;  %v6503_v22 = vld [vmem:[#allocation3 + $0x68] sm:$0xff] }
 0x5fc   : > { %6466 = vst.msk [vmem:[#allocation3 + $0x99] sm:$0xff] %vm882_vm5, %v6434_v42  ;;  %v6501_v52 = vld [vmem:[#allocation3 + $0x50] sm:$0xff]  ;;  %v26218_v25 = vpack.c.bf16 %v6503_v22, %v6502_v50 }
 0x5fd   : > { %6464 = vst.msk [vmem:[#allocation3 + $0x81] sm:$0xff] %vm882_vm5, %v6432_v4  ;;  %v21372_v34 = vpop.f32.mrb[28].mxu1  ;;  %v26215_v49 = vpack.c.bf16 %v6501_v52, %v6500_v31 }
 0x5fe   : > { %v22694_v8 = vadd.f32 %v21372_v34, %v26173_v10  ;;  %v6312_v28 = vpop.f32.mrb[29].mxu1 }
 0x5ff   : > { %v22695_v53 = vadd.f32 %v26173_v10, %v6312_v28  ;;  %v21373_v9 = vpop.f32.mrb[30].mxu1  ;;  %21397 = vmatmul.mubr.msk.bf16.gmra.mrb[36].mxu0 %vm882_vm5, %v26215_v49 }
 0x600   : > { %v6437_v20 = vmax.f32 %v22694_v8, 0.0  ;;  %v22696_v6 = vadd.f32 %v21373_v9, %v26173_v10  ;;  %v6315_v37 = vpop.f32.mrb[31].mxu1  ;;  %21400 = vmatprep.mubr.msk.bf16.mxu0 %vm882_vm5, %v26218_v25 }
 0x601   : > { %v6435_v43 = vmax.f32 %v22695_v53, 0.0  ;;  %v22697_v59 = vadd.f32 %v26173_v10, %v6315_v37  ;;  %v6506_v0 = vld [vmem:[#allocation3 + $0x90] sm:$0xff] }
 0x602   : > { %6469 = vst.msk [vmem:[#allocation3 + $0xc1] sm:$0xff] %vm882_vm5, %v6437_v20  ;;  %v6438_v27 = vmax.f32 %v22696_v6, 0.0  ;;  %v6504_v13 = vld [vmem:[#allocation3 + $0x78] sm:$0xff] }
 0x603   : > { %6467 = vst.msk [vmem:[#allocation3 + $0xa9] sm:$0xff] %vm882_vm5, %v6435_v43  ;;  %v6436_v46 = vmax.f32 %v22697_v59, 0.0  ;;  %v6507_v29 = vld [vmem:[#allocation3 + $0x98] sm:$0xff] }
 0x604   : > { %6470 = vst.msk [vmem:[#allocation3 + $0xc9] sm:$0xff] %vm882_vm5, %v6438_v27  ;;  %v6505_v14 = vld [vmem:[#allocation3 + $0x80] sm:$0xff]  ;;  %v26234_v58 = vpack.c.bf16 %v6507_v29, %v6506_v0 }
 0x605   : > { %6468 = vst.msk [vmem:[#allocation3 + $0xb1] sm:$0xff] %vm882_vm5, %v6436_v46  ;;  %v21376_v47 = vpop.f32.mrb[32].mxu1  ;;  %v26231_v24 = vpack.c.bf16 %v6505_v14, %v6504_v13 }
 0x606   : > { %v22698_v32 = vadd.f32 %v21376_v47, %v26173_v10  ;;  %v6328_v16 = vpop.f32.mrb[33].mxu1 }
 0x607   : > { %v22699_v60 = vadd.f32 %v26173_v10, %v6328_v16  ;;  %v21377_v35 = vpop.f32.mrb[34].mxu1  ;;  %21401 = vmatmul.mubr.msk.bf16.gmra.mrb[40].mxu0 %vm882_vm5, %v26231_v24 }
 0x608   : > { %v6441_v1 = vmax.f32 %v22698_v32, 0.0  ;;  %v22700_v44 = vadd.f32 %v21377_v35, %v26173_v10  ;;  %v6331_v7 = vpop.f32.mrb[35].mxu1  ;;  %21404 = vmatprep.mubr.msk.bf16.mxu0 %vm882_vm5, %v26234_v58 }
 0x609   : > { %v6439_v36 = vmax.f32 %v22699_v60, 0.0  ;;  %v22701_v21 = vadd.f32 %v26173_v10, %v6331_v7  ;;  %v6510_v2 = vld [vmem:[#allocation3 + $0xc0] sm:$0xff] }
 0x60a   : > { %6473 = vst.msk [vmem:[#allocation3 + $0xf1] sm:$0xff] %vm882_vm5, %v6441_v1  ;;  %v6442_v61 = vmax.f32 %v22700_v44, 0.0  ;;  %v6508_v51 = vld [vmem:[#allocation3 + $0xa8] sm:$0xff] }
 0x60b   : > { %6471 = vst.msk [vmem:[#allocation3 + $0xd9] sm:$0xff] %vm882_vm5, %v6439_v36  ;;  %v6440_v57 = vmax.f32 %v22701_v21, 0.0  ;;  %v6511_v45 = vld [vmem:[#allocation3 + $0xc8] sm:$0xff] }
 0x60c   : > { %6474 = vst.msk [vmem:[#allocation3 + $0xf9] sm:$0xff] %vm882_vm5, %v6442_v61  ;;  %v6509_v56 = vld [vmem:[#allocation3 + $0xb0] sm:$0xff]  ;;  %v26250_v55 = vpack.c.bf16 %v6511_v45, %v6510_v2 }
 0x60d   : > { %6472 = vst.msk [vmem:[#allocation3 + $0xe1] sm:$0xff] %vm882_vm5, %v6440_v57  ;;  %v21380_v41 = vpop.f32.mrb[36].mxu1  ;;  %v26247_v3 = vpack.c.bf16 %v6509_v56, %v6508_v51 }
 0x60e   : > { %v22702_v38 = vadd.f32 %v21380_v41, %v26173_v10  ;;  %v6344_v19 = vpop.f32.mrb[37].mxu1 }
 0x60f   : > { %v22703_v17 = vadd.f32 %v26173_v10, %v6344_v19  ;;  %v21381_v30 = vpop.f32.mrb[38].mxu1  ;;  %21405 = vmatmul.mubr.msk.bf16.gmra.mrb[44].mxu0 %vm882_vm5, %v26247_v3 }
 0x610   : > { %v6445_v42 = vmax.f32 %v22702_v38, 0.0  ;;  %v22704_v4 = vadd.f32 %v21381_v30, %v26173_v10  ;;  %v6347_v22 = vpop.f32.mrb[39].mxu1  ;;  %21408 = vmatprep.mubr.msk.bf16.mxu0 %vm882_vm5, %v26250_v55 }
 0x611   : > { %v6443_v31 = vmax.f32 %v22703_v17, 0.0  ;;  %v22705_v52 = vadd.f32 %v26173_v10, %v6347_v22  ;;  %v6514_v6 = vld [vmem:[#allocation3 + $0xf0] sm:$0xff] }
 0x612   : > { %6477 = vst.msk [vmem:[#allocation3 + $0x121] sm:$0xff] %vm882_vm5, %v6445_v42  ;;  %v6446_v34 = vmax.f32 %v22704_v4, 0.0  ;;  %v6512_v28 = vld [vmem:[#allocation3 + $0xd8] sm:$0xff] }
 0x613   : > { %6475 = vst.msk [vmem:[#allocation3 + $0x109] sm:$0xff] %vm882_vm5, %v6443_v31  ;;  %v6444_v50 = vmax.f32 %v22705_v52, 0.0  ;;  %v6515_v8 = vld [vmem:[#allocation3 + $0xf8] sm:$0xff] }
 0x614   : > { %6478 = vst.msk [vmem:[#allocation3 + $0x129] sm:$0xff] %vm882_vm5, %v6446_v34  ;;  %v6513_v53 = vld [vmem:[#allocation3 + $0xe0] sm:$0xff]  ;;  %v26266_v59 = vpack.c.bf16 %v6515_v8, %v6514_v6 }
 0x615   : > { %6476 = vst.msk [vmem:[#allocation3 + $0x111] sm:$0xff] %vm882_vm5, %v6444_v50  ;;  %v21384_v9 = vpop.f32.mrb[40].mxu1  ;;  %v26263_v20 = vpack.c.bf16 %v6513_v53, %v6512_v28  ;;  %v6788_v50 = vld [vmem:[#allocation3 + $0x9] sm:$0xff]  ;;  %v6790_v6 = vld [vmem:[#allocation3 + $0x21] sm:$0xff] }
 0x616   : > { %v22706_v37 = vadd.f32 %v21384_v9, %v26173_v10  ;;  %v6360_v43 = vpop.f32.mrb[41].mxu1 }
 0x617   : > { %v22707_v27 = vadd.f32 %v26173_v10, %v6360_v43  ;;  %v21385_v46 = vpop.f32.mrb[42].mxu1  ;;  %21409 = vmatmul.mubr.msk.bf16.gmra.mrb[48].mxu0 %vm882_vm5, %v26263_v20  ;;  %v6789_v43 = vld [vmem:[#allocation3 + $0x19] sm:$0xff] }
 0x618   : > { %v6449_v29 = vmax.f32 %v22706_v37, 0.0  ;;  %v22708_v13 = vadd.f32 %v21385_v46, %v26173_v10  ;;  %v6363_v14 = vpop.f32.mrb[43].mxu1  ;;  %21412 = vmatprep.mubr.msk.bf16.mxu0 %vm882_vm5, %v26266_v59  ;;  %v6792_v37 = vld [vmem:[#allocation3 + $0x39] sm:$0xff]  ;;  %v7178_v46 = vsel %vm3881_vm4, %v26200_v12, 0  ;;  %v6796_v12 = vld [vmem:[#allocation3 + $0x69] sm:$0xff] }
 0x619   : > { %v6447_v47 = vmax.f32 %v22707_v27, 0.0  ;;  %v22709_v0 = vadd.f32 %v26173_v10, %v6363_v14  ;;  %v6518_v36 = vld [vmem:[#allocation3 + $0x120] sm:$0xff]  ;;  %v26308_v27 = vpack.c.bf16 %v6790_v6, %v6789_v43  ;;  %v26317_v14 = vld [vmem:[%s28832_s5 + $0xc] sm:$0xf] }
 0x61a   : > { %6481 = vst.msk [vmem:[#allocation3 + $0x151] sm:$0xff] %vm882_vm5, %v6449_v29  ;;  %v6450_v32 = vmax.f32 %v22708_v13, 0.0  ;;  %v6516_v35 = vld [vmem:[#allocation3 + $0x108] sm:$0xff]  ;;  %v6791_v29 = vld [vmem:[#allocation3 + $0x31] sm:$0xff] }
 0x61b   : > { %6479 = vst.msk [vmem:[#allocation3 + $0x139] sm:$0xff] %vm882_vm5, %v6447_v47  ;;  %v6448_v16 = vmax.f32 %v22709_v0, 0.0  ;;  %v6519_v60 = vld [vmem:[#allocation3 + $0x128] sm:$0xff]  ;;  %v26312_v13 = vpack.c.bf16 %v6792_v37, %v6791_v29  ;;  %v6794_v47 = vld [vmem:[#allocation3 + $0x51] sm:$0xff] }
 0x61c   : > { %6482 = vst.msk [vmem:[#allocation3 + $0x159] sm:$0xff] %vm882_vm5, %v6450_v32  ;;  %v6517_v1 = vld [vmem:[#allocation3 + $0x110] sm:$0xff]  ;;  %v26282_v57 = vpack.c.bf16 %v6519_v60, %v6518_v36 }
 0x61d   : > { %6480 = vst.msk [vmem:[#allocation3 + $0x141] sm:$0xff] %vm882_vm5, %v6448_v16  ;;  %v21388_v44 = vpop.f32.mrb[44].mxu1  ;;  %v26279_v7 = vpack.c.bf16 %v6517_v1, %v6516_v35  ;;  %v6793_v0 = vld [vmem:[#allocation3 + $0x49] sm:$0xff]  ;;  %v6795_v16 = vld [vmem:[#allocation3 + $0x61] sm:$0xff]  ;;  %v6800_v1 = vld [vmem:[#allocation3 + $0x99] sm:$0xff] }
 0x61e   : > { %v22710_v21 = vadd.f32 %v21388_v44, %v26173_v10  ;;  %v6376_v61 = vpop.f32.mrb[45].mxu1  ;;  %v26325_v32 = vpack.c.bf16 %v6794_v47, %v6793_v0  ;;  %v26327_v60 = vpack.c.bf16 %v6796_v12, %v6795_v16  ;;  %v6798_v35 = vld [vmem:[#allocation3 + $0x81] sm:$0xff]  ;;  %v6797_v44 = vld [vmem:[#allocation3 + $0x79] sm:$0xff]  ;;  %v7081_v0 = vld [vmem:[#allocation3 + $0xa] sm:$0xff] }
 0x61f   : > { %v22711_v45 = vadd.f32 %v26173_v10, %v6376_v61  ;;  %v21389_v51 = vpop.f32.mrb[46].mxu1  ;;  %21413 = vmatmul.mubr.msk.bf16.gmra.mrb[52].mxu0 %vm882_vm5, %v26279_v7  ;;  %v26333_v36 = vpack.c.bf16 %v6798_v35, %v6797_v44  ;;  %v7080_v12 = vld [vmem:[#allocation3 + $0x2] sm:$0xff] }
 0x620   : > { %v6453_v56 = vmax.f32 %v22710_v21, 0.0  ;;  %v22712_v41 = vadd.f32 %v21389_v51, %v26173_v10  ;;  %v6379_v2 = vpop.f32.mrb[47].mxu1  ;;  %21416 = vmatprep.mubr.msk.bf16.mxu0 %vm882_vm5, %v26282_v57  ;;  %v6799_v21 = vld [vmem:[#allocation3 + $0x91] sm:$0xff]  ;;  %v6804_v51 = vld [vmem:[#allocation3 + $0xc9] sm:$0xff] }
 0x621   : > { %v6451_v38 = vmax.f32 %v22711_v45, 0.0  ;;  %v22713_v19 = vadd.f32 %v26173_v10, %v6379_v2  ;;  %v6522_v52 = vld [vmem:[#allocation3 + $0x150] sm:$0xff]  ;;  %v6787_v10 = vld [vmem:[#allocation3 + $0x1] sm:$0xff]  ;;  %v26335_v61 = vpack.c.bf16 %v6800_v1, %v6799_v21  ;;  %v7112_v1 = vpack.c.bf16 %v7081_v0, %v7080_v12 }
 0x622   : > { %6485 = vst.msk [vmem:[#allocation3 + $0x181] sm:$0xff] %vm882_vm5, %v6453_v56  ;;  %v6454_v17 = vmax.f32 %v22712_v41, 0.0  ;;  %v6520_v4 = vld [vmem:[#allocation3 + $0x138] sm:$0xff]  ;;  %v6819_v53 = vpack.c.bf16 %v6788_v50, %v6787_v10  ;;  %v6801_v56 = vld [vmem:[#allocation3 + $0xa9] sm:$0xff]  ;;  %v6803_v2 = vld [vmem:[#allocation3 + $0xc1] sm:$0xff] }
 0x623   : > { %6483 = vst.msk [vmem:[#allocation3 + $0x169] sm:$0xff] %vm882_vm5, %v6451_v38  ;;  %v6452_v30 = vmax.f32 %v22713_v19, 0.0  ;;  %v6523_v42 = vld [vmem:[#allocation3 + $0x158] sm:$0xff]  ;;  %v26343_v38 = vpack.c.bf16 %v6804_v51, %v6803_v2  ;;  %v6806_v19 = vld [vmem:[#allocation3 + $0xe1] sm:$0xff]  ;;  %v6812_v10 = vld [vmem:[#allocation3 + $0x129] sm:$0xff] }
 0x624   : > { %6486 = vst.msk [vmem:[#allocation3 + $0x189] sm:$0xff] %vm882_vm5, %v6454_v17  ;;  %v6521_v22 = vld [vmem:[#allocation3 + $0x140] sm:$0xff]  ;;  %v26297_v34 = vpack.c.bf16 %v6523_v42, %v6522_v52  ;;  %v6802_v45 = vld [vmem:[#allocation3 + $0xb1] sm:$0xff]  ;;  %v6809_v50 = vld [vmem:[#allocation3 + $0x109] sm:$0xff] }
 0x625   : > { %6484 = vst.msk [vmem:[#allocation3 + $0x171] sm:$0xff] %vm882_vm5, %v6452_v30  ;;  %v26295_v31 = vpack.c.bf16 %v6521_v22, %v6520_v4  ;;  %v26341_v41 = vpack.c.bf16 %v6802_v45, %v6801_v56  ;;  %v6808_v17 = vld [vmem:[#allocation3 + $0xf9] sm:$0xff]  ;;  %v6807_v4 = vld [vmem:[#allocation3 + $0xf1] sm:$0xff]  ;;  %v6814_v6 = vld [vmem:[#allocation3 + $0x141] sm:$0xff] }
 0x626   : > { %v6805_v30 = vld [vmem:[#allocation3 + $0xd9] sm:$0xff]  ;;  %v26351_v22 = vpack.c.bf16 %v6808_v17, %v6807_v4  ;;  %v6810_v52 = vld [vmem:[#allocation3 + $0x111] sm:$0xff]  ;;  %v7083_v45 = vld [vmem:[#allocation3 + $0x22] sm:$0xff] }
 0x627   : > { %21417 = vmatmul.mubr.msk.bf16.gmra.mrb[56].mxu0 %vm882_vm5, %v26295_v31  ;;  %v26349_v42 = vpack.c.bf16 %v6806_v19, %v6805_v30  ;;  %v6816_v37 = vld [vmem:[#allocation3 + $0x159] sm:$0xff]  ;;  %v6815_v29 = vld [vmem:[#allocation3 + $0x151] sm:$0xff]  ;;  %v7471_v19 = vsel %vm3881_vm4, %v26317_v14, 0 }
 0x628   : > { %21420 = vmatprep.mubr.msk.bf16.mxu0 %vm882_vm5, %v26297_v34  ;;  %v6813_v43 = vld [vmem:[#allocation3 + $0x139] sm:$0xff]  ;;  %v26367_v47 = vpack.c.bf16 %v6816_v37, %v6815_v29  ;;  %v7086_v4 = vld [vmem:[#allocation3 + $0x4a] sm:$0xff]  ;;  %v7091_v37 = vld [vmem:[#allocation3 + $0x82] sm:$0xff] }
 0x629   : > { %v7082_v21 = vld [vmem:[#allocation3 + $0x1a] sm:$0xff]  ;;  %v7084_v51 = vld [vmem:[#allocation3 + $0x32] sm:$0xff] }
 0x62a   : > { %v6524_v8 = vld [vmem:[#allocation3 + $0x168] sm:$0xff]  ;;  %v7085_v56 = vld [vmem:[#allocation3 + $0x3a] sm:$0xff]  ;;  %v26378_v2 = vpack.c.bf16 %v7083_v45, %v7082_v21 }
 0x62b   : > { %v6817_v35 = vld [vmem:[#allocation3 + $0x169] sm:$0xff]  ;;  %v26382_v17 = vpack.c.bf16 %v7085_v56, %v7084_v51  ;;  %v7714_v30 = vld [vmem:[%s28832_s5 + $0x10] sm:$0xf] }
 0x62c   : > { %v6525_v28 = vld [vmem:[#allocation3 + $0x170] sm:$0xff]  ;;  %v7093_v29 = vld [vmem:[#allocation3 + $0x9a] sm:$0xff] }
 0x62d   : > { %v26303_v9 = vpack.c.bf16 %v6525_v28, %v6524_v8  ;;  %v26357_v8 = vpack.c.bf16 %v6810_v52, %v6809_v50  ;;  %v6811_v28 = vld [vmem:[#allocation3 + $0x121] sm:$0xff]  ;;  %v6818_v16 = vld [vmem:[#allocation3 + $0x171] sm:$0xff] }
 0x62e   : > { %v26373_v44 = vpack.c.bf16 %v6818_v16, %v6817_v35  ;;  %v7087_v52 = vld [vmem:[#allocation3 + $0x52] sm:$0xff]  ;;  %v7089_v50 = vld [vmem:[#allocation3 + $0x6a] sm:$0xff]  ;;  %v7098_v56 = vld [vmem:[#allocation3 + $0xda] sm:$0xff] }
 0x62f   : > { %21421 = vmatmul.mubr.msk.bf16.gmra.mrb[60].mxu0 %vm882_vm5, %v26303_v9  ;;  %v7094_v16 = vld [vmem:[#allocation3 + $0xaa] sm:$0xff]  ;;  %v7095_v35 = vld [vmem:[#allocation3 + $0xb2] sm:$0xff] }
 0x630   : > { %21426 = vmatprep.mubr.msk.bf16.mxu0 %vm882_vm5, %v6819_v53  ;;  %v26359_v53 = vpack.c.bf16 %v6812_v10, %v6811_v28  ;;  %v7088_v10 = vld [vmem:[#allocation3 + $0x62] sm:$0xff]  ;;  %v7097_v21 = vld [vmem:[#allocation3 + $0xca] sm:$0xff]  ;;  %v26408_v45 = vpack.c.bf16 %v7095_v35, %v7094_v16 }
 0x631   : > { %v26394_v28 = vpack.c.bf16 %v7089_v50, %v7088_v10 }
 0x637   : > { %21427 = vmatmul.mubr.msk.bf16.vlgmr.msra.gmra.mrb[32].mxu0 %vm882_vm5, %v26308_v27 }
 0x638   : > { %21459 = vmatpush3.bf16.msra.mxu0 %v7178_v46  ;;  %21430 = vmatprep.mubr.msk.bf16.mxu0 %vm882_vm5, %v26312_v13  ;;  %v26365_v46 = vpack.c.bf16 %v6814_v6, %v6813_v43  ;;  %v7090_v6 = vld [vmem:[#allocation3 + $0x7a] sm:$0xff]  ;;  %v7092_v43 = vld [vmem:[#allocation3 + $0x92] sm:$0xff] }
 0x639   : > { %24172 = vmatprep.subr.msk.bf16.mxu0 %vm3881_vm4, %v26317_v14  ;;  %v26392_v14 = vpack.c.bf16 %v7087_v52, %v7086_v4  ;;  %v26400_v12 = vpack.c.bf16 %v7091_v37, %v7090_v6  ;;  %v26402_v0 = vpack.c.bf16 %v7093_v29, %v7092_v43  ;;  %v7100_v4 = vld [vmem:[#allocation3 + $0xf2] sm:$0xff]  ;;  %v7101_v52 = vld [vmem:[#allocation3 + $0xfa] sm:$0xff]  ;;  %v7102_v6 = vld [vmem:[#allocation3 + $0x10a] sm:$0xff] }
 0x63a   : > { %v26418_v50 = vpack.c.bf16 %v7101_v52, %v7100_v4  ;;  %v7103_v37 = vld [vmem:[#allocation3 + $0x112] sm:$0xff]  ;;  %v7104_v43 = vld [vmem:[#allocation3 + $0x122] sm:$0xff]  ;;  %v7105_v29 = vld [vmem:[#allocation3 + $0x12a] sm:$0xff] }
 0x63b   : > { %v26424_v16 = vpack.c.bf16 %v7103_v37, %v7102_v6  ;;  %v26426_v35 = vpack.c.bf16 %v7105_v29, %v7104_v43  ;;  %v7110_v6 = vld [vmem:[#allocation3 + $0x16a] sm:$0xff]  ;;  %v7111_v37 = vld [vmem:[#allocation3 + $0x172] sm:$0xff]  ;;  %v7764_v29 = vsel %vm3881_vm4, %v7714_v30, 0 }
 0x63c   : > { %v26440_v43 = vpack.c.bf16 %v7111_v37, %v7110_v6  ;;  %v7696_v6 = vld [vmem:[#allocation3 + $0x181] sm:$0xff] }
 0x63f   : > { %21431 = vmatmul.mubr.msk.bf16.gmra.mrb[36].mxu0 %vm882_vm5, %v26325_v32 }
 0x640   : > { %21434 = vmatprep.mubr.msk.bf16.mxu0 %vm882_vm5, %v26327_v60 }
 0x647   : > { %21435 = vmatmul.mubr.msk.bf16.gmra.mrb[40].mxu0 %vm882_vm5, %v26333_v36 }
 0x648   : > { %21438 = vmatprep.mubr.msk.bf16.mxu0 %vm882_vm5, %v26335_v61 }
 0x64f   : > { %21439 = vmatmul.mubr.msk.bf16.gmra.mrb[44].mxu0 %vm882_vm5, %v26341_v41 }
 0x650   : > { %21442 = vmatprep.mubr.msk.bf16.mxu0 %vm882_vm5, %v26343_v38 }
 0x657   : > { %21443 = vmatmul.mubr.msk.bf16.gmra.mrb[48].mxu0 %vm882_vm5, %v26349_v42 }
 0x658   : > { %21446 = vmatprep.mubr.msk.bf16.mxu0 %vm882_vm5, %v26351_v22 }
 0x65f   : > { %21447 = vmatmul.mubr.msk.bf16.gmra.mrb[52].mxu0 %vm882_vm5, %v26357_v8 }
 0x660   : > { %21450 = vmatprep.mubr.msk.bf16.mxu0 %vm882_vm5, %v26359_v53 }
 0x667   : > { %21451 = vmatmul.mubr.msk.bf16.gmra.mrb[56].mxu0 %vm882_vm5, %v26365_v46 }
 0x668   : > { %21454 = vmatprep.mubr.msk.bf16.mxu0 %vm882_vm5, %v26367_v47 }
 0x66f   : > { %21455 = vmatmul.mubr.msk.bf16.gmra.mrb[60].mxu0 %vm882_vm5, %v26373_v44 }
 0x670   : > { %21460 = vmatprep.mubr.msk.bf16.mxu0 %vm882_vm5, %v7112_v1  ;;  %v7096_v1 = vld [vmem:[#allocation3 + $0xc2] sm:$0xff] }
 0x671   : > { %v26410_v51 = vpack.c.bf16 %v7097_v21, %v7096_v1  ;;  %v7106_v1 = vld [vmem:[#allocation3 + $0x13a] sm:$0xff]  ;;  %v7107_v21 = vld [vmem:[#allocation3 + $0x142] sm:$0xff] }
 0x672   : > { %v26432_v4 = vpack.c.bf16 %v7107_v21, %v7106_v1  ;;  %v8007_v1 = vld [vmem:[%s28832_s5 + $0x14] sm:$0xf] }
 0x677   : > { %21461 = vmatmul.mubr.msk.bf16.vlgmr.msra.gmra.mrb[32].mxu0 %vm882_vm5, %v26378_v2 }
 0x678   : > { %21493 = vmatpush3.bf16.msra.mxu0 %v7471_v19  ;;  %21464 = vmatprep.mubr.msk.bf16.mxu0 %vm882_vm5, %v26382_v17  ;;  %v7099_v19 = vld [vmem:[#allocation3 + $0xe2] sm:$0xff] }
 0x679   : > { %24173 = vmatprep.subr.msk.bf16.mxu0 %vm3881_vm4, %v7714_v30  ;;  %v26416_v10 = vpack.c.bf16 %v7099_v19, %v7098_v56  ;;  %v7108_v56 = vld [vmem:[#allocation3 + $0x152] sm:$0xff]  ;;  %v7109_v19 = vld [vmem:[#allocation3 + $0x15a] sm:$0xff] }
 0x67a   : > { %v26434_v52 = vpack.c.bf16 %v7109_v19, %v7108_v56  ;;  %v7403_v30 = vld [vmem:[#allocation3 + $0x180] sm:$0xff]  ;;  %v8057_v56 = vsel %vm3881_vm4, %v8007_v1, 0  ;;  %v8300_v19 = vld [vmem:[%s28832_s5 + $0x18] sm:$0xf] }
 0x67f   : > { %21465 = vmatmul.mubr.msk.bf16.gmra.mrb[36].mxu0 %vm882_vm5, %v26392_v14 }
 0x680   : > { %21468 = vmatprep.mubr.msk.bf16.mxu0 %vm882_vm5, %v26394_v28 }
 0x687   : > { %21469 = vmatmul.mubr.msk.bf16.gmra.mrb[40].mxu0 %vm882_vm5, %v26400_v12 }
 0x688   : > { %21472 = vmatprep.mubr.msk.bf16.mxu0 %vm882_vm5, %v26402_v0 }
 0x68f   : > { %21473 = vmatmul.mubr.msk.bf16.gmra.mrb[44].mxu0 %vm882_vm5, %v26408_v45 }
 0x690   : > { %21476 = vmatprep.mubr.msk.bf16.mxu0 %vm882_vm5, %v26410_v51 }
 0x697   : > { %21477 = vmatmul.mubr.msk.bf16.gmra.mrb[48].mxu0 %vm882_vm5, %v26416_v10 }
 0x698   : > { %21480 = vmatprep.mubr.msk.bf16.mxu0 %vm882_vm5, %v26418_v50 }
 0x69f   : > { %21481 = vmatmul.mubr.msk.bf16.gmra.mrb[52].mxu0 %vm882_vm5, %v26424_v16 }
 0x6a0   : > { %21484 = vmatprep.mubr.msk.bf16.mxu0 %vm882_vm5, %v26426_v35 }
 0x6a7   : > { %21485 = vmatmul.mubr.msk.bf16.gmra.mrb[56].mxu0 %vm882_vm5, %v26432_v4 }
 0x6a8   : > { %21488 = vmatprep.mubr.msk.bf16.mxu0 %vm882_vm5, %v26434_v52 }
 0x6af   : > { %21489 = vmatmul.mubr.msk.bf16.gmra.mrb[60].mxu0 %vm882_vm5, %v26440_v43 }
 0x6b0   : > { %21494 = vmatprep.mubr.msk.bf16.mxu0 %vm882_vm5, %v26191_v39  ;;  %v7404_v39 = vld [vmem:[#allocation3 + $0x188] sm:$0xff] }
 0x6b1   : > { %v26479_v21 = vpack.c.bf16 %v7404_v39, %v7403_v30  ;;  %v7990_v39 = vld [vmem:[#allocation3 + $0x18a] sm:$0xff] }
 0x6b7   : > { %21495 = vmatmul.mubr.msk.bf16.vlgmr.msra.gmra.mrb[32].mxu0 %vm882_vm5, %v26195_v5 }
 0x6b8   : > { %21527 = vmatpush3.bf16.msra.mxu0 %v7764_v29  ;;  %21498 = vmatprep.mubr.msk.bf16.mxu0 %vm882_vm5, %v26215_v49  ;;  %v8350_v29 = vsel %vm3881_vm4, %v8300_v19, 0 }
 0x6b9   : > { %24174 = vmatprep.subr.msk.bf16.mxu0 %vm3881_vm4, %v8007_v1  ;;  %v8593_v1 = vld [vmem:[%s28832_s5 + $0x1c] sm:$0xf] }
 0x6bf   : > { %21499 = vmatmul.mubr.msk.bf16.gmra.mrb[36].mxu0 %vm882_vm5, %v26218_v25 }
 0x6c0   : > { %21502 = vmatprep.mubr.msk.bf16.mxu0 %vm882_vm5, %v26231_v24 }
 0x6c7   : > { %21503 = vmatmul.mubr.msk.bf16.gmra.mrb[40].mxu0 %vm882_vm5, %v26234_v58 }
 0x6c8   : > { %21506 = vmatprep.mubr.msk.bf16.mxu0 %vm882_vm5, %v26247_v3 }
 0x6cf   : > { %21507 = vmatmul.mubr.msk.bf16.gmra.mrb[44].mxu0 %vm882_vm5, %v26250_v55 }
 0x6d0   : > { %21510 = vmatprep.mubr.msk.bf16.mxu0 %vm882_vm5, %v26263_v20 }
 0x6d7   : > { %21511 = vmatmul.mubr.msk.bf16.gmra.mrb[48].mxu0 %vm882_vm5, %v26266_v59 }
 0x6d8   : > { %21514 = vmatprep.mubr.msk.bf16.mxu0 %vm882_vm5, %v26279_v7 }
 0x6df   : > { %21515 = vmatmul.mubr.msk.bf16.gmra.mrb[52].mxu0 %vm882_vm5, %v26282_v57 }
 0x6e0   : > { %21518 = vmatprep.mubr.msk.bf16.mxu0 %vm882_vm5, %v26295_v31 }
 0x6e7   : > { %21519 = vmatmul.mubr.msk.bf16.gmra.mrb[56].mxu0 %vm882_vm5, %v26297_v34 }
 0x6e8   : > { %21522 = vmatprep.mubr.msk.bf16.mxu0 %vm882_vm5, %v26303_v9 }
 0x6ef   : > { %21523 = vmatmul.mubr.msk.bf16.gmra.mrb[60].mxu0 %vm882_vm5, %v26479_v21 }
 0x6f0   : > { %21528 = vmatprep.mubr.msk.bf16.mxu0 %vm882_vm5, %v26308_v27  ;;  %v7697_v27 = vld [vmem:[#allocation3 + $0x189] sm:$0xff] }
 0x6f1   : > { %v26518_v37 = vpack.c.bf16 %v7697_v27, %v7696_v6  ;;  %v28843_v27 = vmax.f32 %v25540_v33, 0.0  ;;  %v26716_v33 = vld [vmem:[%s28834_s11 + $0x8] sm:$0xf] }
 0x6f7   : > { %21529 = vmatmul.mubr.msk.bf16.vlgmr.msra.gmra.mrb[32].mxu0 %vm882_vm5, %v26312_v13 }
 0x6f8   : > { %21561 = vmatpush3.bf16.msra.mxu0 %v8057_v56  ;;  %21532 = vmatprep.mubr.msk.bf16.mxu0 %vm882_vm5, %v26325_v32  ;;  %v8643_v56 = vsel %vm3881_vm4, %v8593_v1, 0 }
 0x6f9   : > { %24175 = vmatprep.subr.msk.bf16.mxu0 %vm3881_vm4, %v8300_v19  ;;  %v8886_v19 = vld [vmem:[%s28832_s5 + $0x20] sm:$0xf]  ;;  %s28835_s5 = sld [smem:[#allocation43_spill]] }
 0x6ff   : > { %21533 = vmatmul.mubr.msk.bf16.gmra.mrb[36].mxu0 %vm882_vm5, %v26327_v60 }
 0x700   : > { %21536 = vmatprep.mubr.msk.bf16.mxu0 %vm882_vm5, %v26333_v36 }
 0x707   : > { %21537 = vmatmul.mubr.msk.bf16.gmra.mrb[40].mxu0 %vm882_vm5, %v26335_v61 }
 0x708   : > { %21540 = vmatprep.mubr.msk.bf16.mxu0 %vm882_vm5, %v26341_v41 }
 0x70f   : > { %21541 = vmatmul.mubr.msk.bf16.gmra.mrb[44].mxu0 %vm882_vm5, %v26343_v38 }
 0x710   : > { %21544 = vmatprep.mubr.msk.bf16.mxu0 %vm882_vm5, %v26349_v42 }
 0x717   : > { %21545 = vmatmul.mubr.msk.bf16.gmra.mrb[48].mxu0 %vm882_vm5, %v26351_v22 }
 0x718   : > { %21548 = vmatprep.mubr.msk.bf16.mxu0 %vm882_vm5, %v26357_v8 }
 0x71f   : > { %21549 = vmatmul.mubr.msk.bf16.gmra.mrb[52].mxu0 %vm882_vm5, %v26359_v53 }
 0x720   : > { %21552 = vmatprep.mubr.msk.bf16.mxu0 %vm882_vm5, %v26365_v46 }
 0x727   : > { %21553 = vmatmul.mubr.msk.bf16.gmra.mrb[56].mxu0 %vm882_vm5, %v26367_v47 }
 0x728   : > { %21556 = vmatprep.mubr.msk.bf16.mxu0 %vm882_vm5, %v26373_v44 }
 0x72f   : > { %21557 = vmatmul.mubr.msk.bf16.gmra.mrb[60].mxu0 %vm882_vm5, %v26518_v37 }
 0x730   : > { %21562 = vmatprep.mubr.msk.bf16.mxu0 %vm882_vm5, %v26378_v2  ;;  %v7989_v2 = vld [vmem:[#allocation3 + $0x182] sm:$0xff] }
 0x731   : > { %v26557_v30 = vpack.c.bf16 %v7990_v39, %v7989_v2 }
 0x737   : > { %21563 = vmatmul.mubr.msk.bf16.vlgmr.msra.gmra.mrb[32].mxu0 %vm882_vm5, %v26382_v17 }
 0x738   : > { %21595 = vmatpush3.bf16.msra.mxu0 %v8350_v29  ;;  %21566 = vmatprep.mubr.msk.bf16.mxu0 %vm882_vm5, %v26392_v14 }
 0x739   : > { %24176 = vmatprep.subr.msk.bf16.mxu0 %vm3881_vm4, %v8593_v1 }
 0x73f   : > { %21567 = vmatmul.mubr.msk.bf16.gmra.mrb[36].mxu0 %vm882_vm5, %v26394_v28 }
 0x740   : > { %21570 = vmatprep.mubr.msk.bf16.mxu0 %vm882_vm5, %v26400_v12 }
 0x747   : > { %21571 = vmatmul.mubr.msk.bf16.gmra.mrb[40].mxu0 %vm882_vm5, %v26402_v0 }
 0x748   : > { %21574 = vmatprep.mubr.msk.bf16.mxu0 %vm882_vm5, %v26408_v45 }
 0x74f   : > { %21575 = vmatmul.mubr.msk.bf16.gmra.mrb[44].mxu0 %vm882_vm5, %v26410_v51 }
 0x750   : > { %21578 = vmatprep.mubr.msk.bf16.mxu0 %vm882_vm5, %v26416_v10 }
 0x757   : > { %21579 = vmatmul.mubr.msk.bf16.gmra.mrb[48].mxu0 %vm882_vm5, %v26418_v50 }
 0x758   : > { %21582 = vmatprep.mubr.msk.bf16.mxu0 %vm882_vm5, %v26424_v16 }
 0x75f   : > { %21583 = vmatmul.mubr.msk.bf16.gmra.mrb[52].mxu0 %vm882_vm5, %v26426_v35 }
 0x760   : > { %21586 = vmatprep.mubr.msk.bf16.mxu0 %vm882_vm5, %v26432_v4 }
 0x767   : > { %21587 = vmatmul.mubr.msk.bf16.gmra.mrb[56].mxu0 %vm882_vm5, %v26434_v52 }
 0x768   : > { %21590 = vmatprep.mubr.msk.bf16.mxu0 %vm882_vm5, %v26440_v43 }
 0x76f   : > { %21591 = vmatmul.mubr.msk.bf16.gmra.mrb[60].mxu0 %vm882_vm5, %v26557_v30 }
 0x770   : > { %21596 = vmatprep.mubr.msk.bf16.mxu0 %vm882_vm5, %v26195_v5  ;;  %v8282_v5 = vld [vmem:[#allocation3 + $0x198] sm:$0xff] }
 0x777   : > { %21597 = vmatmul.mubr.msk.bf16.vlgmr.msra.gmra.mrb[32].mxu0 %vm882_vm5, %v26215_v49  ;;  %v8283_v49 = vld [vmem:[#allocation3 + $0x1a0] sm:$0xff] }
 0x778   : > { %21629 = vmatpush3.bf16.msra.mxu0 %v8643_v56  ;;  %21600 = vmatprep.mubr.msk.bf16.mxu0 %vm882_vm5, %v26218_v25  ;;  %v8299_v25 = vpack.c.bf16 %v8283_v49, %v8282_v5  ;;  %v28844_v49 = vmax.f32 %v25560_v40, 0.0  ;;  %v28846_v40 = vmax.f32 %v25576_v15, 0.0 }
 0x779   : > { %24177 = vmatprep.subr.msk.bf16.mxu0 %vm3881_vm4, %v8886_v19 }
 0x77f   : > { %21601 = vmatmul.mubr.msk.bf16.gmra.mrb[36].mxu0 %vm882_vm5, %v26231_v24  ;;  %v9250_v24 = vld [vmem:[%s28834_s11] sm:$0xf] }
 0x780   : > { %21604 = vmatprep.mubr.msk.bf16.mxu0 %vm882_vm5, %v26234_v58  ;;  %24178 = vmatprep.subr.msk.bf16.mxu1 %vm3881_vm4, %v9250_v24  ;;  %v9300_v58 = vsel %vm3881_vm4, %v9250_v24, 0 }
 0x781   : > { %21697 = vmatpush3.bf16.msra.mxu1 %v9300_v58 }
 0x787   : > { %21605 = vmatmul.mubr.msk.bf16.gmra.mrb[40].mxu0 %vm882_vm5, %v26247_v3  ;;  %v8936_v3 = vsel %vm3881_vm4, %v8886_v19, 0 }
 0x788   : > { %21608 = vmatprep.mubr.msk.bf16.mxu0 %vm882_vm5, %v26250_v55  ;;  %v8575_v55 = vld [vmem:[#allocation3 + $0x199] sm:$0xff] }
 0x78f   : > { %21609 = vmatmul.mubr.msk.bf16.gmra.mrb[44].mxu0 %vm882_vm5, %v26263_v20  ;;  %v8576_v20 = vld [vmem:[#allocation3 + $0x1a1] sm:$0xff] }
 0x790   : > { %21612 = vmatprep.mubr.msk.bf16.mxu0 %vm882_vm5, %v26266_v59  ;;  %v8592_v59 = vpack.c.bf16 %v8576_v20, %v8575_v55 }
 0x797   : > { %21613 = vmatmul.mubr.msk.bf16.gmra.mrb[48].mxu0 %vm882_vm5, %v26279_v7  ;;  %v8868_v7 = vld [vmem:[#allocation3 + $0x19a] sm:$0xff] }
 0x798   : > { %21616 = vmatprep.mubr.msk.bf16.mxu0 %vm882_vm5, %v26282_v57  ;;  %v8869_v57 = vld [vmem:[#allocation3 + $0x1a2] sm:$0xff] }
 0x79f   : > { %21617 = vmatmul.mubr.msk.bf16.gmra.mrb[52].mxu0 %vm882_vm5, %v26295_v31  ;;  %v8885_v31 = vpack.c.bf16 %v8869_v57, %v8868_v7  ;;  %v28847_v7 = vld [vmem:[#allocation16_spill] sm:$0xff] }
 0x7a0   : > { %21620 = vmatprep.mubr.msk.bf16.mxu0 %vm882_vm5, %v26297_v34  ;;  %v9202_v34 = vld [vmem:[#allocation3] sm:$0xff]  ;;  %v28848_v57 = vmax.f32 %v28847_v7, 0.0 }
 0x7a7   : > { %21621 = vmatmul.mubr.msk.bf16.gmra.mrb[56].mxu0 %vm882_vm5, %v26303_v9  ;;  %v9203_v9 = vld [vmem:[#allocation3 + $0x8] sm:$0xff] }
 0x7a8   : > { %21624 = vmatprep.mubr.msk.bf16.mxu0 %vm882_vm5, %v26479_v21 }
 0x7af   : > { %21625 = vmatmul.mubr.msk.bf16.gmra.mrb[60].mxu0 %vm882_vm5, %v8299_v25 }
 0x7b0   : > { %21630 = vmatprep.mubr.msk.bf16.mxu0 %vm882_vm5, %v26312_v13  ;;  %v9234_v13 = vpack.c.bf16 %v9203_v9, %v9202_v34 }
 0x7b2   : > { %21698 = vmatprep.mubr.msk.bf16.mxu1 %vm882_vm5, %v9234_v13 }
 0x7b7   : > { %21631 = vmatmul.mubr.msk.bf16.vlgmr.msra.gmra.mrb[32].mxu0 %vm882_vm5, %v26325_v32  ;;  %v9511_v32 = vld [vmem:[%s28834_s11 + $0x4] sm:$0xf] }
 0x7b8   : > { %21663 = vmatpush3.bf16.msra.mxu0 %v8936_v3  ;;  %21634 = vmatprep.mubr.msk.bf16.mxu0 %vm882_vm5, %v26327_v60  ;;  %v26673_v60 = vld [vmem:[%s28835_s5] ss:$0 sm:$0xff]  ;;  %v9561_v2 = vsel %vm3881_vm4, %v9511_v32, 0  ;;  %v28845_v3 = vmax.f32 %v25570_v62, 0.0  ;;  %s28892_s5 = sld [smem:[#allocation48_spill]] }
 0x7b9   : > { %24179 = vmatprep.subr.msk.bf16.mxu1 %vm3881_vm4, %v9511_v32 }
 0x7bf   : > { %21635 = vmatmul.mubr.msk.bf16.gmra.mrb[36].mxu0 %vm882_vm5, %v26333_v36 }
 0x7c0   : > { %21638 = vmatprep.mubr.msk.bf16.mxu0 %vm882_vm5, %v26335_v61 }
 0x7c7   : > { %21639 = vmatmul.mubr.msk.bf16.gmra.mrb[40].mxu0 %vm882_vm5, %v26341_v41 }
 0x7c8   : > { %21642 = vmatprep.mubr.msk.bf16.mxu0 %vm882_vm5, %v26343_v38 }
 0x7cf   : > { %21643 = vmatmul.mubr.msk.bf16.gmra.mrb[44].mxu0 %vm882_vm5, %v26349_v42 }
 0x7d0   : > { %21646 = vmatprep.mubr.msk.bf16.mxu0 %vm882_vm5, %v26351_v22  ;;  %v28836_v22 = vmax.f32 %v25501_v18, 0.0 }
 0x7d7   : > { %21647 = vmatmul.mubr.msk.bf16.gmra.mrb[48].mxu0 %vm882_vm5, %v26357_v8 }
 0x7d8   : > { %21650 = vmatprep.mubr.msk.bf16.mxu0 %vm882_vm5, %v26359_v53 }
 0x7df   : > { %21651 = vmatmul.mubr.msk.bf16.gmra.mrb[52].mxu0 %vm882_vm5, %v26365_v46 }
 0x7e0   : > { %21654 = vmatprep.mubr.msk.bf16.mxu0 %vm882_vm5, %v26367_v47  ;;  %v28837_v47 = vmax.f32 %v25504_v26, 0.0 }
 0x7e7   : > { %21655 = vmatmul.mubr.msk.bf16.gmra.mrb[56].mxu0 %vm882_vm5, %v26373_v44 }
 0x7e8   : > { %21658 = vmatprep.mubr.msk.bf16.mxu0 %vm882_vm5, %v26518_v37 }
 0x7ef   : > { %21659 = vmatmul.mubr.msk.bf16.gmra.mrb[60].mxu0 %vm882_vm5, %v8592_v59 }
 0x7f0   : > { %21664 = vmatprep.mubr.msk.bf16.mxu0 %vm882_vm5, %v26382_v17 }
 0x7f7   : > { %21665 = vmatmul.mubr.msk.bf16.vlgmr.msra.gmra.mrb[32].mxu0 %vm882_vm5, %v26392_v14  ;;  %v28838_v14 = vmax.f32 %v25508_v54, 0.0 }
 0x7f8   : > { %21668 = vmatprep.mubr.msk.bf16.mxu0 %vm882_vm5, %v26394_v28 }
 0x7ff   : > { %21669 = vmatmul.mubr.msk.bf16.gmra.mrb[36].mxu0 %vm882_vm5, %v26400_v12  ;;  %v28839_v12 = vmax.f32 %v25512_v63, 0.0  ;;  %v28841_v63 = vmax.f32 %v25532_v48, 0.0 }
 0x800   : > { %21672 = vmatprep.mubr.msk.bf16.mxu0 %vm882_vm5, %v26402_v0 }
 0x807   : > { %21673 = vmatmul.mubr.msk.bf16.gmra.mrb[40].mxu0 %vm882_vm5, %v26408_v45 }
 0x808   : > { %21676 = vmatprep.mubr.msk.bf16.mxu0 %vm882_vm5, %v26410_v51 }
 0x80f   : > { %21677 = vmatmul.mubr.msk.bf16.gmra.mrb[44].mxu0 %vm882_vm5, %v26416_v10 }
 0x810   : > { %21680 = vmatprep.mubr.msk.bf16.mxu0 %vm882_vm5, %v26418_v50  ;;  %v28840_v50 = vmax.f32 %v25529_v11, 0.0 }
 0x817   : > { %21681 = vmatmul.mubr.msk.bf16.gmra.mrb[48].mxu0 %vm882_vm5, %v26424_v16 }
 0x818   : > { %21684 = vmatprep.mubr.msk.bf16.mxu0 %vm882_vm5, %v26426_v35 }
 0x81f   : > { %21685 = vmatmul.mubr.msk.bf16.gmra.mrb[52].mxu0 %vm882_vm5, %v26432_v4 }
 0x820   : > { %21688 = vmatprep.mubr.msk.bf16.mxu0 %vm882_vm5, %v26434_v52 }
 0x827   : > { %21689 = vmatmul.mubr.msk.bf16.gmra.mrb[56].mxu0 %vm882_vm5, %v26440_v43  ;;  %v28842_v43 = vmax.f32 %v25536_v23, 0.0 }
 0x828   : > { %21692 = vmatprep.mubr.msk.bf16.mxu0 %vm882_vm5, %v26557_v30 }
 0x82f   : > { %21693 = vmatmul.mubr.msk.bf16.gmra.mrb[60].mxu0 %vm882_vm5, %v8885_v31 }
 0x8ca   : > { %v21666_v36 = vpop.f32.mrb[32].mxu0 }
 0x8cb   : > { %v22714_v61 = vadd.f32 %v21666_v36, %v26673_v60  ;;  %v8972_v41 = vpop.f32.mrb[33].mxu0 }
 0x8cc   : > { %v22715_v38 = vadd.f32 %v26673_v60, %v8972_v41  ;;  %v21667_v42 = vpop.f32.mrb[34].mxu0 }
 0x8cd   : > { %v9133_v8 = vadd.f32 %v22714_v61, %v28836_v22  ;;  %v22716_v53 = vadd.f32 %v21667_v42, %v26673_v60  ;;  %v8975_v46 = vpop.f32.mrb[35].mxu0  ;;  %v28849_v22 = vld [vmem:[#allocation17_spill] sm:$0xff] }
 0x8ce   : > { %v9131_v44 = vadd.f32 %v22715_v38, %v28837_v47  ;;  %v22717_v17 = vadd.f32 %v26673_v60, %v8975_v46 }
 0x8cf   : > { %9165 = vst.msk [vmem:[#allocation3 + $0x31] sm:$0xff] %vm882_vm5, %v9133_v8  ;;  %v9134_v28 = vadd.f32 %v22716_v53, %v28838_v14  ;;  %v28850_v8 = vmax.f32 %v28849_v22, 0.0 }
 0x8d0   : > { %9163 = vst.msk [vmem:[#allocation3 + $0x19] sm:$0xff] %vm882_vm5, %v9131_v44  ;;  %v9132_v0 = vadd.f32 %v22717_v17, %v28839_v12  ;;  %v28851_v44 = vld [vmem:[#allocation18_spill] sm:$0xff]  ;;  %v28853_v12 = vld [vmem:[#allocation19_spill] sm:$0xff] }
 0x8d1   : > { %9166 = vst.msk [vmem:[#allocation3 + $0x39] sm:$0xff] %vm882_vm5, %v9134_v28  ;;  %v28852_v17 = vmax.f32 %v28851_v44, 0.0 }
 0x8d2   : > { %9164 = vst.msk [vmem:[#allocation3 + $0x21] sm:$0xff] %vm882_vm5, %v9132_v0  ;;  %v21670_v18 = vpop.f32.mrb[36].mxu0  ;;  %v28854_v0 = vmax.f32 %v28853_v12, 0.0 }
 0x8d3   : > { %v22718_v26 = vadd.f32 %v21670_v18, %v26673_v60  ;;  %v8988_v45 = vpop.f32.mrb[37].mxu0 }
 0x8d4   : > { %v22719_v51 = vadd.f32 %v26673_v60, %v8988_v45  ;;  %v21671_v10 = vpop.f32.mrb[38].mxu0 }
 0x8d5   : > { %v9137_v54 = vadd.f32 %v22718_v26, %v28840_v50  ;;  %v22720_v16 = vadd.f32 %v21671_v10, %v26673_v60  ;;  %v8991_v35 = vpop.f32.mrb[39].mxu0  ;;  %v28855_v26 = vld [vmem:[#allocation20_spill] sm:$0xff] }
 0x8d6   : > { %v9135_v4 = vadd.f32 %v22719_v51, %v28841_v63  ;;  %v22721_v52 = vadd.f32 %v26673_v60, %v8991_v35  ;;  %v9206_v39 = vld [vmem:[#allocation3 + $0x30] sm:$0xff]  ;;  %v28856_v45 = vmax.f32 %v28855_v26, 0.0 }
 0x8d7   : > { %9169 = vst.msk [vmem:[#allocation3 + $0x61] sm:$0xff] %vm882_vm5, %v9137_v54  ;;  %v9138_v21 = vadd.f32 %v22720_v16, %v28842_v43  ;;  %v9204_v37 = vld [vmem:[#allocation3 + $0x18] sm:$0xff] }
 0x8d8   : > { %9167 = vst.msk [vmem:[#allocation3 + $0x49] sm:$0xff] %vm882_vm5, %v9135_v4  ;;  %v9136_v6 = vadd.f32 %v22721_v52, %v28843_v27  ;;  %v9207_v11 = vld [vmem:[#allocation3 + $0x38] sm:$0xff] }
 0x8d9   : > { %9170 = vst.msk [vmem:[#allocation3 + $0x69] sm:$0xff] %vm882_vm5, %v9138_v21  ;;  %v9205_v29 = vld [vmem:[#allocation3 + $0x20] sm:$0xff]  ;;  %v26711_v56 = vpack.c.bf16 %v9207_v11, %v9206_v39 }
 0x8da   : > { %9168 = vst.msk [vmem:[#allocation3 + $0x51] sm:$0xff] %vm882_vm5, %v9136_v6  ;;  %v21674_v48 = vpop.f32.mrb[40].mxu0  ;;  %v26707_v1 = vpack.c.bf16 %v9205_v29, %v9204_v37  ;;  %v28857_v6 = vld [vmem:[#allocation21_spill] sm:$0xff] }
 0x8db   : > { %v22722_v23 = vadd.f32 %v21674_v48, %v26673_v60  ;;  %v9004_v30 = vpop.f32.mrb[41].mxu0  ;;  %v28858_v11 = vmax.f32 %v28857_v6, 0.0 }
 0x8dc   : > { %v22723_v19 = vadd.f32 %v26673_v60, %v9004_v30  ;;  %v21675_v5 = vpop.f32.mrb[42].mxu0  ;;  %21699 = vmatmul.mubr.msk.bf16.vlgmr.msra.gmra.mrb[48].mxu1 %vm882_vm5, %v26707_v1 }
 0x8dd   : > { %v9141_v25 = vadd.f32 %v22722_v23, %v28844_v49  ;;  %v22724_v24 = vadd.f32 %v21675_v5, %v26673_v60  ;;  %21731 = vmatpush3.bf16.msra.mxu1 %v9561_v2  ;;  %v9007_v58 = vpop.f32.mrb[43].mxu0  ;;  %21702 = vmatprep.mubr.msk.bf16.mxu1 %vm882_vm5, %v26711_v56  ;;  %v28859_v2 = vld [vmem:[#allocation22_spill] sm:$0xff] }
 0x8de   : > { %v9139_v55 = vadd.f32 %v22723_v19, %v28845_v3  ;;  %v22725_v20 = vadd.f32 %v26673_v60, %v9007_v58  ;;  %24180 = vmatprep.subr.msk.bf16.mxu1 %vm3881_vm4, %v26716_v33  ;;  %v9210_v36 = vld [vmem:[#allocation3 + $0x60] sm:$0xff]  ;;  %v28860_v39 = vmax.f32 %v28859_v2, 0.0  ;;  %v28861_v19 = vld [vmem:[#allocation23_spill] sm:$0xff] }
 0x8df   : > { %9173 = vst.msk [vmem:[#allocation3 + $0x91] sm:$0xff] %vm882_vm5, %v9141_v25  ;;  %v9142_v59 = vadd.f32 %v22724_v24, %v28846_v40  ;;  %v9208_v62 = vld [vmem:[#allocation3 + $0x48] sm:$0xff]  ;;  %v28862_v5 = vmax.f32 %v28861_v19, 0.0  ;;  %v28863_v25 = vld [vmem:[#allocation24_spill] sm:$0xff]  ;;  %v28877_v2 = vld [vmem:[#allocation31_spill] sm:$0xff] }
 0x8e0   : > { %9171 = vst.msk [vmem:[#allocation3 + $0x79] sm:$0xff] %vm882_vm5, %v9139_v55  ;;  %v9140_v31 = vadd.f32 %v22725_v20, %v28848_v57  ;;  %v9211_v34 = vld [vmem:[#allocation3 + $0x68] sm:$0xff]  ;;  %v28864_v24 = vmax.f32 %v28863_v25, 0.0 }
 0x8e1   : > { %9174 = vst.msk [vmem:[#allocation3 + $0x99] sm:$0xff] %vm882_vm5, %v9142_v59  ;;  %v9209_v9 = vld [vmem:[#allocation3 + $0x50] sm:$0xff]  ;;  %v26742_v41 = vpack.c.bf16 %v9211_v34, %v9210_v36 }
 0x8e2   : > { %9172 = vst.msk [vmem:[#allocation3 + $0x81] sm:$0xff] %vm882_vm5, %v9140_v31  ;;  %v21678_v13 = vpop.f32.mrb[44].mxu0  ;;  %v26739_v32 = vpack.c.bf16 %v9209_v9, %v9208_v62 }
 0x8e3   : > { %v22726_v61 = vadd.f32 %v21678_v13, %v26673_v60  ;;  %v9020_v15 = vpop.f32.mrb[45].mxu0  ;;  %v28865_v13 = vld [vmem:[#allocation25_spill] sm:$0xff] }
 0x8e4   : > { %v22727_v38 = vadd.f32 %v26673_v60, %v9020_v15  ;;  %v21679_v42 = vpop.f32.mrb[46].mxu0  ;;  %21703 = vmatmul.mubr.msk.bf16.gmra.mrb[52].mxu1 %vm882_vm5, %v26739_v32  ;;  %v28866_v36 = vmax.f32 %v28865_v13, 0.0 }
 0x8e5   : > { %v9145_v53 = vadd.f32 %v22726_v61, %v28850_v8  ;;  %v22728_v46 = vadd.f32 %v21679_v42, %v26673_v60  ;;  %v9023_v47 = vpop.f32.mrb[47].mxu0  ;;  %21706 = vmatprep.mubr.msk.bf16.mxu1 %vm882_vm5, %v26742_v41  ;;  %v28867_v42 = vld [vmem:[#allocation26_spill] sm:$0xff] }
 0x8e6   : > { %v9143_v14 = vadd.f32 %v22727_v38, %v28852_v17  ;;  %v22729_v28 = vadd.f32 %v26673_v60, %v9023_v47  ;;  %v9214_v63 = vld [vmem:[#allocation3 + $0x90] sm:$0xff]  ;;  %v28868_v22 = vmax.f32 %v28867_v42, 0.0  ;;  %v28871_v17 = vld [vmem:[#allocation28_spill] sm:$0xff] }
 0x8e7   : > { %9177 = vst.msk [vmem:[#allocation3 + $0xc1] sm:$0xff] %vm882_vm5, %v9145_v53  ;;  %v9146_v18 = vadd.f32 %v22728_v46, %v28854_v0  ;;  %v9212_v50 = vld [vmem:[#allocation3 + $0x78] sm:$0xff]  ;;  %v28869_v46 = vld [vmem:[#allocation27_spill] sm:$0xff] }
 0x8e8   : > { %9175 = vst.msk [vmem:[#allocation3 + $0xa9] sm:$0xff] %vm882_vm5, %v9143_v14  ;;  %v9144_v51 = vadd.f32 %v22729_v28, %v28856_v45  ;;  %v9215_v10 = vld [vmem:[#allocation3 + $0x98] sm:$0xff]  ;;  %v28870_v47 = vmax.f32 %v28869_v46, 0.0  ;;  %v28872_v14 = vmax.f32 %v28871_v17, 0.0 }
 0x8e9   : > { %9178 = vst.msk [vmem:[#allocation3 + $0xc9] sm:$0xff] %vm882_vm5, %v9146_v18  ;;  %v9213_v54 = vld [vmem:[#allocation3 + $0x80] sm:$0xff]  ;;  %v26766_v43 = vpack.c.bf16 %v9215_v10, %v9214_v63 }
 0x8ea   : > { %9176 = vst.msk [vmem:[#allocation3 + $0xb1] sm:$0xff] %vm882_vm5, %v9144_v51  ;;  %v21682_v16 = vpop.f32.mrb[48].mxu0  ;;  %v26763_v35 = vpack.c.bf16 %v9213_v54, %v9212_v50 }
 0x8eb   : > { %v22730_v4 = vadd.f32 %v21682_v16, %v26673_v60  ;;  %v9036_v52 = vpop.f32.mrb[49].mxu0 }
 0x8ec   : > { %v22731_v21 = vadd.f32 %v26673_v60, %v9036_v52  ;;  %v21683_v27 = vpop.f32.mrb[50].mxu0  ;;  %21707 = vmatmul.mubr.msk.bf16.gmra.mrb[56].mxu1 %vm882_vm5, %v26763_v35 }
 0x8ed   : > { %v9149_v37 = vadd.f32 %v22730_v4, %v28858_v11  ;;  %v22732_v29 = vadd.f32 %v21683_v27, %v26673_v60  ;;  %v9039_v48 = vpop.f32.mrb[51].mxu0  ;;  %21710 = vmatprep.mubr.msk.bf16.mxu1 %vm882_vm5, %v26766_v43  ;;  %v28873_v4 = vld [vmem:[#allocation29_spill] sm:$0xff]  ;;  %v28875_v11 = vld [vmem:[#allocation30_spill] sm:$0xff] }
 0x8ee   : > { %v9147_v23 = vadd.f32 %v22731_v21, %v28860_v39  ;;  %v22733_v30 = vadd.f32 %v26673_v60, %v9039_v48  ;;  %v9218_v7 = vld [vmem:[#allocation3 + $0xc0] sm:$0xff]  ;;  %v28874_v52 = vmax.f32 %v28873_v4, 0.0  ;;  %v28878_v39 = vmax.f32 %v28877_v2, 0.0  ;;  %v9469_v2 = vld [vmem:[#allocation3 + $0x49] sm:$0xff] }
 0x8ef   : > { %9181 = vst.msk [vmem:[#allocation3 + $0xf1] sm:$0xff] %vm882_vm5, %v9149_v37  ;;  %v9150_v49 = vadd.f32 %v22732_v29, %v28862_v5  ;;  %v9216_v55 = vld [vmem:[#allocation3 + $0xa8] sm:$0xff]  ;;  %v28876_v37 = vmax.f32 %v28875_v11, 0.0  ;;  %v9467_v11 = vld [vmem:[#allocation3 + $0x31] sm:$0xff] }
 0x8f0   : > { %9179 = vst.msk [vmem:[#allocation3 + $0xd9] sm:$0xff] %vm882_vm5, %v9147_v23  ;;  %v9148_v58 = vadd.f32 %v22733_v30, %v28864_v24  ;;  %v9219_v3 = vld [vmem:[#allocation3 + $0xc8] sm:$0xff]  ;;  %v28879_v30 = vld [vmem:[#allocation32_spill] sm:$0xff] }
 0x8f1   : > { %9182 = vst.msk [vmem:[#allocation3 + $0xf9] sm:$0xff] %vm882_vm5, %v9150_v49  ;;  %v9217_v20 = vld [vmem:[#allocation3 + $0xb0] sm:$0xff]  ;;  %v26790_v34 = vpack.c.bf16 %v9219_v3, %v9218_v7  ;;  %v28880_v19 = vmax.f32 %v28879_v30, 0.0  ;;  %v9466_v4 = vld [vmem:[#allocation3 + $0x21] sm:$0xff] }
 0x8f2   : > { %9180 = vst.msk [vmem:[#allocation3 + $0xe1] sm:$0xff] %vm882_vm5, %v9148_v58  ;;  %v21686_v40 = vpop.f32.mrb[52].mxu0  ;;  %v26787_v59 = vpack.c.bf16 %v9217_v20, %v9216_v55 }
 0x8f3   : > { %v22734_v57 = vadd.f32 %v21686_v40, %v26673_v60  ;;  %v9052_v31 = vpop.f32.mrb[53].mxu0 }
 0x8f4   : > { %v22735_v62 = vadd.f32 %v26673_v60, %v9052_v31  ;;  %v21687_v9 = vpop.f32.mrb[54].mxu0  ;;  %21711 = vmatmul.mubr.msk.bf16.gmra.mrb[60].mxu1 %vm882_vm5, %v26787_v59 }
 0x8f5   : > { %v9153_v61 = vadd.f32 %v22734_v57, %v28866_v36  ;;  %v22736_v15 = vadd.f32 %v21687_v9, %v26673_v60  ;;  %v9055_v38 = vpop.f32.mrb[55].mxu0  ;;  %21714 = vmatprep.mubr.msk.bf16.mxu1 %vm882_vm5, %v26790_v34 }
 0x8f6   : > { %v9151_v8 = vadd.f32 %v22735_v62, %v28868_v22  ;;  %v22737_v53 = vadd.f32 %v26673_v60, %v9055_v38  ;;  %v9222_v51 = vld [vmem:[#allocation3 + $0xf0] sm:$0xff]  ;;  %v28881_v62 = vld [vmem:[#allocation33_spill] sm:$0xff] }
 0x8f7   : > { %9185 = vst.msk [vmem:[#allocation3 + $0x121] sm:$0xff] %vm882_vm5, %v9153_v61  ;;  %v9154_v44 = vadd.f32 %v22736_v15, %v28870_v47  ;;  %v9220_v0 = vld [vmem:[#allocation3 + $0xd8] sm:$0xff]  ;;  %v28882_v9 = vmax.f32 %v28881_v62, 0.0  ;;  %v28883_v15 = vld [vmem:[#allocation34_spill] sm:$0xff] }
 0x8f8   : > { %9183 = vst.msk [vmem:[#allocation3 + $0x109] sm:$0xff] %vm882_vm5, %v9151_v8  ;;  %v9152_v28 = vadd.f32 %v22737_v53, %v28872_v14  ;;  %v9223_v12 = vld [vmem:[#allocation3 + $0xf8] sm:$0xff]  ;;  %v28884_v38 = vmax.f32 %v28883_v15, 0.0  ;;  %v28885_v8 = vld [vmem:[#allocation35_spill] sm:$0xff] }
 0x8f9   : > { %9186 = vst.msk [vmem:[#allocation3 + $0x129] sm:$0xff] %vm882_vm5, %v9154_v44  ;;  %v9221_v18 = vld [vmem:[#allocation3 + $0xe0] sm:$0xff]  ;;  %v26814_v54 = vpack.c.bf16 %v9223_v12, %v9222_v51  ;;  %v28886_v53 = vmax.f32 %v28885_v8, 0.0  ;;  %v28887_v47 = vld [vmem:[#allocation36_spill] sm:$0xff]  ;;  %v9464_v51 = vld [vmem:[#allocation3 + $0x9] sm:$0xff] }
 0x8fa   : > { %9184 = vst.msk [vmem:[#allocation3 + $0x111] sm:$0xff] %vm882_vm5, %v9152_v28  ;;  %v21690_v26 = vpop.f32.mrb[56].mxu0  ;;  %v26811_v45 = vpack.c.bf16 %v9221_v18, %v9220_v0  ;;  %v28888_v44 = vmax.f32 %v28887_v47, 0.0  ;;  %v9483_v15 = vld [vmem:[#allocation3 + $0xf1] sm:$0xff] }
 0x8fb   : > { %v22738_v10 = vadd.f32 %v21690_v26, %v26673_v60  ;;  %v9068_v50 = vpop.f32.mrb[57].mxu0  ;;  %v9463_v26 = vld [vmem:[#allocation3 + $0x1] sm:$0xff] }
 0x8fc   : > { %v22739_v16 = vadd.f32 %v26673_v60, %v9068_v50  ;;  %v21691_v63 = vpop.f32.mrb[58].mxu0  ;;  %21715 = vmatmul.mubr.msk.bf16.gmra.mrb[64].mxu1 %vm882_vm5, %v26811_v45 }
 0x8fd   : > { %v9157_v21 = vadd.f32 %v22738_v10, %v28874_v52  ;;  %v22740_v27 = vadd.f32 %v21691_v63, %v26673_v60  ;;  %v9071_v6 = vpop.f32.mrb[59].mxu0  ;;  %21718 = vmatprep.mubr.msk.bf16.mxu1 %vm882_vm5, %v26814_v54  ;;  %v9468_v52 = vld [vmem:[#allocation3 + $0x39] sm:$0xff] }
 0x8fe   : > { %v9155_v29 = vadd.f32 %v22739_v16, %v28876_v37  ;;  %v22741_v48 = vadd.f32 %v26673_v60, %v9071_v6  ;;  %v9226_v55 = vld [vmem:[#allocation3 + $0x120] sm:$0xff]  ;;  %v9495_v16 = vpack.c.bf16 %v9464_v51, %v9463_v26  ;;  %v9822_v6 = vsel %vm3881_vm4, %v26716_v33, 0  ;;  %v9472_v33 = vld [vmem:[#allocation3 + $0x69] sm:$0xff] }
 0x8ff   : > { %9189 = vst.msk [vmem:[#allocation3 + $0x151] sm:$0xff] %vm882_vm5, %v9157_v21  ;;  %v9158_v23 = vadd.f32 %v22740_v27, %v28878_v39  ;;  %v9224_v25 = vld [vmem:[#allocation3 + $0x108] sm:$0xff]  ;;  %v9465_v21 = vld [vmem:[#allocation3 + $0x19] sm:$0xff]  ;;  %v26876_v37 = vpack.c.bf16 %v9468_v52, %v9467_v11 }
 0x900   : > { %9187 = vst.msk [vmem:[#allocation3 + $0x139] sm:$0xff] %vm882_vm5, %v9155_v29  ;;  %v9156_v5 = vadd.f32 %v22741_v48, %v28880_v19  ;;  %v9227_v49 = vld [vmem:[#allocation3 + $0x128] sm:$0xff]  ;;  %v26872_v27 = vpack.c.bf16 %v9466_v4, %v9465_v21  ;;  %v26881_v29 = vld [vmem:[%s28834_s11 + $0xc] sm:$0xf]  ;;  %v9470_v48 = vld [vmem:[#allocation3 + $0x51] sm:$0xff] }
 0x901   : > { %9190 = vst.msk [vmem:[#allocation3 + $0x159] sm:$0xff] %vm882_vm5, %v9158_v23  ;;  %v9225_v24 = vld [vmem:[#allocation3 + $0x110] sm:$0xff]  ;;  %v26838_v7 = vpack.c.bf16 %v9227_v49, %v9226_v55  ;;  %v26889_v39 = vpack.c.bf16 %v9470_v48, %v9469_v2  ;;  %v9471_v23 = vld [vmem:[#allocation3 + $0x61] sm:$0xff]  ;;  %v9473_v49 = vld [vmem:[#allocation3 + $0x79] sm:$0xff] }
 0x902   : > { %9188 = vst.msk [vmem:[#allocation3 + $0x141] sm:$0xff] %vm882_vm5, %v9156_v5  ;;  %v21694_v58 = vpop.f32.mrb[60].mxu0  ;;  %v26835_v3 = vpack.c.bf16 %v9225_v24, %v9224_v25  ;;  %v26891_v30 = vpack.c.bf16 %v9472_v33, %v9471_v23  ;;  %v9474_v19 = vld [vmem:[#allocation3 + $0x81] sm:$0xff]  ;;  %v9476_v5 = vld [vmem:[#allocation3 + $0x99] sm:$0xff]  ;;  %v9475_v24 = vld [vmem:[#allocation3 + $0x91] sm:$0xff]  ;;  %v10083_v33 = vsel %vm3881_vm4, %v26881_v29, 0 }
 0x903   : > { %v22742_v20 = vadd.f32 %v21694_v58, %v26673_v60  ;;  %v9084_v40 = vpop.f32.mrb[61].mxu0  ;;  %v26897_v25 = vpack.c.bf16 %v9474_v19, %v9473_v49  ;;  %v26899_v58 = vpack.c.bf16 %v9476_v5, %v9475_v24  ;;  %v9478_v55 = vld [vmem:[#allocation3 + $0xb1] sm:$0xff]  ;;  %v9485_v8 = vld [vmem:[#allocation3 + $0x109] sm:$0xff]  ;;  %v9726_v52 = vld [vmem:[#allocation3 + $0x1a] sm:$0xff] }
 0x904   : > { %v22743_v57 = vadd.f32 %v26673_v60, %v9084_v40  ;;  %v21695_v31 = vpop.f32.mrb[62].mxu0  ;;  %21719 = vmatmul.mubr.msk.bf16.gmra.mrb[68].mxu1 %vm882_vm5, %v26835_v3  ;;  %v9477_v40 = vld [vmem:[#allocation3 + $0xa9] sm:$0xff]  ;;  %v9729_v11 = vld [vmem:[#allocation3 + $0x3a] sm:$0xff]  ;;  %v9731_v5 = vld [vmem:[#allocation3 + $0x52] sm:$0xff] }
 0x905   : > { %v9161_v13 = vadd.f32 %v22742_v20, %v28882_v9  ;;  %v22744_v36 = vadd.f32 %v21695_v31, %v26673_v60  ;;  %v9087_v61 = vpop.f32.mrb[63].mxu0  ;;  %21722 = vmatprep.mubr.msk.bf16.mxu1 %vm882_vm5, %v26838_v7  ;;  %v9480_v20 = vld [vmem:[#allocation3 + $0xc9] sm:$0xff]  ;;  %v9479_v31 = vld [vmem:[#allocation3 + $0xc1] sm:$0xff] }
 0x906   : > { %v9159_v42 = vadd.f32 %v22743_v57, %v28884_v38  ;;  %v22745_v22 = vadd.f32 %v26673_v60, %v9087_v61  ;;  %v9230_v60 = vld [vmem:[#allocation3 + $0x150] sm:$0xff]  ;;  %v26905_v57 = vpack.c.bf16 %v9478_v55, %v9477_v40  ;;  %v26907_v62 = vpack.c.bf16 %v9480_v20, %v9479_v31  ;;  %v9482_v9 = vld [vmem:[#allocation3 + $0xe1] sm:$0xff] }
 0x907   : > { %9193 = vst.msk [vmem:[#allocation3 + $0x181] sm:$0xff] %vm882_vm5, %v9161_v13  ;;  %v9162_v46 = vadd.f32 %v22744_v36, %v28886_v53  ;;  %v9228_v28 = vld [vmem:[#allocation3 + $0x138] sm:$0xff]  ;;  %v9724_v26 = vld [vmem:[#allocation3 + $0x2] sm:$0xff]  ;;  %v9725_v51 = vld [vmem:[#allocation3 + $0xa] sm:$0xff] }
 0x908   : > { %9191 = vst.msk [vmem:[#allocation3 + $0x169] sm:$0xff] %vm882_vm5, %v9159_v42  ;;  %v9160_v17 = vadd.f32 %v22745_v22, %v28888_v44  ;;  %v9231_v14 = vld [vmem:[#allocation3 + $0x158] sm:$0xff]  ;;  %v9488_v22 = vld [vmem:[#allocation3 + $0x129] sm:$0xff]  ;;  %v10294_v23 = vld [vmem:[%s28834_s11 + $0x10] sm:$0xf] }
 0x909   : > { %9194 = vst.msk [vmem:[#allocation3 + $0x189] sm:$0xff] %vm882_vm5, %v9162_v46  ;;  %v9229_v12 = vld [vmem:[#allocation3 + $0x140] sm:$0xff]  ;;  %v26861_v18 = vpack.c.bf16 %v9231_v14, %v9230_v60  ;;  %v9486_v42 = vld [vmem:[#allocation3 + $0x111] sm:$0xff] }
 0x90a   : > { %9192 = vst.msk [vmem:[#allocation3 + $0x171] sm:$0xff] %vm882_vm5, %v9160_v17  ;;  %v26859_v0 = vpack.c.bf16 %v9229_v12, %v9228_v28  ;;  %v9484_v13 = vld [vmem:[#allocation3 + $0xf9] sm:$0xff]  ;;  %v26921_v53 = vpack.c.bf16 %v9486_v42, %v9485_v8  ;;  %v9487_v46 = vld [vmem:[#allocation3 + $0x121] sm:$0xff]  ;;  %v9491_v12 = vld [vmem:[#allocation3 + $0x151] sm:$0xff] }
 0x90b   : > { %v9481_v36 = vld [vmem:[#allocation3 + $0xd9] sm:$0xff]  ;;  %v26915_v38 = vpack.c.bf16 %v9484_v13, %v9483_v15  ;;  %v26923_v47 = vpack.c.bf16 %v9488_v22, %v9487_v46  ;;  %v9490_v44 = vld [vmem:[#allocation3 + $0x141] sm:$0xff]  ;;  %v9730_v19 = vld [vmem:[#allocation3 + $0x4a] sm:$0xff] }
 0x90c   : > { %21723 = vmatmul.mubr.msk.bf16.gmra.mrb[72].mxu1 %vm882_vm5, %v26859_v0  ;;  %v26913_v61 = vpack.c.bf16 %v9482_v9, %v9481_v36  ;;  %v9492_v17 = vld [vmem:[#allocation3 + $0x159] sm:$0xff]  ;;  %v9727_v21 = vld [vmem:[#allocation3 + $0x22] sm:$0xff]  ;;  %v9733_v24 = vld [vmem:[#allocation3 + $0x6a] sm:$0xff] }
 0x90d   : > { %21726 = vmatprep.mubr.msk.bf16.mxu1 %vm882_vm5, %v26861_v18  ;;  %v9489_v14 = vld [vmem:[#allocation3 + $0x139] sm:$0xff]  ;;  %v26931_v60 = vpack.c.bf16 %v9492_v17, %v9491_v12  ;;  %v26942_v48 = vpack.c.bf16 %v9727_v21, %v9726_v52  ;;  %v9732_v49 = vld [vmem:[#allocation3 + $0x62] sm:$0xff]  ;;  %v9738_v15 = vld [vmem:[#allocation3 + $0xaa] sm:$0xff] }
 0x90e   : > { %v26929_v28 = vpack.c.bf16 %v9490_v44, %v9489_v14  ;;  %v26958_v55 = vpack.c.bf16 %v9733_v24, %v9732_v49  ;;  %v9734_v20 = vld [vmem:[#allocation3 + $0x7a] sm:$0xff]  ;;  %v9735_v40 = vld [vmem:[#allocation3 + $0x82] sm:$0xff]  ;;  %v9736_v31 = vld [vmem:[#allocation3 + $0x92] sm:$0xff] }
 0x90f   : > { %v9232_v10 = vld [vmem:[#allocation3 + $0x168] sm:$0xff]  ;;  %v9737_v9 = vld [vmem:[#allocation3 + $0x9a] sm:$0xff]  ;;  %v26964_v13 = vpack.c.bf16 %v9735_v40, %v9734_v20  ;;  %v9739_v42 = vld [vmem:[#allocation3 + $0xb2] sm:$0xff] }
 0x910   : > { %v26966_v36 = vpack.c.bf16 %v9737_v9, %v9736_v31  ;;  %v9740_v22 = vld [vmem:[#allocation3 + $0xc2] sm:$0xff]  ;;  %v9741_v8 = vld [vmem:[#allocation3 + $0xca] sm:$0xff]  ;;  %v26972_v46 = vpack.c.bf16 %v9739_v42, %v9738_v15  ;;  %v9742_v17 = vld [vmem:[#allocation3 + $0xda] sm:$0xff]  ;;  %v10344_v15 = vsel %vm3881_vm4, %v10294_v23, 0 }
 0x911   : > { %v9233_v50 = vld [vmem:[#allocation3 + $0x170] sm:$0xff]  ;;  %v26974_v44 = vpack.c.bf16 %v9741_v8, %v9740_v22  ;;  %v9743_v14 = vld [vmem:[#allocation3 + $0xe2] sm:$0xff]  ;;  %v9753_v49 = vld [vmem:[#allocation3 + $0x15a] sm:$0xff] }
 0x912   : > { %v26867_v63 = vpack.c.bf16 %v9233_v50, %v9232_v10  ;;  %v9494_v10 = vld [vmem:[#allocation3 + $0x171] sm:$0xff]  ;;  %v9493_v50 = vld [vmem:[#allocation3 + $0x169] sm:$0xff]  ;;  %v10555_v42 = vld [vmem:[%s28834_s11 + $0x14] sm:$0xf] }
 0x913   : > { %v26937_v4 = vpack.c.bf16 %v9494_v10, %v9493_v50  ;;  %v9744_v12 = vld [vmem:[#allocation3 + $0xf2] sm:$0xff]  ;;  %v9746_v50 = vld [vmem:[#allocation3 + $0x10a] sm:$0xff]  ;;  %v9748_v52 = vld [vmem:[#allocation3 + $0x122] sm:$0xff]  ;;  %v10605_v8 = vsel %vm3881_vm4, %v10555_v42, 0 }
 0x914   : > { %21727 = vmatmul.mubr.msk.bf16.gmra.mrb[76].mxu1 %vm882_vm5, %v26867_v63  ;;  %v9749_v21 = vld [vmem:[#allocation3 + $0x12a] sm:$0xff]  ;;  %v9755_v31 = vld [vmem:[#allocation3 + $0x172] sm:$0xff] }
 0x915   : > { %21732 = vmatprep.mubr.msk.bf16.mxu1 %vm882_vm5, %v9495_v16  ;;  %v9756_v16 = vpack.c.bf16 %v9725_v51, %v9724_v26  ;;  %v9745_v26 = vld [vmem:[#allocation3 + $0xfa] sm:$0xff]  ;;  %v26980_v51 = vpack.c.bf16 %v9743_v14, %v9742_v17  ;;  %v9754_v40 = vld [vmem:[#allocation3 + $0x16a] sm:$0xff] }
 0x916   : > { %v26982_v10 = vpack.c.bf16 %v9745_v26, %v9744_v12  ;;  %v27004_v9 = vpack.c.bf16 %v9755_v31, %v9754_v40  ;;  %v10816_v17 = vld [vmem:[%s28834_s11 + $0x18] sm:$0xf] }
 0x917   : > { %v10276_v14 = vld [vmem:[#allocation3 + $0x181] sm:$0xff]  ;;  %v10866_v26 = vsel %vm3881_vm4, %v10816_v17, 0 }
 0x91c   : > { %21733 = vmatmul.mubr.msk.bf16.vlgmr.msra.gmra.mrb[48].mxu1 %vm882_vm5, %v26872_v27 }
 0x91d   : > { %21765 = vmatpush3.bf16.msra.mxu1 %v9822_v6  ;;  %21736 = vmatprep.mubr.msk.bf16.mxu1 %vm882_vm5, %v26876_v37  ;;  %v9728_v6 = vld [vmem:[#allocation3 + $0x32] sm:$0xff] }
 0x91e   : > { %24181 = vmatprep.subr.msk.bf16.mxu1 %vm3881_vm4, %v26881_v29  ;;  %v26946_v2 = vpack.c.bf16 %v9729_v11, %v9728_v6  ;;  %v26956_v29 = vpack.c.bf16 %v9731_v5, %v9730_v19  ;;  %v26990_v11 = vpack.c.bf16 %v9749_v21, %v9748_v52  ;;  %v9751_v19 = vld [vmem:[#allocation3 + $0x142] sm:$0xff]  ;;  %v9752_v5 = vld [vmem:[#allocation3 + $0x152] sm:$0xff] }
 0x91f   : > { %v26998_v20 = vpack.c.bf16 %v9753_v49, %v9752_v5 }
 0x924   : > { %21737 = vmatmul.mubr.msk.bf16.gmra.mrb[52].mxu1 %vm882_vm5, %v26889_v39 }
 0x925   : > { %21740 = vmatprep.mubr.msk.bf16.mxu1 %vm882_vm5, %v26891_v30 }
 0x92c   : > { %21741 = vmatmul.mubr.msk.bf16.gmra.mrb[56].mxu1 %vm882_vm5, %v26897_v25 }
 0x92d   : > { %21744 = vmatprep.mubr.msk.bf16.mxu1 %vm882_vm5, %v26899_v58 }
 0x934   : > { %21745 = vmatmul.mubr.msk.bf16.gmra.mrb[60].mxu1 %vm882_vm5, %v26905_v57 }
 0x935   : > { %21748 = vmatprep.mubr.msk.bf16.mxu1 %vm882_vm5, %v26907_v62 }
 0x93c   : > { %21749 = vmatmul.mubr.msk.bf16.gmra.mrb[64].mxu1 %vm882_vm5, %v26913_v61 }
 0x93d   : > { %21752 = vmatprep.mubr.msk.bf16.mxu1 %vm882_vm5, %v26915_v38 }
 0x944   : > { %21753 = vmatmul.mubr.msk.bf16.gmra.mrb[68].mxu1 %vm882_vm5, %v26921_v53 }
 0x945   : > { %21756 = vmatprep.mubr.msk.bf16.mxu1 %vm882_vm5, %v26923_v47 }
 0x94c   : > { %21757 = vmatmul.mubr.msk.bf16.gmra.mrb[72].mxu1 %vm882_vm5, %v26929_v28 }
 0x94d   : > { %21760 = vmatprep.mubr.msk.bf16.mxu1 %vm882_vm5, %v26931_v60 }
 0x954   : > { %21761 = vmatmul.mubr.msk.bf16.gmra.mrb[76].mxu1 %vm882_vm5, %v26937_v4 }
 0x955   : > { %21766 = vmatprep.mubr.msk.bf16.mxu1 %vm882_vm5, %v9756_v16  ;;  %v9747_v16 = vld [vmem:[#allocation3 + $0x112] sm:$0xff] }
 0x956   : > { %v26988_v6 = vpack.c.bf16 %v9747_v16, %v9746_v50  ;;  %v11077_v50 = vld [vmem:[%s28834_s11 + $0x1c] sm:$0xf] }
 0x957   : > { %v10538_v16 = vld [vmem:[#allocation3 + $0x18a] sm:$0xff]  ;;  %v11127_v21 = vsel %vm3881_vm4, %v11077_v50, 0 }
 0x95c   : > { %21767 = vmatmul.mubr.msk.bf16.vlgmr.msra.gmra.mrb[48].mxu1 %vm882_vm5, %v26942_v48 }
 0x95d   : > { %21799 = vmatpush3.bf16.msra.mxu1 %v10083_v33  ;;  %21770 = vmatprep.mubr.msk.bf16.mxu1 %vm882_vm5, %v26946_v2  ;;  %v9750_v33 = vld [vmem:[#allocation3 + $0x13a] sm:$0xff] }
 0x95e   : > { %24182 = vmatprep.subr.msk.bf16.mxu1 %vm3881_vm4, %v10294_v23  ;;  %v26996_v24 = vpack.c.bf16 %v9751_v19, %v9750_v33  ;;  %v10015_v23 = vld [vmem:[#allocation3 + $0x180] sm:$0xff]  ;;  %v11338_v33 = vld [vmem:[%s28834_s11 + $0x20] sm:$0xf]  ;;  %s28891_s11 = sld [smem:[#allocation45_spill]] }
 0x964   : > { %21771 = vmatmul.mubr.msk.bf16.gmra.mrb[52].mxu1 %vm882_vm5, %v26956_v29 }
 0x965   : > { %21774 = vmatprep.mubr.msk.bf16.mxu1 %vm882_vm5, %v26958_v55 }
 0x96c   : > { %21775 = vmatmul.mubr.msk.bf16.gmra.mrb[56].mxu1 %vm882_vm5, %v26964_v13 }
 0x96d   : > { %21778 = vmatprep.mubr.msk.bf16.mxu1 %vm882_vm5, %v26966_v36 }
 0x974   : > { %21779 = vmatmul.mubr.msk.bf16.gmra.mrb[60].mxu1 %vm882_vm5, %v26972_v46 }
 0x975   : > { %21782 = vmatprep.mubr.msk.bf16.mxu1 %vm882_vm5, %v26974_v44 }
 0x97c   : > { %21783 = vmatmul.mubr.msk.bf16.gmra.mrb[64].mxu1 %vm882_vm5, %v26980_v51 }
 0x97d   : > { %21786 = vmatprep.mubr.msk.bf16.mxu1 %vm882_vm5, %v26982_v10 }
 0x984   : > { %21787 = vmatmul.mubr.msk.bf16.gmra.mrb[68].mxu1 %vm882_vm5, %v26988_v6 }
 0x985   : > { %21790 = vmatprep.mubr.msk.bf16.mxu1 %vm882_vm5, %v26990_v11 }
 0x98c   : > { %21791 = vmatmul.mubr.msk.bf16.gmra.mrb[72].mxu1 %vm882_vm5, %v26996_v24 }
 0x98d   : > { %21794 = vmatprep.mubr.msk.bf16.mxu1 %vm882_vm5, %v26998_v20 }
 0x994   : > { %21795 = vmatmul.mubr.msk.bf16.gmra.mrb[76].mxu1 %vm882_vm5, %v27004_v9 }
 0x995   : > { %21800 = vmatprep.mubr.msk.bf16.mxu1 %vm882_vm5, %v26707_v1  ;;  %v10016_v1 = vld [vmem:[#allocation3 + $0x188] sm:$0xff] }
 0x996   : > { %v27043_v22 = vpack.c.bf16 %v10016_v1, %v10015_v23 }
 0x99c   : > { %21801 = vmatmul.mubr.msk.bf16.vlgmr.msra.gmra.mrb[48].mxu1 %vm882_vm5, %v26711_v56 }
 0x99d   : > { %21833 = vmatpush3.bf16.msra.mxu1 %v10344_v15  ;;  %21804 = vmatprep.mubr.msk.bf16.mxu1 %vm882_vm5, %v26739_v32 }
 0x99e   : > { %24183 = vmatprep.subr.msk.bf16.mxu1 %vm3881_vm4, %v10555_v42 }
 0x9a4   : > { %21805 = vmatmul.mubr.msk.bf16.gmra.mrb[52].mxu1 %vm882_vm5, %v26742_v41 }
 0x9a5   : > { %21808 = vmatprep.mubr.msk.bf16.mxu1 %vm882_vm5, %v26763_v35 }
 0x9ac   : > { %21809 = vmatmul.mubr.msk.bf16.gmra.mrb[56].mxu1 %vm882_vm5, %v26766_v43 }
 0x9ad   : > { %21812 = vmatprep.mubr.msk.bf16.mxu1 %vm882_vm5, %v26787_v59 }
 0x9b4   : > { %21813 = vmatmul.mubr.msk.bf16.gmra.mrb[60].mxu1 %vm882_vm5, %v26790_v34 }
 0x9b5   : > { %21816 = vmatprep.mubr.msk.bf16.mxu1 %vm882_vm5, %v26811_v45 }
 0x9bc   : > { %21817 = vmatmul.mubr.msk.bf16.gmra.mrb[64].mxu1 %vm882_vm5, %v26814_v54 }
 0x9bd   : > { %21820 = vmatprep.mubr.msk.bf16.mxu1 %vm882_vm5, %v26835_v3 }
 0x9c4   : > { %21821 = vmatmul.mubr.msk.bf16.gmra.mrb[68].mxu1 %vm882_vm5, %v26838_v7 }
 0x9c5   : > { %21824 = vmatprep.mubr.msk.bf16.mxu1 %vm882_vm5, %v26859_v0 }
 0x9cc   : > { %21825 = vmatmul.mubr.msk.bf16.gmra.mrb[72].mxu1 %vm882_vm5, %v26861_v18 }
 0x9cd   : > { %21828 = vmatprep.mubr.msk.bf16.mxu1 %vm882_vm5, %v26867_v63 }
 0x9d4   : > { %21829 = vmatmul.mubr.msk.bf16.gmra.mrb[76].mxu1 %vm882_vm5, %v27043_v22 }
 0x9d5   : > { %21834 = vmatprep.mubr.msk.bf16.mxu1 %vm882_vm5, %v26872_v27  ;;  %v10277_v27 = vld [vmem:[#allocation3 + $0x189] sm:$0xff] }
 0x9d6   : > { %v27082_v12 = vpack.c.bf16 %v10277_v27, %v10276_v14 }
 0x9dc   : > { %21835 = vmatmul.mubr.msk.bf16.vlgmr.msra.gmra.mrb[48].mxu1 %vm882_vm5, %v26876_v37 }
 0x9dd   : > { %21867 = vmatpush3.bf16.msra.mxu1 %v10605_v8  ;;  %21838 = vmatprep.mubr.msk.bf16.mxu1 %vm882_vm5, %v26889_v39 }
 0x9de   : > { %24184 = vmatprep.subr.msk.bf16.mxu1 %vm3881_vm4, %v10816_v17 }
 0x9e4   : > { %21839 = vmatmul.mubr.msk.bf16.gmra.mrb[52].mxu1 %vm882_vm5, %v26891_v30 }
 0x9e5   : > { %21842 = vmatprep.mubr.msk.bf16.mxu1 %vm882_vm5, %v26897_v25 }
 0x9ec   : > { %21843 = vmatmul.mubr.msk.bf16.gmra.mrb[56].mxu1 %vm882_vm5, %v26899_v58 }
 0x9ed   : > { %21846 = vmatprep.mubr.msk.bf16.mxu1 %vm882_vm5, %v26905_v57 }
 0x9f4   : > { %21847 = vmatmul.mubr.msk.bf16.gmra.mrb[60].mxu1 %vm882_vm5, %v26907_v62 }
 0x9f5   : > { %21850 = vmatprep.mubr.msk.bf16.mxu1 %vm882_vm5, %v26913_v61 }
 0x9fc   : > { %21851 = vmatmul.mubr.msk.bf16.gmra.mrb[64].mxu1 %vm882_vm5, %v26915_v38 }
 0x9fd   : > { %21854 = vmatprep.mubr.msk.bf16.mxu1 %vm882_vm5, %v26921_v53 }
 0xa04   : > { %21855 = vmatmul.mubr.msk.bf16.gmra.mrb[68].mxu1 %vm882_vm5, %v26923_v47 }
 0xa05   : > { %21858 = vmatprep.mubr.msk.bf16.mxu1 %vm882_vm5, %v26929_v28 }
 0xa0c   : > { %21859 = vmatmul.mubr.msk.bf16.gmra.mrb[72].mxu1 %vm882_vm5, %v26931_v60 }
 0xa0d   : > { %21862 = vmatprep.mubr.msk.bf16.mxu1 %vm882_vm5, %v26937_v4 }
 0xa14   : > { %21863 = vmatmul.mubr.msk.bf16.gmra.mrb[76].mxu1 %vm882_vm5, %v27082_v12 }
 0xa15   : > { %21868 = vmatprep.mubr.msk.bf16.mxu1 %vm882_vm5, %v26942_v48  ;;  %v10537_v48 = vld [vmem:[#allocation3 + $0x182] sm:$0xff] }
 0xa16   : > { %v10554_v52 = vpack.c.bf16 %v10538_v16, %v10537_v48 }
 0xa1c   : > { %21869 = vmatmul.mubr.msk.bf16.vlgmr.msra.gmra.mrb[48].mxu1 %vm882_vm5, %v26946_v2 }
 0xa1d   : > { %21901 = vmatpush3.bf16.msra.mxu1 %v10866_v26  ;;  %21872 = vmatprep.mubr.msk.bf16.mxu1 %vm882_vm5, %v26956_v29 }
 0xa1e   : > { %24185 = vmatprep.subr.msk.bf16.mxu1 %vm3881_vm4, %v11077_v50 }
 0xa24   : > { %21873 = vmatmul.mubr.msk.bf16.gmra.mrb[52].mxu1 %vm882_vm5, %v26958_v55 }
 0xa25   : > { %21876 = vmatprep.mubr.msk.bf16.mxu1 %vm882_vm5, %v26964_v13 }
 0xa2c   : > { %21877 = vmatmul.mubr.msk.bf16.gmra.mrb[56].mxu1 %vm882_vm5, %v26966_v36 }
 0xa2d   : > { %21880 = vmatprep.mubr.msk.bf16.mxu1 %vm882_vm5, %v26972_v46 }
 0xa34   : > { %21881 = vmatmul.mubr.msk.bf16.gmra.mrb[60].mxu1 %vm882_vm5, %v26974_v44 }
 0xa35   : > { %21884 = vmatprep.mubr.msk.bf16.mxu1 %vm882_vm5, %v26980_v51 }
 0xa3c   : > { %21885 = vmatmul.mubr.msk.bf16.gmra.mrb[64].mxu1 %vm882_vm5, %v26982_v10 }
 0xa3d   : > { %21888 = vmatprep.mubr.msk.bf16.mxu1 %vm882_vm5, %v26988_v6 }
 0xa44   : > { %21889 = vmatmul.mubr.msk.bf16.gmra.mrb[68].mxu1 %vm882_vm5, %v26990_v11 }
 0xa45   : > { %21892 = vmatprep.mubr.msk.bf16.mxu1 %vm882_vm5, %v26996_v24 }
 0xa4c   : > { %21893 = vmatmul.mubr.msk.bf16.gmra.mrb[72].mxu1 %vm882_vm5, %v26998_v20 }
 0xa4d   : > { %21896 = vmatprep.mubr.msk.bf16.mxu1 %vm882_vm5, %v27004_v9 }
 0xa54   : > { %21897 = vmatmul.mubr.msk.bf16.gmra.mrb[76].mxu1 %vm882_vm5, %v10554_v52 }
 0xa55   : > { %21902 = vmatprep.mubr.msk.bf16.mxu1 %vm882_vm5, %v26711_v56  ;;  %v10798_v56 = vld [vmem:[#allocation3 + $0x198] sm:$0xff] }
 0xa5c   : > { %21903 = vmatmul.mubr.msk.bf16.vlgmr.msra.gmra.mrb[48].mxu1 %vm882_vm5, %v26739_v32  ;;  %v10799_v32 = vld [vmem:[#allocation3 + $0x1a0] sm:$0xff] }
 0xa5d   : > { %21935 = vmatpush3.bf16.msra.mxu1 %v11127_v21  ;;  %21906 = vmatprep.mubr.msk.bf16.mxu1 %vm882_vm5, %v26742_v41  ;;  %v10815_v41 = vpack.c.bf16 %v10799_v32, %v10798_v56 }
 0xa5e   : > { %24186 = vmatprep.subr.msk.bf16.mxu1 %vm3881_vm4, %v11338_v33 }
 0xa64   : > { %21907 = vmatmul.mubr.msk.bf16.gmra.mrb[52].mxu1 %vm882_vm5, %v26763_v35  ;;  %v11388_v35 = vsel %vm3881_vm4, %v11338_v33, 0  ;;  %vm960_vm4 = vcmask 253952  }
 0xa65   : > { %21910 = vmatprep.mubr.msk.bf16.mxu1 %vm882_vm5, %v26766_v43  ;;  %v11059_v43 = vld [vmem:[#allocation3 + $0x199] sm:$0xff] }
 0xa6c   : > { %21911 = vmatmul.mubr.msk.bf16.gmra.mrb[56].mxu1 %vm882_vm5, %v26787_v59  ;;  %v11060_v59 = vld [vmem:[#allocation3 + $0x1a1] sm:$0xff] }
 0xa6d   : > { %21914 = vmatprep.mubr.msk.bf16.mxu1 %vm882_vm5, %v26790_v34  ;;  %v11076_v34 = vpack.c.bf16 %v11060_v59, %v11059_v43 }
 0xa74   : > { %21915 = vmatmul.mubr.msk.bf16.gmra.mrb[60].mxu1 %vm882_vm5, %v26811_v45  ;;  %v11320_v45 = vld [vmem:[#allocation3 + $0x19a] sm:$0xff] }
 0xa75   : > { %21918 = vmatprep.mubr.msk.bf16.mxu1 %vm882_vm5, %v26814_v54  ;;  %v11321_v54 = vld [vmem:[#allocation3 + $0x1a2] sm:$0xff] }
 0xa7c   : > { %21919 = vmatmul.mubr.msk.bf16.gmra.mrb[64].mxu1 %vm882_vm5, %v26835_v3  ;;  %v11337_v3 = vpack.c.bf16 %v11321_v54, %v11320_v45 }
 0xa7d   : > { %21922 = vmatprep.mubr.msk.bf16.mxu1 %vm882_vm5, %v26838_v7  ;;  %v28889_v7 = vmov 0.0  }
 0xa7e   : > { %929 = vst.msk [vmem:[#allocation4] sm:$0xff] %vm928_vm8, %v28889_v7  ;;  %933 = vst.msk [vmem:[#allocation4 + $0x90] sm:$0xff] %vm928_vm8, %v28889_v7 }
 0xa7f   : > { %931 = vst.msk [vmem:[#allocation4 + $0x8] sm:$0x3] %vm930_vm9, %v28889_v7  ;;  %934 = vst.msk [vmem:[#allocation4 + $0x98] sm:$0x3] %vm930_vm9, %v28889_v7 }
 0xa80   : > { %936 = vst.msk [vmem:[#allocation4] sm:$0x1] %vm935_vm10, %v28889_v7  ;;  %937 = vst.msk [vmem:[#allocation4 + $0x10] sm:$0x1] %vm935_vm10, %v28889_v7 }
 0xa81   : > { %938 = vst.msk [vmem:[#allocation4 + $0x20] sm:$0x1] %vm935_vm10, %v28889_v7  ;;  %939 = vst.msk [vmem:[#allocation4 + $0x30] sm:$0x1] %vm935_vm10, %v28889_v7 }
 0xa82   : > { %940 = vst.msk [vmem:[#allocation4 + $0x40] sm:$0x1] %vm935_vm10, %v28889_v7  ;;  %941 = vst.msk [vmem:[#allocation4 + $0x50] sm:$0x1] %vm935_vm10, %v28889_v7 }
 0xa83   : > { %942 = vst.msk [vmem:[#allocation4 + $0x60] sm:$0x1] %vm935_vm10, %v28889_v7  ;;  %943 = vst.msk [vmem:[#allocation4 + $0x70] sm:$0x1] %vm935_vm10, %v28889_v7 }
 0xa84   : > { %21923 = vmatmul.mubr.msk.bf16.gmra.mrb[68].mxu1 %vm882_vm5, %v26859_v0  ;;  %v24250_v0 = vld [vmem:[%s28890_s2] sm:$0xff]   ;;  %944 = vst.msk [vmem:[#allocation4 + $0x80] sm:$0x1] %vm935_vm10, %v28889_v7  ;;  %945 = vst.msk [vmem:[#allocation4 + $0x90] sm:$0x1] %vm935_vm10, %v28889_v7 }
 0xa85   : > { %21926 = vmatprep.mubr.msk.bf16.mxu1 %vm882_vm5, %v26861_v18  ;;  %22002 = vmatprep.subr.bf16.mxu0 %v24250_v0  ;;  %947 = vst.msk [vmem:[#allocation4 + $0x19] sm:$0x1] %vm935_vm10, %v28889_v7  ;;  %948 = vst.msk [vmem:[#allocation4 + $0x29] sm:$0x1] %vm935_vm10, %v28889_v7  ;;  %v27272_v18 = vld [vmem:[%s28890_s2 + $0x8] sm:$0xff]  }
 0xa86   : > { %949 = vst.msk [vmem:[#allocation4 + $0x39] sm:$0x1] %vm935_vm10, %v28889_v7  ;;  %950 = vst.msk [vmem:[#allocation4 + $0x49] sm:$0x1] %vm935_vm10, %v28889_v7  ;;  %22003 = vmatpush3.bf16.msra.mxu0 %v24250_v0 }
 0xa87   : > { %951 = vst.msk [vmem:[#allocation4 + $0x59] sm:$0x1] %vm935_vm10, %v28889_v7  ;;  %952 = vst.msk [vmem:[#allocation4 + $0x69] sm:$0x1] %vm935_vm10, %v28889_v7  ;;  %22012 = vmatprep.subr.bf16.mxu0 %v27272_v18 }
 0xa88   : > { %953 = vst.msk [vmem:[#allocation4 + $0x79] sm:$0x1] %vm935_vm10, %v28889_v7  ;;  %954 = vst.msk [vmem:[#allocation4 + $0x89] sm:$0x1] %vm935_vm10, %v28889_v7 }
 0xa89   : > { %946 = vst.msk [vmem:[#allocation4 + $0x9] sm:$0x1] %vm935_vm10, %v28889_v7  ;;  %955 = vst.msk [vmem:[#allocation4 + $0x99] sm:$0x1] %vm935_vm10, %v28889_v7 }
 0xa8a   : > { %974 = vst.msk [vmem:[#allocation6] sm:$0xf] %vm973_vm2, %v28889_v7  ;;  %976 = vst.msk [vmem:[#allocation6 + $0xc] sm:$0xf] %vm973_vm2, %v28889_v7 }
 0xa8b   : > { %957 = vst.msk [vmem:[#allocation5] sm:$0x3f] %vm956_vm3, %v28889_v7  ;;  %959 = vst.msk [vmem:[#allocation5 + $0x28] sm:$0x3f] %vm956_vm3, %v28889_v7 }
 0xa8c   : > { %21927 = vmatmul.mubr.msk.bf16.gmra.mrb[72].mxu1 %vm882_vm5, %v26867_v63  ;;  %v24582_v63 = vmov 1983009808   ;;  %962 = vst.msk [vmem:[#allocation5 + $0x8] sm:$0x1] %vm960_vm4, %v28889_v7  ;;  %963 = vst.msk [vmem:[#allocation5 + $0x10] sm:$0x1] %vm960_vm4, %v28889_v7 }
 0xa8d   : > { %21930 = vmatprep.mubr.msk.bf16.mxu1 %vm882_vm5, %v27043_v22  ;;  %964 = vst.msk [vmem:[#allocation5 + $0x18] sm:$0x1] %vm960_vm4, %v28889_v7  ;;  %965 = vst.msk [vmem:[#allocation5 + $0x20] sm:$0x1] %vm960_vm4, %v28889_v7 }
 0xa8e   : > { %968 = vst.msk [vmem:[#allocation5 + $0xd] sm:$0x1] %vm960_vm4, %v28889_v7  ;;  %969 = vst.msk [vmem:[#allocation5 + $0x15] sm:$0x1] %vm960_vm4, %v28889_v7 }
 0xa8f   : > { %970 = vst.msk [vmem:[#allocation5 + $0x1d] sm:$0x1] %vm960_vm4, %v28889_v7  ;;  %971 = vst.msk [vmem:[#allocation5 + $0x25] sm:$0x1] %vm960_vm4, %v28889_v7 }
 0xa90   : > { %977 = vst.msk [vmem:[#allocation6] sm:$0x1] %vm960_vm4, %v28889_v7  ;;  %978 = vst.msk [vmem:[#allocation6 + $0x4] sm:$0x1] %vm960_vm4, %v28889_v7 }
 0xa91   : > { %979 = vst.msk [vmem:[#allocation6 + $0x8] sm:$0x1] %vm960_vm4, %v28889_v7  ;;  %980 = vst.msk [vmem:[#allocation6 + $0xc] sm:$0x1] %vm960_vm4, %v28889_v7 }
 0xa92   : > { %981 = vst.msk [vmem:[#allocation6 + $0x3] sm:$0x1] %vm960_vm4, %v28889_v7  ;;  %982 = vst.msk [vmem:[#allocation6 + $0x7] sm:$0x1] %vm960_vm4, %v28889_v7 }
 0xa93   : > { %983 = vst.msk [vmem:[#allocation6 + $0xb] sm:$0x1] %vm960_vm4, %v28889_v7  ;;  %984 = vst.msk [vmem:[#allocation6 + $0xf] sm:$0x1] %vm960_vm4, %v28889_v7 }
 0xa94   : > { %21931 = vmatmul.mubr.msk.bf16.gmra.mrb[76].mxu1 %vm882_vm5, %v10815_v41  ;;  %961 = vst.msk [vmem:[#allocation5] sm:$0x1] %vm960_vm4, %v28889_v7  ;;  %967 = vst.msk [vmem:[#allocation5 + $0x5] sm:$0x1] %vm960_vm4, %v28889_v7 }
 0xa95   : > { %21936 = vmatprep.mubr.msk.bf16.mxu1 %vm882_vm5, %v26876_v37  ;;  %v11585_v37 = vunpack.c.l.s4 %v24582_v63  ;;  %966 = vst.msk [vmem:[#allocation5 + $0x28] sm:$0x1] %vm960_vm4, %v28889_v7  ;;  %972 = vst.msk [vmem:[#allocation5 + $0x2d] sm:$0x1] %vm960_vm4, %v28889_v7 }
 0xa9c   : > { %21937 = vmatmul.mubr.msk.bf16.vlgmr.msra.gmra.mrb[48].mxu1 %vm882_vm5, %v26889_v39  ;;  %v11587_v39 = vlaneseq }
 0xa9d   : > { %21969 = vmatpush3.bf16.msra.mxu1 %v11388_v35  ;;  %21940 = vmatprep.mubr.msk.bf16.mxu1 %vm882_vm5, %v26891_v30  ;;  %v11586_v30 = vunpack.c.0.s8 %v11585_v37 }
 0xaa4   : > { %21941 = vmatmul.mubr.msk.bf16.gmra.mrb[52].mxu1 %vm882_vm5, %v26897_v25  ;;  %v27275_v25 = vshrl.u32 %v11587_v39, 7 }
 0xaa5   : > { %21944 = vmatprep.mubr.msk.bf16.mxu1 %vm882_vm5, %v26899_v58  ;;  %v27280_v58 = vld [vmem:[%s28891_s11] ss:$0 sm:$0xff] }
 0xaac   : > { %21945 = vmatmul.mubr.msk.bf16.gmra.mrb[56].mxu1 %vm882_vm5, %v26905_v57 }
 0xaad   : > { %21948 = vmatprep.mubr.msk.bf16.mxu1 %vm882_vm5, %v26907_v62 }
 0xab4   : > { %21949 = vmatmul.mubr.msk.bf16.gmra.mrb[60].mxu1 %vm882_vm5, %v26913_v61 }
 0xab5   : > { %21952 = vmatprep.mubr.msk.bf16.mxu1 %vm882_vm5, %v26915_v38  ;;  %v27284_v38 = vsub.s32 %v11586_v30, %v27275_v25 }
 0xabc   : > { %21953 = vmatmul.mubr.msk.bf16.gmra.mrb[64].mxu1 %vm882_vm5, %v26921_v53 }
 0xabd   : > { %21956 = vmatprep.mubr.msk.bf16.mxu1 %vm882_vm5, %v26923_v47 }
 0xac4   : > { %21957 = vmatmul.mubr.msk.bf16.gmra.mrb[68].mxu1 %vm882_vm5, %v26929_v28 }
 0xac5   : > { %21960 = vmatprep.mubr.msk.bf16.mxu1 %vm882_vm5, %v26931_v60 }
 0xacc   : > { %21961 = vmatmul.mubr.msk.bf16.gmra.mrb[72].mxu1 %vm882_vm5, %v26937_v4  ;;  %v27288_v4 = vsub.s32 0, %v27275_v25 }
 0xacd   : > { %21964 = vmatprep.mubr.msk.bf16.mxu1 %vm882_vm5, %v27082_v12 }
 0xad4   : > { %21965 = vmatmul.mubr.msk.bf16.gmra.mrb[76].mxu1 %vm882_vm5, %v11076_v34 }
 0xad5   : > { %21970 = vmatprep.mubr.msk.bf16.mxu1 %vm882_vm5, %v26946_v2 }
 0xadc   : > { %21971 = vmatmul.mubr.msk.bf16.vlgmr.msra.gmra.mrb[48].mxu1 %vm882_vm5, %v26956_v29 }
 0xadd   : > { %21974 = vmatprep.mubr.msk.bf16.mxu1 %vm882_vm5, %v26958_v55 }
 0xae4   : > { %21975 = vmatmul.mubr.msk.bf16.gmra.mrb[52].mxu1 %vm882_vm5, %v26964_v13 }
 0xae5   : > { %21978 = vmatprep.mubr.msk.bf16.mxu1 %vm882_vm5, %v26966_v36 }
 0xaec   : > { %21979 = vmatmul.mubr.msk.bf16.gmra.mrb[56].mxu1 %vm882_vm5, %v26972_v46 }
 0xaed   : > { %21982 = vmatprep.mubr.msk.bf16.mxu1 %vm882_vm5, %v26974_v44 }
 0xaf4   : > { %21983 = vmatmul.mubr.msk.bf16.gmra.mrb[60].mxu1 %vm882_vm5, %v26980_v51 }
 0xaf5   : > { %21986 = vmatprep.mubr.msk.bf16.mxu1 %vm882_vm5, %v26982_v10 }
 0xafc   : > { %21987 = vmatmul.mubr.msk.bf16.gmra.mrb[64].mxu1 %vm882_vm5, %v26988_v6 }
 0xafd   : > { %21990 = vmatprep.mubr.msk.bf16.mxu1 %vm882_vm5, %v26990_v11 }
 0xb04   : > { %21991 = vmatmul.mubr.msk.bf16.gmra.mrb[68].mxu1 %vm882_vm5, %v26996_v24 }
 0xb05   : > { %21994 = vmatprep.mubr.msk.bf16.mxu1 %vm882_vm5, %v26998_v20 }
 0xb0c   : > { %21995 = vmatmul.mubr.msk.bf16.gmra.mrb[72].mxu1 %vm882_vm5, %v27004_v9 }
 0xb0d   : > { %21998 = vmatprep.mubr.msk.bf16.mxu1 %vm882_vm5, %v10554_v52 }
 0xb14   : > { %21999 = vmatmul.mubr.msk.bf16.gmra.mrb[76].mxu1 %vm882_vm5, %v11337_v3  ;;  %vm24583_vm5 = vmmov 0  }
 0xbaf   : > { %v21972_v57 = vpop.f32.mrb[48].mxu1 }
 0xbb0   : > { %v11424_v62 = vpop.f32.mrb[49].mxu1 }
 0xbb1   : > { %v22746_v61 = vadd.f32 %v27280_v58, %v11424_v62  ;;  %v21973_v53 = vpop.f32.mrb[50].mxu1 }
 0xbb2   : > { %v11427_v47 = vpop.f32.mrb[51].mxu1 }
 0xbb3   : > { %v11551_v28 = vmax.f32 %v22746_v61, 0.0  ;;  %v22747_v60 = vadd.f32 %v27280_v58, %v11427_v47 }
 0xbb5   : > { %v11583_v2 = vcombine.high %v11551_v28, %v11551_v28  ;;  %v11590_v29 = vrot.slane %v11551_v28, %v27284_v38  ;;  %v11552_v55 = vmax.f32 %v22747_v60, 0.0 }
 0xbb7   : > { %v11597_v13 = vrot.slane %v11583_v2, %v27284_v38  ;;  %v11598_v36 = vcombine.high %v11590_v29, %v11590_v29  ;;  %v11600_v46 = vcombine.high %v11552_v55, %v11552_v55  ;;  %v21976_v44 = vpop.f32.mrb[52].mxu1  ;;  %v11858_v51 = vrot.slane %v11590_v29, %v27288_v4 }
 0xbb8   : > { %v11607_v10 = vrot.slane %v11552_v55, %v27284_v38  ;;  %v11438_v6 = vpop.f32.mrb[53].mxu1 }
 0xbb9   : > { %v11599_v11 = vcombine.high %v11597_v13, %v11597_v13  ;;  %v11862_v19 = vrot.slane %v11598_v36, %v27288_v4  ;;  %v11866_v5 = vrot.slane %v11597_v13, %v27288_v4  ;;  %v11614_v49 = vrot.slane %v11600_v46, %v27284_v38  ;;  %v21977_v24 = vpop.f32.mrb[54].mxu1 }
 0xbba   : > { %v11615_v20 = vcombine.high %v11607_v10, %v11607_v10  ;;  %v22748_v40 = vadd.f32 %v27280_v58, %v11438_v6  ;;  %v11441_v31 = vpop.f32.mrb[55].mxu1  ;;  %v11874_v23 = vrot.slane %v11607_v10, %v27288_v4 }
 0xbbb   : > { %v11870_v9 = vrot.slane %v11599_v11, %v27288_v4  ;;  %v12112_v15 = vsel %vm12111_vm11, %v11862_v19, %v11858_v51  ;;  %v11616_v42 = vcombine.high %v11614_v49, %v11614_v49  ;;  %v22749_v8 = vadd.f32 %v27280_v58, %v11441_v31 }
 0xbbc   : > { %v12114_v1 = vsel %vm12113_vm12, %v11866_v5, %v12112_v15  ;;  %v11553_v22 = vmax.f32 %v22748_v40, 0.0  ;;  %v11878_v17 = vrot.slane %v11615_v20, %v27288_v4  ;;  %v11882_v27 = vrot.slane %v11614_v49, %v27288_v4  ;;  %v27340_v15 = vld [vmem:[#allocation4] sm:$0xff] }
 0xbbd   : > { %v12116_v14 = vsel %vm12115_vm13, %v11870_v9, %v12114_v1  ;;  %v11554_v48 = vmax.f32 %v22749_v8, 0.0  ;;  %v11886_v16 = vrot.slane %v11616_v42, %v27288_v4 }
 0xbbe   : > { %v12118_v12 = vsel %vm12117_vm14, %v11874_v23, %v12116_v14  ;;  %v11617_v26 = vcombine.high %v11553_v22, %v11553_v22  ;;  %v11624_v50 = vrot.slane %v11553_v22, %v27284_v38 }
 0xbbf   : > { %v12120_v52 = vsel %vm12119_vm15, %v11878_v17, %v12118_v12  ;;  %v21980_v21 = vpop.f32.mrb[56].mxu1  ;;  %v11634_v43 = vcombine.high %v11554_v48, %v11554_v48  ;;  %v11641_v59 = vrot.slane %v11554_v48, %v27284_v38 }
 0xbc0   : > { %v12122_v33 = vsel %vm12121_vm0, %v11882_v27, %v12120_v52  ;;  %v11631_v56 = vrot.slane %v11617_v26, %v27284_v38  ;;  %v11632_v32 = vcombine.high %v11624_v50, %v11624_v50  ;;  %v11452_v41 = vpop.f32.mrb[57].mxu1  ;;  %v11890_v3 = vrot.slane %v11624_v50, %v27288_v4 }
 0xbc1   : > { %v27313_v35 = vsel %vm12123_vm1, %v11886_v16, %v12122_v33  ;;  %v22750_v34 = vadd.f32 %v27280_v58, %v11452_v41  ;;  %v21981_v45 = vpop.f32.mrb[58].mxu1  ;;  %v11648_v39 = vrot.slane %v11634_v43, %v27284_v38  ;;  %v11649_v30 = vcombine.high %v11641_v59, %v11641_v59 }
 0xbc2   : > { %12183 = vst.msk [vmem:[#allocation4 + $0x11] sm:$0xff] %vm928_vm8, %v27313_v35  ;;  %v11633_v54 = vcombine.high %v11631_v56, %v11631_v56  ;;  %v11894_v0 = vrot.slane %v11632_v32, %v27288_v4  ;;  %v11898_v63 = vrot.slane %v11631_v56, %v27288_v4  ;;  %v11455_v37 = vpop.f32.mrb[59].mxu1  ;;  %v11906_v60 = vrot.slane %v11641_v59, %v27288_v4 }
 0xbc3   : > { %v11555_v57 = vmax.f32 %v22750_v34, 0.0  ;;  %v22751_v53 = vadd.f32 %v27280_v58, %v11455_v37  ;;  %v11650_v28 = vcombine.high %v11648_v39, %v11648_v39  ;;  %v11910_v2 = vrot.slane %v11649_v30, %v27288_v4 }
 0xbc4   : > { %v11902_v62 = vrot.slane %v11633_v54, %v27288_v4  ;;  %v12125_v61 = vsel %vm12111_vm11, %v11894_v0, %v11890_v3  ;;  %v11914_v46 = vrot.slane %v11648_v39, %v27288_v4 }
 0xbc5   : > { %v12126_v47 = vsel %vm12113_vm12, %v11898_v63, %v12125_v61  ;;  %v11651_v55 = vcombine.high %v11555_v57, %v11555_v57  ;;  %v11658_v13 = vrot.slane %v11555_v57, %v27284_v38  ;;  %v11556_v36 = vmax.f32 %v22751_v53, 0.0 }
 0xbc6   : > { %v12127_v29 = vsel %vm12115_vm13, %v11902_v62, %v12126_v47  ;;  %v11918_v44 = vrot.slane %v11650_v28, %v27288_v4 }
 0xbc7   : > { %v12128_v51 = vsel %vm12117_vm14, %v11906_v60, %v12127_v29  ;;  %v21984_v10 = vpop.f32.mrb[60].mxu1  ;;  %v11665_v11 = vrot.slane %v11651_v55, %v27284_v38  ;;  %v11666_v19 = vcombine.high %v11658_v13, %v11658_v13  ;;  %v11922_v5 = vrot.slane %v11658_v13, %v27288_v4 }
 0xbc8   : > { %v12129_v6 = vsel %vm12119_vm15, %v11910_v2, %v12128_v51  ;;  %v11466_v49 = vpop.f32.mrb[61].mxu1  ;;  %v11668_v20 = vcombine.high %v11556_v36, %v11556_v36  ;;  %v11675_v40 = vrot.slane %v11556_v36, %v27284_v38 }
 0xbc9   : > { %v12130_v24 = vsel %vm12121_vm0, %v11914_v46, %v12129_v6  ;;  %v22752_v31 = vadd.f32 %v27280_v58, %v11466_v49  ;;  %v21985_v9 = vpop.f32.mrb[62].mxu1  ;;  %v27342_v42 = vld [vmem:[#allocation4 + $0x10] sm:$0xff]  ;;  %v11667_v23 = vcombine.high %v11665_v11, %v11665_v11  ;;  %v11926_v22 = vrot.slane %v11666_v19, %v27288_v4 }
 0xbca   : > { %v27345_v1 = vsel %vm12123_vm1, %v11918_v44, %v12130_v24  ;;  %v11930_v8 = vrot.slane %v11665_v11, %v27288_v4  ;;  %v11469_v17 = vpop.f32.mrb[63].mxu1  ;;  %v11682_v27 = vrot.slane %v11668_v20, %v27284_v38  ;;  %v11683_v14 = vcombine.high %v11675_v40, %v11675_v40 }
 0xbcb   : > { %12184 = vst.msk [vmem:[#allocation4 + $0x21] sm:$0xff] %vm928_vm8, %v27345_v1  ;;  %v11557_v12 = vmax.f32 %v22752_v31, 0.0  ;;  %v11934_v26 = vrot.slane %v11667_v23, %v27288_v4  ;;  %v12132_v50 = vsel %vm12111_vm11, %v11926_v22, %v11922_v5  ;;  %v22753_v48 = vadd.f32 %v27280_v58, %v11469_v17 }
 0xbcc   : > { %v12206_v16 = vpack.c.bf16 %v27342_v42, %v27340_v15  ;;  %v12133_v52 = vsel %vm12113_vm12, %v11930_v8, %v12132_v50  ;;  %v11684_v21 = vcombine.high %v11682_v27, %v11682_v27  ;;  %v11938_v33 = vrot.slane %v11675_v40, %v27288_v4 }
 0xbcd   : > { %v11942_v56 = vrot.slane %v11683_v14, %v27288_v4  ;;  %v12134_v32 = vsel %vm12115_vm13, %v11934_v26, %v12133_v52  ;;  %v11685_v41 = vcombine.high %v11557_v12, %v11557_v12  ;;  %v11692_v43 = vrot.slane %v11557_v12, %v27284_v38 }
 0xbce   : > { %v11558_v59 = vmax.f32 %v22753_v48, 0.0  ;;  %22004 = vmatprep.mubr.msk.bf16.mxu0 %vm928_vm8, %v12206_v16  ;;  %v11946_v34 = vrot.slane %v11682_v27, %v27288_v4  ;;  %v11950_v45 = vrot.slane %v11684_v21, %v27288_v4  ;;  %v12135_v54 = vsel %vm12117_vm14, %v11938_v33, %v12134_v32 }
 0xbcf   : > { %v21988_v3 = vpop.f32.mrb[64].mxu1  ;;  %v12136_v0 = vsel %vm12119_vm15, %v11942_v56, %v12135_v54  ;;  %v11699_v63 = vrot.slane %v11685_v41, %v27284_v38  ;;  %v11700_v37 = vcombine.high %v11692_v43, %v11692_v43  ;;  %v11954_v39 = vrot.slane %v11692_v43, %v27288_v4 }
 0xbd0   : > { %v11480_v30 = vpop.f32.mrb[65].mxu1  ;;  %v12137_v57 = vsel %vm12121_vm0, %v11946_v34, %v12136_v0  ;;  %v11702_v62 = vcombine.high %v11558_v59, %v11558_v59  ;;  %v11709_v61 = vrot.slane %v11558_v59, %v27284_v38 }
 0xbd1   : > { %v22754_v53 = vadd.f32 %v27280_v58, %v11480_v30  ;;  %v21989_v47 = vpop.f32.mrb[66].mxu1  ;;  %v27373_v28 = vsel %vm12123_vm1, %v11950_v45, %v12137_v57  ;;  %v11701_v60 = vcombine.high %v11699_v63, %v11699_v63  ;;  %v11958_v2 = vrot.slane %v11700_v37, %v27288_v4 }
 0xbd2   : > { %v11962_v29 = vrot.slane %v11699_v63, %v27288_v4  ;;  %v11483_v55 = vpop.f32.mrb[67].mxu1  ;;  %12185 = vst.msk [vmem:[#allocation4 + $0x31] sm:$0xff] %vm928_vm8, %v27373_v28  ;;  %v11716_v13 = vrot.slane %v11702_v62, %v27284_v38  ;;  %v11717_v36 = vcombine.high %v11709_v61, %v11709_v61  ;;  %v11970_v19 = vrot.slane %v11709_v61, %v27288_v4  ;;  %v27407_v54 = vld [vmem:[#allocation4 + $0x20] sm:$0xff] }
 0xbd3   : > { %v11559_v46 = vmax.f32 %v22754_v53, 0.0  ;;  %v11966_v44 = vrot.slane %v11701_v60, %v27288_v4  ;;  %v12139_v51 = vsel %vm12111_vm11, %v11958_v2, %v11954_v39  ;;  %v22755_v10 = vadd.f32 %v27280_v58, %v11483_v55  ;;  %v27419_v39 = vld [vmem:[%s28890_s2 + $0x10] sm:$0xff]  }
 0xbd4   : > { %v12140_v6 = vsel %vm12113_vm12, %v11962_v29, %v12139_v51  ;;  %v11718_v11 = vcombine.high %v11716_v13, %v11716_v13  ;;  %v11974_v5 = vrot.slane %v11717_v36, %v27288_v4  ;;  %v11978_v31 = vrot.slane %v11716_v13, %v27288_v4 }
 0xbd5   : > { %v12141_v49 = vsel %vm12115_vm13, %v11966_v44, %v12140_v6  ;;  %v11719_v24 = vcombine.high %v11559_v46, %v11559_v46  ;;  %v11726_v20 = vrot.slane %v11559_v46, %v27284_v38  ;;  %v11560_v40 = vmax.f32 %v22755_v10, 0.0 }
 0xbd6   : > { %v11982_v9 = vrot.slane %v11718_v11, %v27288_v4  ;;  %v12142_v23 = vsel %vm12117_vm14, %v11970_v19, %v12141_v49 }
 0xbd7   : > { %v21992_v22 = vpop.f32.mrb[68].mxu1  ;;  %v12143_v8 = vsel %vm12119_vm15, %v11974_v5, %v12142_v23  ;;  %v11733_v17 = vrot.slane %v11719_v24, %v27284_v38  ;;  %v11734_v27 = vcombine.high %v11726_v20, %v11726_v20  ;;  %v11986_v14 = vrot.slane %v11726_v20, %v27288_v4 }
 0xbd8   : > { %v11494_v12 = vpop.f32.mrb[69].mxu1  ;;  %v12144_v26 = vsel %vm12121_vm0, %v11978_v31, %v12143_v8  ;;  %v11736_v50 = vcombine.high %v11560_v40, %v11560_v40  ;;  %v11743_v48 = vrot.slane %v11560_v40, %v27284_v38 }
 0xbd9   : > { %v22756_v16 = vadd.f32 %v27280_v58, %v11494_v12  ;;  %v21993_v52 = vpop.f32.mrb[70].mxu1  ;;  %v27398_v21 = vsel %vm12123_vm1, %v11982_v9, %v12144_v26  ;;  %v11735_v33 = vcombine.high %v11733_v17, %v11733_v17  ;;  %v11990_v56 = vrot.slane %v11734_v27, %v27288_v4  ;;  %v27402_v43 = vld [vmem:[#allocation4 + $0x30] sm:$0xff] }
 0xbda   : > { %v11994_v32 = vrot.slane %v11733_v17, %v27288_v4  ;;  %v11497_v41 = vpop.f32.mrb[71].mxu1  ;;  %12186 = vst.msk [vmem:[#allocation4 + $0x41] sm:$0xff] %vm928_vm8, %v27398_v21  ;;  %v11750_v59 = vrot.slane %v11736_v50, %v27284_v38  ;;  %v11751_v34 = vcombine.high %v11743_v48, %v11743_v48  ;;  %v27414_v37 = vpack.c.bf16 %v27402_v43, %v27407_v54 }
 0xbdb   : > { %v11561_v45 = vmax.f32 %v22756_v16, 0.0  ;;  %v11998_v3 = vrot.slane %v11735_v33, %v27288_v4  ;;  %v12146_v0 = vsel %vm12111_vm11, %v11990_v56, %v11986_v14  ;;  %v22757_v63 = vadd.f32 %v27280_v58, %v11497_v41 }
 0xbdc   : > { %v12147_v30 = vsel %vm12113_vm12, %v11994_v32, %v12146_v0  ;;  %v11752_v57 = vcombine.high %v11750_v59, %v11750_v59  ;;  %v12002_v62 = vrot.slane %v11743_v48, %v27288_v4  ;;  %v12006_v61 = vrot.slane %v11751_v34, %v27288_v4  ;;  %22005 = vmatmul.mubr.msk.bf16.vlgmr.msra.gmra.mrb[64].mxu0 %vm928_vm8, %v27414_v37 }
 0xbdd   : > { %v12148_v53 = vsel %vm12115_vm13, %v11998_v3, %v12147_v30  ;;  %v11753_v47 = vcombine.high %v11561_v45, %v11561_v45  ;;  %v11760_v60 = vrot.slane %v11561_v45, %v27284_v38  ;;  %v11562_v2 = vmax.f32 %v22757_v63, 0.0  ;;  %22013 = vmatpush3.bf16.msra.mxu0 %v27272_v18 }
 0xbde   : > { %v12010_v29 = vrot.slane %v11750_v59, %v27288_v4  ;;  %v12014_v55 = vrot.slane %v11752_v57, %v27288_v4  ;;  %v12149_v13 = vsel %vm12117_vm14, %v12002_v62, %v12148_v53  ;;  %22022 = vmatprep.subr.bf16.mxu0 %v27419_v39 }
 0xbdf   : > { %v21996_v36 = vpop.f32.mrb[72].mxu1  ;;  %v12150_v46 = vsel %vm12119_vm15, %v12006_v61, %v12149_v13  ;;  %v11767_v44 = vrot.slane %v11753_v47, %v27284_v38  ;;  %v11768_v51 = vcombine.high %v11760_v60, %v11760_v60  ;;  %v12018_v10 = vrot.slane %v11760_v60, %v27288_v4 }
 0xbe0   : > { %v11508_v6 = vpop.f32.mrb[73].mxu1  ;;  %v12151_v11 = vsel %vm12121_vm0, %v12010_v29, %v12150_v46  ;;  %v11770_v19 = vcombine.high %v11562_v2, %v11562_v2  ;;  %v11777_v5 = vrot.slane %v11562_v2, %v27284_v38 }
 0xbe1   : > { %v22758_v49 = vadd.f32 %v27280_v58, %v11508_v6  ;;  %v21997_v24 = vpop.f32.mrb[74].mxu1  ;;  %v27440_v18 = vsel %vm12123_vm1, %v12014_v55, %v12151_v11  ;;  %v11769_v20 = vcombine.high %v11767_v44, %v11767_v44  ;;  %v12022_v40 = vrot.slane %v11768_v51, %v27288_v4 }
 0xbe2   : > { %v12026_v31 = vrot.slane %v11767_v44, %v27288_v4  ;;  %v11511_v9 = vpop.f32.mrb[75].mxu1  ;;  %12187 = vst.msk [vmem:[#allocation4 + $0x51] sm:$0xff] %vm928_vm8, %v27440_v18  ;;  %v11784_v23 = vrot.slane %v11770_v19, %v27284_v38  ;;  %v11785_v22 = vcombine.high %v11777_v5, %v11777_v5  ;;  %v12034_v50 = vrot.slane %v11777_v5, %v27288_v4 }
 0xbe3   : > { %v11563_v8 = vmax.f32 %v22758_v49, 0.0  ;;  %v12030_v17 = vrot.slane %v11769_v20, %v27288_v4  ;;  %v12153_v27 = vsel %vm12111_vm11, %v12022_v40, %v12018_v10  ;;  %v22759_v14 = vadd.f32 %v27280_v58, %v11511_v9  ;;  %v27474_v10 = vld [vmem:[#allocation4 + $0x40] sm:$0xff] }
 0xbe4   : > { %v12154_v12 = vsel %vm12113_vm12, %v12026_v31, %v12153_v27  ;;  %v11786_v26 = vcombine.high %v11784_v23, %v11784_v23  ;;  %v12038_v48 = vrot.slane %v11785_v22, %v27288_v4  ;;  %v12042_v32 = vrot.slane %v11784_v23, %v27288_v4 }
 0xbe5   : > { %v12155_v16 = vsel %vm12115_vm13, %v12030_v17, %v12154_v12  ;;  %v11787_v52 = vcombine.high %v11563_v8, %v11563_v8  ;;  %v11794_v33 = vrot.slane %v11563_v8, %v27284_v38  ;;  %v11564_v56 = vmax.f32 %v22759_v14, 0.0 }
 0xbe6   : > { %v12046_v41 = vrot.slane %v11786_v26, %v27288_v4  ;;  %v12156_v59 = vsel %vm12117_vm14, %v12034_v50, %v12155_v16 }
 0xbe7   : > { %v22000_v34 = vpop.f32.mrb[76].mxu1  ;;  %v12157_v45 = vsel %vm12119_vm15, %v12038_v48, %v12156_v59  ;;  %v11801_v3 = vrot.slane %v11787_v52, %v27284_v38  ;;  %v11802_v0 = vcombine.high %v11794_v33, %v11794_v33  ;;  %v12050_v63 = vrot.slane %v11794_v33, %v27288_v4 }
 0xbe8   : > { %v11522_v30 = vpop.f32.mrb[77].mxu1  ;;  %v12158_v57 = vsel %vm12121_vm0, %v12042_v32, %v12157_v45  ;;  %v11804_v62 = vcombine.high %v11564_v56, %v11564_v56  ;;  %v11811_v61 = vrot.slane %v11564_v56, %v27284_v38 }
 0xbe9   : > { %v22760_v53 = vadd.f32 %v27280_v58, %v11522_v30  ;;  %v22001_v47 = vpop.f32.mrb[78].mxu1  ;;  %v27465_v60 = vsel %vm12123_vm1, %v12046_v41, %v12158_v57  ;;  %v11803_v2 = vcombine.high %v11801_v3, %v11801_v3  ;;  %v12054_v29 = vrot.slane %v11802_v0, %v27288_v4  ;;  %v27469_v36 = vld [vmem:[#allocation4 + $0x50] sm:$0xff] }
 0xbea   : > { %v12058_v55 = vrot.slane %v11801_v3, %v27288_v4  ;;  %v11525_v13 = vpop.f32.mrb[79].mxu1  ;;  %12188 = vst.msk [vmem:[#allocation4 + $0x61] sm:$0xff] %vm928_vm8, %v27465_v60  ;;  %v11818_v46 = vrot.slane %v11804_v62, %v27284_v38  ;;  %v11819_v44 = vcombine.high %v11811_v61, %v11811_v61  ;;  %v27481_v5 = vpack.c.bf16 %v27469_v36, %v27474_v10 }
 0xbeb   : > { %v11565_v51 = vmax.f32 %v22760_v53, 0.0  ;;  %v12062_v6 = vrot.slane %v11803_v2, %v27288_v4  ;;  %v12160_v11 = vsel %vm12111_vm11, %v12054_v29, %v12050_v63  ;;  %v22761_v19 = vadd.f32 %v27280_v58, %v11525_v13  ;;  %v27517_v29 = vld [vmem:[#allocation4 + $0x1] sm:$0xff] }
 0xbec   : > { %v12161_v49 = vsel %vm12113_vm12, %v12058_v55, %v12160_v11  ;;  %v11820_v24 = vcombine.high %v11818_v46, %v11818_v46  ;;  %v12066_v20 = vrot.slane %v11811_v61, %v27288_v4  ;;  %v12070_v40 = vrot.slane %v11819_v44, %v27288_v4  ;;  %22008 = vmatprep.mubr.msk.bf16.mxu0 %vm928_vm8, %v27481_v5  ;;  %v12304_v55 = vld [vmem:[#allocation4 + $0x11] sm:$0xff]  ;;  %v24259_v11 = vld [vmem:[%s28892_s5] sm:$0xff]  }
 0xbed   : > { %v12162_v31 = vsel %vm12115_vm13, %v12062_v6, %v12161_v49  ;;  %v11821_v9 = vcombine.high %v11565_v51, %v11565_v51  ;;  %v11828_v23 = vrot.slane %v11565_v51, %v27284_v38  ;;  %v11566_v22 = vmax.f32 %v22761_v19, 0.0  ;;  %22092 = vmatprep.subr.bf16.mxu1 %v24259_v11  ;;  %v12306_v19 = vld [vmem:[#allocation4 + $0x31] sm:$0xff] }
 0xbee   : > { %v12074_v58 = vrot.slane %v11818_v46, %v27288_v4  ;;  %v12163_v8 = vsel %vm12117_vm14, %v12066_v20, %v12162_v31  ;;  %v12078_v17 = vrot.slane %v11820_v24, %v27288_v4  ;;  %v12311_v6 = vpack.c.bf16 %v12304_v55, %v27517_v29  ;;  %22093 = vmatpush3.bf16.msra.mxu1 %v24259_v11  ;;  %v12308_v49 = vld [vmem:[#allocation4 + $0x51] sm:$0xff]  ;;  %v12305_v24 = vld [vmem:[#allocation4 + $0x21] sm:$0xff] }
 0xbef   : > { %v12164_v27 = vsel %vm12119_vm15, %v12070_v40, %v12163_v8  ;;  %v11835_v14 = vrot.slane %v11821_v9, %v27284_v38  ;;  %v11836_v12 = vcombine.high %v11828_v23, %v11828_v23  ;;  %v12082_v50 = vrot.slane %v11828_v23, %v27288_v4  ;;  %v12307_v40 = vld [vmem:[#allocation4 + $0x41] sm:$0xff]  ;;  %v24253_v31 = vld [vmem:[%s28890_s2 + $0x18] sm:$0xff]  }
 0xbf0   : > { %v12165_v26 = vsel %vm12121_vm0, %v12074_v58, %v12164_v27  ;;  %v11838_v48 = vcombine.high %v11566_v22, %v11566_v22  ;;  %v11845_v16 = vrot.slane %v11566_v22, %v27284_v38  ;;  %v27533_v20 = vpack.c.bf16 %v12306_v19, %v12305_v24  ;;  %v27545_v22 = vld [vmem:[#allocation4 + $0x2] sm:$0xff]  ;;  %v12409_v58 = vld [vmem:[#allocation4 + $0x12] sm:$0xff] }
 0xbf1   : > { %v27499_v52 = vsel %vm12123_vm1, %v12078_v17, %v12165_v26  ;;  %v11837_v33 = vcombine.high %v11835_v14, %v11835_v14  ;;  %v12086_v56 = vrot.slane %v11836_v12, %v27288_v4  ;;  %v12090_v32 = vrot.slane %v11835_v14, %v27288_v4  ;;  %v12204_v46 = vld [vmem:[#allocation4 + $0x60] sm:$0xff]  ;;  %v12411_v14 = vld [vmem:[#allocation4 + $0x32] sm:$0xff] }
 0xbf2   : > { %12189 = vst.msk [vmem:[#allocation4 + $0x71] sm:$0xff] %vm928_vm8, %v27499_v52  ;;  %v11852_v41 = vrot.slane %v11838_v48, %v27284_v38  ;;  %v11853_v59 = vcombine.high %v11845_v16, %v11845_v16  ;;  %v12098_v63 = vrot.slane %v11845_v16, %v27288_v4  ;;  %v27538_v9 = vpack.c.bf16 %v12308_v49, %v12307_v40  ;;  %v12309_v8 = vld [vmem:[#allocation4 + $0x61] sm:$0xff] }
 0xbf3   : > { %v12094_v34 = vrot.slane %v11837_v33, %v27288_v4  ;;  %v12167_v45 = vsel %vm12111_vm11, %v12086_v56, %v12082_v50  ;;  %v12416_v27 = vpack.c.bf16 %v12409_v58, %v27545_v22  ;;  %v12410_v12 = vld [vmem:[#allocation4 + $0x22] sm:$0xff] }
 0xbf4   : > { %v12168_v3 = vsel %vm12113_vm12, %v12090_v32, %v12167_v45  ;;  %v11854_v0 = vcombine.high %v11852_v41, %v11852_v41  ;;  %v12102_v30 = vrot.slane %v11853_v59, %v27288_v4  ;;  %v12106_v62 = vrot.slane %v11852_v41, %v27288_v4  ;;  %v12412_v50 = vld [vmem:[#allocation4 + $0x42] sm:$0xff] }
 0xbf5   : > { %v12169_v57 = vsel %vm12115_vm13, %v12094_v34, %v12168_v3  ;;  %v27553_v26 = vpack.c.bf16 %v12411_v14, %v12410_v12  ;;  %v24254_v48 = vld [vmem:[%s28890_s2 + $0x20] sm:$0xff]   ;;  %v12521_v41 = vpack.c.bf16 %v27407_v54, %v27342_v42  ;;  %v12522_v59 = vpack.c.bf16 %v27474_v10, %v27402_v43  ;;  %v24255_v34 = vld [vmem:[%s28890_s2 + $0x28] sm:$0xff]   ;;  %v24256_v10 = vld [vmem:[%s28890_s2 + $0x30] sm:$0xff]  }
 0xbf6   : > { %v12170_v61 = vsel %vm12117_vm14, %v12098_v63, %v12169_v57  ;;  %v12110_v53 = vrot.slane %v11854_v0, %v27288_v4  ;;  %v12414_v56 = vld [vmem:[#allocation4 + $0x62] sm:$0xff]  ;;  %v12523_v45 = vpack.c.bf16 %v12204_v46, %v27469_v36  ;;  %v12626_v3 = vpack.c.bf16 %v12305_v24, %v12304_v55  ;;  %v27597_v55 = vld [vmem:[#allocation4 + $0x90] sm:$0xff] }
 0xbf7   : > { %v12171_v47 = vsel %vm12119_vm15, %v12102_v30, %v12170_v61  ;;  %v12627_v43 = vpack.c.bf16 %v12307_v40, %v12306_v19  ;;  %v12628_v0 = vpack.c.bf16 %v12309_v8, %v12308_v49  ;;  %v12731_v30 = vpack.c.bf16 %v12410_v12, %v12409_v58 }
 0xbf8   : > { %v12172_v2 = vsel %vm12121_vm0, %v12106_v62, %v12171_v47  ;;  %v12732_v57 = vpack.c.bf16 %v12412_v50, %v12411_v14  ;;  %v24257_v62 = vld [vmem:[%s28890_s2 + $0x38] sm:$0xff]  }
 0xbf9   : > { %v27520_v13 = vsel %vm12123_vm1, %v12110_v53, %v12172_v2  ;;  %v12205_v44 = vld [vmem:[#allocation4 + $0x70] sm:$0xff]  ;;  %v24258_v2 = vld [vmem:[%s28890_s2 + $0x40] sm:$0xff]   ;;  %s28893_s2 = sld [smem:[#allocation47_spill]] }
 0xbfa   : > { %12190 = vst.msk [vmem:[#allocation4 + $0x81] sm:$0xff] %vm928_vm8, %v27520_v13  ;;  %v27524_v51 = vpack.c.bf16 %v12205_v44, %v12204_v46  ;;  %v12310_v23 = vld [vmem:[#allocation4 + $0x71] sm:$0xff] }
 0xbfb   : > { %v27547_v17 = vpack.c.bf16 %v12310_v23, %v12309_v8  ;;  %v12415_v33 = vld [vmem:[#allocation4 + $0x72] sm:$0xff] }
 0xbfc   : > { %22009 = vmatmul.mubr.msk.bf16.gmra.mrb[68].mxu0 %vm928_vm8, %v27524_v51  ;;  %v12419_v32 = vpack.c.bf16 %v12415_v33, %v12414_v56 }
 0xbfd   : > { %22014 = vmatprep.mubr.msk.bf16.mxu0 %vm928_vm8, %v12311_v6  ;;  %v24260_v6 = vld [vmem:[%s28892_s5 + $0x8] sm:$0xff]  }
 0xbfe   : > { %22102 = vmatprep.subr.bf16.mxu1 %v24260_v6 }
 0xbff   : > { %v19603_v11 = vld [vmem:[%s28893_s2] ss:$0 sm:$0xff] }
 0xc01   : > { %v12520_v42 = vld [vmem:[#allocation4 + $0x80] sm:$0xff] }
 0xc02   : > { %v12524_v54 = vpack.c.bf16 %v12520_v42, %v12205_v44  ;;  %v12625_v36 = vld [vmem:[#allocation4 + $0x81] sm:$0xff]  ;;  %v12840_v46 = vpack.c.bf16 %v27597_v55, %v12520_v42  ;;  %v27615_v44 = vld [vmem:[#allocation4 + $0x92] sm:$0xff] }
 0xc03   : > { %v12629_v63 = vpack.c.bf16 %v12625_v36, %v12310_v23  ;;  %v12730_v53 = vld [vmem:[#allocation4 + $0x82] sm:$0xff] }
 0xc04   : > { %22015 = vmatmul.mubr.msk.bf16.vlgmr.msra.gmra.mrb[64].mxu0 %vm928_vm8, %v27533_v20  ;;  %v12734_v47 = vpack.c.bf16 %v12730_v53, %v12415_v33 }
 0xc05   : > { %22023 = vmatpush3.bf16.msra.mxu0 %v27419_v39  ;;  %22018 = vmatprep.mubr.msk.bf16.mxu0 %vm928_vm8, %v27538_v9  ;;  %v12413_v39 = vld [vmem:[#allocation4 + $0x52] sm:$0xff] }
 0xc06   : > { %22032 = vmatprep.subr.bf16.mxu0 %v24253_v31  ;;  %v12418_v16 = vpack.c.bf16 %v12413_v39, %v12412_v50  ;;  %v12733_v61 = vpack.c.bf16 %v12414_v56, %v12413_v39 }
 0xc0c   : > { %22019 = vmatmul.mubr.msk.bf16.gmra.mrb[68].mxu0 %vm928_vm8, %v27547_v17 }
 0xc0d   : > { %22024 = vmatprep.mubr.msk.bf16.mxu0 %vm928_vm8, %v12416_v27 }
 0xc14   : > { %22025 = vmatmul.mubr.msk.bf16.vlgmr.msra.gmra.mrb[64].mxu0 %vm928_vm8, %v27553_v26 }
 0xc15   : > { %22033 = vmatpush3.bf16.msra.mxu0 %v24253_v31  ;;  %22028 = vmatprep.mubr.msk.bf16.mxu0 %vm928_vm8, %v12418_v16 }
 0xc16   : > { %22042 = vmatprep.subr.bf16.mxu0 %v24254_v48 }
 0xc1c   : > { %22029 = vmatmul.mubr.msk.bf16.gmra.mrb[68].mxu0 %vm928_vm8, %v12419_v32 }
 0xc1d   : > { %22034 = vmatprep.mubr.msk.bf16.mxu0 %vm928_vm8, %v12521_v41 }
 0xc24   : > { %22035 = vmatmul.mubr.msk.bf16.vlgmr.msra.gmra.mrb[64].mxu0 %vm928_vm8, %v12522_v59 }
 0xc25   : > { %22043 = vmatpush3.bf16.msra.mxu0 %v24254_v48  ;;  %22038 = vmatprep.mubr.msk.bf16.mxu0 %vm928_vm8, %v12523_v45 }
 0xc26   : > { %22052 = vmatprep.subr.bf16.mxu0 %v24255_v34 }
 0xc2c   : > { %22039 = vmatmul.mubr.msk.bf16.gmra.mrb[68].mxu0 %vm928_vm8, %v12524_v54 }
 0xc2d   : > { %22044 = vmatprep.mubr.msk.bf16.mxu0 %vm928_vm8, %v12626_v3 }
 0xc34   : > { %22045 = vmatmul.mubr.msk.bf16.vlgmr.msra.gmra.mrb[64].mxu0 %vm928_vm8, %v12627_v43  ;;  %v24261_v43 = vld [vmem:[%s28892_s5 + $0x10] sm:$0xff]  }
 0xc35   : > { %22053 = vmatpush3.bf16.msra.mxu0 %v24255_v34  ;;  %22048 = vmatprep.mubr.msk.bf16.mxu0 %vm928_vm8, %v12628_v0 }
 0xc36   : > { %22062 = vmatprep.subr.bf16.mxu0 %v24256_v10 }
 0xc3c   : > { %22049 = vmatmul.mubr.msk.bf16.gmra.mrb[68].mxu0 %vm928_vm8, %v12629_v63 }
 0xc3d   : > { %22054 = vmatprep.mubr.msk.bf16.mxu0 %vm928_vm8, %v12731_v30 }
 0xc44   : > { %22055 = vmatmul.mubr.msk.bf16.vlgmr.msra.gmra.mrb[64].mxu0 %vm928_vm8, %v12732_v57 }
 0xc45   : > { %22063 = vmatpush3.bf16.msra.mxu0 %v24256_v10  ;;  %22058 = vmatprep.mubr.msk.bf16.mxu0 %vm928_vm8, %v12733_v61 }
 0xc46   : > { %22072 = vmatprep.subr.bf16.mxu0 %v24257_v62 }
 0xc4c   : > { %22059 = vmatmul.mubr.msk.bf16.gmra.mrb[68].mxu0 %vm928_vm8, %v12734_v47 }
 0xc4d   : > { %22064 = vmatprep.mubr.msk.bf16.mxu0 %vm928_vm8, %v27414_v37  ;;  %v27607_v37 = vld [vmem:[#allocation4 + $0x91] sm:$0xff] }
 0xc54   : > { %22065 = vmatmul.mubr.msk.bf16.vlgmr.msra.gmra.mrb[64].mxu0 %vm928_vm8, %v27481_v5  ;;  %v12945_v5 = vpack.c.bf16 %v27607_v37, %v12625_v36 }
 0xc55   : > { %22073 = vmatpush3.bf16.msra.mxu0 %v24257_v62  ;;  %22068 = vmatprep.mubr.msk.bf16.mxu0 %vm928_vm8, %v27524_v51  ;;  %v13050_v51 = vpack.c.bf16 %v27615_v44, %v12730_v53 }
 0xc56   : > { %22082 = vmatprep.subr.bf16.mxu0 %v24258_v2 }
 0xc5c   : > { %22069 = vmatmul.mubr.msk.bf16.gmra.mrb[68].mxu0 %vm928_vm8, %v12840_v46 }
 0xc5d   : > { %22074 = vmatprep.mubr.msk.bf16.mxu0 %vm928_vm8, %v27533_v20 }
 0xc64   : > { %22075 = vmatmul.mubr.msk.bf16.vlgmr.msra.gmra.mrb[64].mxu0 %vm928_vm8, %v27538_v9 }
 0xc65   : > { %22083 = vmatpush3.bf16.msra.mxu0 %v24258_v2  ;;  %22078 = vmatprep.mubr.msk.bf16.mxu0 %vm928_vm8, %v27547_v17 }
 0xc6c   : > { %22079 = vmatmul.mubr.msk.bf16.gmra.mrb[68].mxu0 %vm928_vm8, %v12945_v5  ;;  %v24262_v5 = vld [vmem:[%s28892_s5 + $0x18] sm:$0xff]  }
 0xc6d   : > { %22084 = vmatprep.mubr.msk.bf16.mxu0 %vm928_vm8, %v27553_v26 }
 0xc74   : > { %22085 = vmatmul.mubr.msk.bf16.vlgmr.msra.gmra.mrb[64].mxu0 %vm928_vm8, %v12418_v16 }
 0xc75   : > { %22088 = vmatprep.mubr.msk.bf16.mxu0 %vm928_vm8, %v12419_v32 }
 0xc7c   : > { %22089 = vmatmul.mubr.msk.bf16.gmra.mrb[68].mxu0 %vm928_vm8, %v13050_v51 }
 0xd47   : > { %v22086_v19 = vpop.f32.mrb[64].mxu0 }
 0xd48   : > { %v22762_v49 = vadd.f32 %v22086_v19, %v19603_v11  ;;  %v13105_v24 = vpop.f32.mrb[65].mxu0 }
 0xd49   : > { %v22763_v20 = vadd.f32 %v19603_v11, %v13105_v24  ;;  %v22087_v40 = vpop.f32.mrb[66].mxu0 }
 0xd4a   : > { %v13146_v31 = vmax.f32 %v22762_v49, 0.0  ;;  %v22764_v9 = vadd.f32 %v22087_v40, %v19603_v11  ;;  %v13108_v23 = vpop.f32.mrb[67].mxu0 }
 0xd4b   : > { %v13144_v58 = vmax.f32 %v22763_v20, 0.0  ;;  %v22765_v8 = vadd.f32 %v19603_v11, %v13108_v23 }
 0xd4c   : > { %13154 = vst.msk [vmem:[#allocation4 + $0x31] sm:$0xff] %vm928_vm8, %v13146_v31  ;;  %v13147_v17 = vmax.f32 %v22764_v9, 0.0 }
 0xd4d   : > { %13152 = vst.msk [vmem:[#allocation4 + $0x11] sm:$0xff] %vm928_vm8, %v13144_v58  ;;  %v13145_v27 = vmax.f32 %v22765_v8, 0.0  ;;  %v24263_v58 = vld [vmem:[%s28892_s5 + $0x20] sm:$0xff]  }
 0xd4e   : > { %13155 = vst.msk [vmem:[#allocation4 + $0x41] sm:$0xff] %vm928_vm8, %v13147_v17 }
 0xd4f   : > { %13153 = vst.msk [vmem:[#allocation4 + $0x21] sm:$0xff] %vm928_vm8, %v13145_v27  ;;  %v22090_v14 = vpop.f32.mrb[68].mxu0 }
 0xd50   : > { %v22766_v39 = vadd.f32 %v22090_v14, %v19603_v11  ;;  %v13121_v12 = vpop.f32.mrb[69].mxu0 }
 0xd51   : > { %v22767_v26 = vadd.f32 %v19603_v11, %v13121_v12  ;;  %v22091_v50 = vpop.f32.mrb[70].mxu0 }
 0xd52   : > { %v13150_v48 = vmax.f32 %v22766_v39, 0.0  ;;  %v22768_v16 = vadd.f32 %v22091_v50, %v19603_v11  ;;  %v13124_v33 = vpop.f32.mrb[71].mxu0 }
 0xd53   : > { %v13148_v56 = vmax.f32 %v22767_v26, 0.0  ;;  %v22769_v32 = vadd.f32 %v19603_v11, %v13124_v33  ;;  %v13170_v54 = vld [vmem:[#allocation4 + $0x30] sm:$0xff]  ;;  %v24264_v26 = vld [vmem:[%s28892_s5 + $0x28] sm:$0xff]  }
 0xd54   : > { %13158 = vst.msk [vmem:[#allocation4 + $0x71] sm:$0xff] %vm928_vm8, %v13150_v48  ;;  %v13151_v41 = vmax.f32 %v22768_v16, 0.0  ;;  %v13168_v59 = vld [vmem:[#allocation4 + $0x10] sm:$0xff] }
 0xd55   : > { %13156 = vst.msk [vmem:[#allocation4 + $0x51] sm:$0xff] %vm928_vm8, %v13148_v56  ;;  %v13149_v34 = vmax.f32 %v22769_v32, 0.0  ;;  %v13175_v45 = vpack.c.bf16 %v13168_v59, %v27340_v15  ;;  %v13171_v15 = vld [vmem:[#allocation4 + $0x40] sm:$0xff]  ;;  %v13273_v36 = vld [vmem:[#allocation4 + $0x11] sm:$0xff] }
 0xd56   : > { %13159 = vst.msk [vmem:[#allocation4 + $0x81] sm:$0xff] %vm928_vm8, %v13151_v41  ;;  %v13169_v42 = vld [vmem:[#allocation4 + $0x20] sm:$0xff]  ;;  %v13280_v62 = vpack.c.bf16 %v13273_v36, %v27517_v29  ;;  %v13275_v47 = vld [vmem:[#allocation4 + $0x31] sm:$0xff]  ;;  %v13491_v12 = vpack.c.bf16 %v13171_v15, %v13170_v54 }
 0xd57   : > { %13157 = vst.msk [vmem:[#allocation4 + $0x61] sm:$0xff] %vm928_vm8, %v13149_v34  ;;  %22094 = vmatprep.mubr.msk.bf16.mxu1 %vm928_vm8, %v13175_v45  ;;  %v27635_v3 = vpack.c.bf16 %v13170_v54, %v13169_v42  ;;  %v13274_v61 = vld [vmem:[#allocation4 + $0x21] sm:$0xff]  ;;  %v13378_v11 = vld [vmem:[#allocation4 + $0x12] sm:$0xff]  ;;  %v13490_v39 = vpack.c.bf16 %v13169_v42, %v13168_v59 }
 0xd58   : > { %v27652_v2 = vpack.c.bf16 %v13275_v47, %v13274_v61  ;;  %v13276_v46 = vld [vmem:[#allocation4 + $0x41] sm:$0xff]  ;;  %v13385_v24 = vpack.c.bf16 %v13378_v11, %v27545_v22  ;;  %v13380_v31 = vld [vmem:[#allocation4 + $0x32] sm:$0xff]  ;;  %v13595_v33 = vpack.c.bf16 %v13274_v61, %v13273_v36 }
 0xd59   : > { %22095 = vmatmul.mubr.msk.bf16.vlgmr.msra.gmra.mrb[80].mxu1 %vm928_vm8, %v27635_v3  ;;  %v13379_v20 = vld [vmem:[#allocation4 + $0x22] sm:$0xff]  ;;  %v13596_v56 = vpack.c.bf16 %v13276_v46, %v13275_v47  ;;  %v24265_v32 = vld [vmem:[%s28892_s5 + $0x30] sm:$0xff]   ;;  %v24266_v54 = vld [vmem:[%s28892_s5 + $0x38] sm:$0xff]  }
 0xd5a   : > { %22103 = vmatpush3.bf16.msra.mxu1 %v24260_v6  ;;  %v27669_v9 = vpack.c.bf16 %v13380_v31, %v13379_v20  ;;  %v13381_v23 = vld [vmem:[#allocation4 + $0x42] sm:$0xff]  ;;  %v13700_v45 = vpack.c.bf16 %v13379_v20, %v13378_v11 }
 0xd5b   : > { %22112 = vmatprep.subr.bf16.mxu1 %v24261_v43  ;;  %v13174_v30 = vld [vmem:[#allocation4 + $0x70] sm:$0xff]  ;;  %v13701_v42 = vpack.c.bf16 %v13381_v23, %v13380_v31  ;;  %v24267_v36 = vld [vmem:[%s28892_s5 + $0x40] sm:$0xff]   ;;  %s19894_s5 = sshll.u32 %s24755_s9, 8 }
 0xd5c   : > { %v13172_v10 = vld [vmem:[#allocation4 + $0x50] sm:$0xff]  ;;  %s28568_s11 = scalar_lea.hbm %s28713_s26, %s19894_s5 }
 0xd5d   : > { %v27642_v0 = vpack.c.bf16 %v13172_v10, %v13171_v15  ;;  %v13277_v53 = vld [vmem:[#allocation4 + $0x51] sm:$0xff]  ;;  %v13489_v48 = vld [vmem:[#allocation4 + $0x80] sm:$0xff] }
 0xd5e   : > { %v13173_v63 = vld [vmem:[#allocation4 + $0x60] sm:$0xff]  ;;  %v27657_v51 = vpack.c.bf16 %v13277_v53, %v13276_v46  ;;  %v13279_v19 = vld [vmem:[#allocation4 + $0x71] sm:$0xff]  ;;  %v13493_v16 = vpack.c.bf16 %v13489_v48, %v13174_v30 }
 0xd5f   : > { %22098 = vmatprep.mubr.msk.bf16.mxu1 %vm928_vm8, %v27642_v0  ;;  %v27646_v57 = vpack.c.bf16 %v13174_v30, %v13173_v63  ;;  %v13278_v6 = vld [vmem:[#allocation4 + $0x61] sm:$0xff]  ;;  %v13382_v40 = vld [vmem:[#allocation4 + $0x52] sm:$0xff]  ;;  %v13492_v50 = vpack.c.bf16 %v13173_v63, %v13172_v10  ;;  %v13808_v63 = vpack.c.bf16 %v27597_v55, %v13489_v48 }
 0xd60   : > { %v27663_v49 = vpack.c.bf16 %v13279_v19, %v13278_v6  ;;  %v13387_v8 = vpack.c.bf16 %v13382_v40, %v13381_v23  ;;  %v13383_v17 = vld [vmem:[#allocation4 + $0x62] sm:$0xff]  ;;  %v13384_v27 = vld [vmem:[#allocation4 + $0x72] sm:$0xff]  ;;  %v13597_v41 = vpack.c.bf16 %v13278_v6, %v13277_v53 }
 0xd61   : > { %22099 = vmatmul.mubr.msk.bf16.gmra.mrb[84].mxu1 %vm928_vm8, %v27646_v57  ;;  %v13388_v14 = vpack.c.bf16 %v13384_v27, %v13383_v17  ;;  %v13594_v59 = vld [vmem:[#allocation4 + $0x81] sm:$0xff] }
 0xd62   : > { %22104 = vmatprep.mubr.msk.bf16.mxu1 %vm928_vm8, %v13280_v62  ;;  %v13598_v34 = vpack.c.bf16 %v13594_v59, %v13279_v19  ;;  %v13699_v15 = vld [vmem:[#allocation4 + $0x82] sm:$0xff]  ;;  %v19649_v62 = vld [vmem:[%s28895_s12] ss:$0 sm:$0xff]  ;;  %s19015_s12 = sshll.u32 %s27732_s10, 4 }
 0xd63   : > { %v13703_v10 = vpack.c.bf16 %v13699_v15, %v13384_v27  ;;  %v24268_v30 = vld [vmem:[%s28894_s13] sm:$0xff]   ;;  %s28230_s8 = scalar_lea.vmem [#allocation9], %s19015_s12 }
 0xd64   : > { %22182 = vmatprep.subr.bf16.mxu0 %v24268_v30  ;;  %v14143_v23 = vld [vmem:[#allocation4] sm:$0xff]  ;;  %s18871_s12 = sshll.u32 %s28230_s8, 4  ;;  %s28563_s12 = int_to_ptr.vmem [resolvable:$true] %s18871_s12 }
 0xd65   : > { %22183 = vmatpush3.bf16.msra.mxu0 %v24268_v30 }
 0xd69   : > { %22105 = vmatmul.mubr.msk.bf16.vlgmr.msra.gmra.mrb[80].mxu1 %vm928_vm8, %v27652_v2 }
 0xd6a   : > { %22113 = vmatpush3.bf16.msra.mxu1 %v24261_v43  ;;  %22108 = vmatprep.mubr.msk.bf16.mxu1 %vm928_vm8, %v27657_v51  ;;  %v13702_v43 = vpack.c.bf16 %v13383_v17, %v13382_v40 }
 0xd6b   : > { %22122 = vmatprep.subr.bf16.mxu1 %v24262_v5 }
 0xd71   : > { %22109 = vmatmul.mubr.msk.bf16.gmra.mrb[84].mxu1 %vm928_vm8, %v27663_v49 }
 0xd72   : > { %22114 = vmatprep.mubr.msk.bf16.mxu1 %vm928_vm8, %v13385_v24 }
 0xd79   : > { %22115 = vmatmul.mubr.msk.bf16.vlgmr.msra.gmra.mrb[80].mxu1 %vm928_vm8, %v27669_v9 }
 0xd7a   : > { %22123 = vmatpush3.bf16.msra.mxu1 %v24262_v5  ;;  %22118 = vmatprep.mubr.msk.bf16.mxu1 %vm928_vm8, %v13387_v8 }
 0xd7b   : > { %22132 = vmatprep.subr.bf16.mxu1 %v24263_v58 }
 0xd81   : > { %22119 = vmatmul.mubr.msk.bf16.gmra.mrb[84].mxu1 %vm928_vm8, %v13388_v14 }
 0xd82   : > { %22124 = vmatprep.mubr.msk.bf16.mxu1 %vm928_vm8, %v13490_v39 }
 0xd89   : > { %22125 = vmatmul.mubr.msk.bf16.vlgmr.msra.gmra.mrb[80].mxu1 %vm928_vm8, %v13491_v12 }
 0xd8a   : > { %22133 = vmatpush3.bf16.msra.mxu1 %v24263_v58  ;;  %22128 = vmatprep.mubr.msk.bf16.mxu1 %vm928_vm8, %v13492_v50 }
 0xd8b   : > { %22142 = vmatprep.subr.bf16.mxu1 %v24264_v26 }
 0xd91   : > { %22129 = vmatmul.mubr.msk.bf16.gmra.mrb[84].mxu1 %vm928_vm8, %v13493_v16 }
 0xd92   : > { %22134 = vmatprep.mubr.msk.bf16.mxu1 %vm928_vm8, %v13595_v33 }
 0xd99   : > { %22135 = vmatmul.mubr.msk.bf16.vlgmr.msra.gmra.mrb[80].mxu1 %vm928_vm8, %v13596_v56 }
 0xd9a   : > { %22143 = vmatpush3.bf16.msra.mxu1 %v24264_v26  ;;  %22138 = vmatprep.mubr.msk.bf16.mxu1 %vm928_vm8, %v13597_v41 }
 0xd9b   : > { %22152 = vmatprep.subr.bf16.mxu1 %v24265_v32 }
 0xda1   : > { %22139 = vmatmul.mubr.msk.bf16.gmra.mrb[84].mxu1 %vm928_vm8, %v13598_v34 }
 0xda2   : > { %22144 = vmatprep.mubr.msk.bf16.mxu1 %vm928_vm8, %v13700_v45 }
 0xda9   : > { %22145 = vmatmul.mubr.msk.bf16.vlgmr.msra.gmra.mrb[80].mxu1 %vm928_vm8, %v13701_v42 }
 0xdaa   : > { %22153 = vmatpush3.bf16.msra.mxu1 %v24265_v32  ;;  %22148 = vmatprep.mubr.msk.bf16.mxu1 %vm928_vm8, %v13702_v43 }
 0xdab   : > { %22162 = vmatprep.subr.bf16.mxu1 %v24266_v54 }
 0xdb1   : > { %22149 = vmatmul.mubr.msk.bf16.gmra.mrb[84].mxu1 %vm928_vm8, %v13703_v10 }
 0xdb2   : > { %22154 = vmatprep.mubr.msk.bf16.mxu1 %vm928_vm8, %v27635_v3  ;;  %v13913_v3 = vpack.c.bf16 %v27607_v37, %v13594_v59 }
 0xdb9   : > { %22155 = vmatmul.mubr.msk.bf16.vlgmr.msra.gmra.mrb[80].mxu1 %vm928_vm8, %v27642_v0  ;;  %v14018_v0 = vpack.c.bf16 %v27615_v44, %v13699_v15 }
 0xdba   : > { %22163 = vmatpush3.bf16.msra.mxu1 %v24266_v54  ;;  %22158 = vmatprep.mubr.msk.bf16.mxu1 %vm928_vm8, %v27646_v57  ;;  %v24269_v57 = vld [vmem:[%s28894_s13 + $0x8] sm:$0xff]  }
 0xdbb   : > { %22172 = vmatprep.subr.bf16.mxu1 %v24267_v36  ;;  %22192 = vmatprep.subr.bf16.mxu0 %v24269_v57 }
 0xdc1   : > { %22159 = vmatmul.mubr.msk.bf16.gmra.mrb[84].mxu1 %vm928_vm8, %v13808_v63 }
 0xdc2   : > { %22164 = vmatprep.mubr.msk.bf16.mxu1 %vm928_vm8, %v27652_v2 }
 0xdc9   : > { %22165 = vmatmul.mubr.msk.bf16.vlgmr.msra.gmra.mrb[80].mxu1 %vm928_vm8, %v27657_v51 }
 0xdca   : > { %22173 = vmatpush3.bf16.msra.mxu1 %v24267_v36  ;;  %22168 = vmatprep.mubr.msk.bf16.mxu1 %vm928_vm8, %v27663_v49 }
 0xdcb   : > { %22272 = vmatprep.subr.bf16.mxu1 %v28889_v7 }
 0xdd1   : > { %22169 = vmatmul.mubr.msk.bf16.gmra.mrb[84].mxu1 %vm928_vm8, %v13913_v3 }
 0xdd2   : > { %22174 = vmatprep.mubr.msk.bf16.mxu1 %vm928_vm8, %v27669_v9 }
 0xdd9   : > { %22175 = vmatmul.mubr.msk.bf16.vlgmr.msra.gmra.mrb[80].mxu1 %vm928_vm8, %v13387_v8 }
 0xdda   : > { %22178 = vmatprep.mubr.msk.bf16.mxu1 %vm928_vm8, %v13388_v14 }
 0xde1   : > { %22179 = vmatmul.mubr.msk.bf16.gmra.mrb[84].mxu1 %vm928_vm8, %v14018_v0 }
 0xde2   : > { %22276 = vmatprep.mubr.msk.bf16.mxu1 %vm24583_vm5, %v28889_v7 }
 0xeac   : > { %v22176_v61 = vpop.f32.mrb[80].mxu1 }
 0xead   : > { %v22770_v53 = vadd.f32 %v22176_v61, %v19649_v62  ;;  %v14073_v47 = vpop.f32.mrb[81].mxu1  ;;  %v24272_v61 = vld [vmem:[%s28894_s13 + $0x20] sm:$0xff]  }
 0xeae   : > { %v22771_v2 = vadd.f32 %v19649_v62, %v14073_v47  ;;  %v22177_v46 = vpop.f32.mrb[82].mxu1 }
 0xeaf   : > { %v14114_v5 = vadd.f32 %v22770_v53, %v27373_v28  ;;  %v22772_v51 = vadd.f32 %v22177_v46, %v19649_v62  ;;  %v14076_v6 = vpop.f32.mrb[83].mxu1 }
 0xeb0   : > { %v14112_v11 = vadd.f32 %v22771_v2, %v27313_v35  ;;  %v22773_v19 = vadd.f32 %v19649_v62, %v14076_v6 }
 0xeb1   : > { %14122 = vst.msk [vmem:[%s27740_s3 + $0x10] sm:$0xff] %vm928_vm8, %v14114_v5  ;;  %14130 = vst.msk [vmem:[#allocation4 + $0x31] sm:$0xff] %vm928_vm8, %v14114_v5  ;;  %v14115_v49 = vadd.f32 %v22772_v51, %v27398_v21  ;;  %v24273_v51 = vld [vmem:[%s28894_s13 + $0x28] sm:$0xff]  }
 0xeb2   : > { %14120 = vst.msk [vmem:[%s27740_s3] sm:$0xff] %vm928_vm8, %v14112_v11  ;;  %14128 = vst.msk [vmem:[#allocation4 + $0x11] sm:$0xff] %vm928_vm8, %v14112_v11  ;;  %v14113_v28 = vadd.f32 %v22773_v19, %v27345_v1 }
 0xeb3   : > { %14123 = vst.msk [vmem:[%s27740_s3 + $0x18] sm:$0xff] %vm928_vm8, %v14115_v49  ;;  %14131 = vst.msk [vmem:[#allocation4 + $0x41] sm:$0xff] %vm928_vm8, %v14115_v49 }
 0xeb4   : > { %14121 = vst.msk [vmem:[%s27740_s3 + $0x8] sm:$0xff] %vm928_vm8, %v14113_v28  ;;  %14129 = vst.msk [vmem:[#allocation4 + $0x21] sm:$0xff] %vm928_vm8, %v14113_v28  ;;  %v22180_v35 = vpop.f32.mrb[84].mxu1 }
 0xeb5   : > { %v22774_v24 = vadd.f32 %v22180_v35, %v19649_v62  ;;  %v14089_v20 = vpop.f32.mrb[85].mxu1  ;;  %v24274_v35 = vld [vmem:[%s28894_s13 + $0x30] sm:$0xff]  }
 0xeb6   : > { %v22775_v21 = vadd.f32 %v19649_v62, %v14089_v20  ;;  %v22181_v40 = vpop.f32.mrb[86].mxu1 }
 0xeb7   : > { %v14118_v31 = vadd.f32 %v22774_v24, %v27499_v52  ;;  %v22776_v9 = vadd.f32 %v22181_v40, %v19649_v62  ;;  %v14092_v1 = vpop.f32.mrb[87].mxu1 }
 0xeb8   : > { %v14116_v58 = vadd.f32 %v22775_v21, %v27440_v18  ;;  %v22777_v8 = vadd.f32 %v19649_v62, %v14092_v1  ;;  %v14146_v39 = vld [vmem:[#allocation4 + $0x30] sm:$0xff] }
 0xeb9   : > { %14126 = vst.msk [vmem:[%s27740_s3 + $0x30] sm:$0xff] %vm928_vm8, %v14118_v31  ;;  %14134 = vst.msk [vmem:[#allocation4 + $0x71] sm:$0xff] %vm928_vm8, %v14118_v31  ;;  %v14119_v17 = vadd.f32 %v22776_v9, %v27520_v13  ;;  %v27762_v27 = vld [vmem:[#allocation4 + $0x10] sm:$0xff]  ;;  %v24275_v9 = vld [vmem:[%s28894_s13 + $0x38] sm:$0xff]  }
 0xeba   : > { %14124 = vst.msk [vmem:[%s27740_s3 + $0x20] sm:$0xff] %vm928_vm8, %v14116_v58  ;;  %14132 = vst.msk [vmem:[#allocation4 + $0x51] sm:$0xff] %vm928_vm8, %v14116_v58  ;;  %v14117_v52 = vadd.f32 %v22777_v8, %v27465_v60  ;;  %v14151_v14 = vpack.c.bf16 %v27762_v27, %v14143_v23  ;;  %v24270_v60 = vld [vmem:[%s28894_s13 + $0x10] sm:$0xff]   ;;  %v14147_v12 = vld [vmem:[#allocation4 + $0x40] sm:$0xff] }
 0xebb   : > { %14127 = vst.msk [vmem:[%s27740_s3 + $0x38] sm:$0xff] %vm928_vm8, %v14119_v17  ;;  %14135 = vst.msk [vmem:[#allocation4 + $0x81] sm:$0xff] %vm928_vm8, %v14119_v17  ;;  %v14145_v18 = vld [vmem:[#allocation4 + $0x20] sm:$0xff]  ;;  %v14241_v48 = vld [vmem:[#allocation4 + $0x11] sm:$0xff]  ;;  %v14443_v5 = vpack.c.bf16 %v14147_v12, %v14146_v39 }
 0xebc   : > { %14125 = vst.msk [vmem:[%s27740_s3 + $0x28] sm:$0xff] %vm928_vm8, %v14117_v52  ;;  %14133 = vst.msk [vmem:[#allocation4 + $0x61] sm:$0xff] %vm928_vm8, %v14117_v52  ;;  %22184 = vmatprep.mubr.msk.bf16.mxu0 %vm928_vm8, %v14151_v14  ;;  %v27776_v13 = vpack.c.bf16 %v14146_v39, %v14145_v18  ;;  %v14248_v32 = vpack.c.bf16 %v14241_v48, %v27517_v29  ;;  %v14242_v41 = vld [vmem:[#allocation4 + $0x21] sm:$0xff]  ;;  %v14243_v34 = vld [vmem:[#allocation4 + $0x31] sm:$0xff]  ;;  %v14442_v46 = vpack.c.bf16 %v14145_v18, %v27762_v27  ;;  %v24584_v52 = vmov 572653568  }
 0xebd   : > { %v27797_v45 = vpack.c.bf16 %v14243_v34, %v14242_v41  ;;  %v14244_v42 = vld [vmem:[#allocation4 + $0x41] sm:$0xff]  ;;  %v24271_v29 = vld [vmem:[%s28894_s13 + $0x18] sm:$0xff]   ;;  %v14539_v49 = vpack.c.bf16 %v14242_v41, %v14241_v48  ;;  %v16562_v14 = vunpack.c.l.s4 %v24584_v52  ;;  %v19695_v18 = vld [vmem:[%s28897_s14] ss:$0 sm:$0xff]  ;;  %s28571_s14 = scalar_lea.sflag [#allocation10], %s18836_s29 }
 0xebe   : > { %22185 = vmatmul.mubr.msk.bf16.vlgmr.msra.gmra.mrb[72].mxu0 %vm928_vm8, %v27776_v13  ;;  %v14338_v15 = vld [vmem:[#allocation4 + $0x12] sm:$0xff]  ;;  %v14339_v3 = vld [vmem:[#allocation4 + $0x22] sm:$0xff]  ;;  %v14540_v28 = vpack.c.bf16 %v14244_v42, %v14243_v34 }
 0xebf   : > { %22193 = vmatpush3.bf16.msra.mxu0 %v24269_v57  ;;  %v14345_v63 = vpack.c.bf16 %v14338_v15, %v27545_v22  ;;  %v14340_v30 = vld [vmem:[#allocation4 + $0x32] sm:$0xff]  ;;  %v14341_v62 = vld [vmem:[#allocation4 + $0x42] sm:$0xff]  ;;  %v14636_v40 = vpack.c.bf16 %v14339_v3, %v14338_v15 }
 0xec0   : > { %22202 = vmatprep.subr.bf16.mxu0 %v24270_v60  ;;  %v14150_v33 = vld [vmem:[#allocation4 + $0x70] sm:$0xff]  ;;  %v27814_v57 = vpack.c.bf16 %v14340_v30, %v14339_v3  ;;  %v14637_v31 = vpack.c.bf16 %v14341_v62, %v14340_v30  ;;  %v24276_v8 = vld [vmem:[%s28894_s13 + $0x40] sm:$0xff]  }
 0xec1   : > { %v14148_v26 = vld [vmem:[#allocation4 + $0x50] sm:$0xff] }
 0xec2   : > { %v27783_v50 = vpack.c.bf16 %v14148_v26, %v14147_v12  ;;  %v14245_v59 = vld [vmem:[#allocation4 + $0x51] sm:$0xff]  ;;  %v14441_v11 = vld [vmem:[#allocation4 + $0x80] sm:$0xff] }
 0xec3   : > { %v14149_v16 = vld [vmem:[#allocation4 + $0x60] sm:$0xff]  ;;  %v27802_v54 = vpack.c.bf16 %v14245_v59, %v14244_v42  ;;  %v14247_v10 = vld [vmem:[#allocation4 + $0x71] sm:$0xff]  ;;  %v14445_v19 = vpack.c.bf16 %v14441_v11, %v14150_v33  ;;  %v14736_v17 = vpack.c.bf16 %v27597_v55, %v14441_v11 }
 0xec4   : > { %22188 = vmatprep.mubr.msk.bf16.mxu0 %vm928_vm8, %v27783_v50  ;;  %v27787_v56 = vpack.c.bf16 %v14150_v33, %v14149_v16  ;;  %v14246_v43 = vld [vmem:[#allocation4 + $0x61] sm:$0xff]  ;;  %v14342_v0 = vld [vmem:[#allocation4 + $0x52] sm:$0xff]  ;;  %v14444_v6 = vpack.c.bf16 %v14149_v16, %v14148_v26 }
 0xec5   : > { %v27808_v36 = vpack.c.bf16 %v14247_v10, %v14246_v43  ;;  %v14347_v53 = vpack.c.bf16 %v14342_v0, %v14341_v62  ;;  %v14343_v22 = vld [vmem:[#allocation4 + $0x62] sm:$0xff]  ;;  %v14344_v47 = vld [vmem:[#allocation4 + $0x72] sm:$0xff]  ;;  %v14541_v24 = vpack.c.bf16 %v14246_v43, %v14245_v59 }
 0xec6   : > { %22189 = vmatmul.mubr.msk.bf16.gmra.mrb[76].mxu0 %vm928_vm8, %v27787_v56  ;;  %v14348_v2 = vpack.c.bf16 %v14344_v47, %v14343_v22  ;;  %v14538_v20 = vld [vmem:[#allocation4 + $0x81] sm:$0xff]  ;;  %v14638_v1 = vpack.c.bf16 %v14343_v22, %v14342_v0 }
 0xec7   : > { %22194 = vmatprep.mubr.msk.bf16.mxu0 %vm928_vm8, %v14248_v32  ;;  %v14542_v21 = vpack.c.bf16 %v14538_v20, %v14247_v10  ;;  %v14635_v23 = vld [vmem:[#allocation4 + $0x82] sm:$0xff]  ;;  %v14833_v27 = vpack.c.bf16 %v27607_v37, %v14538_v20 }
 0xec8   : > { %v14639_v58 = vpack.c.bf16 %v14635_v23, %v14344_v47  ;;  %v14930_v55 = vpack.c.bf16 %v27615_v44, %v14635_v23  ;;  %v24277_v37 = vld [vmem:[%s28896_s15] sm:$0xff]   ;;  %v24278_v44 = vld [vmem:[%s28896_s15 + $0x8] sm:$0xff]  }
 0xec9   : > { %22273 = vmatpush3.bf16.msra.mxu1 %v24277_v37 }
 0xeca   : > { %22274 = vmatprep.subr.bf16.mxu1 %v28889_v7 }
 0xecd   : > { %22275 = vmatpush3.bf16.msra.mxu1 %v24278_v44 }
 0xece   : > { %22195 = vmatmul.mubr.msk.bf16.vlgmr.msra.gmra.mrb[72].mxu0 %vm928_vm8, %v27797_v45  ;;  %22280 = vmatprep.subr.bf16.mxu1 %v28889_v7 }
 0xecf   : > { %22203 = vmatpush3.bf16.msra.mxu0 %v24270_v60  ;;  %22198 = vmatprep.mubr.msk.bf16.mxu0 %vm928_vm8, %v27802_v54 }
 0xed0   : > { %22212 = vmatprep.subr.bf16.mxu0 %v24271_v29 }
 0xed6   : > { %22199 = vmatmul.mubr.msk.bf16.gmra.mrb[76].mxu0 %vm928_vm8, %v27808_v36 }
 0xed7   : > { %22204 = vmatprep.mubr.msk.bf16.mxu0 %vm928_vm8, %v14345_v63 }
 0xede   : > { %22205 = vmatmul.mubr.msk.bf16.vlgmr.msra.gmra.mrb[72].mxu0 %vm928_vm8, %v27814_v57 }
 0xedf   : > { %22213 = vmatpush3.bf16.msra.mxu0 %v24271_v29  ;;  %22208 = vmatprep.mubr.msk.bf16.mxu0 %vm928_vm8, %v14347_v53 }
 0xee0   : > { %22222 = vmatprep.subr.bf16.mxu0 %v24272_v61 }
 0xee6   : > { %22209 = vmatmul.mubr.msk.bf16.gmra.mrb[76].mxu0 %vm928_vm8, %v14348_v2 }
 0xee7   : > { %22214 = vmatprep.mubr.msk.bf16.mxu0 %vm928_vm8, %v14442_v46 }
 0xeee   : > { %22215 = vmatmul.mubr.msk.bf16.vlgmr.msra.gmra.mrb[72].mxu0 %vm928_vm8, %v14443_v5 }
 0xeef   : > { %22223 = vmatpush3.bf16.msra.mxu0 %v24272_v61  ;;  %22218 = vmatprep.mubr.msk.bf16.mxu0 %vm928_vm8, %v14444_v6 }
 0xef0   : > { %22232 = vmatprep.subr.bf16.mxu0 %v24273_v51 }
 0xef6   : > { %22219 = vmatmul.mubr.msk.bf16.gmra.mrb[76].mxu0 %vm928_vm8, %v14445_v19 }
 0xef7   : > { %22224 = vmatprep.mubr.msk.bf16.mxu0 %vm928_vm8, %v14539_v49 }
 0xefe   : > { %22225 = vmatmul.mubr.msk.bf16.vlgmr.msra.gmra.mrb[72].mxu0 %vm928_vm8, %v14540_v28 }
 0xeff   : > { %22233 = vmatpush3.bf16.msra.mxu0 %v24273_v51  ;;  %22228 = vmatprep.mubr.msk.bf16.mxu0 %vm928_vm8, %v14541_v24 }
 0xf00   : > { %22242 = vmatprep.subr.bf16.mxu0 %v24274_v35 }
 0xf06   : > { %22229 = vmatmul.mubr.msk.bf16.gmra.mrb[76].mxu0 %vm928_vm8, %v14542_v21 }
 0xf07   : > { %22234 = vmatprep.mubr.msk.bf16.mxu0 %vm928_vm8, %v14636_v40 }
 0xf0e   : > { %22235 = vmatmul.mubr.msk.bf16.vlgmr.msra.gmra.mrb[72].mxu0 %vm928_vm8, %v14637_v31 }
 0xf0f   : > { %22243 = vmatpush3.bf16.msra.mxu0 %v24274_v35  ;;  %22238 = vmatprep.mubr.msk.bf16.mxu0 %vm928_vm8, %v14638_v1 }
 0xf10   : > { %22252 = vmatprep.subr.bf16.mxu0 %v24275_v9 }
 0xf16   : > { %22239 = vmatmul.mubr.msk.bf16.gmra.mrb[76].mxu0 %vm928_vm8, %v14639_v58 }
 0xf17   : > { %22244 = vmatprep.mubr.msk.bf16.mxu0 %vm928_vm8, %v27776_v13  ;;  %v16563_v13 = vunpack.c.0.s8 %v16562_v14 }
 0xf19   : > { %v27929_v33 = vsub.s32 %v16563_v13, %v27275_v25 }
 0xf1e   : > { %22245 = vmatmul.mubr.msk.bf16.vlgmr.msra.gmra.mrb[72].mxu0 %vm928_vm8, %v27783_v50 }
 0xf1f   : > { %22253 = vmatpush3.bf16.msra.mxu0 %v24275_v9  ;;  %22248 = vmatprep.mubr.msk.bf16.mxu0 %vm928_vm8, %v27787_v56 }
 0xf20   : > { %22262 = vmatprep.subr.bf16.mxu0 %v24276_v8 }
 0xf26   : > { %22249 = vmatmul.mubr.msk.bf16.gmra.mrb[76].mxu0 %vm928_vm8, %v14736_v17 }
 0xf27   : > { %22254 = vmatprep.mubr.msk.bf16.mxu0 %vm928_vm8, %v27797_v45 }
 0xf2e   : > { %22255 = vmatmul.mubr.msk.bf16.vlgmr.msra.gmra.mrb[72].mxu0 %vm928_vm8, %v27802_v54 }
 0xf2f   : > { %22263 = vmatpush3.bf16.msra.mxu0 %v24276_v8  ;;  %22258 = vmatprep.mubr.msk.bf16.mxu0 %vm928_vm8, %v27808_v36 }
 0xf30   : > { %22416 = vmatprep.subr.bf16.mxu0 %v28889_v7 }
 0xf36   : > { %22259 = vmatmul.mubr.msk.bf16.gmra.mrb[76].mxu0 %vm928_vm8, %v14833_v27 }
 0xf37   : > { %22264 = vmatprep.mubr.msk.bf16.mxu0 %vm928_vm8, %v27814_v57 }
 0xf3e   : > { %22265 = vmatmul.mubr.msk.bf16.vlgmr.msra.gmra.mrb[72].mxu0 %vm928_vm8, %v14347_v53 }
 0xf3f   : > { %22268 = vmatprep.mubr.msk.bf16.mxu0 %vm928_vm8, %v14348_v2 }
 0xf46   : > { %22269 = vmatmul.mubr.msk.bf16.gmra.mrb[76].mxu0 %vm928_vm8, %v14930_v55 }
 0xf47   : > { %22420 = vmatprep.mubr.msk.bf16.mxu0 %vm24583_vm5, %v28889_v7 }
0x1011   : > { %v22266_v39 = vpop.f32.mrb[72].mxu0 }
0x1012   : > { %v22778_v60 = vadd.f32 %v22266_v39, %v19695_v18  ;;  %v14985_v12 = vpop.f32.mrb[73].mxu0 }
0x1013   : > { %v22779_v26 = vadd.f32 %v19695_v18, %v14985_v12  ;;  %v22267_v50 = vpop.f32.mrb[74].mxu0 }
0x1014   : > { %v15017_v48 = vmax.f32 %v22778_v60, 0.0  ;;  %v14988_v16 = vpop.f32.mrb[75].mxu0 }
0x1015   : > { %v15016_v56 = vmax.f32 %v22779_v26, 0.0 }
0x1016   : > { %v15041_v32 = vcombine.high %v15017_v48, %v15017_v48  ;;  %v15048_v41 = vrot.slane %v15017_v48, %v27284_v38 }
0x1017   : > { %v15024_v59 = vcombine.high %v15016_v56, %v15016_v56  ;;  %v15031_v34 = vrot.slane %v15016_v56, %v27284_v38 }
0x1018   : > { %v15055_v45 = vrot.slane %v15041_v32, %v27284_v38  ;;  %v15056_v42 = vcombine.high %v15048_v41, %v15048_v41  ;;  %v15111_v29 = vrot.slane %v15048_v41, %v27288_v4  ;;  %v16595_v54 = vrot.slane %v15048_v41, %v27929_v33 }
0x1019   : > { %v15038_v43 = vrot.slane %v15024_v59, %v27284_v38  ;;  %v15039_v15 = vcombine.high %v15031_v34, %v15031_v34  ;;  %v15095_v25 = vrot.slane %v15031_v34, %v27288_v4  ;;  %v22270_v10 = vpop.f32.mrb[76].mxu0  ;;  %v16567_v53 = vrot.slane %v15031_v34, %v27929_v33 }
0x101a   : > { %v15057_v36 = vcombine.high %v15055_v45, %v15055_v45  ;;  %v15115_v63 = vrot.slane %v15056_v42, %v27288_v4  ;;  %v15119_v3 = vrot.slane %v15055_v45, %v27288_v4  ;;  %v16602_v0 = vrot.slane %v15056_v42, %v27929_v33  ;;  %v14999_v30 = vpop.f32.mrb[77].mxu0 }
0x101b   : > { %v15040_v57 = vcombine.high %v15038_v43, %v15038_v43  ;;  %v15099_v62 = vrot.slane %v15039_v15, %v27288_v4  ;;  %v15103_v61 = vrot.slane %v15038_v43, %v27288_v4  ;;  %v22271_v22 = vpop.f32.mrb[78].mxu0  ;;  %v16574_v5 = vrot.slane %v15039_v15, %v27929_v33 }
0x101c   : > { %v15123_v47 = vrot.slane %v15057_v36, %v27288_v4  ;;  %v15159_v2 = vsel %vm12111_vm11, %v15115_v63, %v15111_v29  ;;  %v16679_v46 = vsel %vm12111_vm11, %v16602_v0, %v16595_v54  ;;  %v15002_v51 = vpop.f32.mrb[79].mxu0  ;;  %v16609_v35 = vrot.slane %v15055_v45, %v27929_v33 }
0x101d   : > { %v15160_v6 = vsel %vm12113_vm12, %v15119_v3, %v15159_v2  ;;  %v16680_v11 = vsel %vm12119_vm15, %v16602_v0, %v16679_v46  ;;  %v15107_v19 = vrot.slane %v15040_v57, %v27288_v4  ;;  %v15156_v49 = vsel %vm12111_vm11, %v15099_v62, %v15095_v25 }
0x101e   : > { %v15161_v28 = vsel %vm12115_vm13, %v15123_v47, %v15160_v6  ;;  %v15157_v24 = vsel %vm12113_vm12, %v15103_v61, %v15156_v49  ;;  %v16673_v20 = vsel %vm12111_vm11, %v16574_v5, %v16567_v53  ;;  %v16581_v40 = vrot.slane %v15038_v43, %v27929_v33 }
0x101f   : > { %15174 = vst.msk [vmem:[#allocation5 + $0x11] sm:$0xf] %vm973_vm2, %v15161_v28  ;;  %v15158_v21 = vsel %vm12115_vm13, %v15107_v19, %v15157_v24  ;;  %v22780_v31 = vadd.f32 %v22270_v10, %v19695_v18  ;;  %v22781_v9 = vadd.f32 %v19695_v18, %v14999_v30  ;;  %v16616_v1 = vrot.slane %v15057_v36, %v27929_v33 }
0x1020   : > { %15173 = vst.msk [vmem:[#allocation5 + $0x9] sm:$0xf] %vm973_vm2, %v15158_v21  ;;  %v16674_v23 = vsel %vm12119_vm15, %v16574_v5, %v16673_v20  ;;  %v16681_v58 = vsel %vm12113_vm12, %v16609_v35, %v16680_v11  ;;  %v16588_v37 = vrot.slane %v15040_v57, %v27929_v33 }
0x1021   : > { %v15019_v8 = vmax.f32 %v22780_v31, 0.0  ;;  %v15018_v17 = vmax.f32 %v22781_v9, 0.0  ;;  %v16675_v27 = vsel %vm12113_vm12, %v16581_v40, %v16674_v23  ;;  %v16682_v55 = vsel %vm12121_vm0, %v16609_v35, %v16681_v58 }
0x1022   : > { %v16676_v44 = vsel %vm12121_vm0, %v16581_v40, %v16675_v27  ;;  %v16683_v52 = vsel %vm12115_vm13, %v16616_v1, %v16682_v55  ;;  %v24286_v27 = vld [vmem:[%s28896_s15 + $0x28] sm:$0xff]  }
0x1023   : > { %v15075_v14 = vcombine.high %v15019_v8, %v15019_v8  ;;  %v15082_v18 = vrot.slane %v15019_v8, %v27284_v38  ;;  %v15058_v39 = vcombine.high %v15018_v17, %v15018_v17  ;;  %v15065_v13 = vrot.slane %v15018_v17, %v27284_v38  ;;  %v24285_v8 = vld [vmem:[%s28896_s15 + $0x20] sm:$0xff]  }
0x1024   : > { %v16677_v60 = vsel %vm12115_vm13, %v16588_v37, %v16676_v44  ;;  %v27972_v12 = vsel %vm12123_vm1, %v16616_v1, %v16683_v52  ;;  %v24282_v1 = vld [vmem:[%s28896_s15 + $0x18] sm:$0xff]   ;;  %v24289_v44 = vld [vmem:[%s28896_s15 + $0x30] sm:$0xff]  }
0x1025   : > { %v15089_v26 = vrot.slane %v15075_v14, %v27284_v38  ;;  %v15090_v50 = vcombine.high %v15082_v18, %v15082_v18  ;;  %v15143_v48 = vrot.slane %v15082_v18, %v27288_v4  ;;  %v16651_v16 = vrot.slane %v15082_v18, %v27929_v33  ;;  %v24290_v14 = vld [vmem:[%s28896_s15 + $0x38] sm:$0xff]  }
0x1026   : > { %v15072_v56 = vrot.slane %v15058_v39, %v27284_v38  ;;  %v15073_v32 = vcombine.high %v15065_v13, %v15065_v13  ;;  %v15127_v41 = vrot.slane %v15065_v13, %v27288_v4  ;;  %v16623_v15 = vrot.slane %v15065_v13, %v27929_v33  ;;  %v24293_v13 = vld [vmem:[%s28896_s15 + $0x40] sm:$0xff]  }
0x1027   : > { %v15091_v59 = vcombine.high %v15089_v26, %v15089_v26  ;;  %v15147_v34 = vrot.slane %v15090_v50, %v27288_v4  ;;  %v15151_v45 = vrot.slane %v15089_v26, %v27288_v4  ;;  %v16658_v42 = vrot.slane %v15090_v50, %v27929_v33  ;;  %v24279_v40 = vld [vmem:[#allocation5] ss:$8 sps:$4 sm:$0xff]  }
0x1028   : > { %v15074_v29 = vcombine.high %v15072_v56, %v15072_v56  ;;  %v15131_v54 = vrot.slane %v15073_v32, %v27288_v4  ;;  %v15135_v43 = vrot.slane %v15072_v56, %v27288_v4  ;;  %v16630_v63 = vrot.slane %v15073_v32, %v27929_v33  ;;  %v24283_v58 = vld [vmem:[#allocation5 + $0x1] ss:$8 sps:$4 sm:$0xff]   ;;  %v24298_v32 = vld [vmem:[%s28896_s15 + $0x58] sm:$0xff]  }
0x1029   : > { %v15155_v25 = vrot.slane %v15091_v59, %v27288_v4  ;;  %v15165_v10 = vsel %vm12111_vm11, %v15147_v34, %v15143_v48  ;;  %v16691_v36 = vsel %vm12111_vm11, %v16658_v42, %v16651_v16  ;;  %v16665_v61 = vrot.slane %v15089_v26, %v27929_v33  ;;  %v24291_v39 = vld [vmem:[#allocation5 + $0x8] ss:$8 sps:$4 sm:$0xff]   ;;  %v24301_v34 = vld [vmem:[%s28896_s15 + $0x60] sm:$0xff]  }
0x102a   : > { %v15166_v3 = vsel %vm12113_vm12, %v15151_v45, %v15165_v10  ;;  %v16692_v0 = vsel %vm12119_vm15, %v16658_v42, %v16691_v36  ;;  %v15139_v30 = vrot.slane %v15074_v29, %v27288_v4  ;;  %v15162_v57 = vsel %vm12111_vm11, %v15131_v54, %v15127_v41  ;;  %v24294_v26 = vld [vmem:[%s28896_s15 + $0x48] sm:$0xff]   ;;  %v24297_v16 = vld [vmem:[%s28896_s15 + $0x50] sm:$0xff]  }
0x102b   : > { %v15167_v62 = vsel %vm12115_vm13, %v15155_v25, %v15166_v3  ;;  %v15163_v53 = vsel %vm12113_vm12, %v15135_v43, %v15162_v57  ;;  %v16685_v22 = vsel %vm12111_vm11, %v16630_v63, %v16623_v15  ;;  %v16637_v2 = vrot.slane %v15072_v56, %v27929_v33  ;;  %v24295_v48 = vld [vmem:[#allocation5 + $0x9] ss:$8 sps:$4 sm:$0xff]   ;;  %v24306_v25 = vld [vmem:[%s28896_s15 + $0x78] sm:$0xff]  }
0x102c   : > { %15176 = vst.msk [vmem:[#allocation5 + $0x21] sm:$0xf] %vm973_vm2, %v15167_v62  ;;  %v15164_v47 = vsel %vm12115_vm13, %v15139_v30, %v15163_v53  ;;  %v28001_v46 = vsel %vm12123_vm1, %v16588_v37, %v16677_v60  ;;  %v16672_v5 = vrot.slane %v15091_v59, %v27929_v33  ;;  %v16686_v51 = vsel %vm12119_vm15, %v16630_v63, %v16685_v22  ;;  %v24287_v37 = vld [vmem:[#allocation5 + $0x2] ss:$8 sps:$4 sm:$0xff]   ;;  %v24305_v43 = vld [vmem:[%s28896_s15 + $0x70] sm:$0xff]  }
0x102d   : > { %15175 = vst.msk [vmem:[#allocation5 + $0x19] sm:$0xf] %vm973_vm2, %v15164_v47  ;;  %v16693_v6 = vsel %vm12113_vm12, %v16665_v61, %v16692_v0  ;;  %v16644_v11 = vrot.slane %v15074_v29, %v27929_v33  ;;  %v16687_v19 = vsel %vm12113_vm12, %v16637_v2, %v16686_v51  ;;  %v24281_v33 = vld [vmem:[%s28896_s15 + $0x10] sm:$0xff]   ;;  %v24302_v42 = vld [vmem:[%s28896_s15 + $0x68] sm:$0xff]   ;;  %v24309_v63 = vld [vmem:[%s28896_s15 + $0x80] sm:$0xff]  }
0x102e   : > { %v16694_v49 = vsel %vm12121_vm0, %v16665_v61, %v16693_v6  ;;  %v16688_v28 = vsel %vm12121_vm0, %v16637_v2, %v16687_v19  ;;  %v24299_v59 = vld [vmem:[#allocation5 + $0xa] ss:$8 sps:$4 sm:$0xff]   ;;  %v24313_v61 = vld [vmem:[%s28898_s17] sm:$0xff]  }
0x102f   : > { %v16695_v35 = vsel %vm12115_vm13, %v16672_v5, %v16694_v49  ;;  %v16689_v24 = vsel %vm12115_vm13, %v16644_v11, %v16688_v28  ;;  %v24310_v0 = vld [vmem:[%s28896_s15 + $0x88] sm:$0xff]   ;;  %v19741_v22 = vld [vmem:[%s28899_s16] ss:$0 sm:$0xff]  ;;  %s24457_s15 = scalar_lea.vmem %s28563_s12, 256 }
0x1030   : > { %v28014_v20 = vsel %vm12123_vm1, %v16672_v5, %v16695_v35  ;;  %v28017_v21 = vsel %vm12123_vm1, %v16644_v11, %v16689_v24  ;;  %v24314_v53 = vld [vmem:[%s28898_s17 + $0x8] sm:$0xff]   ;;  %p24458_p11 = scmp.ne.s32.totalorder %s28563_s12, %s24457_s15 }
0x1032   : > { %p24459_p12 = pnand %p24458_p11, %p24774_p5 }
0x1033   : > { %v24304_v54 = vld [vmem:[#allocation5 + $0x20] ss:$8 sps:$4 sm:$0xff]  }
0x1034   : > { %v24280_v31 = vld [vmem:[#allocation5 + $0x10] ss:$8 sps:$4 sm:$0xff]   ;;  %v24308_v36 = vld [vmem:[#allocation5 + $0x21] ss:$8 sps:$4 sm:$0xff]   ;;  %p24460_p13 = pneg %p24459_p12 }
0x1035   : > { %v15196_v9 = vpack.c.bf16 %v24280_v31, %v24279_v40  ;;  %v24284_v23 = vld [vmem:[#allocation5 + $0x11] ss:$8 sps:$4 sm:$0xff]   ;;  %v24312_v57 = vld [vmem:[#allocation5 + $0x22] ss:$8 sps:$4 sm:$0xff]  }
0x1036   : > { %v15272_v17 = vpack.c.bf16 %v24284_v23, %v24283_v58  ;;  %v24288_v55 = vld [vmem:[#allocation5 + $0x12] ss:$8 sps:$4 sm:$0xff]   ;;  %v24321_v58 = vld [vmem:[%s28898_s17 + $0x20] sm:$0xff]  }
0x1037   : > { %22277 = vmatmul.mubr.msk.bf16.vlgmr.msra.gmra.mrb[88].mxu1 %vm15213_vm6, %v15196_v9  ;;  %v15347_v52 = vpack.c.bf16 %v24288_v55, %v24287_v37  ;;  %v24292_v18 = vld [vmem:[#allocation5 + $0x18] ss:$8 sps:$4 sm:$0xff]   ;;  %v24317_v31 = vld [vmem:[%s28898_s17 + $0x10] sm:$0xff]  }
0x1038   : > { %22281 = vmatpush3.bf16.msra.mxu1 %v24281_v33  ;;  %22284 = vmatprep.mubr.msk.bf16.mxu1 %vm24583_vm5, %v28889_v7  ;;  %v15422_v60 = vpack.c.bf16 %v24292_v18, %v24291_v39  ;;  %v24296_v50 = vld [vmem:[#allocation5 + $0x19] ss:$8 sps:$4 sm:$0xff]   ;;  %v24325_v37 = vld [vmem:[%s28898_s17 + $0x30] sm:$0xff]  }
0x1039   : > { %22282 = vmatprep.subr.bf16.mxu1 %v28889_v7  ;;  %v15497_v56 = vpack.c.bf16 %v24296_v50, %v24295_v48  ;;  %v24300_v41 = vld [vmem:[#allocation5 + $0x1a] ss:$8 sps:$4 sm:$0xff]   ;;  %v24333_v48 = vld [vmem:[%s28898_s17 + $0x50] sm:$0xff]  }
0x103a   : > { %v15572_v45 = vpack.c.bf16 %v24300_v41, %v24299_v59  ;;  %v24303_v29 = vld [vmem:[#allocation5 + $0x10] ss:$8 sps:$4 sm:$0xff]   ;;  %v24329_v39 = vld [vmem:[%s28898_s17 + $0x40] sm:$0xff]  }
0x103b   : > { %v15648_v15 = vpack.c.bf16 %v24304_v54, %v24303_v29  ;;  %v24307_v10 = vld [vmem:[#allocation5 + $0x11] ss:$8 sps:$4 sm:$0xff]   ;;  %v24337_v59 = vld [vmem:[%s28898_s17 + $0x60] sm:$0xff]  }
0x103c   : > { %22283 = vmatpush3.bf16.msra.mxu1 %v24282_v1  ;;  %v15723_v3 = vpack.c.bf16 %v24308_v36, %v24307_v10  ;;  %v24311_v30 = vld [vmem:[#allocation5 + $0x12] ss:$8 sps:$4 sm:$0xff]   ;;  %v24345_v36 = vld [vmem:[%s28898_s17 + $0x80] sm:$0xff]  }
0x103d   : > { %22288 = vmatprep.subr.bf16.mxu1 %v28889_v7  ;;  %v15798_v62 = vpack.c.bf16 %v24312_v57, %v24311_v30  ;;  %v24318_v9 = vld [vmem:[%s28898_s17 + $0x18] sm:$0xff]   ;;  %v24341_v54 = vld [vmem:[%s28898_s17 + $0x70] sm:$0xff]  }
0x1043   : > { %22285 = vmatmul.mubr.msk.bf16.vlgmr.msra.gmra.mrb[88].mxu1 %vm15213_vm6, %v15272_v17  ;;  %v24322_v17 = vld [vmem:[%s28898_s17 + $0x28] sm:$0xff]  }
0x1044   : > { %22289 = vmatpush3.bf16.msra.mxu1 %v24285_v8  ;;  %22292 = vmatprep.mubr.msk.bf16.mxu1 %vm24583_vm5, %v28889_v7 }
0x1045   : > { %22290 = vmatprep.subr.bf16.mxu1 %v28889_v7 }
0x1048   : > { %22291 = vmatpush3.bf16.msra.mxu1 %v24286_v27 }
0x1049   : > { %22296 = vmatprep.subr.bf16.mxu1 %v28889_v7 }
0x104f   : > { %22293 = vmatmul.mubr.msk.bf16.vlgmr.msra.gmra.mrb[88].mxu1 %vm15213_vm6, %v15347_v52  ;;  %v24326_v52 = vld [vmem:[%s28898_s17 + $0x38] sm:$0xff]  }
0x1050   : > { %22297 = vmatpush3.bf16.msra.mxu1 %v24289_v44  ;;  %22300 = vmatprep.mubr.msk.bf16.mxu1 %vm24583_vm5, %v28889_v7 }
0x1051   : > { %22298 = vmatprep.subr.bf16.mxu1 %v28889_v7 }
0x1054   : > { %22299 = vmatpush3.bf16.msra.mxu1 %v24290_v14 }
0x1055   : > { %22304 = vmatprep.subr.bf16.mxu1 %v28889_v7 }
0x105b   : > { %22301 = vmatmul.mubr.msk.bf16.vlgmr.msra.gmra.mrb[88].mxu1 %vm15213_vm6, %v15422_v60  ;;  %v24330_v60 = vld [vmem:[%s28898_s17 + $0x48] sm:$0xff]  }
0x105c   : > { %22305 = vmatpush3.bf16.msra.mxu1 %v24293_v13  ;;  %22308 = vmatprep.mubr.msk.bf16.mxu1 %vm24583_vm5, %v28889_v7 }
0x105d   : > { %22306 = vmatprep.subr.bf16.mxu1 %v28889_v7 }
0x1060   : > { %22307 = vmatpush3.bf16.msra.mxu1 %v24294_v26 }
0x1061   : > { %22312 = vmatprep.subr.bf16.mxu1 %v28889_v7 }
0x1067   : > { %22309 = vmatmul.mubr.msk.bf16.vlgmr.msra.gmra.mrb[88].mxu1 %vm15213_vm6, %v15497_v56  ;;  %v24334_v56 = vld [vmem:[%s28898_s17 + $0x58] sm:$0xff]  }
0x1068   : > { %22313 = vmatpush3.bf16.msra.mxu1 %v24297_v16  ;;  %22316 = vmatprep.mubr.msk.bf16.mxu1 %vm24583_vm5, %v28889_v7 }
0x1069   : > { %22314 = vmatprep.subr.bf16.mxu1 %v28889_v7 }
0x106c   : > { %22315 = vmatpush3.bf16.msra.mxu1 %v24298_v32 }
0x106d   : > { %22320 = vmatprep.subr.bf16.mxu1 %v28889_v7 }
0x1073   : > { %22317 = vmatmul.mubr.msk.bf16.vlgmr.msra.gmra.mrb[88].mxu1 %vm15213_vm6, %v15572_v45  ;;  %v24338_v45 = vld [vmem:[%s28898_s17 + $0x68] sm:$0xff]  }
0x1074   : > { %22321 = vmatpush3.bf16.msra.mxu1 %v24301_v34  ;;  %22324 = vmatprep.mubr.msk.bf16.mxu1 %vm24583_vm5, %v28889_v7 }
0x1075   : > { %22322 = vmatprep.subr.bf16.mxu1 %v28889_v7 }
0x1078   : > { %22323 = vmatpush3.bf16.msra.mxu1 %v24302_v42 }
0x1079   : > { %22328 = vmatprep.subr.bf16.mxu1 %v28889_v7 }
0x107f   : > { %22325 = vmatmul.mubr.msk.bf16.vlgmr.msra.gmra.mrb[88].mxu1 %vm15213_vm6, %v15648_v15  ;;  %v24342_v15 = vld [vmem:[%s28898_s17 + $0x78] sm:$0xff]  }
0x1080   : > { %22329 = vmatpush3.bf16.msra.mxu1 %v24305_v43  ;;  %22332 = vmatprep.mubr.msk.bf16.mxu1 %vm24583_vm5, %v28889_v7 }
0x1081   : > { %22330 = vmatprep.subr.bf16.mxu1 %v28889_v7 }
0x1084   : > { %22331 = vmatpush3.bf16.msra.mxu1 %v24306_v25 }
0x1085   : > { %22336 = vmatprep.subr.bf16.mxu1 %v28889_v7 }
0x108b   : > { %22333 = vmatmul.mubr.msk.bf16.vlgmr.msra.gmra.mrb[88].mxu1 %vm15213_vm6, %v15723_v3  ;;  %v24346_v3 = vld [vmem:[%s28898_s17 + $0x88] sm:$0xff]  }
0x108c   : > { %22337 = vmatpush3.bf16.msra.mxu1 %v24309_v63  ;;  %22340 = vmatprep.mubr.msk.bf16.mxu1 %vm24583_vm5, %v28889_v7 }
0x108d   : > { %22338 = vmatprep.subr.bf16.mxu1 %v28889_v7 }
0x1090   : > { %22339 = vmatpush3.bf16.msra.mxu1 %v24310_v0 }
0x1091   : > { %22344 = vmatprep.subr.bf16.mxu1 %v28889_v7 }
0x1097   : > { %22341 = vmatmul.mubr.msk.bf16.vlgmr.msra.gmra.mrb[88].mxu1 %vm15213_vm6, %v15798_v62  ;;  %v24349_v62 = vld [vmem:[%s28706_s19] sm:$0xff]  }
0x1098   : > { %22348 = vmatprep.mubr.msk.bf16.mxu1 %vm24583_vm5, %v28889_v7  ;;  %22345 = vmatpush3.bf16.msra.mxu1 %v24313_v61  ;;  %v24350_v61 = vld [vmem:[%s28706_s19 + $0x8] sm:$0xff]  }
0x1099   : > { %22346 = vmatprep.subr.bf16.mxu1 %v28889_v7  ;;  %22417 = vmatpush3.bf16.msra.mxu0 %v24349_v62 }
0x109a   : > { %22418 = vmatprep.subr.bf16.mxu0 %v28889_v7 }
0x109c   : > { %22347 = vmatpush3.bf16.msra.mxu1 %v24314_v53  ;;  %v19769_v53 = vld [vmem:[%s28900_s18] ss:$0 sm:$0xff] }
0x109d   : > { %22352 = vmatprep.subr.bf16.mxu1 %v28889_v7  ;;  %22419 = vmatpush3.bf16.msra.mxu0 %v24350_v61 }
0x109e   : > { %22424 = vmatprep.subr.bf16.mxu0 %v28889_v7 }
0x116a   : > { %v15852_v47 = vpop.f32.mrb[88].mxu1 }
0x116b   : > { %v22782_v2 = vadd.f32 %v19741_v22, %v15852_v47  ;;  %v22342_v5 = vpop.f32.mrb[89].mxu1 }
0x116c   : > { %v15855_v51 = vpop.f32.mrb[90].mxu1 }
0x116d   : > { %v15861_v6 = vmax.f32 %v22782_v2, 0.0  ;;  %v22783_v11 = vadd.f32 %v19741_v22, %v15855_v51  ;;  %v22343_v19 = vpop.f32.mrb[91].mxu1 }
0x116f   : > { %v15865_v49 = vcombine.high %v15861_v6, %v15861_v6  ;;  %15869 = vst.msk [vmem:[#allocation5 + $0x9] sm:$0xf] %vm973_vm2, %v15861_v6  ;;  %v15862_v28 = vmax.f32 %v22783_v11, 0.0 }
0x1171   : > { %15870 = vst.msk [vmem:[#allocation5 + $0x11] sm:$0xf] %vm973_vm2, %v15865_v49  ;;  %v15866_v35 = vcombine.high %v15862_v28, %v15862_v28  ;;  %15871 = vst.msk [vmem:[#allocation5 + $0x19] sm:$0xf] %vm973_vm2, %v15862_v28 }
0x1173   : > { %15872 = vst.msk [vmem:[#allocation5 + $0x21] sm:$0xf] %vm973_vm2, %v15866_v35 }
0x1176   : > { %v24315_v24 = vld [vmem:[#allocation5] ss:$8 sps:$4 sm:$0xff]  }
0x1177   : > { %v24319_v23 = vld [vmem:[#allocation5 + $0x1] ss:$8 sps:$4 sm:$0xff]  }
0x1178   : > { %v24316_v40 = vld [vmem:[#allocation5 + $0x10] ss:$8 sps:$4 sm:$0xff]   ;;  %v24323_v55 = vld [vmem:[#allocation5 + $0x2] ss:$8 sps:$4 sm:$0xff]  }
0x1179   : > { %v15892_v33 = vpack.c.bf16 %v24316_v40, %v24315_v24  ;;  %v24320_v1 = vld [vmem:[#allocation5 + $0x11] ss:$8 sps:$4 sm:$0xff]  }
0x117a   : > { %v15967_v8 = vpack.c.bf16 %v24320_v1, %v24319_v23  ;;  %v24324_v27 = vld [vmem:[#allocation5 + $0x12] ss:$8 sps:$4 sm:$0xff]   ;;  %v24340_v42 = vld [vmem:[#allocation5 + $0x20] ss:$8 sps:$4 sm:$0xff]  }
0x117b   : > { %22349 = vmatmul.mubr.msk.bf16.vlgmr.msra.gmra.mrb[92].mxu1 %vm15213_vm6, %v15892_v33  ;;  %v16042_v44 = vpack.c.bf16 %v24324_v27, %v24323_v55  ;;  %v24328_v14 = vld [vmem:[#allocation5 + $0x18] ss:$8 sps:$4 sm:$0xff]   ;;  %v24327_v18 = vld [vmem:[#allocation5 + $0x8] ss:$8 sps:$4 sm:$0xff]  }
0x117c   : > { %22353 = vmatpush3.bf16.msra.mxu1 %v24317_v31  ;;  %22356 = vmatprep.mubr.msk.bf16.mxu1 %vm24583_vm5, %v28889_v7  ;;  %v16117_v13 = vpack.c.bf16 %v24328_v14, %v24327_v18  ;;  %v24332_v26 = vld [vmem:[#allocation5 + $0x19] ss:$8 sps:$4 sm:$0xff]   ;;  %v24331_v50 = vld [vmem:[#allocation5 + $0x9] ss:$8 sps:$4 sm:$0xff]  }
0x117d   : > { %22354 = vmatprep.subr.bf16.mxu1 %v28889_v7  ;;  %v16192_v16 = vpack.c.bf16 %v24332_v26, %v24331_v50  ;;  %v24336_v32 = vld [vmem:[#allocation5 + $0x1a] ss:$8 sps:$4 sm:$0xff]   ;;  %v24335_v41 = vld [vmem:[#allocation5 + $0xa] ss:$8 sps:$4 sm:$0xff]  }
0x117e   : > { %v16267_v34 = vpack.c.bf16 %v24336_v32, %v24335_v41  ;;  %v24339_v29 = vld [vmem:[#allocation5 + $0x10] ss:$8 sps:$4 sm:$0xff]   ;;  %v24344_v25 = vld [vmem:[#allocation5 + $0x21] ss:$8 sps:$4 sm:$0xff]  }
0x117f   : > { %v16342_v43 = vpack.c.bf16 %v24340_v42, %v24339_v29  ;;  %v24343_v10 = vld [vmem:[#allocation5 + $0x11] ss:$8 sps:$4 sm:$0xff]   ;;  %v24348_v0 = vld [vmem:[#allocation5 + $0x22] ss:$8 sps:$4 sm:$0xff]  }
0x1180   : > { %22355 = vmatpush3.bf16.msra.mxu1 %v24318_v9  ;;  %v16417_v63 = vpack.c.bf16 %v24344_v25, %v24343_v10  ;;  %v24347_v30 = vld [vmem:[#allocation5 + $0x12] ss:$8 sps:$4 sm:$0xff]   ;;  %v24357_v9 = vld [vmem:[%s28706_s19 + $0x20] sm:$0xff]   ;;  %v24358_v23 = vld [vmem:[%s28706_s19 + $0x28] sm:$0xff]  }
0x1181   : > { %22360 = vmatprep.subr.bf16.mxu1 %v28889_v7  ;;  %v16492_v57 = vpack.c.bf16 %v24348_v0, %v24347_v30  ;;  %v24362_v55 = vld [vmem:[%s28706_s19 + $0x38] sm:$0xff]   ;;  %v24366_v18 = vld [vmem:[%s28706_s19 + $0x48] sm:$0xff]   ;;  %v24385_v0 = vld [vmem:[%s28708_s21] sm:$0xff]  }
0x1182   : > { %v24370_v50 = vld [vmem:[%s28706_s19 + $0x58] sm:$0xff]   ;;  %v24374_v41 = vld [vmem:[%s28706_s19 + $0x68] sm:$0xff]  }
0x1183   : > { %v24378_v29 = vld [vmem:[%s28706_s19 + $0x78] sm:$0xff]   ;;  %v24382_v10 = vld [vmem:[%s28706_s19 + $0x88] sm:$0xff]  }
0x1184   : > { %v24386_v30 = vld [vmem:[%s28708_s21 + $0x8] sm:$0xff]  }
0x1187   : > { %22357 = vmatmul.mubr.msk.bf16.vlgmr.msra.gmra.mrb[92].mxu1 %vm15213_vm6, %v15967_v8 }
0x1188   : > { %22361 = vmatpush3.bf16.msra.mxu1 %v24321_v58  ;;  %22364 = vmatprep.mubr.msk.bf16.mxu1 %vm24583_vm5, %v28889_v7 }
0x1189   : > { %22362 = vmatprep.subr.bf16.mxu1 %v28889_v7 }
0x118c   : > { %22363 = vmatpush3.bf16.msra.mxu1 %v24322_v17  ;;  %v24361_v17 = vld [vmem:[%s28706_s19 + $0x30] sm:$0xff]  }
0x118d   : > { %22368 = vmatprep.subr.bf16.mxu1 %v28889_v7 }
0x1193   : > { %22365 = vmatmul.mubr.msk.bf16.vlgmr.msra.gmra.mrb[92].mxu1 %vm15213_vm6, %v16042_v44 }
0x1194   : > { %22369 = vmatpush3.bf16.msra.mxu1 %v24325_v37  ;;  %22372 = vmatprep.mubr.msk.bf16.mxu1 %vm24583_vm5, %v28889_v7 }
0x1195   : > { %22370 = vmatprep.subr.bf16.mxu1 %v28889_v7 }
0x1198   : > { %22371 = vmatpush3.bf16.msra.mxu1 %v24326_v52  ;;  %v24365_v52 = vld [vmem:[%s28706_s19 + $0x40] sm:$0xff]  }
0x1199   : > { %22376 = vmatprep.subr.bf16.mxu1 %v28889_v7 }
0x119f   : > { %22373 = vmatmul.mubr.msk.bf16.vlgmr.msra.gmra.mrb[92].mxu1 %vm15213_vm6, %v16117_v13 }
0x11a0   : > { %22377 = vmatpush3.bf16.msra.mxu1 %v24329_v39  ;;  %22380 = vmatprep.mubr.msk.bf16.mxu1 %vm24583_vm5, %v28889_v7 }
0x11a1   : > { %22378 = vmatprep.subr.bf16.mxu1 %v28889_v7 }
0x11a4   : > { %22379 = vmatpush3.bf16.msra.mxu1 %v24330_v60  ;;  %v24369_v60 = vld [vmem:[%s28706_s19 + $0x50] sm:$0xff]  }
0x11a5   : > { %22384 = vmatprep.subr.bf16.mxu1 %v28889_v7 }
0x11ab   : > { %22381 = vmatmul.mubr.msk.bf16.vlgmr.msra.gmra.mrb[92].mxu1 %vm15213_vm6, %v16192_v16 }
0x11ac   : > { %22385 = vmatpush3.bf16.msra.mxu1 %v24333_v48  ;;  %22388 = vmatprep.mubr.msk.bf16.mxu1 %vm24583_vm5, %v28889_v7 }
0x11ad   : > { %22386 = vmatprep.subr.bf16.mxu1 %v28889_v7 }
0x11b0   : > { %22387 = vmatpush3.bf16.msra.mxu1 %v24334_v56  ;;  %v24373_v56 = vld [vmem:[%s28706_s19 + $0x60] sm:$0xff]  }
0x11b1   : > { %22392 = vmatprep.subr.bf16.mxu1 %v28889_v7 }
0x11b7   : > { %22389 = vmatmul.mubr.msk.bf16.vlgmr.msra.gmra.mrb[92].mxu1 %vm15213_vm6, %v16267_v34 }
0x11b8   : > { %22393 = vmatpush3.bf16.msra.mxu1 %v24337_v59  ;;  %22396 = vmatprep.mubr.msk.bf16.mxu1 %vm24583_vm5, %v28889_v7 }
0x11b9   : > { %22394 = vmatprep.subr.bf16.mxu1 %v28889_v7 }
0x11bc   : > { %22395 = vmatpush3.bf16.msra.mxu1 %v24338_v45  ;;  %v24377_v45 = vld [vmem:[%s28706_s19 + $0x70] sm:$0xff]  }
0x11bd   : > { %22400 = vmatprep.subr.bf16.mxu1 %v28889_v7 }
0x11c3   : > { %22397 = vmatmul.mubr.msk.bf16.vlgmr.msra.gmra.mrb[92].mxu1 %vm15213_vm6, %v16342_v43 }
0x11c4   : > { %22401 = vmatpush3.bf16.msra.mxu1 %v24341_v54  ;;  %22404 = vmatprep.mubr.msk.bf16.mxu1 %vm24583_vm5, %v28889_v7 }
0x11c5   : > { %22402 = vmatprep.subr.bf16.mxu1 %v28889_v7 }
0x11c8   : > { %22403 = vmatpush3.bf16.msra.mxu1 %v24342_v15  ;;  %v24381_v15 = vld [vmem:[%s28706_s19 + $0x80] sm:$0xff]  }
0x11c9   : > { %22408 = vmatprep.subr.bf16.mxu1 %v28889_v7 }
0x11cf   : > { %22405 = vmatmul.mubr.msk.bf16.vlgmr.msra.gmra.mrb[92].mxu1 %vm15213_vm6, %v16417_v63 }
0x11d0   : > { %22409 = vmatpush3.bf16.msra.mxu1 %v24345_v36  ;;  %22412 = vmatprep.mubr.msk.bf16.mxu1 %vm24583_vm5, %v28889_v7 }
0x11d1   : > { %22410 = vmatprep.subr.bf16.mxu1 %v28889_v7 }
0x11d4   : > { %22411 = vmatpush3.bf16.msra.mxu1 %v24346_v3 }
0x11d5   : > { %22488 = vmatprep.subr.bf16.mxu1 %v28889_v7 }
0x11db   : > { %22413 = vmatmul.mubr.msk.bf16.vlgmr.msra.gmra.mrb[92].mxu1 %vm15213_vm6, %v16492_v57  ;;  %v19797_v57 = vld [vmem:[%s28707_s20] ss:$0 sm:$0xff] }
0x11dc   : > { %22492 = vmatprep.mubr.msk.bf16.mxu1 %vm24583_vm5, %v28889_v7  ;;  %22489 = vmatpush3.bf16.msra.mxu1 %v24385_v0  ;;  %v24410_v0 = vld [vmem:[%s28708_s21 + $0x88] sm:$0xff]  }
0x11dd   : > { %22490 = vmatprep.subr.bf16.mxu1 %v28889_v7 }
0x11e0   : > { %22491 = vmatpush3.bf16.msra.mxu1 %v24386_v30 }
0x11e1   : > { %22496 = vmatprep.subr.bf16.mxu1 %v28889_v7 }
0x12ae   : > { %v16546_v22 = vpop.f32.mrb[92].mxu1 }
0x12af   : > { %v22784_v47 = vadd.f32 %v19769_v53, %v16546_v22  ;;  %v22414_v2 = vpop.f32.mrb[93].mxu1 }
0x12b0   : > { %v16549_v5 = vpop.f32.mrb[94].mxu1 }
0x12b1   : > { %v16557_v51 = vcombine.high %v22784_v47, %v22784_v47  ;;  %v16701_v6 = vadd.f32 %v22784_v47, %v28001_v46  ;;  %v22785_v11 = vadd.f32 %v19769_v53, %v16549_v5  ;;  %v22415_v19 = vpop.f32.mrb[95].mxu1 }
0x12b3   : > { %v16702_v49 = vadd.f32 %v27972_v12, %v16557_v51  ;;  %16705 = vst.msk [vmem:[%s28230_s8] sm:$0xf] %vm973_vm2, %v16701_v6  ;;  %16709 = vst.msk [vmem:[#allocation5 + $0x9] sm:$0xf] %vm973_vm2, %v16701_v6  ;;  %v16558_v28 = vcombine.high %v22785_v11, %v22785_v11  ;;  %v16703_v35 = vadd.f32 %v22785_v11, %v28017_v21  ;;  %v24353_v21 = vld [vmem:[%s28706_s19 + $0x10] sm:$0xff]  }
0x12b5   : > { %16706 = vst.msk [vmem:[%s28230_s8 + $0x4] sm:$0xf] %vm973_vm2, %v16702_v49  ;;  %16710 = vst.msk [vmem:[#allocation5 + $0x11] sm:$0xf] %vm973_vm2, %v16702_v49  ;;  %v16704_v46 = vadd.f32 %v28014_v20, %v16558_v28  ;;  %v24354_v20 = vld [vmem:[%s28706_s19 + $0x18] sm:$0xff]  }
0x12b6   : > { %16707 = vst.msk [vmem:[%s28230_s8 + $0x8] sm:$0xf] %vm973_vm2, %v16703_v35  ;;  %16711 = vst.msk [vmem:[#allocation5 + $0x19] sm:$0xf] %vm973_vm2, %v16703_v35 }
0x12b7   : > { %16708 = vst.msk [vmem:[%s28230_s8 + $0xc] sm:$0xf] %vm973_vm2, %v16704_v46  ;;  %16712 = vst.msk [vmem:[#allocation5 + $0x21] sm:$0xf] %vm973_vm2, %v16704_v46  ;;  %s24585_s8 = smov [#allocation9]  }
0x12b8   : > { %s24461_s16 = sshll.u32 %s24585_s8, 4  ;;  %s24462_s16 = int_to_ptr.vmem [resolvable:$false] %s24461_s16 }
0x12b9   : > { %s24463_s17 = scalar_lea.vmem %s24462_s16, 512  ;;  %p24464_p0 = scmp.lt.s32.totalorder %s28563_s12, %s24462_s16 }
0x12ba   : > { %v24351_v12 = vld [vmem:[#allocation5] ss:$8 sps:$4 sm:$0xff]   ;;  %p24465_p1 = scmp.lt.s32.totalorder %s24463_s17, %s24457_s15 }
0x12bb   : > { %v24355_v33 = vld [vmem:[#allocation5 + $0x1] ss:$8 sps:$4 sm:$0xff]  }
0x12bc   : > { %v24359_v8 = vld [vmem:[#allocation5 + $0x2] ss:$8 sps:$4 sm:$0xff]   ;;  %p24466_p2 = por %p24465_p1, %p24464_p0 }
0x12bd   : > { %v24352_v24 = vld [vmem:[#allocation5 + $0x10] ss:$8 sps:$4 sm:$0xff]  }
0x12be   : > { %v16732_v40 = vpack.c.bf16 %v24352_v24, %v24351_v12  ;;  %v24356_v31 = vld [vmem:[#allocation5 + $0x11] ss:$8 sps:$4 sm:$0xff]   ;;  %v24376_v59 = vld [vmem:[#allocation5 + $0x20] ss:$8 sps:$4 sm:$0xff]   ;;  %p24467_p3 = pnand %p24466_p2, %p24460_p13 }
0x12bf   : > { %v16807_v1 = vpack.c.bf16 %v24356_v31, %v24355_v33  ;;  %v24360_v58 = vld [vmem:[#allocation5 + $0x12] ss:$8 sps:$4 sm:$0xff]   ;;  %v24380_v54 = vld [vmem:[#allocation5 + $0x21] ss:$8 sps:$4 sm:$0xff]  }
0x12c0   : > { %22421 = vmatmul.mubr.msk.bf16.vlgmr.msra.gmra.mrb[80].mxu0 %vm15213_vm6, %v16732_v40  ;;  %v16882_v27 = vpack.c.bf16 %v24360_v58, %v24359_v8  ;;  %v24364_v37 = vld [vmem:[#allocation5 + $0x18] ss:$8 sps:$4 sm:$0xff]   ;;  %v24363_v44 = vld [vmem:[#allocation5 + $0x8] ss:$8 sps:$4 sm:$0xff]  }
0x12c1   : > { %22425 = vmatpush3.bf16.msra.mxu0 %v24353_v21  ;;  %22428 = vmatprep.mubr.msk.bf16.mxu0 %vm24583_vm5, %v28889_v7  ;;  %v16957_v14 = vpack.c.bf16 %v24364_v37, %v24363_v44  ;;  %v24368_v39 = vld [vmem:[#allocation5 + $0x19] ss:$8 sps:$4 sm:$0xff]   ;;  %v24367_v13 = vld [vmem:[#allocation5 + $0x9] ss:$8 sps:$4 sm:$0xff]  }
0x12c2   : > { %22426 = vmatprep.subr.bf16.mxu0 %v28889_v7  ;;  %v17032_v26 = vpack.c.bf16 %v24368_v39, %v24367_v13  ;;  %v24372_v48 = vld [vmem:[#allocation5 + $0x1a] ss:$8 sps:$4 sm:$0xff]   ;;  %v24371_v16 = vld [vmem:[#allocation5 + $0xa] ss:$8 sps:$4 sm:$0xff]  }
0x12c3   : > { %v17107_v32 = vpack.c.bf16 %v24372_v48, %v24371_v16  ;;  %v24375_v34 = vld [vmem:[#allocation5 + $0x10] ss:$8 sps:$4 sm:$0xff]   ;;  %v24384_v36 = vld [vmem:[#allocation5 + $0x22] ss:$8 sps:$4 sm:$0xff]  }
0x12c4   : > { %v17182_v42 = vpack.c.bf16 %v24376_v59, %v24375_v34  ;;  %v24379_v43 = vld [vmem:[#allocation5 + $0x11] ss:$8 sps:$4 sm:$0xff]   ;;  %v24397_v48 = vld [vmem:[%s28708_s21 + $0x40] sm:$0xff]  }
0x12c5   : > { %22427 = vmatpush3.bf16.msra.mxu0 %v24354_v20  ;;  %v17257_v25 = vpack.c.bf16 %v24380_v54, %v24379_v43  ;;  %v24383_v63 = vld [vmem:[#allocation5 + $0x12] ss:$8 sps:$4 sm:$0xff]   ;;  %v24404_v54 = vld [vmem:[%s28708_s21 + $0x68] sm:$0xff]  }
0x12c6   : > { %22432 = vmatprep.subr.bf16.mxu0 %v28889_v7  ;;  %v17332_v3 = vpack.c.bf16 %v24384_v36, %v24383_v63  ;;  %v24389_v37 = vld [vmem:[%s28708_s21 + $0x18] sm:$0xff]   ;;  %v24394_v13 = vld [vmem:[%s28708_s21 + $0x30] sm:$0xff]   ;;  %v24409_v63 = vld [vmem:[%s28708_s21 + $0x80] sm:$0xff]  }
0x12c7   : > { %v24401_v34 = vld [vmem:[%s28708_s21 + $0x58] sm:$0xff]  }
0x12cc   : > { %22429 = vmatmul.mubr.msk.bf16.vlgmr.msra.gmra.mrb[80].mxu0 %vm15213_vm6, %v16807_v1 }
0x12cd   : > { %22433 = vmatpush3.bf16.msra.mxu0 %v24357_v9  ;;  %22436 = vmatprep.mubr.msk.bf16.mxu0 %vm24583_vm5, %v28889_v7 }
0x12ce   : > { %22434 = vmatprep.subr.bf16.mxu0 %v28889_v7 }
0x12d1   : > { %22435 = vmatpush3.bf16.msra.mxu0 %v24358_v23 }
0x12d2   : > { %22440 = vmatprep.subr.bf16.mxu0 %v28889_v7 }
0x12d8   : > { %22437 = vmatmul.mubr.msk.bf16.vlgmr.msra.gmra.mrb[80].mxu0 %vm15213_vm6, %v16882_v27  ;;  %v24388_v27 = vld [vmem:[%s28708_s21 + $0x10] sm:$0xff]  }
0x12d9   : > { %22441 = vmatpush3.bf16.msra.mxu0 %v24361_v17  ;;  %22444 = vmatprep.mubr.msk.bf16.mxu0 %vm24583_vm5, %v28889_v7 }
0x12da   : > { %22442 = vmatprep.subr.bf16.mxu0 %v28889_v7 }
0x12dd   : > { %22443 = vmatpush3.bf16.msra.mxu0 %v24362_v55 }
0x12de   : > { %22448 = vmatprep.subr.bf16.mxu0 %v28889_v7 }
0x12e4   : > { %22445 = vmatmul.mubr.msk.bf16.vlgmr.msra.gmra.mrb[80].mxu0 %vm15213_vm6, %v16957_v14 }
0x12e5   : > { %22449 = vmatpush3.bf16.msra.mxu0 %v24365_v52  ;;  %22452 = vmatprep.mubr.msk.bf16.mxu0 %vm24583_vm5, %v28889_v7  ;;  %v24391_v52 = vld [vmem:[%s28708_s21 + $0x20] sm:$0xff]  }
0x12e6   : > { %22450 = vmatprep.subr.bf16.mxu0 %v28889_v7 }
0x12e9   : > { %22451 = vmatpush3.bf16.msra.mxu0 %v24366_v18  ;;  %v24392_v18 = vld [vmem:[%s28708_s21 + $0x28] sm:$0xff]  }
0x12ea   : > { %22456 = vmatprep.subr.bf16.mxu0 %v28889_v7 }
0x12f0   : > { %22453 = vmatmul.mubr.msk.bf16.vlgmr.msra.gmra.mrb[80].mxu0 %vm15213_vm6, %v17032_v26  ;;  %v24395_v26 = vld [vmem:[%s28708_s21 + $0x38] sm:$0xff]  }
0x12f1   : > { %22457 = vmatpush3.bf16.msra.mxu0 %v24369_v60  ;;  %22460 = vmatprep.mubr.msk.bf16.mxu0 %vm24583_vm5, %v28889_v7 }
0x12f2   : > { %22458 = vmatprep.subr.bf16.mxu0 %v28889_v7 }
0x12f5   : > { %22459 = vmatpush3.bf16.msra.mxu0 %v24370_v50 }
0x12f6   : > { %22464 = vmatprep.subr.bf16.mxu0 %v28889_v7 }
0x12fc   : > { %22461 = vmatmul.mubr.msk.bf16.vlgmr.msra.gmra.mrb[80].mxu0 %vm15213_vm6, %v17107_v32 }
0x12fd   : > { %22465 = vmatpush3.bf16.msra.mxu0 %v24373_v56  ;;  %22468 = vmatprep.mubr.msk.bf16.mxu0 %vm24583_vm5, %v28889_v7  ;;  %v24398_v56 = vld [vmem:[%s28708_s21 + $0x48] sm:$0xff]  }
0x12fe   : > { %22466 = vmatprep.subr.bf16.mxu0 %v28889_v7 }
0x1301   : > { %22467 = vmatpush3.bf16.msra.mxu0 %v24374_v41  ;;  %v24400_v41 = vld [vmem:[%s28708_s21 + $0x50] sm:$0xff]  }
0x1302   : > { %22472 = vmatprep.subr.bf16.mxu0 %v28889_v7 }
0x1308   : > { %22469 = vmatmul.mubr.msk.bf16.vlgmr.msra.gmra.mrb[80].mxu0 %vm15213_vm6, %v17182_v42  ;;  %v24403_v42 = vld [vmem:[%s28708_s21 + $0x60] sm:$0xff]  }
0x1309   : > { %22473 = vmatpush3.bf16.msra.mxu0 %v24377_v45  ;;  %22476 = vmatprep.mubr.msk.bf16.mxu0 %vm24583_vm5, %v28889_v7 }
0x130a   : > { %22474 = vmatprep.subr.bf16.mxu0 %v28889_v7 }
0x130d   : > { %22475 = vmatpush3.bf16.msra.mxu0 %v24378_v29 }
0x130e   : > { %22480 = vmatprep.subr.bf16.mxu0 %v28889_v7 }
0x1314   : > { %22477 = vmatmul.mubr.msk.bf16.vlgmr.msra.gmra.mrb[80].mxu0 %vm15213_vm6, %v17257_v25 }
0x1315   : > { %22481 = vmatpush3.bf16.msra.mxu0 %v24381_v15  ;;  %22484 = vmatprep.mubr.msk.bf16.mxu0 %vm24583_vm5, %v28889_v7  ;;  %v24406_v15 = vld [vmem:[%s28708_s21 + $0x70] sm:$0xff]  }
0x1316   : > { %22482 = vmatprep.subr.bf16.mxu0 %v28889_v7 }
0x1319   : > { %22483 = vmatpush3.bf16.msra.mxu0 %v24382_v10  ;;  %v24407_v10 = vld [vmem:[%s28708_s21 + $0x78] sm:$0xff]  }
0x131a   : > { %22560 = vmatprep.subr.bf16.mxu0 %v28889_v7 }
0x1320   : > { %22485 = vmatmul.mubr.msk.bf16.vlgmr.msra.gmra.mrb[80].mxu0 %vm15213_vm6, %v17332_v3 }
0x1321   : > { %22564 = vmatprep.mubr.msk.bf16.mxu0 %vm24583_vm5, %v28889_v7 }
0x13f3   : > { %v17386_v62 = vpop.f32.mrb[80].mxu0 }
0x13f4   : > { %v22786_v61 = vadd.f32 %v19797_v57, %v17386_v62  ;;  %v22486_v53 = vpop.f32.mrb[81].mxu0  ;;  %v24412_v62 = vld [vmem:[%s28710_s23] sm:$0xff]  }
0x13f5   : > { %v17389_v22 = vpop.f32.mrb[82].mxu0  ;;  %22561 = vmatpush3.bf16.msra.mxu0 %v24412_v62  ;;  %v19825_v53 = vld [vmem:[%s28709_s22] ss:$0 sm:$0xff] }
0x13f6   : > { %v17395_v47 = vmax.f32 %v22786_v61, 0.0  ;;  %v22787_v2 = vadd.f32 %v19797_v57, %v17389_v22  ;;  %v22487_v5 = vpop.f32.mrb[83].mxu0  ;;  %v24413_v61 = vld [vmem:[%s28710_s23 + $0x8] sm:$0xff]   ;;  %22562 = vmatprep.subr.bf16.mxu0 %v28889_v7 }
0x13f8   : > { %v17405_v51 = vrot.slane %v17395_v47, %v27284_v38  ;;  %v17396_v6 = vmax.f32 %v22787_v2, 0.0 }
0x13f9   : > { %22563 = vmatpush3.bf16.msra.mxu0 %v24413_v61 }
0x13fa   : > { %v17406_v11 = vcombine.high %v17405_v51, %v17405_v51  ;;  %v17413_v19 = vrot.slane %v17396_v6, %v27284_v38  ;;  %v17418_v49 = vrot.slane %v17405_v51, %v27288_v4  ;;  %22568 = vmatprep.subr.bf16.mxu0 %v28889_v7 }
0x13fc   : > { %v17422_v28 = vrot.slane %v17406_v11, %v27288_v4  ;;  %v18813_v35 = vrot.slane %v17406_v11, 7  ;;  %v17414_v46 = vcombine.high %v17413_v19, %v17413_v19  ;;  %v17426_v12 = vrot.slane %v17413_v19, %v27288_v4 }
0x13fe   : > { %v17431_v24 = vsel %vm12111_vm11, %v17422_v28, %v17418_v49  ;;  %v18814_v21 = vsel %vm12111_vm11, %v18813_v35, %v17405_v51  ;;  %v17430_v40 = vrot.slane %v17414_v46, %v27288_v4  ;;  %v18820_v20 = vrot.slane %v17414_v46, 7  ;;  %v24415_v28 = vld [vmem:[%s28710_s23 + $0x10] sm:$0xff]   ;;  %v24416_v46 = vld [vmem:[%s28710_s23 + $0x18] sm:$0xff]  }
0x13ff   : > { %17437 = vst.msk [vmem:[#allocation6 + $0x5] sm:$0x3] %vm17436_vm7, %v17431_v24  ;;  %v18815_v31 = vsel %vm12115_vm13, %v18813_v35, %v18814_v21  ;;  %v24418_v24 = vld [vmem:[%s28710_s23 + $0x20] sm:$0xff]  }
0x1400   : > { %v17432_v33 = vsel %vm12111_vm11, %v17430_v40, %v17426_v12  ;;  %v18821_v9 = vsel %vm12111_vm11, %v18820_v20, %v17413_v19  ;;  %v18816_v1 = vsel %vm12119_vm15, %v18813_v35, %v18815_v31  ;;  %v24419_v40 = vld [vmem:[%s28710_s23 + $0x28] sm:$0xff]   ;;  %v24421_v31 = vld [vmem:[%s28710_s23 + $0x30] sm:$0xff]  }
0x1401   : > { %17438 = vst.msk [vmem:[#allocation6 + $0x9] sm:$0x3] %vm17436_vm7, %v17432_v33  ;;  %v18822_v23 = vsel %vm12115_vm13, %v18820_v20, %v18821_v9  ;;  %v28364_v58 = vsel %vm12123_vm1, %v18813_v35, %v18816_v1  ;;  %v24422_v9 = vld [vmem:[%s28710_s23 + $0x38] sm:$0xff]  }
0x1402   : > { %v18823_v4 = vsel %vm12119_vm15, %v18820_v20, %v18822_v23  ;;  %v24424_v23 = vld [vmem:[%s28710_s23 + $0x40] sm:$0xff]  }
0x1403   : > { %v28368_v8 = vsel %vm12123_vm1, %v18820_v20, %v18823_v4 }
0x1406   : > { %v24439_v17 = vld.sshfl [vmem:[#allocation6] sm:$0xf pattern:$0x76325410] }
0x1407   : > { %v17459_v55 = vpack.c.bf16 %v24439_v17, %v24439_v17  ;;  %v24440_v44 = vld.sshfl [vmem:[#allocation6 + $0x1] sm:$0xf pattern:$0x76325410]  ;;  %v24425_v17 = vld [vmem:[%s28710_s23 + $0x48] sm:$0xff]  }
0x1408   : > { %v17533_v14 = vpack.c.bf16 %v24440_v44, %v24440_v44  ;;  %v24441_v39 = vld.sshfl [vmem:[#allocation6 + $0x2] sm:$0xf pattern:$0x76325410]  ;;  %v24428_v44 = vld [vmem:[%s28710_s23 + $0x58] sm:$0xff]  }
0x1409   : > { %22493 = vmatmul.mubr.msk.bf16.vlgmr.msra.gmra.mrb[96].mxu1 %vm15213_vm6, %v17459_v55  ;;  %v17607_v60 = vpack.c.bf16 %v24441_v39, %v24441_v39  ;;  %v24442_v50 = vld.sshfl [vmem:[#allocation6 + $0x4] sm:$0xf pattern:$0x76325410]  ;;  %v24431_v39 = vld [vmem:[%s28710_s23 + $0x68] sm:$0xff]  }
0x140a   : > { %22497 = vmatpush3.bf16.msra.mxu1 %v24388_v27  ;;  %22500 = vmatprep.mubr.msk.bf16.mxu1 %vm24583_vm5, %v28889_v7  ;;  %v17681_v16 = vpack.c.bf16 %v24442_v50, %v24442_v50  ;;  %v24443_v32 = vld.sshfl [vmem:[#allocation6 + $0x5] sm:$0xf pattern:$0x76325410] }
0x140b   : > { %22498 = vmatprep.subr.bf16.mxu1 %v28889_v7  ;;  %v17755_v59 = vpack.c.bf16 %v24443_v32, %v24443_v32  ;;  %v24444_v45 = vld.sshfl [vmem:[#allocation6 + $0x6] sm:$0xf pattern:$0x76325410]  ;;  %v24437_v32 = vld [vmem:[%s28710_s23 + $0x88] sm:$0xff]  }
0x140c   : > { %v17829_v29 = vpack.c.bf16 %v24444_v45, %v24444_v45  ;;  %v24445_v43 = vld.sshfl [vmem:[#allocation6 + $0x8] sm:$0xf pattern:$0x76325410]  ;;  %v24427_v55 = vld [vmem:[%s28710_s23 + $0x50] sm:$0xff]  }
0x140d   : > { %v17904_v25 = vpack.c.bf16 %v24445_v43, %v24445_v43  ;;  %v24446_v36 = vld.sshfl [vmem:[#allocation6 + $0x9] sm:$0xf pattern:$0x76325410] }
0x140e   : > { %22499 = vmatpush3.bf16.msra.mxu1 %v24389_v37  ;;  %v17978_v3 = vpack.c.bf16 %v24446_v36, %v24446_v36  ;;  %v24447_v30 = vld.sshfl [vmem:[#allocation6 + $0xa] sm:$0xf pattern:$0x76325410] }
0x140f   : > { %22504 = vmatprep.subr.bf16.mxu1 %v28889_v7  ;;  %v18052_v57 = vpack.c.bf16 %v24447_v30, %v24447_v30  ;;  %v24434_v50 = vld [vmem:[%s28710_s23 + $0x78] sm:$0xff]  }
0x1415   : > { %22501 = vmatmul.mubr.msk.bf16.vlgmr.msra.gmra.mrb[96].mxu1 %vm15213_vm6, %v17533_v14  ;;  %v24430_v14 = vld [vmem:[%s28710_s23 + $0x60] sm:$0xff]  }
0x1416   : > { %22505 = vmatpush3.bf16.msra.mxu1 %v24391_v52  ;;  %22508 = vmatprep.mubr.msk.bf16.mxu1 %vm24583_vm5, %v28889_v7 }
0x1417   : > { %22506 = vmatprep.subr.bf16.mxu1 %v28889_v7 }
0x141a   : > { %22507 = vmatpush3.bf16.msra.mxu1 %v24392_v18 }
0x141b   : > { %22512 = vmatprep.subr.bf16.mxu1 %v28889_v7 }
0x1421   : > { %22509 = vmatmul.mubr.msk.bf16.vlgmr.msra.gmra.mrb[96].mxu1 %vm15213_vm6, %v17607_v60  ;;  %v24433_v60 = vld [vmem:[%s28710_s23 + $0x70] sm:$0xff]  }
0x1422   : > { %22513 = vmatpush3.bf16.msra.mxu1 %v24394_v13  ;;  %22516 = vmatprep.mubr.msk.bf16.mxu1 %vm24583_vm5, %v28889_v7 }
0x1423   : > { %22514 = vmatprep.subr.bf16.mxu1 %v28889_v7 }
0x1426   : > { %22515 = vmatpush3.bf16.msra.mxu1 %v24395_v26 }
0x1427   : > { %22520 = vmatprep.subr.bf16.mxu1 %v28889_v7 }
0x142d   : > { %22517 = vmatmul.mubr.msk.bf16.vlgmr.msra.gmra.mrb[96].mxu1 %vm15213_vm6, %v17681_v16  ;;  %v24436_v16 = vld [vmem:[%s28710_s23 + $0x80] sm:$0xff]  }
0x142e   : > { %22521 = vmatpush3.bf16.msra.mxu1 %v24397_v48  ;;  %22524 = vmatprep.mubr.msk.bf16.mxu1 %vm24583_vm5, %v28889_v7 }
0x142f   : > { %22522 = vmatprep.subr.bf16.mxu1 %v28889_v7 }
0x1432   : > { %22523 = vmatpush3.bf16.msra.mxu1 %v24398_v56 }
0x1433   : > { %22528 = vmatprep.subr.bf16.mxu1 %v28889_v7 }
0x1439   : > { %22525 = vmatmul.mubr.msk.bf16.vlgmr.msra.gmra.mrb[96].mxu1 %vm15213_vm6, %v17755_v59 }
0x143a   : > { %22529 = vmatpush3.bf16.msra.mxu1 %v24400_v41  ;;  %22532 = vmatprep.mubr.msk.bf16.mxu1 %vm24583_vm5, %v28889_v7 }
0x143b   : > { %22530 = vmatprep.subr.bf16.mxu1 %v28889_v7 }
0x143e   : > { %22531 = vmatpush3.bf16.msra.mxu1 %v24401_v34 }
0x143f   : > { %22536 = vmatprep.subr.bf16.mxu1 %v28889_v7 }
0x1445   : > { %22533 = vmatmul.mubr.msk.bf16.vlgmr.msra.gmra.mrb[96].mxu1 %vm15213_vm6, %v17829_v29 }
0x1446   : > { %22537 = vmatpush3.bf16.msra.mxu1 %v24403_v42  ;;  %22540 = vmatprep.mubr.msk.bf16.mxu1 %vm24583_vm5, %v28889_v7 }
0x1447   : > { %22538 = vmatprep.subr.bf16.mxu1 %v28889_v7 }
0x144a   : > { %22539 = vmatpush3.bf16.msra.mxu1 %v24404_v54 }
0x144b   : > { %22544 = vmatprep.subr.bf16.mxu1 %v28889_v7 }
0x1451   : > { %22541 = vmatmul.mubr.msk.bf16.vlgmr.msra.gmra.mrb[96].mxu1 %vm15213_vm6, %v17904_v25 }
0x1452   : > { %22545 = vmatpush3.bf16.msra.mxu1 %v24406_v15  ;;  %22548 = vmatprep.mubr.msk.bf16.mxu1 %vm24583_vm5, %v28889_v7 }
0x1453   : > { %22546 = vmatprep.subr.bf16.mxu1 %v28889_v7 }
0x1456   : > { %22547 = vmatpush3.bf16.msra.mxu1 %v24407_v10 }
0x1457   : > { %22552 = vmatprep.subr.bf16.mxu1 %v28889_v7 }
0x145d   : > { %22549 = vmatmul.mubr.msk.bf16.vlgmr.msra.gmra.mrb[96].mxu1 %vm15213_vm6, %v17978_v3 }
0x145e   : > { %22553 = vmatpush3.bf16.msra.mxu1 %v24409_v63  ;;  %22556 = vmatprep.mubr.msk.bf16.mxu1 %vm24583_vm5, %v28889_v7 }
0x145f   : > { %22554 = vmatprep.subr.bf16.mxu1 %v28889_v7 }
0x1462   : > { %22555 = vmatpush3.bf16.msra.mxu1 %v24410_v0 }
0x1469   : > { %22557 = vmatmul.mubr.msk.bf16.vlgmr.msra.gmra.mrb[96].mxu1 %vm15213_vm6, %v18052_v57 }
0x153c   : > { %v18106_v22 = vpop.f32.mrb[96].mxu1 }
0x153d   : > { %v22788_v47 = vadd.f32 %v19825_v53, %v18106_v22  ;;  %v22558_v2 = vpop.f32.mrb[97].mxu1 }
0x153e   : > { %v18109_v5 = vpop.f32.mrb[98].mxu1 }
0x153f   : > { %v18113_v51 = vmax.f32 %v22788_v47, 0.0  ;;  %v22559_v6 = vpop.f32.mrb[99].mxu1 }
0x1541   : > { %v18121_v11 = vrot.slane %v18113_v51, %v27284_v38 }
0x1543   : > { %v18122_v19 = vcombine.high %v18121_v11, %v18121_v11  ;;  %18125 = vst.msk [vmem:[#allocation6 + $0x5] sm:$0x3] %vm17436_vm7, %v18121_v11 }
0x1545   : > { %18126 = vst.msk [vmem:[#allocation6 + $0x9] sm:$0x3] %vm17436_vm7, %v18122_v19 }
0x154a   : > { %v24448_v49 = vld.sshfl [vmem:[#allocation6] sm:$0xf pattern:$0x76325410] }
0x154b   : > { %v18147_v35 = vpack.c.bf16 %v24448_v49, %v24448_v49  ;;  %v24449_v12 = vld.sshfl [vmem:[#allocation6 + $0x1] sm:$0xf pattern:$0x76325410] }
0x154c   : > { %v18221_v21 = vpack.c.bf16 %v24449_v12, %v24449_v12  ;;  %v24450_v20 = vld.sshfl [vmem:[#allocation6 + $0x2] sm:$0xf pattern:$0x76325410] }
0x154d   : > { %22565 = vmatmul.mubr.msk.bf16.vlgmr.msra.gmra.mrb[84].mxu0 %vm15213_vm6, %v18147_v35  ;;  %v18295_v33 = vpack.c.bf16 %v24450_v20, %v24450_v20  ;;  %v24451_v1 = vld.sshfl [vmem:[#allocation6 + $0x4] sm:$0xf pattern:$0x76325410] }
0x154e   : > { %22569 = vmatpush3.bf16.msra.mxu0 %v24415_v28  ;;  %22572 = vmatprep.mubr.msk.bf16.mxu0 %vm24583_vm5, %v28889_v7  ;;  %v18369_v4 = vpack.c.bf16 %v24451_v1, %v24451_v1  ;;  %v24452_v27 = vld.sshfl [vmem:[#allocation6 + $0x5] sm:$0xf pattern:$0x76325410] }
0x154f   : > { %22570 = vmatprep.subr.bf16.mxu0 %v28889_v7  ;;  %v18443_v37 = vpack.c.bf16 %v24452_v27, %v24452_v27  ;;  %v24453_v52 = vld.sshfl [vmem:[#allocation6 + $0x6] sm:$0xf pattern:$0x76325410] }
0x1550   : > { %v18517_v18 = vpack.c.bf16 %v24453_v52, %v24453_v52  ;;  %v24454_v13 = vld.sshfl [vmem:[#allocation6 + $0x8] sm:$0xf pattern:$0x76325410] }
0x1551   : > { %v18591_v26 = vpack.c.bf16 %v24454_v13, %v24454_v13  ;;  %v24455_v48 = vld.sshfl [vmem:[#allocation6 + $0x9] sm:$0xf pattern:$0x76325410] }
0x1552   : > { %22571 = vmatpush3.bf16.msra.mxu0 %v24416_v46  ;;  %v18665_v56 = vpack.c.bf16 %v24455_v48, %v24455_v48  ;;  %v24456_v41 = vld.sshfl [vmem:[#allocation6 + $0xa] sm:$0xf pattern:$0x76325410] }
0x1553   : > { %22576 = vmatprep.subr.bf16.mxu0 %v28889_v7  ;;  %v18739_v59 = vpack.c.bf16 %v24456_v41, %v24456_v41 }
0x1559   : > { %22573 = vmatmul.mubr.msk.bf16.vlgmr.msra.gmra.mrb[84].mxu0 %vm15213_vm6, %v18221_v21 }
0x155a   : > { %22577 = vmatpush3.bf16.msra.mxu0 %v24418_v24  ;;  %22580 = vmatprep.mubr.msk.bf16.mxu0 %vm24583_vm5, %v28889_v7 }
0x155b   : > { %22578 = vmatprep.subr.bf16.mxu0 %v28889_v7 }
0x155e   : > { %22579 = vmatpush3.bf16.msra.mxu0 %v24419_v40 }
0x155f   : > { %22584 = vmatprep.subr.bf16.mxu0 %v28889_v7 }
0x1565   : > { %22581 = vmatmul.mubr.msk.bf16.vlgmr.msra.gmra.mrb[84].mxu0 %vm15213_vm6, %v18295_v33 }
0x1566   : > { %22585 = vmatpush3.bf16.msra.mxu0 %v24421_v31  ;;  %22588 = vmatprep.mubr.msk.bf16.mxu0 %vm24583_vm5, %v28889_v7 }
0x1567   : > { %22586 = vmatprep.subr.bf16.mxu0 %v28889_v7 }
0x156a   : > { %22587 = vmatpush3.bf16.msra.mxu0 %v24422_v9 }
0x156b   : > { %22592 = vmatprep.subr.bf16.mxu0 %v28889_v7 }
0x1571   : > { %22589 = vmatmul.mubr.msk.bf16.vlgmr.msra.gmra.mrb[84].mxu0 %vm15213_vm6, %v18369_v4 }
0x1572   : > { %22593 = vmatpush3.bf16.msra.mxu0 %v24424_v23  ;;  %22596 = vmatprep.mubr.msk.bf16.mxu0 %vm24583_vm5, %v28889_v7 }
0x1573   : > { %22594 = vmatprep.subr.bf16.mxu0 %v28889_v7 }
0x1576   : > { %22595 = vmatpush3.bf16.msra.mxu0 %v24425_v17 }
0x1577   : > { %22600 = vmatprep.subr.bf16.mxu0 %v28889_v7 }
0x157d   : > { %22597 = vmatmul.mubr.msk.bf16.vlgmr.msra.gmra.mrb[84].mxu0 %vm15213_vm6, %v18443_v37 }
0x157e   : > { %22601 = vmatpush3.bf16.msra.mxu0 %v24427_v55  ;;  %22604 = vmatprep.mubr.msk.bf16.mxu0 %vm24583_vm5, %v28889_v7 }
0x157f   : > { %22602 = vmatprep.subr.bf16.mxu0 %v28889_v7 }
0x1582   : > { %22603 = vmatpush3.bf16.msra.mxu0 %v24428_v44 }
0x1583   : > { %22608 = vmatprep.subr.bf16.mxu0 %v28889_v7 }
0x1589   : > { %22605 = vmatmul.mubr.msk.bf16.vlgmr.msra.gmra.mrb[84].mxu0 %vm15213_vm6, %v18517_v18 }
0x158a   : > { %22609 = vmatpush3.bf16.msra.mxu0 %v24430_v14  ;;  %22612 = vmatprep.mubr.msk.bf16.mxu0 %vm24583_vm5, %v28889_v7 }
0x158b   : > { %22610 = vmatprep.subr.bf16.mxu0 %v28889_v7 }
0x158e   : > { %22611 = vmatpush3.bf16.msra.mxu0 %v24431_v39 }
0x158f   : > { %22616 = vmatprep.subr.bf16.mxu0 %v28889_v7 }
0x1595   : > { %22613 = vmatmul.mubr.msk.bf16.vlgmr.msra.gmra.mrb[84].mxu0 %vm15213_vm6, %v18591_v26 }
0x1596   : > { %22617 = vmatpush3.bf16.msra.mxu0 %v24433_v60  ;;  %22620 = vmatprep.mubr.msk.bf16.mxu0 %vm24583_vm5, %v28889_v7 }
0x1597   : > { %22618 = vmatprep.subr.bf16.mxu0 %v28889_v7 }
0x159a   : > { %22619 = vmatpush3.bf16.msra.mxu0 %v24434_v50 }
0x159b   : > { %22624 = vmatprep.subr.bf16.mxu0 %v28889_v7 }
0x15a1   : > { %22621 = vmatmul.mubr.msk.bf16.vlgmr.msra.gmra.mrb[84].mxu0 %vm15213_vm6, %v18665_v56 }
0x15a2   : > { %22625 = vmatpush3.bf16.msra.mxu0 %v24436_v16  ;;  %22628 = vmatprep.mubr.msk.bf16.mxu0 %vm24583_vm5, %v28889_v7 }
0x15a3   : > { %22626 = vmatprep.subr.bf16.mxu0 %v28889_v7 }
0x15a6   : > { %22627 = vmatpush3.bf16.msra.mxu0 %v24437_v32 }
0x15ad   : > { %22629 = vmatmul.mubr.msk.bf16.vlgmr.msra.gmra.mrb[84].mxu0 %vm15213_vm6, %v18739_v59 }
0x15ae   : > { %24470 = shalt.err (!%p24467_p3)
}
0x15af   : > { %s24471_s13 = scalar_lea.hbm %s28568_s11, 256  ;;  %s24475_s2 = scalar_lea.hbm %s28713_s26, 512 }
0x15b0   : > { %p24472_p4 = scmp.ne.s32.totalorder %s28568_s11, %s24471_s13  ;;  %p24476_p9 = scmp.lt.u32.totalorder %s28568_s11, %s28713_s26 }
0x15b1   : > { %p24477_p10 = scmp.lt.u32.totalorder %s24475_s2, %s24471_s13  ;;  %p24479_p12 = scmp.lt.u32.totalorder %s24471_s13, %s28568_s11 }
0x15b2   : > { %p24473_p7 = pnand %p24472_p4, %p24774_p5 }
0x15b3   : > { %p24478_p11 = por %p24477_p10, %p24476_p9 }
0x15b4   : > { %p24474_p8 = pneg %p24473_p7 }
0x15b5   : > { %p24480_p13 = por %p24479_p12, %p24478_p11 }
0x15b7   : > { %p24481_p0 = pnand %p24480_p13, %p24474_p8 }
0x15b9   : > { %24484 = shalt.err (!%p24481_p0)
}
0x15ba   : > { %s24586_s15 = smov 64   ;;  %s24587_s17 = smov 4  }
0x15bb   : > { %24188 = dma.vmem_to_hbm [thread:$0]  (%p24774_p5), %s28563_s12, 256, %s28568_s11, %s28571_s14, %s24586_s15, %s24586_s15, %s24587_s17  }
0x15bc   : > { %s28600_s13 = scalar_lea.hbm %s28712_s25, %s19893_s0  ;;  %s18855_s2 = sshll.u32 %s27740_s3, 4  ;;  %s28603_s2 = int_to_ptr.vmem [resolvable:$true] %s18855_s2 }
0x15bd   : > { %s18832_s8 = scalar_lea.sflag [#allocation8], %s27732_s10  ;;  %s24485_s16 = scalar_lea.vmem %s28603_s2, 1024 }
0x15be   : > { %p24486_p1 = scmp.ne.s32.totalorder %s28603_s2, %s24485_s16  ;;  %s24588_s18 = smov [#allocation7]  }
0x15bf   : > { %s24489_s12 = sshll.u32 %s24588_s18, 4  ;;  %s24490_s12 = int_to_ptr.vmem [resolvable:$false] %s24489_s12 }
0x15c0   : > { %p24487_p2 = pnand %p24486_p1, %p24774_p5  ;;  %s24491_s11 = scalar_lea.vmem %s24490_s12, 2048 }
0x15c1   : > { %p24492_p4 = scmp.lt.s32.totalorder %s28603_s2, %s24490_s12  ;;  %p24493_p7 = scmp.lt.s32.totalorder %s24491_s11, %s24485_s16 }
0x15c2   : > { %p24488_p3 = pneg %p24487_p2 }
0x15c3   : > { %p24494_p8 = por %p24493_p7, %p24492_p4 }
0x15c5   : > { %p24495_p9 = pnand %p24494_p8, %p24488_p3 }
0x15c7   : > { %24498 = shalt.err (!%p24495_p9)
}
0x15c8   : > { %s24499_s3 = scalar_lea.hbm %s28600_s13, 1024  ;;  %s24503_s18 = scalar_lea.hbm %s28712_s25, 2048 }
0x15c9   : > { %p24500_p10 = scmp.ne.s32.totalorder %s28600_s13, %s24499_s3  ;;  %p24504_p13 = scmp.lt.u32.totalorder %s28600_s13, %s28712_s25 }
0x15ca   : > { %p24505_p0 = scmp.lt.u32.totalorder %s24503_s18, %s24499_s3  ;;  %p24507_p2 = scmp.lt.u32.totalorder %s24499_s3, %s28600_s13 }
0x15cb   : > { %p24501_p11 = pnand %p24500_p10, %p24774_p5 }
0x15cc   : > { %p24506_p1 = por %p24505_p0, %p24504_p13 }
0x15cd   : > { %p24502_p12 = pneg %p24501_p11 }
0x15ce   : > { %p24508_p3 = por %p24507_p2, %p24506_p1 }
0x15d0   : > { %p24509_p4 = pnand %p24508_p3, %p24502_p12 }
0x15d2   : > { %24512 = shalt.err (!%p24509_p4)
}
0x15d3   : > { %s24589_s5 = smov 128   ;;  %s24590_s16 = smov 8   ;;  %v19853_v7 = vld [vmem:[%s28711_s24] ss:$0 sm:$0xff] }
0x15d4   : > { %24187 = dma.vmem_to_hbm [thread:$0]  (%p24774_p5), %s28603_s2, 1024, %s28600_s13, %s18832_s8, %s24589_s5, %s24589_s5, %s24590_s16  }
0x15d5   : > { %s19016_s12 = sshll.u32 %s27732_s10, 2  ;;  %s19895_s18 = sshll.u32 %s24755_s9, 6 }
0x15d6   : > { %s829_s3 = scalar_lea.vmem [#allocation11], %s19016_s12  ;;  %s28641_s2 = scalar_lea.hbm %s28714_s27, %s19895_s18 }
0x15d7   : > { %s18887_s15 = sshll.u32 %s829_s3, 4  ;;  %s24591_s8 = smov [#allocation11]   ;;  %s28636_s15 = int_to_ptr.vmem [resolvable:$true] %s18887_s15 }
0x15d8   : > { %s24513_s9 = scalar_lea.vmem %s28636_s15, 64  ;;  %s24517_s17 = sshll.u32 %s24591_s8, 4  ;;  %s24518_s17 = int_to_ptr.vmem [resolvable:$false] %s24517_s17 }
0x15d9   : > { %p24514_p7 = scmp.ne.s32.totalorder %s28636_s15, %s24513_s9  ;;  %s24519_s29 = scalar_lea.vmem %s24518_s17, 128 }
0x15da   : > { %p24520_p10 = scmp.lt.s32.totalorder %s28636_s15, %s24518_s17  ;;  %p24521_p11 = scmp.lt.s32.totalorder %s24519_s29, %s24513_s9 }
0x15db   : > { %p24515_p8 = pnand %p24514_p7, %p24774_p5 }
0x15dc   : > { %p24522_p12 = por %p24521_p11, %p24520_p10 }
0x15dd   : > { %p24516_p9 = pneg %p24515_p8 }
0x15df   : > { %p24523_p13 = pnand %p24522_p12, %p24516_p9 }
0x1680   : > { %v18793_v34 = vpop.f32.mrb[84].mxu0 }
0x1681   : > { %v22789_v45 = vadd.f32 %v19853_v7, %v18793_v34  ;;  %v22630_v42 = vpop.f32.mrb[85].mxu0 }
0x1682   : > { %v18796_v29 = vpop.f32.mrb[86].mxu0 }
0x1683   : > { %v18807_v54 = vrot.slane %v22789_v45, %v27284_v38  ;;  %v22631_v43 = vpop.f32.mrb[87].mxu0 }
0x1685   : > { %v18808_v15 = vcombine.high %v18807_v54, %v18807_v54  ;;  %v18827_v25 = vadd.f32 %v28364_v58, %v18807_v54 }
0x1687   : > { %v18828_v10 = vadd.f32 %v28368_v8, %v18808_v15  ;;  %18829 = vst.msk [vmem:[%s829_s3] sm:$0x3] %vm17436_vm7, %v18827_v25 }
0x1689   : > { %18830 = vst.msk [vmem:[%s829_s3 + $0x2] sm:$0x3] %vm17436_vm7, %v18828_v10 }
0x168a   : > { %24526 = shalt.err (!%p24523_p13)
}
0x168b   : > { %s24527_s5 = scalar_lea.hbm %s28641_s2, 64  ;;  %s24531_s11 = scalar_lea.hbm %s28714_s27, 128 }
0x168c   : > { %p24528_p0 = scmp.ne.s32.totalorder %s28641_s2, %s24527_s5  ;;  %p24532_p3 = scmp.lt.u32.totalorder %s28641_s2, %s28714_s27 }
0x168d   : > { %p24533_p4 = scmp.lt.u32.totalorder %s24531_s11, %s24527_s5  ;;  %p24535_p8 = scmp.lt.u32.totalorder %s24527_s5, %s28641_s2 }
0x168e   : > { %p24529_p1 = pnand %p24528_p0, %p24774_p5 }
0x168f   : > { %p24534_p7 = por %p24533_p4, %p24532_p3 }
0x1690   : > { %p24530_p2 = pneg %p24529_p1 }
0x1691   : > { %p24536_p9 = por %p24535_p8, %p24534_p7 }
0x1693   : > { %p24537_p10 = pnand %p24536_p9, %p24530_p2 }
0x1695   : > { %24540 = shalt.err (!%p24537_p10)
}
0x1696   : > { %s24592_s18 = smov 32   ;;  %s24593_s10 = smov 2  }
0x1697   : > { %24189 = dma.vmem_to_hbm [thread:$0]  (%p24774_p5), %s28636_s15, 64, %s28641_s2, %s28571_s14, %s24592_s18, %s24592_s18, %s24593_s10  }
0x1698 PF: > { %p24203_p11 = scmp.ge.s32.totalorder %s24579_s30, 2  ;;  %s18902_s13 = sand.u32 1, %s24567_s7  }
0x1699   : > { %s18903_s9 = scalar_lea.sflag [#allocation8], %s18902_s13 }
0x169a   : > { %p24194_p12 = pnand %p24203_p11, %p24778_p6 }
0x169c   : > { %24558 = dma.done.wait (!%p24194_p12), %s18903_s9, 1024  }
0x169d   : > { %24560 = vsyncadd (!%p24194_p12), %s18903_s9, 4294966272  ;;  %s28901_s8 = sadd.s32 4294967294, %s24579_s30  }
0x169e   : > { %s18911_s17 = sand.u32 1, %s28901_s8  }
0x169f   : > { %s18912_s29 = scalar_lea.sflag [#allocation10], %s18911_s17 }
0x16a0   : > { %24562 = dma.done.wait (!%p24194_p12), %s18912_s29, 320  }
0x16a1   : > { %24564 = vsyncadd (!%p24194_p12), %s18912_s29, 4294966976  ;;  %s28902_s14 = sld [smem:[#allocation14_spill]]  ;;  %s28903_s8 = sld [smem:[#allocation15_spill]] }
0x16a2   : > { %p41_p5 = scmp.ge.s32.totalorder %s24759_s28, 4   ;;  %s28904_s7 = smov %s24571_s4 }
0x16a3   : > { %s28906_s30 = smov %s24759_s28 }
0x16a4   :  { %43 = sbr.rel (!%p41_p5) target bundleno = 25 (0x19), region = 202 }
0x16a7   : > { %s28905_s4 = smov %s28902_s14 }
0x16ab   :  { %18926 = vsyncpa [#allocation8], 1 }
0x16ac   :  { %18928 = vsyncpa [#allocation8 + $0x1], 1 }
0x16ad   :  { %18929 = vsyncpa [#allocation10], 1 }
0x16ae   :  { %18931 = vsyncpa [#allocation10 + $0x1], 1 }

</bundles_post_ra>
